<compile_context>
chip_gen: v7x
topology: tpu7x:2x2x1
jax: 0.10.0
libtpu: 0.0.40
codegen_flags: <defaults>
</compile_context>

<pallas_src>
import functools
import math

import jax
import jax.numpy as jnp
from jax.experimental import pallas as pl
from jax.experimental.pallas import tpu as pltpu


# ----------------------------------------------------------------------------- helpers
def _layer_norm(x, w, b, eps=1e-5):
    mu = jnp.mean(x, axis=-1, keepdims=True)
    d = x - mu
    var = jnp.mean(d * d, axis=-1, keepdims=True)
    return d * jax.lax.rsqrt(var + eps) * w + b


# ----------------------------------------------------------------------------- fused kernel
def fused_encoder_kernel(S, Nh, E, n_ff_chunks,
                         x0_ref,
                         wq_ref, bq_ref, wk_ref, bk_ref, wv_ref, bv_ref,
                         wo_ref, bo_ref, ln1w_ref, ln1b_ref,
                         w1_ref, b1_ref, w2_ref, b2_ref,
                         ln2w_ref, ln2b_ref,
                         seg_ref, outw_ref, outb_ref,
                         o_ref, h_ref):
    # grid = (core_half, layer): axis 0 splits the transformer "batch" (N) across TensorCores,
    # axis 1 iterates encoder layers; h_ref (VMEM scratch) carries this half's activation.
    layer = pl.program_id(1)
    n_layers = pl.num_programs(1)

    @pl.when(layer == 0)
    def _init():
        h_ref[...] = x0_ref[0, :, :]              # (S*Nh, E) f32, rows = s*Nh + n'

    x = h_ref[...]                                # (S*Nh, E) f32
    xb = x.astype(jnp.bfloat16)

    # ---- self-attention (post-norm nn.TransformerEncoderLayer, dropout = identity) --------
    # Three separate lane-aligned projections; 1/sqrt(head_dim) folded into wq/bq at prep.
    q = jnp.dot(xb, wq_ref[0, :, :], preferred_element_type=jnp.float32) + bq_ref[0, :, :]
    k = jnp.dot(xb, wk_ref[0, :, :], preferred_element_type=jnp.float32) + bk_ref[0, :, :]
    v = jnp.dot(xb, wv_ref[0, :, :], preferred_element_type=jnp.float32) + bv_ref[0, :, :]

    seg = seg_ref[...]                            # (E, E) bf16 block-diag per-head ones

    # Per-head scores via one (S*Nh, E)@(E, E) seg matmul per query position (bf16 operands,
    # f32 accumulate); softmax + weighting on the VPU/EUP (S is tiny).
    ctx_parts = []
    for s in range(S):
        qs = q[s * Nh:(s + 1) * Nh]                                       # (Nh, E)
        prod = (jnp.concatenate([qs] * S, axis=0) * k).astype(jnp.bfloat16)   # (S*Nh, E)
        sc = jnp.dot(prod, seg, preferred_element_type=jnp.float32)       # (S*Nh, E) f32
        blocks = [sc[t * Nh:(t + 1) * Nh] for t in range(S)]
        m = blocks[0]
        for t in range(1, S):
            m = jnp.maximum(m, blocks[t])
        es = [jnp.exp(blk - m) for blk in blocks]
        den = es[0]
        for t in range(1, S):
            den = den + es[t]
        inv = pl.reciprocal(den, approx=True)   # ~1e-3 rel. deviation vs exact divide (inference)
        cs = (es[0] * inv) * v[0:Nh]
        for t in range(1, S):
            cs = cs + (es[t] * inv) * v[t * Nh:(t + 1) * Nh]
        ctx_parts.append(cs)
    ctx = jnp.concatenate(ctx_parts, axis=0)                              # (S*Nh, E) f32

    sa = jnp.dot(ctx.astype(jnp.bfloat16), wo_ref[0, :, :],
                 preferred_element_type=jnp.float32) + bo_ref[0, :, :]
    h1 = _layer_norm(x + sa, ln1w_ref[0, :, :], ln1b_ref[0, :, :])

    # ---- feed-forward, chunk-fused over the wide intermediate ------------------------------
    h1b = h1.astype(jnp.bfloat16)
    ff = jnp.zeros_like(h1)                                               # f32 accumulator
    for c in range(n_ff_chunks):
        fc = jnp.dot(h1b, w1_ref[0, c, :, :], preferred_element_type=jnp.float32)
        fc = jnp.maximum(fc + b1_ref[0, c, :, :], 0.0).astype(jnp.bfloat16)
        ff = ff + jnp.dot(fc, w2_ref[0, c, :, :], preferred_element_type=jnp.float32)
    ff = ff + b2_ref[0, :, :]
    h2 = _layer_norm(h1 + ff, ln2w_ref[0, :, :], ln2b_ref[0, :, :])

    h_ref[...] = h2

    # ---- output linear fused into the last layer step; lane-dense 128-padded store ---------
    @pl.when(layer == n_layers - 1)
    def _out():
        o_ref[0, :, :] = (jnp.dot(h2.astype(jnp.bfloat16), outw_ref[...],
                                  preferred_element_type=jnp.float32) + outb_ref[...])


# ----------------------------------------------------------------------------- raw params
def init_params(key, *, input_dim, model_dim, nhead, num_encoder_layers, output_dim, ff_dim):
    ks = iter(jax.random.split(key, 64))

    def nrm(shape, scale=0.05):
        return scale * jax.random.normal(next(ks), shape, dtype=jnp.float32)

    params = {
        "conv_w": nrm((model_dim, input_dim, 3)),
        "conv_b": nrm((model_dim,)),
        "bn_gamma": 1.0 + nrm((model_dim,)),
        "bn_beta": nrm((model_dim,)),
        "bn_mean": jnp.zeros((model_dim,), jnp.float32),   # running stats (eval)
        "bn_var": jnp.ones((model_dim,), jnp.float32),
        "layers": [],
        "out_w": nrm((output_dim, model_dim)),
        "out_b": nrm((output_dim,)),
    }
    for _ in range(num_encoder_layers):
        params["layers"].append({
            "in_proj_w": nrm((3 * model_dim, model_dim)),
            "in_proj_b": nrm((3 * model_dim,)),
            "out_proj_w": nrm((model_dim, model_dim)),
            "out_proj_b": nrm((model_dim,)),
            "lin1_w": nrm((ff_dim, model_dim)),
            "lin1_b": nrm((ff_dim,)),
            "lin2_w": nrm((model_dim, ff_dim)),
            "lin2_b": nrm((model_dim,)),
            "ln1_w": 1.0 + nrm((model_dim,)),
            "ln1_b": nrm((model_dim,)),
            "ln2_w": 1.0 + nrm((model_dim,)),
            "ln2_b": nrm((model_dim,)),
        })
    return params


# ----------------------------------------------------------------------------- param prep (once)
def prepare_params(params, *, nhead, ff_chunk=512, out_pad=128):
    eps = 1e-5
    conv_w = params["conv_w"]                                   # (C_out, C_in, 3)
    C_out, _, _ = conv_w.shape
    E = C_out
    dh = E // nhead
    qscale = 1.0 / math.sqrt(dh)

    bn_scale = params["bn_gamma"] / jnp.sqrt(params["bn_var"] + eps)
    bn_shift = params["bn_beta"] - params["bn_mean"] * bn_scale

    def stack(fn):
        return jnp.stack([fn(l) for l in params["layers"]], axis=0)

    FF = params["layers"][0]["lin1_w"].shape[0]
    ff_chunk = min(ff_chunk, FF)
    assert FF % ff_chunk == 0
    n_chunks = FF // ff_chunk
    out_dim = params["out_w"].shape[0]

    prepped = {
        # stem: eval-mode BatchNorm and conv bias folded into the conv weight / single bias
        "stem_w": conv_w * bn_scale[:, None, None],
        "stem_b": params["conv_b"] * bn_scale + bn_shift,
        # attention projections, pre-transposed, bf16; 1/sqrt(head_dim) folded into q
        "wq": stack(lambda l: (l["in_proj_w"][:E].T * qscale).astype(jnp.bfloat16)),
        "bq": stack(lambda l: (l["in_proj_b"][:E] * qscale).reshape(1, E)),
        "wk": stack(lambda l: l["in_proj_w"][E:2 * E].T.astype(jnp.bfloat16)),
        "bk": stack(lambda l: l["in_proj_b"][E:2 * E].reshape(1, E)),
        "wv": stack(lambda l: l["in_proj_w"][2 * E:].T.astype(jnp.bfloat16)),
        "bv": stack(lambda l: l["in_proj_b"][2 * E:].reshape(1, E)),
        "wo": stack(lambda l: l["out_proj_w"].T.astype(jnp.bfloat16)),
        "bo": stack(lambda l: l["out_proj_b"].reshape(1, E)),
        "ln1_w": stack(lambda l: l["ln1_w"].reshape(1, E)),
        "ln1_b": stack(lambda l: l["ln1_b"].reshape(1, E)),
        # FFN weights pre-chunked along the wide intermediate axis
        "w1": stack(lambda l: l["lin1_w"].T.reshape(E, n_chunks, ff_chunk)
                    .transpose(1, 0, 2).astype(jnp.bfloat16)),
        "b1": stack(lambda l: l["lin1_b"].reshape(n_chunks, 1, ff_chunk)),
        "w2": stack(lambda l: l["lin2_w"].T.reshape(n_chunks, ff_chunk, E).astype(jnp.bfloat16)),
        "b2": stack(lambda l: l["lin2_b"].reshape(1, E)),
        "ln2_w": stack(lambda l: l["ln2_w"].reshape(1, E)),
        "ln2_b": stack(lambda l: l["ln2_b"].reshape(1, E)),
        # block-diagonal ones (exact 0/1, lossless in bf16): per-head segment sum + broadcast
        "seg": (jnp.arange(E)[:, None] // dh
                == jnp.arange(E)[None, :] // dh).astype(jnp.bfloat16),
        # output linear, padded to a lane-dense 128-wide store
        "out_w": jnp.pad(params["out_w"].T, ((0, 0), (0, out_pad - out_dim))).astype(jnp.bfloat16),
        "out_b": jnp.pad(params["out_b"], (0, out_pad - out_dim)).reshape(1, out_pad),
    }
    return prepped


# ----------------------------------------------------------------------------- forward
def transformer_model_forward(src, p, *, out_dim, n_core_split=2):
    B, C_in, L = src.shape
    C_out = p["stem_w"].shape[0]                  # model_dim
    assert L == C_out, "reference forward requires seq length == model_dim"
    S, N, E = B, C_out, L
    NC = n_core_split
    assert N % NC == 0
    Nh = N // NC
    assert (S * Nh) % 8 == 0

    NL = p["wq"].shape[0]
    n_chunks = p["w1"].shape[1]
    ff_chunk = p["w1"].shape[3]
    OUT_PAD = p["out_w"].shape[1]

    # ---- Stem (Conv1d k3 s1 p1 + folded BN + ReLU) in XLA: <1 MFLOP, keeps the kernel free
    #      of lane-misaligned im2col rearranges.
    y = jax.lax.conv_general_dilated(
        src, p["stem_w"], window_strides=(1,), padding=((1, 1),),
        dimension_numbers=("NCH", "OIH", "NCH"))
    y = jnp.maximum(y + p["stem_b"][None, :, None], 0.0)            # (S, N, E)

    # n-major per-core-half layout: half c owns transformer-batch rows n in [c*Nh, (c+1)*Nh);
    # attention never mixes across n, so the split is exact.
    x0 = y.reshape(S, NC, Nh, E).transpose(1, 0, 2, 3).reshape(NC, S * Nh, E)

    kernel = functools.partial(fused_encoder_kernel, S, Nh, E, n_chunks)
    per_core = lambda c, l: (c, 0, 0)
    per_layer3 = lambda c, l: (l, 0, 0)
    per_layer4 = lambda c, l: (l, 0, 0, 0)
    const2 = lambda c, l: (0, 0)

    out = pl.pallas_call(
        kernel,
        grid=(NC, NL),
        in_specs=[
            pl.BlockSpec((1, S * Nh, E), per_core),            # x0
            pl.BlockSpec((1, E, E), per_layer3),               # wq
            pl.BlockSpec((1, 1, E), per_layer3),               # bq
            pl.BlockSpec((1, E, E), per_layer3),               # wk
            pl.BlockSpec((1, 1, E), per_layer3),               # bk
            pl.BlockSpec((1, E, E), per_layer3),               # wv
            pl.BlockSpec((1, 1, E), per_layer3),               # bv
            pl.BlockSpec((1, E, E), per_layer3),               # wo
            pl.BlockSpec((1, 1, E), per_layer3),               # bo
            pl.BlockSpec((1, 1, E), per_layer3),               # ln1_w
            pl.BlockSpec((1, 1, E), per_layer3),               # ln1_b
            pl.BlockSpec((1, n_chunks, E, ff_chunk), per_layer4),   # w1 (chunked)
            pl.BlockSpec((1, n_chunks, 1, ff_chunk), per_layer4),   # b1 (chunked)
            pl.BlockSpec((1, n_chunks, ff_chunk, E), per_layer4),   # w2 (chunked)
            pl.BlockSpec((1, 1, E), per_layer3),               # b2
            pl.BlockSpec((1, 1, E), per_layer3),               # ln2_w
            pl.BlockSpec((1, 1, E), per_layer3),               # ln2_b
            pl.BlockSpec((E, E), const2),                      # seg
            pl.BlockSpec((E, OUT_PAD), const2),                # out_w
            pl.BlockSpec((1, OUT_PAD), const2),                # out_b
        ],
        out_specs=pl.BlockSpec((1, S * Nh, OUT_PAD), per_core),
        out_shape=jax.ShapeDtypeStruct((NC, S * Nh, OUT_PAD), jnp.float32),
        scratch_shapes=[pltpu.VMEM((S * Nh, E), jnp.float32)],
        compiler_params=pltpu.CompilerParams(
            dimension_semantics=("parallel", "arbitrary"),
            vmem_limit_bytes=32 * 1024 * 1024,
        ),
    )(x0, p["wq"], p["bq"], p["wk"], p["bk"], p["wv"], p["bv"],
      p["wo"], p["bo"], p["ln1_w"], p["ln1_b"],
      p["w1"], p["b1"], p["w2"], p["b2"], p["ln2_w"], p["ln2_b"],
      p["seg"], p["out_w"], p["out_b"])

    out = out.reshape(NC, S, Nh, OUT_PAD).transpose(1, 0, 2, 3).reshape(S, N, OUT_PAD)
    return out[:, :, :out_dim]


# ----------------------------------------------------------------------------- main
if __name__ == "__main__":
    INPUT_DIM = 8
    MODEL_DIM = 64
    NHEAD = 4
    NUM_ENCODER_LAYERS = 2
    NUM_DECODER_LAYERS = 2          # accepted by __init__ but unused by forward()
    OUTPUT_DIM = 10
    FF_DIM = 2048                   # nn.TransformerEncoderLayer default dim_feedforward
    BATCH = 4
    SEQ_LEN = MODEL_DIM             # required so the reference forward is well-formed

    key = jax.random.PRNGKey(0)
    pkey, xkey = jax.random.split(key)
    raw = init_params(pkey, input_dim=INPUT_DIM, model_dim=MODEL_DIM, nhead=NHEAD,
                      num_encoder_layers=NUM_ENCODER_LAYERS, output_dim=OUTPUT_DIM,
                      ff_dim=FF_DIM)
    params = prepare_params(raw, nhead=NHEAD)
    src = jax.random.normal(xkey, (BATCH, INPUT_DIM, SEQ_LEN), dtype=jnp.float32)

    fwd = jax.jit(functools.partial(transformer_model_forward, out_dim=OUTPUT_DIM))
    out = jax.block_until_ready(fwd(src, params))

    assert out.shape == (BATCH, MODEL_DIM, OUTPUT_DIM), out.shape
    assert bool(jnp.all(jnp.isfinite(out)))
    print("KERNEL_OK")
</pallas_src>

<mosaic_0001>
module attributes {stable_mosaic.version = 11 : i64} {
  func.func @fused_encoder_kernel(%arg0: i32, %arg1: i32, %arg2: memref<1x128x64xf32, #tpu.memory_space<vmem>>, %arg3: memref<1x64x64xbf16, #tpu.memory_space<vmem>>, %arg4: memref<1x1x64xf32, #tpu.memory_space<vmem>>, %arg5: memref<1x64x64xbf16, #tpu.memory_space<vmem>>, %arg6: memref<1x1x64xf32, #tpu.memory_space<vmem>>, %arg7: memref<1x64x64xbf16, #tpu.memory_space<vmem>>, %arg8: memref<1x1x64xf32, #tpu.memory_space<vmem>>, %arg9: memref<1x64x64xbf16, #tpu.memory_space<vmem>>, %arg10: memref<1x1x64xf32, #tpu.memory_space<vmem>>, %arg11: memref<1x1x64xf32, #tpu.memory_space<vmem>>, %arg12: memref<1x1x64xf32, #tpu.memory_space<vmem>>, %arg13: memref<1x4x64x512xbf16, #tpu.memory_space<vmem>>, %arg14: memref<1x4x1x512xf32, #tpu.memory_space<vmem>>, %arg15: memref<1x4x512x64xbf16, #tpu.memory_space<vmem>>, %arg16: memref<1x1x64xf32, #tpu.memory_space<vmem>>, %arg17: memref<1x1x64xf32, #tpu.memory_space<vmem>>, %arg18: memref<1x1x64xf32, #tpu.memory_space<vmem>>, %arg19: memref<64x64xbf16, #tpu.memory_space<vmem>>, %arg20: memref<64x128xbf16, #tpu.memory_space<vmem>>, %arg21: memref<1x128xf32, #tpu.memory_space<vmem>>, %arg22: memref<1x128x128xf32, #tpu.memory_space<vmem>>, %arg23: memref<128x64xf32, #tpu.memory_space<vmem>>) attributes {dimension_semantics = [#tpu.dimension_semantics<parallel>, #tpu.dimension_semantics<arbitrary>], iteration_bounds = array<i64: 2, 2>, scalar_prefetch = 0 : i64, scratch_operands = 1 : i64, tpu.core_type = #tpu.core_type<tc>, window_params = [{transform_indices = @transform_0, window_bounds = array<i64: 1, 128, 64>}, {transform_indices = @transform_1, window_bounds = array<i64: 1, 64, 64>}, {transform_indices = @transform_2, window_bounds = array<i64: 1, 1, 64>}, {transform_indices = @transform_3, window_bounds = array<i64: 1, 64, 64>}, {transform_indices = @transform_4, window_bounds = array<i64: 1, 1, 64>}, {transform_indices = @transform_5, window_bounds = array<i64: 1, 64, 64>}, {transform_indices = @transform_6, window_bounds = array<i64: 1, 1, 64>}, {transform_indices = @transform_7, window_bounds = array<i64: 1, 64, 64>}, {transform_indices = @transform_8, window_bounds = array<i64: 1, 1, 64>}, {transform_indices = @transform_9, window_bounds = array<i64: 1, 1, 64>}, {transform_indices = @transform_10, window_bounds = array<i64: 1, 1, 64>}, {transform_indices = @transform_11, window_bounds = array<i64: 1, 4, 64, 512>}, {transform_indices = @transform_12, window_bounds = array<i64: 1, 4, 1, 512>}, {transform_indices = @transform_13, window_bounds = array<i64: 1, 4, 512, 64>}, {transform_indices = @transform_14, window_bounds = array<i64: 1, 1, 64>}, {transform_indices = @transform_15, window_bounds = array<i64: 1, 1, 64>}, {transform_indices = @transform_16, window_bounds = array<i64: 1, 1, 64>}, {pipeline_mode = #tpu.pipeline_mode<synchronous>, transform_indices = @transform_17, window_bounds = array<i64: 64, 64>}, {pipeline_mode = #tpu.pipeline_mode<synchronous>, transform_indices = @transform_18, window_bounds = array<i64: 64, 128>}, {pipeline_mode = #tpu.pipeline_mode<synchronous>, transform_indices = @transform_19, window_bounds = array<i64: 1, 128>}, {transform_indices = @transform_20, window_bounds = array<i64: 1, 128, 128>}]} {
    %c0_i32 = arith.constant 0 : i32
    %0 = arith.cmpi eq, %arg1, %c0_i32 : i32
    %1 = arith.extui %0 : i1 to i32
    %c0_i32_0 = arith.constant 0 : i32
    %2 = arith.cmpi ne, %1, %c0_i32_0 : i32
    scf.if %2 {
      %c0_121 = arith.constant 0 : index
      %c0_122 = arith.constant 0 : index
      %c0_123 = arith.constant 0 : index
      %308 = vector.load %arg2[%c0_121, %c0_122, %c0_123] : memref<1x128x64xf32, #tpu.memory_space<vmem>>, vector<1x128x64xf32>
      %309 = vector.shape_cast %308 : vector<1x128x64xf32> to vector<128x64xf32>
      %c0_124 = arith.constant 0 : index
      %c0_125 = arith.constant 0 : index
      %310 = vector.load %arg23[%c0_124, %c0_125] : memref<128x64xf32, #tpu.memory_space<vmem>>, vector<128x64xf32>
      tpu.vector_store %arg23[%c0_124, %c0_125], %309 {strides = array<i32>} : memref<128x64xf32, #tpu.memory_space<vmem>>, vector<128x64xf32>,
    } else {
    }
    %c0 = arith.constant 0 : index
    %c0_1 = arith.constant 0 : index
    %3 = vector.load %arg23[%c0, %c0_1] : memref<128x64xf32, #tpu.memory_space<vmem>>, vector<128x64xf32>
    %4 = arith.truncf %3 : vector<128x64xf32> to vector<128x64xbf16>
    %c0_2 = arith.constant 0 : index
    %c0_3 = arith.constant 0 : index
    %c0_4 = arith.constant 0 : index
    %5 = vector.load %arg3[%c0_2, %c0_3, %c0_4] : memref<1x64x64xbf16, #tpu.memory_space<vmem>>, vector<1x64x64xbf16>
    %6 = vector.shape_cast %5 : vector<1x64x64xbf16> to vector<64x64xbf16>
    %cst = arith.constant dense<0.000000e+00> : vector<128x64xf32>
    %7 = tpu.matmul %4, %6, %cst {dimension_numbers = #tpu.dot_dimension_numbers<[1], [0], [0], [1], [0, 0, 1, 1], [], []>} : vector<128x64xbf16>, vector<64x64xbf16>, vector<128x64xf32> -> vector<128x64xf32>
    %c0_5 = arith.constant 0 : index
    %c0_6 = arith.constant 0 : index
    %c0_7 = arith.constant 0 : index
    %8 = vector.load %arg4[%c0_5, %c0_6, %c0_7] : memref<1x1x64xf32, #tpu.memory_space<vmem>>, vector<1x1x64xf32>
    %9 = vector.shape_cast %8 : vector<1x1x64xf32> to vector<1x64xf32>
    %10 = vector.broadcast %9 : vector<1x64xf32> to vector<128x64xf32>
    %11 = arith.addf %7, %10 : vector<128x64xf32>
    %c0_8 = arith.constant 0 : index
    %c0_9 = arith.constant 0 : index
    %c0_10 = arith.constant 0 : index
    %12 = vector.load %arg5[%c0_8, %c0_9, %c0_10] : memref<1x64x64xbf16, #tpu.memory_space<vmem>>, vector<1x64x64xbf16>
    %13 = vector.shape_cast %12 : vector<1x64x64xbf16> to vector<64x64xbf16>
    %cst_11 = arith.constant dense<0.000000e+00> : vector<128x64xf32>
    %14 = tpu.matmul %4, %13, %cst_11 {dimension_numbers = #tpu.dot_dimension_numbers<[1], [0], [0], [1], [0, 0, 1, 1], [], []>} : vector<128x64xbf16>, vector<64x64xbf16>, vector<128x64xf32> -> vector<128x64xf32>
    %c0_12 = arith.constant 0 : index
    %c0_13 = arith.constant 0 : index
    %c0_14 = arith.constant 0 : index
    %15 = vector.load %arg6[%c0_12, %c0_13, %c0_14] : memref<1x1x64xf32, #tpu.memory_space<vmem>>, vector<1x1x64xf32>
    %16 = vector.shape_cast %15 : vector<1x1x64xf32> to vector<1x64xf32>
    %17 = vector.broadcast %16 : vector<1x64xf32> to vector<128x64xf32>
    %18 = arith.addf %14, %17 : vector<128x64xf32>
    %c0_15 = arith.constant 0 : index
    %c0_16 = arith.constant 0 : index
    %c0_17 = arith.constant 0 : index
    %19 = vector.load %arg7[%c0_15, %c0_16, %c0_17] : memref<1x64x64xbf16, #tpu.memory_space<vmem>>, vector<1x64x64xbf16>
    %20 = vector.shape_cast %19 : vector<1x64x64xbf16> to vector<64x64xbf16>
    %cst_18 = arith.constant dense<0.000000e+00> : vector<128x64xf32>
    %21 = tpu.matmul %4, %20, %cst_18 {dimension_numbers = #tpu.dot_dimension_numbers<[1], [0], [0], [1], [0, 0, 1, 1], [], []>} : vector<128x64xbf16>, vector<64x64xbf16>, vector<128x64xf32> -> vector<128x64xf32>
    %c0_19 = arith.constant 0 : index
    %c0_20 = arith.constant 0 : index
    %c0_21 = arith.constant 0 : index
    %22 = vector.load %arg8[%c0_19, %c0_20, %c0_21] : memref<1x1x64xf32, #tpu.memory_space<vmem>>, vector<1x1x64xf32>
    %23 = vector.shape_cast %22 : vector<1x1x64xf32> to vector<1x64xf32>
    %24 = vector.broadcast %23 : vector<1x64xf32> to vector<128x64xf32>
    %25 = arith.addf %21, %24 : vector<128x64xf32>
    %c0_22 = arith.constant 0 : index
    %c0_23 = arith.constant 0 : index
    %26 = vector.load %arg19[%c0_22, %c0_23] : memref<64x64xbf16, #tpu.memory_space<vmem>>, vector<64x64xbf16>
    %27 = vector.extract_strided_slice %11 {offsets = [0, 0], sizes = [32, 64], strides = [1, 1]} : vector<128x64xf32> to vector<32x64xf32>
    %28 = tpu.concatenate %27, %27, %27, %27 in 0 : vector<32x64xf32>, vector<32x64xf32>, vector<32x64xf32>, vector<32x64xf32> -> vector<128x64xf32>
    %29 = arith.mulf %28, %18 : vector<128x64xf32>
    %30 = arith.truncf %29 : vector<128x64xf32> to vector<128x64xbf16>
    %cst_24 = arith.constant dense<0.000000e+00> : vector<128x64xf32>
    %31 = tpu.matmul %30, %26, %cst_24 {dimension_numbers = #tpu.dot_dimension_numbers<[1], [0], [0], [1], [0, 0, 1, 1], [], []>} : vector<128x64xbf16>, vector<64x64xbf16>, vector<128x64xf32> -> vector<128x64xf32>
    %32 = vector.extract_strided_slice %31 {offsets = [0, 0], sizes = [32, 64], strides = [1, 1]} : vector<128x64xf32> to vector<32x64xf32>
    %33 = vector.extract_strided_slice %31 {offsets = [32, 0], sizes = [32, 64], strides = [1, 1]} : vector<128x64xf32> to vector<32x64xf32>
    %34 = vector.extract_strided_slice %31 {offsets = [64, 0], sizes = [32, 64], strides = [1, 1]} : vector<128x64xf32> to vector<32x64xf32>
    %35 = vector.extract_strided_slice %31 {offsets = [96, 0], sizes = [32, 64], strides = [1, 1]} : vector<128x64xf32> to vector<32x64xf32>
    %36 = arith.maximumf %32, %33 : vector<32x64xf32>
    %37 = arith.maximumf %36, %34 : vector<32x64xf32>
    %38 = arith.maximumf %37, %35 : vector<32x64xf32>
    %39 = arith.subf %32, %38 : vector<32x64xf32>
    %40 = math.exp %39 : vector<32x64xf32>
    %41 = arith.subf %33, %38 : vector<32x64xf32>
    %42 = math.exp %41 : vector<32x64xf32>
    %43 = arith.subf %34, %38 : vector<32x64xf32>
    %44 = math.exp %43 : vector<32x64xf32>
    %45 = arith.subf %35, %38 : vector<32x64xf32>
    %46 = math.exp %45 : vector<32x64xf32>
    %47 = arith.addf %40, %42 : vector<32x64xf32>
    %48 = arith.addf %47, %44 : vector<32x64xf32>
    %49 = arith.addf %48, %46 : vector<32x64xf32>
    %50 = tpu.reciprocal %49 {approx = true} : vector<32x64xf32> -> vector<32x64xf32>
    %51 = arith.mulf %40, %50 : vector<32x64xf32>
    %52 = vector.extract_strided_slice %25 {offsets = [0, 0], sizes = [32, 64], strides = [1, 1]} : vector<128x64xf32> to vector<32x64xf32>
    %53 = arith.mulf %51, %52 : vector<32x64xf32>
    %54 = arith.mulf %42, %50 : vector<32x64xf32>
    %55 = vector.extract_strided_slice %25 {offsets = [32, 0], sizes = [32, 64], strides = [1, 1]} : vector<128x64xf32> to vector<32x64xf32>
    %56 = arith.mulf %54, %55 : vector<32x64xf32>
    %57 = arith.addf %53, %56 : vector<32x64xf32>
    %58 = arith.mulf %44, %50 : vector<32x64xf32>
    %59 = vector.extract_strided_slice %25 {offsets = [64, 0], sizes = [32, 64], strides = [1, 1]} : vector<128x64xf32> to vector<32x64xf32>
    %60 = arith.mulf %58, %59 : vector<32x64xf32>
    %61 = arith.addf %57, %60 : vector<32x64xf32>
    %62 = arith.mulf %46, %50 : vector<32x64xf32>
    %63 = vector.extract_strided_slice %25 {offsets = [96, 0], sizes = [32, 64], strides = [1, 1]} : vector<128x64xf32> to vector<32x64xf32>
    %64 = arith.mulf %62, %63 : vector<32x64xf32>
    %65 = arith.addf %61, %64 : vector<32x64xf32>
    %66 = vector.extract_strided_slice %11 {offsets = [32, 0], sizes = [32, 64], strides = [1, 1]} : vector<128x64xf32> to vector<32x64xf32>
    %67 = tpu.concatenate %66, %66, %66, %66 in 0 : vector<32x64xf32>, vector<32x64xf32>, vector<32x64xf32>, vector<32x64xf32> -> vector<128x64xf32>
    %68 = arith.mulf %67, %18 : vector<128x64xf32>
    %69 = arith.truncf %68 : vector<128x64xf32> to vector<128x64xbf16>
    %cst_25 = arith.constant dense<0.000000e+00> : vector<128x64xf32>
    %70 = tpu.matmul %69, %26, %cst_25 {dimension_numbers = #tpu.dot_dimension_numbers<[1], [0], [0], [1], [0, 0, 1, 1], [], []>} : vector<128x64xbf16>, vector<64x64xbf16>, vector<128x64xf32> -> vector<128x64xf32>
    %71 = vector.extract_strided_slice %70 {offsets = [0, 0], sizes = [32, 64], strides = [1, 1]} : vector<128x64xf32> to vector<32x64xf32>
    %72 = vector.extract_strided_slice %70 {offsets = [32, 0], sizes = [32, 64], strides = [1, 1]} : vector<128x64xf32> to vector<32x64xf32>
    %73 = vector.extract_strided_slice %70 {offsets = [64, 0], sizes = [32, 64], strides = [1, 1]} : vector<128x64xf32> to vector<32x64xf32>
    %74 = vector.extract_strided_slice %70 {offsets = [96, 0], sizes = [32, 64], strides = [1, 1]} : vector<128x64xf32> to vector<32x64xf32>
    %75 = arith.maximumf %71, %72 : vector<32x64xf32>
    %76 = arith.maximumf %75, %73 : vector<32x64xf32>
    %77 = arith.maximumf %76, %74 : vector<32x64xf32>
    %78 = arith.subf %71, %77 : vector<32x64xf32>
    %79 = math.exp %78 : vector<32x64xf32>
    %80 = arith.subf %72, %77 : vector<32x64xf32>
    %81 = math.exp %80 : vector<32x64xf32>
    %82 = arith.subf %73, %77 : vector<32x64xf32>
    %83 = math.exp %82 : vector<32x64xf32>
    %84 = arith.subf %74, %77 : vector<32x64xf32>
    %85 = math.exp %84 : vector<32x64xf32>
    %86 = arith.addf %79, %81 : vector<32x64xf32>
    %87 = arith.addf %86, %83 : vector<32x64xf32>
    %88 = arith.addf %87, %85 : vector<32x64xf32>
    %89 = tpu.reciprocal %88 {approx = true} : vector<32x64xf32> -> vector<32x64xf32>
    %90 = arith.mulf %79, %89 : vector<32x64xf32>
    %91 = vector.extract_strided_slice %25 {offsets = [0, 0], sizes = [32, 64], strides = [1, 1]} : vector<128x64xf32> to vector<32x64xf32>
    %92 = arith.mulf %90, %91 : vector<32x64xf32>
    %93 = arith.mulf %81, %89 : vector<32x64xf32>
    %94 = vector.extract_strided_slice %25 {offsets = [32, 0], sizes = [32, 64], strides = [1, 1]} : vector<128x64xf32> to vector<32x64xf32>
    %95 = arith.mulf %93, %94 : vector<32x64xf32>
    %96 = arith.addf %92, %95 : vector<32x64xf32>
    %97 = arith.mulf %83, %89 : vector<32x64xf32>
    %98 = vector.extract_strided_slice %25 {offsets = [64, 0], sizes = [32, 64], strides = [1, 1]} : vector<128x64xf32> to vector<32x64xf32>
    %99 = arith.mulf %97, %98 : vector<32x64xf32>
    %100 = arith.addf %96, %99 : vector<32x64xf32>
    %101 = arith.mulf %85, %89 : vector<32x64xf32>
    %102 = vector.extract_strided_slice %25 {offsets = [96, 0], sizes = [32, 64], strides = [1, 1]} : vector<128x64xf32> to vector<32x64xf32>
    %103 = arith.mulf %101, %102 : vector<32x64xf32>
    %104 = arith.addf %100, %103 : vector<32x64xf32>
    %105 = vector.extract_strided_slice %11 {offsets = [64, 0], sizes = [32, 64], strides = [1, 1]} : vector<128x64xf32> to vector<32x64xf32>
    %106 = tpu.concatenate %105, %105, %105, %105 in 0 : vector<32x64xf32>, vector<32x64xf32>, vector<32x64xf32>, vector<32x64xf32> -> vector<128x64xf32>
    %107 = arith.mulf %106, %18 : vector<128x64xf32>
    %108 = arith.truncf %107 : vector<128x64xf32> to vector<128x64xbf16>
    %cst_26 = arith.constant dense<0.000000e+00> : vector<128x64xf32>
    %109 = tpu.matmul %108, %26, %cst_26 {dimension_numbers = #tpu.dot_dimension_numbers<[1], [0], [0], [1], [0, 0, 1, 1], [], []>} : vector<128x64xbf16>, vector<64x64xbf16>, vector<128x64xf32> -> vector<128x64xf32>
    %110 = vector.extract_strided_slice %109 {offsets = [0, 0], sizes = [32, 64], strides = [1, 1]} : vector<128x64xf32> to vector<32x64xf32>
    %111 = vector.extract_strided_slice %109 {offsets = [32, 0], sizes = [32, 64], strides = [1, 1]} : vector<128x64xf32> to vector<32x64xf32>
    %112 = vector.extract_strided_slice %109 {offsets = [64, 0], sizes = [32, 64], strides = [1, 1]} : vector<128x64xf32> to vector<32x64xf32>
    %113 = vector.extract_strided_slice %109 {offsets = [96, 0], sizes = [32, 64], strides = [1, 1]} : vector<128x64xf32> to vector<32x64xf32>
    %114 = arith.maximumf %110, %111 : vector<32x64xf32>
    %115 = arith.maximumf %114, %112 : vector<32x64xf32>
    %116 = arith.maximumf %115, %113 : vector<32x64xf32>
    %117 = arith.subf %110, %116 : vector<32x64xf32>
    %118 = math.exp %117 : vector<32x64xf32>
    %119 = arith.subf %111, %116 : vector<32x64xf32>
    %120 = math.exp %119 : vector<32x64xf32>
    %121 = arith.subf %112, %116 : vector<32x64xf32>
    %122 = math.exp %121 : vector<32x64xf32>
    %123 = arith.subf %113, %116 : vector<32x64xf32>
    %124 = math.exp %123 : vector<32x64xf32>
    %125 = arith.addf %118, %120 : vector<32x64xf32>
    %126 = arith.addf %125, %122 : vector<32x64xf32>
    %127 = arith.addf %126, %124 : vector<32x64xf32>
    %128 = tpu.reciprocal %127 {approx = true} : vector<32x64xf32> -> vector<32x64xf32>
    %129 = arith.mulf %118, %128 : vector<32x64xf32>
    %130 = vector.extract_strided_slice %25 {offsets = [0, 0], sizes = [32, 64], strides = [1, 1]} : vector<128x64xf32> to vector<32x64xf32>
    %131 = arith.mulf %129, %130 : vector<32x64xf32>
    %132 = arith.mulf %120, %128 : vector<32x64xf32>
    %133 = vector.extract_strided_slice %25 {offsets = [32, 0], sizes = [32, 64], strides = [1, 1]} : vector<128x64xf32> to vector<32x64xf32>
    %134 = arith.mulf %132, %133 : vector<32x64xf32>
    %135 = arith.addf %131, %134 : vector<32x64xf32>
    %136 = arith.mulf %122, %128 : vector<32x64xf32>
    %137 = vector.extract_strided_slice %25 {offsets = [64, 0], sizes = [32, 64], strides = [1, 1]} : vector<128x64xf32> to vector<32x64xf32>
    %138 = arith.mulf %136, %137 : vector<32x64xf32>
    %139 = arith.addf %135, %138 : vector<32x64xf32>
    %140 = arith.mulf %124, %128 : vector<32x64xf32>
    %141 = vector.extract_strided_slice %25 {offsets = [96, 0], sizes = [32, 64], strides = [1, 1]} : vector<128x64xf32> to vector<32x64xf32>
    %142 = arith.mulf %140, %141 : vector<32x64xf32>
    %143 = arith.addf %139, %142 : vector<32x64xf32>
    %144 = vector.extract_strided_slice %11 {offsets = [96, 0], sizes = [32, 64], strides = [1, 1]} : vector<128x64xf32> to vector<32x64xf32>
    %145 = tpu.concatenate %144, %144, %144, %144 in 0 : vector<32x64xf32>, vector<32x64xf32>, vector<32x64xf32>, vector<32x64xf32> -> vector<128x64xf32>
    %146 = arith.mulf %145, %18 : vector<128x64xf32>
    %147 = arith.truncf %146 : vector<128x64xf32> to vector<128x64xbf16>
    %cst_27 = arith.constant dense<0.000000e+00> : vector<128x64xf32>
    %148 = tpu.matmul %147, %26, %cst_27 {dimension_numbers = #tpu.dot_dimension_numbers<[1], [0], [0], [1], [0, 0, 1, 1], [], []>} : vector<128x64xbf16>, vector<64x64xbf16>, vector<128x64xf32> -> vector<128x64xf32>
    %149 = vector.extract_strided_slice %148 {offsets = [0, 0], sizes = [32, 64], strides = [1, 1]} : vector<128x64xf32> to vector<32x64xf32>
    %150 = vector.extract_strided_slice %148 {offsets = [32, 0], sizes = [32, 64], strides = [1, 1]} : vector<128x64xf32> to vector<32x64xf32>
    %151 = vector.extract_strided_slice %148 {offsets = [64, 0], sizes = [32, 64], strides = [1, 1]} : vector<128x64xf32> to vector<32x64xf32>
    %152 = vector.extract_strided_slice %148 {offsets = [96, 0], sizes = [32, 64], strides = [1, 1]} : vector<128x64xf32> to vector<32x64xf32>
    %153 = arith.maximumf %149, %150 : vector<32x64xf32>
    %154 = arith.maximumf %153, %151 : vector<32x64xf32>
    %155 = arith.maximumf %154, %152 : vector<32x64xf32>
    %156 = arith.subf %149, %155 : vector<32x64xf32>
    %157 = math.exp %156 : vector<32x64xf32>
    %158 = arith.subf %150, %155 : vector<32x64xf32>
    %159 = math.exp %158 : vector<32x64xf32>
    %160 = arith.subf %151, %155 : vector<32x64xf32>
    %161 = math.exp %160 : vector<32x64xf32>
    %162 = arith.subf %152, %155 : vector<32x64xf32>
    %163 = math.exp %162 : vector<32x64xf32>
    %164 = arith.addf %157, %159 : vector<32x64xf32>
    %165 = arith.addf %164, %161 : vector<32x64xf32>
    %166 = arith.addf %165, %163 : vector<32x64xf32>
    %167 = tpu.reciprocal %166 {approx = true} : vector<32x64xf32> -> vector<32x64xf32>
    %168 = arith.mulf %157, %167 : vector<32x64xf32>
    %169 = vector.extract_strided_slice %25 {offsets = [0, 0], sizes = [32, 64], strides = [1, 1]} : vector<128x64xf32> to vector<32x64xf32>
    %170 = arith.mulf %168, %169 : vector<32x64xf32>
    %171 = arith.mulf %159, %167 : vector<32x64xf32>
    %172 = vector.extract_strided_slice %25 {offsets = [32, 0], sizes = [32, 64], strides = [1, 1]} : vector<128x64xf32> to vector<32x64xf32>
    %173 = arith.mulf %171, %172 : vector<32x64xf32>
    %174 = arith.addf %170, %173 : vector<32x64xf32>
    %175 = arith.mulf %161, %167 : vector<32x64xf32>
    %176 = vector.extract_strided_slice %25 {offsets = [64, 0], sizes = [32, 64], strides = [1, 1]} : vector<128x64xf32> to vector<32x64xf32>
    %177 = arith.mulf %175, %176 : vector<32x64xf32>
    %178 = arith.addf %174, %177 : vector<32x64xf32>
    %179 = arith.mulf %163, %167 : vector<32x64xf32>
    %180 = vector.extract_strided_slice %25 {offsets = [96, 0], sizes = [32, 64], strides = [1, 1]} : vector<128x64xf32> to vector<32x64xf32>
    %181 = arith.mulf %179, %180 : vector<32x64xf32>
    %182 = arith.addf %178, %181 : vector<32x64xf32>
    %183 = tpu.concatenate %65, %104, %143, %182 in 0 : vector<32x64xf32>, vector<32x64xf32>, vector<32x64xf32>, vector<32x64xf32> -> vector<128x64xf32>
    %184 = arith.truncf %183 : vector<128x64xf32> to vector<128x64xbf16>
    %c0_28 = arith.constant 0 : index
    %c0_29 = arith.constant 0 : index
    %c0_30 = arith.constant 0 : index
    %185 = vector.load %arg9[%c0_28, %c0_29, %c0_30] : memref<1x64x64xbf16, #tpu.memory_space<vmem>>, vector<1x64x64xbf16>
    %186 = vector.shape_cast %185 : vector<1x64x64xbf16> to vector<64x64xbf16>
    %cst_31 = arith.constant dense<0.000000e+00> : vector<128x64xf32>
    %187 = tpu.matmul %184, %186, %cst_31 {dimension_numbers = #tpu.dot_dimension_numbers<[1], [0], [0], [1], [0, 0, 1, 1], [], []>} : vector<128x64xbf16>, vector<64x64xbf16>, vector<128x64xf32> -> vector<128x64xf32>
    %c0_32 = arith.constant 0 : index
    %c0_33 = arith.constant 0 : index
    %c0_34 = arith.constant 0 : index
    %188 = vector.load %arg10[%c0_32, %c0_33, %c0_34] : memref<1x1x64xf32, #tpu.memory_space<vmem>>, vector<1x1x64xf32>
    %189 = vector.shape_cast %188 : vector<1x1x64xf32> to vector<1x64xf32>
    %190 = vector.broadcast %189 : vector<1x64xf32> to vector<128x64xf32>
    %191 = arith.addf %187, %190 : vector<128x64xf32>
    %192 = arith.addf %3, %191 : vector<128x64xf32>
    %c0_35 = arith.constant 0 : index
    %c0_36 = arith.constant 0 : index
    %c0_37 = arith.constant 0 : index
    %193 = vector.load %arg11[%c0_35, %c0_36, %c0_37] : memref<1x1x64xf32, #tpu.memory_space<vmem>>, vector<1x1x64xf32>
    %194 = vector.shape_cast %193 : vector<1x1x64xf32> to vector<1x64xf32>
    %c0_38 = arith.constant 0 : index
    %c0_39 = arith.constant 0 : index
    %c0_40 = arith.constant 0 : index
    %195 = vector.load %arg12[%c0_38, %c0_39, %c0_40] : memref<1x1x64xf32, #tpu.memory_space<vmem>>, vector<1x1x64xf32>
    %196 = vector.shape_cast %195 : vector<1x1x64xf32> to vector<1x64xf32>
    %cst_41 = arith.constant dense<0.000000e+00> : vector<128xf32>
    %197 = vector.multi_reduction <add>, %192, %cst_41 [1] : vector<128x64xf32> to vector<128xf32>
    %198 = vector.shape_cast %197 : vector<128xf32> to vector<128x1xf32>
    %cst_42 = arith.constant 6.400000e+01 : f32
    %199 = vector.broadcast %cst_42 : f32 to vector<128x1xf32>
    %200 = arith.divf %198, %199 : vector<128x1xf32>
    %201 = vector.broadcast %200 : vector<128x1xf32> to vector<128x64xf32>
    %202 = arith.subf %192, %201 : vector<128x64xf32>
    %203 = arith.mulf %202, %202 : vector<128x64xf32>
    %cst_43 = arith.constant dense<0.000000e+00> : vector<128xf32>
    %204 = vector.multi_reduction <add>, %203, %cst_43 [1] : vector<128x64xf32> to vector<128xf32>
    %205 = vector.shape_cast %204 : vector<128xf32> to vector<128x1xf32>
    %cst_44 = arith.constant 6.400000e+01 : f32
    %206 = vector.broadcast %cst_44 : f32 to vector<128x1xf32>
    %207 = arith.divf %205, %206 : vector<128x1xf32>
    %cst_45 = arith.constant 9.99999974E-6 : f32
    %208 = vector.broadcast %cst_45 : f32 to vector<128x1xf32>
    %209 = arith.addf %207, %208 : vector<128x1xf32>
    %210 = math.rsqrt %209 : vector<128x1xf32>
    %211 = vector.broadcast %210 : vector<128x1xf32> to vector<128x64xf32>
    %212 = arith.mulf %202, %211 : vector<128x64xf32>
    %213 = vector.broadcast %194 : vector<1x64xf32> to vector<128x64xf32>
    %214 = arith.mulf %212, %213 : vector<128x64xf32>
    %215 = vector.broadcast %196 : vector<1x64xf32> to vector<128x64xf32>
    %216 = arith.addf %214, %215 : vector<128x64xf32>
    %217 = arith.truncf %216 : vector<128x64xf32> to vector<128x64xbf16>
    %cst_46 = arith.constant 0.000000e+00 : f32
    %218 = vector.broadcast %cst_46 : f32 to vector<128x64xf32>
    %c0_47 = arith.constant 0 : index
    %c0_48 = arith.constant 0 : index
    %c0_49 = arith.constant 0 : index
    %c0_50 = arith.constant 0 : index
    %219 = vector.load %arg13[%c0_47, %c0_48, %c0_49, %c0_50] : memref<1x4x64x512xbf16, #tpu.memory_space<vmem>>, vector<1x1x64x512xbf16>
    %220 = vector.shape_cast %219 : vector<1x1x64x512xbf16> to vector<64x512xbf16>
    %cst_51 = arith.constant dense<0.000000e+00> : vector<128x512xf32>
    %221 = tpu.matmul %217, %220, %cst_51 {dimension_numbers = #tpu.dot_dimension_numbers<[1], [0], [0], [1], [0, 0, 1, 1], [], []>} : vector<128x64xbf16>, vector<64x512xbf16>, vector<128x512xf32> -> vector<128x512xf32>
    %c0_52 = arith.constant 0 : index
    %c0_53 = arith.constant 0 : index
    %c0_54 = arith.constant 0 : index
    %c0_55 = arith.constant 0 : index
    %222 = vector.load %arg14[%c0_52, %c0_53, %c0_54, %c0_55] : memref<1x4x1x512xf32, #tpu.memory_space<vmem>>, vector<1x1x1x512xf32>
    %223 = vector.shape_cast %222 : vector<1x1x1x512xf32> to vector<1x512xf32>
    %224 = vector.broadcast %223 : vector<1x512xf32> to vector<128x512xf32>
    %225 = arith.addf %221, %224 : vector<128x512xf32>
    %cst_56 = arith.constant 0.000000e+00 : f32
    %226 = vector.broadcast %cst_56 : f32 to vector<128x512xf32>
    %227 = arith.maximumf %225, %226 : vector<128x512xf32>
    %228 = arith.truncf %227 : vector<128x512xf32> to vector<128x512xbf16>
    %c0_57 = arith.constant 0 : index
    %c0_58 = arith.constant 0 : index
    %c0_59 = arith.constant 0 : index
    %c0_60 = arith.constant 0 : index
    %229 = vector.load %arg15[%c0_57, %c0_58, %c0_59, %c0_60] : memref<1x4x512x64xbf16, #tpu.memory_space<vmem>>, vector<1x1x512x64xbf16>
    %230 = vector.shape_cast %229 : vector<1x1x512x64xbf16> to vector<512x64xbf16>
    %cst_61 = arith.constant dense<0.000000e+00> : vector<128x64xf32>
    %231 = tpu.matmul %228, %230, %cst_61 {dimension_numbers = #tpu.dot_dimension_numbers<[1], [0], [0], [1], [0, 0, 1, 1], [], []>} : vector<128x512xbf16>, vector<512x64xbf16>, vector<128x64xf32> -> vector<128x64xf32>
    %232 = arith.addf %218, %231 : vector<128x64xf32>
    %c0_62 = arith.constant 0 : index
    %c1 = arith.constant 1 : index
    %c0_63 = arith.constant 0 : index
    %c0_64 = arith.constant 0 : index
    %233 = vector.load %arg13[%c0_62, %c1, %c0_63, %c0_64] : memref<1x4x64x512xbf16, #tpu.memory_space<vmem>>, vector<1x1x64x512xbf16>
    %234 = vector.shape_cast %233 : vector<1x1x64x512xbf16> to vector<64x512xbf16>
    %cst_65 = arith.constant dense<0.000000e+00> : vector<128x512xf32>
    %235 = tpu.matmul %217, %234, %cst_65 {dimension_numbers = #tpu.dot_dimension_numbers<[1], [0], [0], [1], [0, 0, 1, 1], [], []>} : vector<128x64xbf16>, vector<64x512xbf16>, vector<128x512xf32> -> vector<128x512xf32>
    %c0_66 = arith.constant 0 : index
    %c1_67 = arith.constant 1 : index
    %c0_68 = arith.constant 0 : index
    %c0_69 = arith.constant 0 : index
    %236 = vector.load %arg14[%c0_66, %c1_67, %c0_68, %c0_69] : memref<1x4x1x512xf32, #tpu.memory_space<vmem>>, vector<1x1x1x512xf32>
    %237 = vector.shape_cast %236 : vector<1x1x1x512xf32> to vector<1x512xf32>
    %238 = vector.broadcast %237 : vector<1x512xf32> to vector<128x512xf32>
    %239 = arith.addf %235, %238 : vector<128x512xf32>
    %cst_70 = arith.constant 0.000000e+00 : f32
    %240 = vector.broadcast %cst_70 : f32 to vector<128x512xf32>
    %241 = arith.maximumf %239, %240 : vector<128x512xf32>
    %242 = arith.truncf %241 : vector<128x512xf32> to vector<128x512xbf16>
    %c0_71 = arith.constant 0 : index
    %c1_72 = arith.constant 1 : index
    %c0_73 = arith.constant 0 : index
    %c0_74 = arith.constant 0 : index
    %243 = vector.load %arg15[%c0_71, %c1_72, %c0_73, %c0_74] : memref<1x4x512x64xbf16, #tpu.memory_space<vmem>>, vector<1x1x512x64xbf16>
    %244 = vector.shape_cast %243 : vector<1x1x512x64xbf16> to vector<512x64xbf16>
    %cst_75 = arith.constant dense<0.000000e+00> : vector<128x64xf32>
    %245 = tpu.matmul %242, %244, %cst_75 {dimension_numbers = #tpu.dot_dimension_numbers<[1], [0], [0], [1], [0, 0, 1, 1], [], []>} : vector<128x512xbf16>, vector<512x64xbf16>, vector<128x64xf32> -> vector<128x64xf32>
    %246 = arith.addf %232, %245 : vector<128x64xf32>
    %c0_76 = arith.constant 0 : index
    %c2 = arith.constant 2 : index
    %c0_77 = arith.constant 0 : index
    %c0_78 = arith.constant 0 : index
    %247 = vector.load %arg13[%c0_76, %c2, %c0_77, %c0_78] : memref<1x4x64x512xbf16, #tpu.memory_space<vmem>>, vector<1x1x64x512xbf16>
    %248 = vector.shape_cast %247 : vector<1x1x64x512xbf16> to vector<64x512xbf16>
    %cst_79 = arith.constant dense<0.000000e+00> : vector<128x512xf32>
    %249 = tpu.matmul %217, %248, %cst_79 {dimension_numbers = #tpu.dot_dimension_numbers<[1], [0], [0], [1], [0, 0, 1, 1], [], []>} : vector<128x64xbf16>, vector<64x512xbf16>, vector<128x512xf32> -> vector<128x512xf32>
    %c0_80 = arith.constant 0 : index
    %c2_81 = arith.constant 2 : index
    %c0_82 = arith.constant 0 : index
    %c0_83 = arith.constant 0 : index
    %250 = vector.load %arg14[%c0_80, %c2_81, %c0_82, %c0_83] : memref<1x4x1x512xf32, #tpu.memory_space<vmem>>, vector<1x1x1x512xf32>
    %251 = vector.shape_cast %250 : vector<1x1x1x512xf32> to vector<1x512xf32>
    %252 = vector.broadcast %251 : vector<1x512xf32> to vector<128x512xf32>
    %253 = arith.addf %249, %252 : vector<128x512xf32>
    %cst_84 = arith.constant 0.000000e+00 : f32
    %254 = vector.broadcast %cst_84 : f32 to vector<128x512xf32>
    %255 = arith.maximumf %253, %254 : vector<128x512xf32>
    %256 = arith.truncf %255 : vector<128x512xf32> to vector<128x512xbf16>
    %c0_85 = arith.constant 0 : index
    %c2_86 = arith.constant 2 : index
    %c0_87 = arith.constant 0 : index
    %c0_88 = arith.constant 0 : index
    %257 = vector.load %arg15[%c0_85, %c2_86, %c0_87, %c0_88] : memref<1x4x512x64xbf16, #tpu.memory_space<vmem>>, vector<1x1x512x64xbf16>
    %258 = vector.shape_cast %257 : vector<1x1x512x64xbf16> to vector<512x64xbf16>
    %cst_89 = arith.constant dense<0.000000e+00> : vector<128x64xf32>
    %259 = tpu.matmul %256, %258, %cst_89 {dimension_numbers = #tpu.dot_dimension_numbers<[1], [0], [0], [1], [0, 0, 1, 1], [], []>} : vector<128x512xbf16>, vector<512x64xbf16>, vector<128x64xf32> -> vector<128x64xf32>
    %260 = arith.addf %246, %259 : vector<128x64xf32>
    %c0_90 = arith.constant 0 : index
    %c3 = arith.constant 3 : index
    %c0_91 = arith.constant 0 : index
    %c0_92 = arith.constant 0 : index
    %261 = vector.load %arg13[%c0_90, %c3, %c0_91, %c0_92] : memref<1x4x64x512xbf16, #tpu.memory_space<vmem>>, vector<1x1x64x512xbf16>
    %262 = vector.shape_cast %261 : vector<1x1x64x512xbf16> to vector<64x512xbf16>
    %cst_93 = arith.constant dense<0.000000e+00> : vector<128x512xf32>
    %263 = tpu.matmul %217, %262, %cst_93 {dimension_numbers = #tpu.dot_dimension_numbers<[1], [0], [0], [1], [0, 0, 1, 1], [], []>} : vector<128x64xbf16>, vector<64x512xbf16>, vector<128x512xf32> -> vector<128x512xf32>
    %c0_94 = arith.constant 0 : index
    %c3_95 = arith.constant 3 : index
    %c0_96 = arith.constant 0 : index
    %c0_97 = arith.constant 0 : index
    %264 = vector.load %arg14[%c0_94, %c3_95, %c0_96, %c0_97] : memref<1x4x1x512xf32, #tpu.memory_space<vmem>>, vector<1x1x1x512xf32>
    %265 = vector.shape_cast %264 : vector<1x1x1x512xf32> to vector<1x512xf32>
    %266 = vector.broadcast %265 : vector<1x512xf32> to vector<128x512xf32>
    %267 = arith.addf %263, %266 : vector<128x512xf32>
    %cst_98 = arith.constant 0.000000e+00 : f32
    %268 = vector.broadcast %cst_98 : f32 to vector<128x512xf32>
    %269 = arith.maximumf %267, %268 : vector<128x512xf32>
    %270 = arith.truncf %269 : vector<128x512xf32> to vector<128x512xbf16>
    %c0_99 = arith.constant 0 : index
    %c3_100 = arith.constant 3 : index
    %c0_101 = arith.constant 0 : index
    %c0_102 = arith.constant 0 : index
    %271 = vector.load %arg15[%c0_99, %c3_100, %c0_101, %c0_102] : memref<1x4x512x64xbf16, #tpu.memory_space<vmem>>, vector<1x1x512x64xbf16>
    %272 = vector.shape_cast %271 : vector<1x1x512x64xbf16> to vector<512x64xbf16>
    %cst_103 = arith.constant dense<0.000000e+00> : vector<128x64xf32>
    %273 = tpu.matmul %270, %272, %cst_103 {dimension_numbers = #tpu.dot_dimension_numbers<[1], [0], [0], [1], [0, 0, 1, 1], [], []>} : vector<128x512xbf16>, vector<512x64xbf16>, vector<128x64xf32> -> vector<128x64xf32>
    %274 = arith.addf %260, %273 : vector<128x64xf32>
    %c0_104 = arith.constant 0 : index
    %c0_105 = arith.constant 0 : index
    %c0_106 = arith.constant 0 : index
    %275 = vector.load %arg16[%c0_104, %c0_105, %c0_106] : memref<1x1x64xf32, #tpu.memory_space<vmem>>, vector<1x1x64xf32>
    %276 = vector.shape_cast %275 : vector<1x1x64xf32> to vector<1x64xf32>
    %277 = vector.broadcast %276 : vector<1x64xf32> to vector<128x64xf32>
    %278 = arith.addf %274, %277 : vector<128x64xf32>
    %279 = arith.addf %216, %278 : vector<128x64xf32>
    %c0_107 = arith.constant 0 : index
    %c0_108 = arith.constant 0 : index
    %c0_109 = arith.constant 0 : index
    %280 = vector.load %arg17[%c0_107, %c0_108, %c0_109] : memref<1x1x64xf32, #tpu.memory_space<vmem>>, vector<1x1x64xf32>
    %281 = vector.shape_cast %280 : vector<1x1x64xf32> to vector<1x64xf32>
    %c0_110 = arith.constant 0 : index
    %c0_111 = arith.constant 0 : index
    %c0_112 = arith.constant 0 : index
    %282 = vector.load %arg18[%c0_110, %c0_111, %c0_112] : memref<1x1x64xf32, #tpu.memory_space<vmem>>, vector<1x1x64xf32>
    %283 = vector.shape_cast %282 : vector<1x1x64xf32> to vector<1x64xf32>
    %cst_113 = arith.constant dense<0.000000e+00> : vector<128xf32>
    %284 = vector.multi_reduction <add>, %279, %cst_113 [1] : vector<128x64xf32> to vector<128xf32>
    %285 = vector.shape_cast %284 : vector<128xf32> to vector<128x1xf32>
    %cst_114 = arith.constant 6.400000e+01 : f32
    %286 = vector.broadcast %cst_114 : f32 to vector<128x1xf32>
    %287 = arith.divf %285, %286 : vector<128x1xf32>
    %288 = vector.broadcast %287 : vector<128x1xf32> to vector<128x64xf32>
    %289 = arith.subf %279, %288 : vector<128x64xf32>
    %290 = arith.mulf %289, %289 : vector<128x64xf32>
    %cst_115 = arith.constant dense<0.000000e+00> : vector<128xf32>
    %291 = vector.multi_reduction <add>, %290, %cst_115 [1] : vector<128x64xf32> to vector<128xf32>
    %292 = vector.shape_cast %291 : vector<128xf32> to vector<128x1xf32>
    %cst_116 = arith.constant 6.400000e+01 : f32
    %293 = vector.broadcast %cst_116 : f32 to vector<128x1xf32>
    %294 = arith.divf %292, %293 : vector<128x1xf32>
    %cst_117 = arith.constant 9.99999974E-6 : f32
    %295 = vector.broadcast %cst_117 : f32 to vector<128x1xf32>
    %296 = arith.addf %294, %295 : vector<128x1xf32>
    %297 = math.rsqrt %296 : vector<128x1xf32>
    %298 = vector.broadcast %297 : vector<128x1xf32> to vector<128x64xf32>
    %299 = arith.mulf %289, %298 : vector<128x64xf32>
    %300 = vector.broadcast %281 : vector<1x64xf32> to vector<128x64xf32>
    %301 = arith.mulf %299, %300 : vector<128x64xf32>
    %302 = vector.broadcast %283 : vector<1x64xf32> to vector<128x64xf32>
    %303 = arith.addf %301, %302 : vector<128x64xf32>
    %c0_118 = arith.constant 0 : index
    %c0_119 = arith.constant 0 : index
    %304 = vector.load %arg23[%c0_118, %c0_119] : memref<128x64xf32, #tpu.memory_space<vmem>>, vector<128x64xf32>
    tpu.vector_store %arg23[%c0_118, %c0_119], %303 {strides = array<i32>} : memref<128x64xf32, #tpu.memory_space<vmem>>, vector<128x64xf32>,
    %c1_i32 = arith.constant 1 : i32
    %305 = arith.cmpi eq, %arg1, %c1_i32 : i32
    %306 = arith.extui %305 : i1 to i32
    %c0_i32_120 = arith.constant 0 : i32
    %307 = arith.cmpi ne, %306, %c0_i32_120 : i32
    scf.if %307 {
      %308 = arith.truncf %303 : vector<128x64xf32> to vector<128x64xbf16>
      %c0_121 = arith.constant 0 : index
      %c0_122 = arith.constant 0 : index
      %309 = vector.load %arg20[%c0_121, %c0_122] : memref<64x128xbf16, #tpu.memory_space<vmem>>, vector<64x128xbf16>
      %cst_123 = arith.constant dense<0.000000e+00> : vector<128x128xf32>
      %310 = tpu.matmul %308, %309, %cst_123 {dimension_numbers = #tpu.dot_dimension_numbers<[1], [0], [0], [1], [0, 0, 1, 1], [], []>} : vector<128x64xbf16>, vector<64x128xbf16>, vector<128x128xf32> -> vector<128x128xf32>
      %c0_124 = arith.constant 0 : index
      %c0_125 = arith.constant 0 : index
      %311 = vector.load %arg21[%c0_124, %c0_125] : memref<1x128xf32, #tpu.memory_space<vmem>>, vector<1x128xf32>
      %312 = vector.broadcast %311 : vector<1x128xf32> to vector<128x128xf32>
      %313 = arith.addf %310, %312 : vector<128x128xf32>
      %c0_126 = arith.constant 0 : index
      %c0_127 = arith.constant 0 : index
      %c0_128 = arith.constant 0 : index
      %314 = vector.load %arg22[%c0_126, %c0_127, %c0_128] : memref<1x128x128xf32, #tpu.memory_space<vmem>>, vector<1x128x128xf32>
      %315 = vector.shape_cast %314 : vector<1x128x128xf32> to vector<128x128xf32>
      %316 = vector.shape_cast %313 : vector<128x128xf32> to vector<1x128x128xf32>
      tpu.vector_store %arg22[%c0_126, %c0_127, %c0_128], %316 {strides = array<i32>} : memref<1x128x128xf32, #tpu.memory_space<vmem>>, vector<1x128x128xf32>,
    } else {
    }
    return
  }
  func.func @transform_0(%arg0: i32, %arg1: i32) -> (i32, i32, i32) {
    %c0_i32 = arith.constant 0 : i32
    %c0_i32_0 = arith.constant 0 : i32
    %c0_i32_1 = arith.constant 0 : i32
    return %arg0, %c0_i32, %c0_i32_0 : i32, i32, i32
  }
  func.func @transform_1(%arg0: i32, %arg1: i32) -> (i32, i32, i32) {
    %c0_i32 = arith.constant 0 : i32
    %c0_i32_0 = arith.constant 0 : i32
    %c0_i32_1 = arith.constant 0 : i32
    return %arg1, %c0_i32, %c0_i32_0 : i32, i32, i32
  }
  func.func @transform_2(%arg0: i32, %arg1: i32) -> (i32, i32, i32) {
    %c0_i32 = arith.constant 0 : i32
    %c0_i32_0 = arith.constant 0 : i32
    %c0_i32_1 = arith.constant 0 : i32
    return %arg1, %c0_i32, %c0_i32_0 : i32, i32, i32
  }
  func.func @transform_3(%arg0: i32, %arg1: i32) -> (i32, i32, i32) {
    %c0_i32 = arith.constant 0 : i32
    %c0_i32_0 = arith.constant 0 : i32
    %c0_i32_1 = arith.constant 0 : i32
    return %arg1, %c0_i32, %c0_i32_0 : i32, i32, i32
  }
  func.func @transform_4(%arg0: i32, %arg1: i32) -> (i32, i32, i32) {
    %c0_i32 = arith.constant 0 : i32
    %c0_i32_0 = arith.constant 0 : i32
    %c0_i32_1 = arith.constant 0 : i32
    return %arg1, %c0_i32, %c0_i32_0 : i32, i32, i32
  }
  func.func @transform_5(%arg0: i32, %arg1: i32) -> (i32, i32, i32) {
    %c0_i32 = arith.constant 0 : i32
    %c0_i32_0 = arith.constant 0 : i32
    %c0_i32_1 = arith.constant 0 : i32
    return %arg1, %c0_i32, %c0_i32_0 : i32, i32, i32
  }
  func.func @transform_6(%arg0: i32, %arg1: i32) -> (i32, i32, i32) {
    %c0_i32 = arith.constant 0 : i32
    %c0_i32_0 = arith.constant 0 : i32
    %c0_i32_1 = arith.constant 0 : i32
    return %arg1, %c0_i32, %c0_i32_0 : i32, i32, i32
  }
  func.func @transform_7(%arg0: i32, %arg1: i32) -> (i32, i32, i32) {
    %c0_i32 = arith.constant 0 : i32
    %c0_i32_0 = arith.constant 0 : i32
    %c0_i32_1 = arith.constant 0 : i32
    return %arg1, %c0_i32, %c0_i32_0 : i32, i32, i32
  }
  func.func @transform_8(%arg0: i32, %arg1: i32) -> (i32, i32, i32) {
    %c0_i32 = arith.constant 0 : i32
    %c0_i32_0 = arith.constant 0 : i32
    %c0_i32_1 = arith.constant 0 : i32
    return %arg1, %c0_i32, %c0_i32_0 : i32, i32, i32
  }
  func.func @transform_9(%arg0: i32, %arg1: i32) -> (i32, i32, i32) {
    %c0_i32 = arith.constant 0 : i32
    %c0_i32_0 = arith.constant 0 : i32
    %c0_i32_1 = arith.constant 0 : i32
    return %arg1, %c0_i32, %c0_i32_0 : i32, i32, i32
  }
  func.func @transform_10(%arg0: i32, %arg1: i32) -> (i32, i32, i32) {
    %c0_i32 = arith.constant 0 : i32
    %c0_i32_0 = arith.constant 0 : i32
    %c0_i32_1 = arith.constant 0 : i32
    return %arg1, %c0_i32, %c0_i32_0 : i32, i32, i32
  }
  func.func @transform_11(%arg0: i32, %arg1: i32) -> (i32, i32, i32, i32) {
    %c0_i32 = arith.constant 0 : i32
    %c0_i32_0 = arith.constant 0 : i32
    %c0_i32_1 = arith.constant 0 : i32
    %c0_i32_2 = arith.constant 0 : i32
    return %arg1, %c0_i32, %c0_i32_0, %c0_i32_1 : i32, i32, i32, i32
  }
  func.func @transform_12(%arg0: i32, %arg1: i32) -> (i32, i32, i32, i32) {
    %c0_i32 = arith.constant 0 : i32
    %c0_i32_0 = arith.constant 0 : i32
    %c0_i32_1 = arith.constant 0 : i32
    %c0_i32_2 = arith.constant 0 : i32
    return %arg1, %c0_i32, %c0_i32_0, %c0_i32_1 : i32, i32, i32, i32
  }
  func.func @transform_13(%arg0: i32, %arg1: i32) -> (i32, i32, i32, i32) {
    %c0_i32 = arith.constant 0 : i32
    %c0_i32_0 = arith.constant 0 : i32
    %c0_i32_1 = arith.constant 0 : i32
    %c0_i32_2 = arith.constant 0 : i32
    return %arg1, %c0_i32, %c0_i32_0, %c0_i32_1 : i32, i32, i32, i32
  }
  func.func @transform_14(%arg0: i32, %arg1: i32) -> (i32, i32, i32) {
    %c0_i32 = arith.constant 0 : i32
    %c0_i32_0 = arith.constant 0 : i32
    %c0_i32_1 = arith.constant 0 : i32
    return %arg1, %c0_i32, %c0_i32_0 : i32, i32, i32
  }
  func.func @transform_15(%arg0: i32, %arg1: i32) -> (i32, i32, i32) {
    %c0_i32 = arith.constant 0 : i32
    %c0_i32_0 = arith.constant 0 : i32
    %c0_i32_1 = arith.constant 0 : i32
    return %arg1, %c0_i32, %c0_i32_0 : i32, i32, i32
  }
  func.func @transform_16(%arg0: i32, %arg1: i32) -> (i32, i32, i32) {
    %c0_i32 = arith.constant 0 : i32
    %c0_i32_0 = arith.constant 0 : i32
    %c0_i32_1 = arith.constant 0 : i32
    return %arg1, %c0_i32, %c0_i32_0 : i32, i32, i32
  }
  func.func @transform_17(%arg0: i32, %arg1: i32) -> (i32, i32) {
    %c0_i32 = arith.constant 0 : i32
    %c0_i32_0 = arith.constant 0 : i32
    %c0_i32_1 = arith.constant 0 : i32
    return %c0_i32, %c0_i32_0 : i32, i32
  }
  func.func @transform_18(%arg0: i32, %arg1: i32) -> (i32, i32) {
    %c0_i32 = arith.constant 0 : i32
    %c0_i32_0 = arith.constant 0 : i32
    %c0_i32_1 = arith.constant 0 : i32
    return %c0_i32, %c0_i32_0 : i32, i32
  }
  func.func @transform_19(%arg0: i32, %arg1: i32) -> (i32, i32) {
    %c0_i32 = arith.constant 0 : i32
    %c0_i32_0 = arith.constant 0 : i32
    %c0_i32_1 = arith.constant 0 : i32
    return %c0_i32, %c0_i32_0 : i32, i32
  }
  func.func @transform_20(%arg0: i32, %arg1: i32) -> (i32, i32, i32) {
    %c0_i32 = arith.constant 0 : i32
    %c0_i32_0 = arith.constant 0 : i32
    %c0_i32_1 = arith.constant 0 : i32
    return %arg0, %c0_i32, %c0_i32_0 : i32, i32, i32
  }
}

</mosaic_0001>

<bundles_post_ra>
// kernel: transformer_model_forward.1
= control target key start
LH: loop header
LB: loop body
LE: loop exit
PB: predicated region body
PF: predicated region fallthrough
CT: control target
= control target key end

     0   :  { %s9453_s22 = smov 0   ;;  %s9455_s23 = smov 0   ;;  %s12445_s0 = inlined_call_operand.vmem [shape: f32[2,128,64], index: 0, kind: input, shape index: {}]   ;;  %s12446_s1 = inlined_call_operand.vmem [shape: bf16[2,64,64], index: 1, kind: input, shape index: {}]   ;;  %s12447_s2 = inlined_call_operand.vmem [shape: f32[2,1,64], index: 2, kind: input, shape index: {}]   ;;  %s12448_s3 = inlined_call_operand.vmem [shape: bf16[2,64,64], index: 3, kind: input, shape index: {}]   ;;  %s12449_s4 = inlined_call_operand.vmem [shape: f32[2,1,64], index: 4, kind: input, shape index: {}]   ;;  %s12450_s5 = inlined_call_operand.vmem [shape: bf16[2,64,64], index: 5, kind: input, shape index: {}]   ;;  %s12451_s6 = inlined_call_operand.vmem [shape: f32[2,1,64], index: 6, kind: input, shape index: {}]   ;;  %s12452_s7 = inlined_call_operand.vmem [shape: bf16[2,64,64], index: 7, kind: input, shape index: {}]   ;;  %s12453_s8 = inlined_call_operand.vmem [shape: f32[2,1,64], index: 8, kind: input, shape index: {}]   ;;  %s12454_s9 = inlined_call_operand.vmem [shape: f32[2,1,64], index: 9, kind: input, shape index: {}]   ;;  %s12455_s10 = inlined_call_operand.vmem [shape: f32[2,1,64], index: 10, kind: input, shape index: {}]   ;;  %s12456_s11 = inlined_call_operand.vmem [shape: bf16[2,4,64,512], index: 11, kind: input, shape index: {}]   ;;  %s12457_s12 = inlined_call_operand.vmem [shape: f32[2,4,1,512], index: 12, kind: input, shape index: {}]   ;;  %s12458_s13 = inlined_call_operand.vmem [shape: bf16[2,4,512,64], index: 13, kind: input, shape index: {}]   ;;  %s12459_s14 = inlined_call_operand.vmem [shape: f32[2,1,64], index: 14, kind: input, shape index: {}]   ;;  %s12460_s15 = inlined_call_operand.vmem [shape: f32[2,1,64], index: 15, kind: input, shape index: {}]   ;;  %s12461_s16 = inlined_call_operand.vmem [shape: f32[2,1,64], index: 16, kind: input, shape index: {}]   ;;  %s12462_s17 = inlined_call_operand.vmem [shape: bf16[64,64], index: 17, kind: input, shape index: {}]   ;;  %s12463_s18 = inlined_call_operand.vmem [shape: bf16[64,128], index: 18, kind: input, shape index: {}]   ;;  %s12464_s19 = inlined_call_operand.vmem [shape: f32[1,128], index: 19, kind: input, shape index: {}]   ;;  %s12465_s20 = inlined_call_operand.vmem [shape: f32[2,128,128], index: 20, kind: output, shape index: {}]  }
   0x1   :  { %12561 = sst [smem:[#allocation51_spill]] %s12445_s0  ;;  %s9457_s24 = smov 0  }
   0x2   :  { %12562 = sst [smem:[#allocation52_spill]] %s12446_s1  ;;  %s9451_s1 = smov 0  }
   0x3   :  { %12563 = sst [smem:[#allocation53_spill]] %s12447_s2  ;;  %s9459_s2 = smov 0  }
   0x4   :  { %12564 = sst [smem:[#allocation54_spill]] %s12448_s3 }
   0x5   :  { %12565 = sst [smem:[#allocation55_spill]] %s12449_s4 }
   0x6   :  { %12566 = sst [smem:[#allocation56_spill]] %s12450_s5 }
   0x7   :  { %12567 = sst [smem:[#allocation57_spill]] %s12452_s7 }
   0x8   :  { %12568 = sst [smem:[#allocation58_spill]] %s12456_s11 }
   0x9   :  { %12569 = sst [smem:[#allocation59_spill]] %s12457_s12 }
   0xa   :  { %12570 = sst [smem:[#allocation60_spill]] %s12461_s16 }
   0xb   :  { %12571 = sst [smem:[#allocation61_spill]] %s12462_s17 }
   0xc   :  { %12572 = sst [smem:[#allocation62_spill]] %s12463_s18 }
   0xd   :  { %12573 = sst [smem:[#allocation63_spill]] %s12464_s19 }
   0xe   :  { %12574 = sst [smem:[#allocation64_spill]] %s12465_s20 }
   0xf LB: > { %12575 = sst [smem:[#allocation3_spill]] %s9327_s1  ;;  %s39_s25 = sadd.s32 1, %s9335_s23  ;;  %s9343_s2 = sphi %s9459_s2, %s30_s2   ;;  %s9339_s24 = sphi %s9457_s24, %s12759_s24   ;;  %s9335_s23 = sphi %s9455_s23, %s12758_s23   ;;  %s9331_s22 = sphi %s9453_s22, %s12757_s22   ;;  %s9327_s1 = sphi %s9451_s1, %s12756_s1  }
  0x10   : > { %12576 = sst [smem:[#allocation4_spill]] %s9335_s23  ;;  %s42_s3 = sadd.s32 1, %s9339_s24 }
  0x11   : > { %12577 = sst [smem:[#allocation5_spill]] %s9339_s24  ;;  %p40_p0 = scmp.ge.s32.totalorder %s39_s25, 2 }
  0x12   : > { %12578 = sst [smem:[#allocation6_spill]] %s9343_s2  ;;  %p7296_p1 = scmp.ge.s32.totalorder %s9343_s2, 1 }
  0x13   : > { %p715_p2 = scmp.lt.s32.totalorder %s9343_s2, 5  ;;  %s12761_s25 = smov (%p40_p0, %s39_s25), 0 }
  0x14   : > { %12579 = sst [smem:[#allocation7_spill]] %s12761_s25  ;;  %s12763_s3 = smov (!%p40_p0, %s42_s3), %s9339_s24 }
  0x15   : > { %p716_p3 = pnand %p7296_p1, %p715_p2  ;;  %p44_p4 = scmp.ge.s32.totalorder %s12763_s3, 2 }
  0x17   : > { %s12765_s3 = smov (%p44_p4, %s12763_s3), 0  ;;  %719 = sbr.rel (%p716_p3) target bundleno = 2928 (0xb70), region = 100 }
  0x18   : > { %12580 = sst [smem:[#allocation8_spill]] %s12765_s3 }
  0x1e   : > { %p834_p5 = scmp.lt.s32.totalorder %s9331_s22, 1  ;;  %p839_p6 = scmp.lt.s32.totalorder %s9327_s1, 1 }
  0x1f   : > { %s12581_s29 = sld [smem:[#allocation51_spill]]  ;;  %s12583_s25 = sld [smem:[#allocation52_spill]] }
  0x20   : > { %s12767_s22 = smov (!%p834_p5, %s9331_s22), 1  ;;  %s12588_s5 = sld [smem:[#allocation56_spill]] }
  0x21   : > { %s9485_s26 = scalar_select %p839_p6, %s9327_s1, 1 }
  0x22   : > { %s7923_s27 = sshll.u32 %s12767_s22, 7  ;;  %s12586_s22 = sld [smem:[#allocation54_spill]] }
  0x23   : > { %s7924_s0 = sshll.u32 %s9485_s26, 5  ;;  %s12589_s7 = sld [smem:[#allocation57_spill]] }
  0x24   : > { %s12590_s11 = sld [smem:[#allocation58_spill]]  ;;  %s12591_s12 = sld [smem:[#allocation59_spill]] }
  0x25   : > { %s9490_s30 = scalar_lea.vmem %s12581_s29, %s7923_s27  ;;  %s9496_s24 = scalar_lea.vmem %s12583_s25, %s7924_s0 }
  0x26   : > { %12582 = sst [smem:[#allocation9_spill]] %s9490_s30  ;;  %s9514_s25 = scalar_lea.vmem %s12588_s5, %s7924_s0 }
  0x27   : > { %12584 = sst [smem:[#allocation10_spill]] %s9496_s24  ;;  %s7928_s5 = sshll.u32 %s9485_s26, 9 }
  0x28   : > { %s9505_s20 = scalar_lea.vmem %s12586_s22, %s7924_s0  ;;  %s7309_s24 = sshll.u32 %s9485_s26, 4 }
  0x29   : > { %s9523_s17 = scalar_lea.vmem %s12589_s7, %s7924_s0  ;;  %s7929_s22 = sshll.u32 %s9485_s26, 10 }
  0x2a   : > { %s9542_s23 = scalar_lea.vmem %s12590_s11, %s7928_s5  ;;  %s9547_s1 = scalar_lea.vmem %s12591_s12, %s7309_s24 }
  0x2b   : > { %12592 = sst [smem:[#allocation11_spill]] %s9547_s1  ;;  %s893_s29 = scalar_lea.vmem %s12459_s14, %s9485_s26 }
  0x2c   : > { %s9557_s3 = scalar_lea.vmem %s12458_s13, %s7929_s22  ;;  %s896_s5 = scalar_lea.vmem %s12460_s15, %s9485_s26 }
  0x2d   : > { %s12593_s11 = sld [smem:[#allocation60_spill]]  ;;  %s12594_s12 = sld [smem:[#allocation64_spill]] }
  0x2e   : > { %s12595_s28 = sld [smem:[#allocation3_spill]] }
  0x33   : > { %s899_s0 = scalar_lea.vmem %s12593_s11, %s9485_s26  ;;  %s9570_s1 = scalar_lea.vmem %s12594_s12, %s7923_s27 }
  0x34   : > { %p7314_p7 = scmp.ne.s32.totalorder %s12595_s28, 0 }
  0x35   : > { %s12596_s4 = sld [smem:[#allocation9_spill]] (!%p7314_p7)  ;;  %vm926_vm0 = vcmask (!%p7314_p7), 523264  }
  0x36   : > { %909 = sbr.rel (%p7314_p7) target bundleno = 68 (0x44), region = 104 }
  0x3b   : > { %v910_v0 = vld [vmem:[%s12596_s4] sm:$0xff] (!%p7314_p7)  ;;  %v911_v1 = vld [vmem:[%s12596_s4 + $0x8] sm:$0xff] (!%p7314_p7)  ;;  %v912_v2 = vld [vmem:[%s12596_s4 + $0x10] sm:$0xff] (!%p7314_p7) }
  0x3c   : > { %927 = vst.msk [vmem:[#allocation2] sm:$0xff] (!%p7314_p7), %vm926_vm0, %v910_v0  ;;  %928 = vst.msk [vmem:[#allocation2 + $0x8] sm:$0xff] (!%p7314_p7), %vm926_vm0, %v911_v1  ;;  %v913_v3 = vld [vmem:[%s12596_s4 + $0x18] sm:$0xff] (!%p7314_p7)  ;;  %v914_v4 = vld [vmem:[%s12596_s4 + $0x20] sm:$0xff] (!%p7314_p7) }
  0x3d   : > { %929 = vst.msk [vmem:[#allocation2 + $0x10] sm:$0xff] %vm926_vm0, %v912_v2  ;;  %v915_v5 = vld [vmem:[%s12596_s4 + $0x28] sm:$0xff]  ;;  %930 = vst.msk [vmem:[#allocation2 + $0x18] sm:$0xff] %vm926_vm0, %v913_v3  ;;  %v916_v6 = vld [vmem:[%s12596_s4 + $0x30] sm:$0xff] }
  0x3e   : > { %931 = vst.msk [vmem:[#allocation2 + $0x20] sm:$0xff] %vm926_vm0, %v914_v4  ;;  %932 = vst.msk [vmem:[#allocation2 + $0x28] sm:$0xff] %vm926_vm0, %v915_v5  ;;  %v917_v7 = vld [vmem:[%s12596_s4 + $0x38] sm:$0xff]  ;;  %v918_v8 = vld [vmem:[%s12596_s4 + $0x40] sm:$0xff] }
  0x3f   : > { %933 = vst.msk [vmem:[#allocation2 + $0x30] sm:$0xff] %vm926_vm0, %v916_v6  ;;  %934 = vst.msk [vmem:[#allocation2 + $0x38] sm:$0xff] %vm926_vm0, %v917_v7  ;;  %v919_v9 = vld [vmem:[%s12596_s4 + $0x48] sm:$0xff]  ;;  %v920_v10 = vld [vmem:[%s12596_s4 + $0x50] sm:$0xff] }
  0x40   : > { %935 = vst.msk [vmem:[#allocation2 + $0x40] sm:$0xff] %vm926_vm0, %v918_v8  ;;  %v921_v11 = vld [vmem:[%s12596_s4 + $0x58] sm:$0xff]  ;;  %936 = vst.msk [vmem:[#allocation2 + $0x48] sm:$0xff] %vm926_vm0, %v919_v9  ;;  %v922_v12 = vld [vmem:[%s12596_s4 + $0x60] sm:$0xff] }
  0x41   : > { %937 = vst.msk [vmem:[#allocation2 + $0x50] sm:$0xff] %vm926_vm0, %v920_v10  ;;  %938 = vst.msk [vmem:[#allocation2 + $0x58] sm:$0xff] %vm926_vm0, %v921_v11  ;;  %v923_v13 = vld [vmem:[%s12596_s4 + $0x68] sm:$0xff]  ;;  %v924_v14 = vld [vmem:[%s12596_s4 + $0x70] sm:$0xff] }
  0x42   : > { %939 = vst.msk [vmem:[#allocation2 + $0x60] sm:$0xff] %vm926_vm0, %v922_v12  ;;  %940 = vst.msk [vmem:[#allocation2 + $0x68] sm:$0xff] %vm926_vm0, %v923_v13  ;;  %v925_v15 = vld [vmem:[%s12596_s4 + $0x78] sm:$0xff] }
  0x43   : > { %941 = vst.msk [vmem:[#allocation2 + $0x70] sm:$0xff] %vm926_vm0, %v924_v14  ;;  %942 = vst.msk [vmem:[#allocation2 + $0x78] sm:$0xff] %vm926_vm0, %v925_v15 }
  0x44 PF: > { %s12597_s7 = sld [smem:[#allocation10_spill]]  ;;  %v8817_v17 = vld [vmem:[%s9505_s20] sm:$0xff]   ;;  %v8819_v19 = vld [vmem:[%s9505_s20 + $0x8] sm:$0xff]   ;;  %v8821_v21 = vld [vmem:[%s9505_s20 + $0x10] sm:$0xff]   ;;  %vm1006_vm1 = vcmask 523264   ;;  %s12598_s18 = sld [smem:[#allocation61_spill]] }
  0x45   : > { %8575 = vmatprep.subr.bf16.mxu1 %v8817_v17  ;;  %v8823_v25 = vld [vmem:[%s9505_s20 + $0x18] sm:$0xff]   ;;  %v948_v30 = vld [vmem:[#allocation2 + $0x28] sm:$0xff]  ;;  %v8825_v37 = vld [vmem:[%s9514_s25 + $0x8] sm:$0xff]   ;;  %s12599_s24 = sld [smem:[#allocation53_spill]]  ;;  %s12603_s30 = scalar_lea.vmem %s12451_s6, %s9485_s26 }
  0x46   : > { %8576 = vmatpush3.bf16.msra.mxu1 %v8817_v17  ;;  %v947_v29 = vld [vmem:[#allocation2 + $0x20] sm:$0xff]  ;;  %v8824_v32 = vld [vmem:[%s9514_s25] sm:$0xff]   ;;  %v949_v35 = vld [vmem:[#allocation2 + $0x30] sm:$0xff]  ;;  %s12690_s16 = scalar_lea.vmem %s12453_s8, %s9485_s26  ;;  %s12692_s4 = scalar_lea.vmem %s12455_s10, %s9485_s26 }
  0x47   : > { %8577 = vmatprep.subr.bf16.mxu1 %v8819_v19  ;;  %v961_v33 = vpack.c.bf16 %v948_v30, %v947_v29  ;;  %v950_v36 = vld [vmem:[#allocation2 + $0x38] sm:$0xff]  ;;  %v951_v38 = vld [vmem:[#allocation2 + $0x40] sm:$0xff]  ;;  %v952_v39 = vld [vmem:[#allocation2 + $0x48] sm:$0xff] }
  0x48   : > { %v8827_v40 = vld [vmem:[%s9514_s25 + $0x10] sm:$0xff]   ;;  %v962_v43 = vpack.c.bf16 %v950_v36, %v949_v35  ;;  %v963_v44 = vpack.c.bf16 %v952_v39, %v951_v38  ;;  %v8828_v45 = vld [vmem:[%s9514_s25 + $0x18] sm:$0xff]   ;;  %v953_v46 = vld [vmem:[#allocation2 + $0x50] sm:$0xff] }
  0x49   : > { %v954_v47 = vld [vmem:[#allocation2 + $0x58] sm:$0xff]  ;;  %v955_v48 = vld [vmem:[#allocation2 + $0x60] sm:$0xff]  ;;  %v956_v49 = vld [vmem:[#allocation2 + $0x68] sm:$0xff] }
  0x4a   : > { %v8816_v16 = vld [vmem:[%s12597_s7] sm:$0xff]   ;;  %v8818_v18 = vld [vmem:[%s12597_s7 + $0x8] sm:$0xff]   ;;  %v8820_v20 = vld [vmem:[%s12597_s7 + $0x10] sm:$0xff]   ;;  %8578 = vmatpush3.bf16.msra.mxu1 %v8819_v19  ;;  %v964_v50 = vpack.c.bf16 %v954_v47, %v953_v46  ;;  %v965_v51 = vpack.c.bf16 %v956_v49, %v955_v48 }
  0x4b   : > { %8551 = vmatprep.subr.bf16.mxu0 %v8816_v16  ;;  %v8822_v22 = vld [vmem:[%s12597_s7 + $0x18] sm:$0xff]   ;;  %v944_v24 = vld [vmem:[#allocation2 + $0x8] sm:$0xff]  ;;  %8579 = vmatprep.subr.bf16.mxu1 %v8821_v21  ;;  %v945_v27 = vld [vmem:[#allocation2 + $0x10] sm:$0xff]  ;;  %s12600_s2 = scalar_lea.vmem %s12599_s24, %s9485_s26  ;;  %s12601_s7 = sld [smem:[#allocation55_spill]] }
  0x4c   : > { %8552 = vmatpush3.bf16.msra.mxu0 %v8816_v16  ;;  %v943_v23 = vld [vmem:[#allocation2] sm:$0xff]  ;;  %v946_v28 = vld [vmem:[#allocation2 + $0x18] sm:$0xff]  ;;  %v9623_v34 = vld [vmem:[%s12598_s18] sm:$0xff]   ;;  %s12691_s24 = scalar_lea.vmem %s12454_s9, %s9485_s26 }
  0x4d   : > { %8553 = vmatprep.subr.bf16.mxu0 %v8818_v18  ;;  %v9613_v26 = vpack.c.bf16 %v944_v24, %v943_v23  ;;  %v960_v31 = vpack.c.bf16 %v946_v28, %v945_v27  ;;  %v9634_v41 = vld [vmem:[%s12598_s18 + $0x8] sm:$0xff]   ;;  %v9640_v42 = vld [vmem:[%s12598_s18 + $0x10] sm:$0xff]   ;;  %v9676_v55 = vld [vmem:[%s12598_s18 + $0x18] sm:$0xff]  }
  0x4e   : > { %8580 = vmatpush3.bf16.msra.mxu1 %v8821_v21  ;;  %v957_v52 = vld [vmem:[#allocation2 + $0x70] sm:$0xff]  ;;  %v958_v53 = vld [vmem:[#allocation2 + $0x78] sm:$0xff]  ;;  %v9689_v56 = vld [vmem:[%s12600_s2] ss:$0 sm:$0xff] }
  0x4f   : > { %8559 = vmatprep.mubr.msk.bf16.mxu0 %vm1006_vm1, %v9613_v26  ;;  %8581 = vmatprep.subr.bf16.mxu1 %v8823_v25  ;;  %v966_v54 = vpack.c.bf16 %v958_v53, %v957_v52 }
  0x50   : > { %8554 = vmatpush3.bf16.msra.mxu0 %v8818_v18  ;;  %8583 = vmatprep.mubr.msk.bf16.mxu1 %vm1006_vm1, %v9613_v26 }
  0x51   : > { %8555 = vmatprep.subr.bf16.mxu0 %v8820_v20  ;;  %s12602_s11 = scalar_lea.vmem %s12601_s7, %s9485_s26  ;;  %s12717_s7 = sld [smem:[#allocation11_spill]] }
  0x52   : > { %8582 = vmatpush3.bf16.msra.mxu1 %v8823_v25  ;;  %v9696_v57 = vld [vmem:[%s12602_s11] ss:$0 sm:$0xff]  ;;  %s12752_s26 = sld [smem:[#allocation3_spill]] }
  0x53   : > { %8623 = vmatprep.subr.bf16.mxu1 %v9623_v34 }
  0x54   : > { %8556 = vmatpush3.bf16.msra.mxu0 %v8820_v20 }
  0x55   : > { %8557 = vmatprep.subr.bf16.mxu0 %v8822_v22  ;;  %8584 = vmatmul.mubr.msk.bf16.vlgmr.msra.gmra.mrb[0].mxu1 %vm1006_vm1, %v960_v31 }
  0x56   : > { %8587 = vmatprep.mubr.msk.bf16.mxu1 %vm1006_vm1, %v961_v33  ;;  %8624 = vmatpush3.bf16.msra.mxu1 %v9623_v34 }
  0x57   : > { %8625 = vmatprep.subr.bf16.mxu1 %v9634_v41 }
  0x58   : > { %8558 = vmatpush3.bf16.msra.mxu0 %v8822_v22  ;;  %p7907_p8 = scmp.ne.s32.totalorder %s12752_s26, 1 }
  0x59   : > { %8599 = vmatprep.subr.bf16.mxu0 %v8824_v32  ;;  %s12753_s27 = sld [smem:[#allocation62_spill]] (!%p7907_p8)  ;;  %s12754_s28 = sld [smem:[#allocation63_spill]] (!%p7907_p8) }
  0x5a   : > { %8626 = vmatpush3.bf16.msra.mxu1 %v9634_v41 }
  0x5b   : > { %8560 = vmatmul.mubr.msk.bf16.vlgmr.msra.gmra.mrb[0].mxu0 %vm1006_vm1, %v960_v31  ;;  %8627 = vmatprep.subr.bf16.mxu1 %v9640_v42 }
  0x5c   : > { %8563 = vmatprep.mubr.msk.bf16.mxu0 %vm1006_vm1, %v961_v33  ;;  %8600 = vmatpush3.bf16.msra.mxu0 %v8824_v32 }
  0x5d   : > { %8601 = vmatprep.subr.bf16.mxu0 %v8825_v37  ;;  %8588 = vmatmul.mubr.msk.bf16.gmra.mrb[4].mxu1 %vm1006_vm1, %v962_v43 }
  0x5e   : > { %8591 = vmatprep.mubr.msk.bf16.mxu1 %vm1006_vm1, %v963_v44  ;;  %8628 = vmatpush3.bf16.msra.mxu1 %v9640_v42 }
  0x5f   : > { %8629 = vmatprep.subr.bf16.mxu1 %v9676_v55 }
  0x60   : > { %8602 = vmatpush3.bf16.msra.mxu0 %v8825_v37 }
  0x61   : > { %8603 = vmatprep.subr.bf16.mxu0 %v8827_v40 }
  0x62   : > { %8630 = vmatpush3.bf16.msra.mxu1 %v9676_v55 }
  0x63   : > { %8564 = vmatmul.mubr.msk.bf16.gmra.mrb[4].mxu0 %vm1006_vm1, %v962_v43  ;;  %8671 = vmatprep.subr.bf16.mxu1 %v9623_v34 }
  0x64   : > { %8567 = vmatprep.mubr.msk.bf16.mxu0 %vm1006_vm1, %v963_v44  ;;  %8604 = vmatpush3.bf16.msra.mxu0 %v8827_v40 }
  0x65   : > { %8605 = vmatprep.subr.bf16.mxu0 %v8828_v45  ;;  %8592 = vmatmul.mubr.msk.bf16.gmra.mrb[8].mxu1 %vm1006_vm1, %v964_v50 }
  0x66   : > { %8595 = vmatprep.mubr.msk.bf16.mxu1 %vm1006_vm1, %v965_v51 }
  0x68   : > { %8606 = vmatpush3.bf16.msra.mxu0 %v8828_v45 }
  0x69   : > { %8647 = vmatprep.subr.bf16.mxu0 %v9623_v34 }
  0x6b   : > { %8568 = vmatmul.mubr.msk.bf16.gmra.mrb[8].mxu0 %vm1006_vm1, %v964_v50 }
  0x6c   : > { %8571 = vmatprep.mubr.msk.bf16.mxu0 %vm1006_vm1, %v965_v51 }
  0x6d   : > { %8596 = vmatmul.mubr.msk.bf16.gmra.mrb[12].mxu1 %vm1006_vm1, %v966_v54 }
  0x73   : > { %8572 = vmatmul.mubr.msk.bf16.gmra.mrb[12].mxu0 %vm1006_vm1, %v966_v54 }
  0x74   : > { %8607 = vmatprep.mubr.msk.bf16.mxu0 %vm1006_vm1, %v9613_v26 }
  0x7b   : > { %8608 = vmatmul.mubr.msk.bf16.vlgmr.msra.gmra.mrb[16].mxu0 %vm1006_vm1, %v960_v31 }
  0x7c   : > { %8611 = vmatprep.mubr.msk.bf16.mxu0 %vm1006_vm1, %v961_v33  ;;  %8648 = vmatpush3.bf16.msra.mxu0 %v9623_v34 }
  0x7d   : > { %8649 = vmatprep.subr.bf16.mxu0 %v9634_v41 }
  0x80   : > { %8650 = vmatpush3.bf16.msra.mxu0 %v9634_v41 }
  0x81   : > { %8651 = vmatprep.subr.bf16.mxu0 %v9640_v42 }
  0x83   : > { %8612 = vmatmul.mubr.msk.bf16.gmra.mrb[20].mxu0 %vm1006_vm1, %v962_v43 }
  0x84   : > { %8615 = vmatprep.mubr.msk.bf16.mxu0 %vm1006_vm1, %v963_v44  ;;  %8652 = vmatpush3.bf16.msra.mxu0 %v9640_v42 }
  0x85   : > { %8653 = vmatprep.subr.bf16.mxu0 %v9676_v55 }
  0x88   : > { %8654 = vmatpush3.bf16.msra.mxu0 %v9676_v55 }
  0x89   : > { %8695 = vmatprep.subr.bf16.mxu0 %v9623_v34 }
  0x8b   : > { %8616 = vmatmul.mubr.msk.bf16.gmra.mrb[24].mxu0 %vm1006_vm1, %v964_v50 }
  0x8c   : > { %8619 = vmatprep.mubr.msk.bf16.mxu0 %vm1006_vm1, %v965_v51 }
  0x93   : > { %8620 = vmatmul.mubr.msk.bf16.gmra.mrb[28].mxu0 %vm1006_vm1, %v966_v54 }
 0x128   : > { %v8585_v60 = vpop.f32.mrb[0].mxu1 }
 0x129   : > { %v9702_v62 = vadd.f32 %v8585_v60, %v9696_v57  ;;  %v1201_v0 = vpop.f32.mrb[1].mxu1 }
 0x12a   : > { %v9708_v2 = vadd.f32 %v9696_v57, %v1201_v0  ;;  %v8586_v4 = vpop.f32.mrb[2].mxu1 }
 0x12b   : > { %v9716_v7 = vadd.f32 %v8586_v4, %v9696_v57  ;;  %v1204_v9 = vpop.f32.mrb[3].mxu1 }
 0x12c   : > { %v9722_v10 = vadd.f32 %v9696_v57, %v1204_v9 }
 0x12e   : > { %v8561_v58 = vpop.f32.mrb[0].mxu0 }
 0x12f   : > { %v9699_v59 = vadd.f32 %v8561_v58, %v9689_v56  ;;  %v1065_v61 = vpop.f32.mrb[1].mxu0 }
 0x130   : > { %v9705_v63 = vadd.f32 %v9689_v56, %v1065_v61  ;;  %v8562_v1 = vpop.f32.mrb[2].mxu0  ;;  %v8589_v17 = vpop.f32.mrb[4].mxu1 }
 0x131   : > { %v9711_v3 = vadd.f32 %v8562_v1, %v9689_v56  ;;  %v1068_v5 = vpop.f32.mrb[3].mxu0  ;;  %v1410_v6 = vmul.f32 %v9702_v62, %v9699_v59  ;;  %v9734_v20 = vadd.f32 %v8589_v17, %v9696_v57  ;;  %v1217_v22 = vpop.f32.mrb[5].mxu1 }
 0x132   : > { %v9719_v8 = vadd.f32 %v9689_v56, %v1068_v5  ;;  %v1408_v11 = vmul.f32 %v9708_v2, %v9705_v63  ;;  %v9742_v25 = vadd.f32 %v9696_v57, %v1217_v22  ;;  %v8590_v27 = vpop.f32.mrb[6].mxu1 }
 0x133   : > { %v1411_v12 = vmul.f32 %v9716_v7, %v9711_v3  ;;  %v9749_v29 = vadd.f32 %v8590_v27, %v9696_v57  ;;  %v1220_v31 = vpop.f32.mrb[7].mxu1  ;;  %v1414_v33 = vmul.f32 %v9734_v20, %v9699_v59 }
 0x134   : > { %v1409_v13 = vmul.f32 %v9722_v10, %v9719_v8  ;;  %v9762_v36 = vadd.f32 %v9696_v57, %v1220_v31  ;;  %v1412_v37 = vmul.f32 %v9742_v25, %v9705_v63 }
 0x135   : > { %v1425_v14 = vpack.c.bf16 %v1411_v12, %v1410_v6  ;;  %v1415_v40 = vmul.f32 %v9749_v29, %v9711_v3 }
 0x136   : > { %v8565_v15 = vpop.f32.mrb[4].mxu0  ;;  %v1424_v19 = vpack.c.bf16 %v1409_v13, %v1408_v11  ;;  %v1413_v46 = vmul.f32 %v9762_v36, %v9719_v8 }
 0x137   : > { %v9731_v16 = vadd.f32 %v8565_v15, %v9689_v56  ;;  %v1081_v18 = vpop.f32.mrb[5].mxu0  ;;  %v1427_v50 = vpack.c.bf16 %v1415_v40, %v1414_v33 }
 0x138   : > { %v9737_v21 = vadd.f32 %v9689_v56, %v1081_v18  ;;  %v8566_v23 = vpop.f32.mrb[6].mxu0  ;;  %8631 = vmatprep.mubr.msk.bf16.mxu1 %vm1006_vm1, %v1424_v19  ;;  %v8593_v53 = vpop.f32.mrb[8].mxu1  ;;  %v1426_v58 = vpack.c.bf16 %v1413_v46, %v1412_v37 }
 0x139   : > { %v1699_v24 = vmul.f32 %v9702_v62, %v9731_v16  ;;  %v9745_v26 = vadd.f32 %v8566_v23, %v9689_v56  ;;  %v1084_v28 = vpop.f32.mrb[7].mxu0  ;;  %8632 = vmatmul.mubr.msk.bf16.vlgmr.msra.gmra.mrb[16].mxu1 %vm1006_vm1, %v1425_v14  ;;  %v9776_v43 = vmul.f32 %v9734_v20, %v9731_v16  ;;  %v9793_v61 = vadd.f32 %v8593_v53, %v9696_v57  ;;  %v1233_v1 = vpop.f32.mrb[9].mxu1 }
 0x13a   : > { %v9752_v30 = vadd.f32 %v9689_v56, %v1084_v28  ;;  %v1697_v32 = vmul.f32 %v9708_v2, %v9737_v21  ;;  %8672 = vmatpush3.bf16.msra.mxu1 %v9623_v34  ;;  %v1701_v38 = vmul.f32 %v9742_v25, %v9737_v21  ;;  %v9805_v6 = vadd.f32 %v9696_v57, %v1233_v1  ;;  %v8594_v11 = vpop.f32.mrb[10].mxu1 }
 0x13b   : > { %v1700_v35 = vmul.f32 %v9716_v7, %v9745_v26  ;;  %8673 = vmatprep.subr.bf16.mxu1 %v9634_v41  ;;  %v9780_v44 = vmul.f32 %v9749_v29, %v9745_v26  ;;  %8635 = vmatprep.mubr.msk.bf16.mxu1 %vm1006_vm1, %v1426_v58  ;;  %v9813_v13 = vadd.f32 %v8594_v11, %v9696_v57  ;;  %v1236_v15 = vpop.f32.mrb[11].mxu1 }
 0x13c   : > { %v1698_v39 = vmul.f32 %v9722_v10, %v9752_v30  ;;  %v1702_v47 = vmul.f32 %v9762_v36, %v9752_v30  ;;  %v1418_v17 = vmul.f32 %v9793_v61, %v9699_v59  ;;  %v9827_v19 = vadd.f32 %v9696_v57, %v1236_v15 }
 0x13d   : > { %v1714_v45 = vpack.c.bf16 %v1700_v35, %v1699_v24  ;;  %v1716_v51 = vpack.c.bf16 %v9780_v44, %v9776_v43  ;;  %v1416_v22 = vmul.f32 %v9805_v6, %v9705_v63  ;;  %v1705_v23 = vmul.f32 %v9805_v6, %v9737_v21 }
 0x13e   : > { %v8569_v48 = vpop.f32.mrb[8].mxu0  ;;  %v1713_v49 = vpack.c.bf16 %v1698_v39, %v1697_v32  ;;  %v1715_v60 = vpack.c.bf16 %v1702_v47, %v1701_v38  ;;  %8674 = vmatpush3.bf16.msra.mxu1 %v9634_v41  ;;  %v1419_v24 = vmul.f32 %v9813_v13, %v9711_v3  ;;  %v9839_v27 = vmul.f32 %v9793_v61, %v9731_v16 }
 0x13f   : > { %v9789_v52 = vadd.f32 %v8569_v48, %v9689_v56  ;;  %v1097_v54 = vpop.f32.mrb[9].mxu0  ;;  %8675 = vmatprep.subr.bf16.mxu1 %v9640_v42  ;;  %v9843_v28 = vmul.f32 %v9813_v13, %v9745_v26  ;;  %v1706_v32 = vmul.f32 %v9827_v19, %v9752_v30 }
 0x140   : > { %v9796_v0 = vadd.f32 %v9689_v56, %v1097_v54  ;;  %v8570_v4 = vpop.f32.mrb[10].mxu0  ;;  %8655 = vmatprep.mubr.msk.bf16.mxu0 %vm1006_vm1, %v1713_v49  ;;  %v1429_v35 = vpack.c.bf16 %v1419_v24, %v1418_v17 }
 0x141   : > { %v9802_v5 = vmul.f32 %v9702_v62, %v9789_v52  ;;  %v9808_v9 = vadd.f32 %v8570_v4, %v9689_v56  ;;  %v1100_v12 = vpop.f32.mrb[11].mxu0  ;;  %8656 = vmatmul.mubr.msk.bf16.vlgmr.msra.gmra.mrb[32].mxu0 %vm1006_vm1, %v1714_v45  ;;  %8636 = vmatmul.mubr.msk.bf16.gmra.mrb[20].mxu1 %vm1006_vm1, %v1427_v50  ;;  %v1718_v37 = vpack.c.bf16 %v9843_v28, %v9839_v27  ;;  %v8597_v45 = vpop.f32.mrb[12].mxu1 }
 0x142   : > { %v9816_v14 = vadd.f32 %v9689_v56, %v1100_v12  ;;  %8659 = vmatprep.mubr.msk.bf16.mxu0 %vm1006_vm1, %v1715_v60  ;;  %8676 = vmatpush3.bf16.msra.mxu1 %v9640_v42  ;;  %v1417_v42 = vmul.f32 %v9827_v19, %v9719_v8  ;;  %v9865_v39 = vmul.f32 %v9742_v25, %v9796_v0  ;;  %v1249_v54 = vpop.f32.mrb[13].mxu1 }
 0x143   : > { %v9824_v18 = vmul.f32 %v9716_v7, %v9808_v9  ;;  %8696 = vmatpush3.bf16.msra.mxu0 %v9623_v34  ;;  %8677 = vmatprep.subr.bf16.mxu1 %v9676_v55  ;;  %v9854_v34 = vmul.f32 %v9708_v2, %v9796_v0  ;;  %v1717_v48 = vpack.c.bf16 %v1706_v32, %v1705_v23  ;;  %v8598_v15 = vpop.f32.mrb[14].mxu1 }
 0x144   : > { %8697 = vmatprep.subr.bf16.mxu0 %v9634_v41  ;;  %v9861_v38 = vmul.f32 %v9722_v10, %v9816_v14  ;;  %v1428_v47 = vpack.c.bf16 %v1417_v42, %v1416_v22  ;;  %v9873_v49 = vmul.f32 %v9762_v36, %v9816_v14  ;;  %v9876_v50 = vadd.f32 %v8597_v45, %v9696_v57  ;;  %v1252_v22 = vpop.f32.mrb[15].mxu1 }
 0x145   : > { %v1979_v31 = vpack.c.bf16 %v9824_v18, %v9802_v5  ;;  %v9886_v1 = vmul.f32 %v9734_v20, %v9789_v52  ;;  %v9893_v11 = vadd.f32 %v9696_v57, %v1249_v54  ;;  %v1253_v43 = vadd.f32 %v9696_v57, %v1252_v22 }
 0x146   : > { %v8573_v33 = vpop.f32.mrb[12].mxu0  ;;  %8678 = vmatpush3.bf16.msra.mxu1 %v9676_v55  ;;  %v1978_v60 = vpack.c.bf16 %v9861_v38, %v9854_v34  ;;  %8639 = vmatprep.mubr.msk.bf16.mxu1 %vm1006_vm1, %v1428_v47  ;;  %v1422_v23 = vmul.f32 %v9876_v50, %v9699_v59  ;;  %v1973_v54 = vmul.f32 %v9813_v13, %v9808_v9 }
 0x147   : > { %v9868_v40 = vadd.f32 %v8573_v33, %v9689_v56  ;;  %v1113_v46 = vpop.f32.mrb[13].mxu0  ;;  %8698 = vmatpush3.bf16.msra.mxu0 %v9634_v41  ;;  %v9904_v41 = vadd.f32 %v8598_v15, %v9696_v57  ;;  %v1420_v44 = vmul.f32 %v9893_v11, %v9705_v63  ;;  %v1980_v63 = vpack.c.bf16 %v9873_v49, %v9865_v39 }
 0x148   : > { %v9879_v53 = vadd.f32 %v9689_v56, %v1113_v46  ;;  %v8574_v58 = vpop.f32.mrb[14].mxu0  ;;  %v1421_v42 = vmul.f32 %v1253_v43, %v9719_v8  ;;  %v1710_v32 = vmul.f32 %v1253_v43, %v9752_v30  ;;  %v1969_v33 = vmul.f32 %v9749_v29, %v9808_v9 }
 0x149   : > { %v9890_v4 = vmul.f32 %v9702_v62, %v9868_v40  ;;  %v9896_v12 = vadd.f32 %v8574_v58, %v9689_v56  ;;  %v1116_v17 = vpop.f32.mrb[15].mxu0  ;;  %8660 = vmatmul.mubr.msk.bf16.gmra.mrb[36].mxu0 %vm1006_vm1, %v1716_v51  ;;  %8640 = vmatmul.mubr.msk.bf16.gmra.mrb[24].mxu1 %vm1006_vm1, %v1429_v35  ;;  %v9284_v51 = vld [vmem:[%s12598_s18 + $0x10] sm:$0xff]   ;;  %v1423_v59 = vmul.f32 %v9904_v41, %v9711_v3 }
 0x14a   : > { %v9907_v62 = vadd.f32 %v9689_v56, %v1116_v17  ;;  %8663 = vmatprep.mubr.msk.bf16.mxu0 %vm1006_vm1, %v1717_v48  ;;  %v1709_v56 = vmul.f32 %v9893_v11, %v9737_v21  ;;  %8699 = vmatprep.subr.bf16.mxu0 %v9284_v51  ;;  %v1712_v57 = vmul.f32 %v9904_v41, %v9745_v26 }
 0x14b   : > { %v9915_v24 = vmul.f32 %v9716_v7, %v9896_v12  ;;  %v1711_v7 = vmul.f32 %v9876_v50, %v9731_v16  ;;  %8700 = vmatpush3.bf16.msra.mxu0 %v9284_v51  ;;  %v2227_v3 = vmul.f32 %v9708_v2, %v9879_v53  ;;  %v1431_v16 = vpack.c.bf16 %v1423_v59, %v1422_v23 }
 0x14c   : > { %8701 = vmatprep.subr.bf16.mxu0 %v9676_v55  ;;  %v2228_v26 = vmul.f32 %v9722_v10, %v9907_v62  ;;  %v1430_v38 = vpack.c.bf16 %v1421_v42, %v1420_v44  ;;  %v1719_v39 = vpack.c.bf16 %v1710_v32, %v1709_v56  ;;  %v1970_v8 = vmul.f32 %v9805_v6, %v9796_v0 }
 0x14d   : > { %v2244_v21 = vpack.c.bf16 %v9915_v24, %v9890_v4  ;;  %v1720_v34 = vpack.c.bf16 %v1712_v57, %v1711_v7  ;;  %v1971_v2 = vmul.f32 %v9827_v19, %v9816_v14  ;;  %v1981_v10 = vpack.c.bf16 %v1969_v33, %v9886_v1  ;;  %v8833_v24 = vld [vmem:[%s9523_s17 + $0x8] sm:$0xff]   ;;  %v8835_v7 = vld [vmem:[%s9523_s17 + $0x18] sm:$0xff]  }
 0x14e   : > { %v9944_v35 = vpop.f32.mrb[16].mxu0  ;;  %v2243_v45 = vpack.c.bf16 %v2228_v26, %v2227_v3  ;;  %v2231_v46 = vmul.f32 %v9742_v25, %v9879_v53  ;;  %v2232_v47 = vmul.f32 %v9762_v36, %v9907_v62  ;;  %8643 = vmatprep.mubr.msk.bf16.mxu1 %vm1006_vm1, %v1430_v38  ;;  %v2233_v58 = vmul.f32 %v9734_v20, %v9868_v40 }
 0x14f   : > { %v9950_v30 = vpop.f32.mrb[17].mxu0  ;;  %8702 = vmatpush3.bf16.msra.mxu0 %v9676_v55  ;;  %v1982_v49 = vpack.c.bf16 %v1971_v2, %v1970_v8  ;;  %v1972_v55 = vmul.f32 %v9793_v61, %v9789_v52  ;;  %v2234_v27 = vmul.f32 %v9749_v29, %v9896_v12  ;;  %v1975_v1 = vmul.f32 %v1253_v43, %v9816_v14 }
 0x150   : > { %v9958_v48 = vpop.f32.mrb[18].mxu0  ;;  %v2245_v36 = vpack.c.bf16 %v2232_v47, %v2231_v46  ;;  %v2235_v15 = vmul.f32 %v9805_v6, %v9879_v53  ;;  %v2236_v22 = vmul.f32 %v9827_v19, %v9907_v62  ;;  %v1976_v20 = vmul.f32 %v9876_v50, %v9789_v52 }
 0x151   : > { %8664 = vmatmul.mubr.msk.bf16.gmra.mrb[40].mxu0 %vm1006_vm1, %v1718_v37  ;;  %v9969_v25 = vpop.f32.mrb[19].mxu0  ;;  %8644 = vmatmul.mubr.msk.bf16.gmra.mrb[28].mxu1 %vm1006_vm1, %v1431_v16  ;;  %v1983_v28 = vpack.c.bf16 %v1973_v54, %v1972_v55  ;;  %v1974_v37 = vmul.f32 %v9893_v11, %v9796_v0  ;;  %v2246_v17 = vpack.c.bf16 %v2234_v27, %v2233_v58 }
 0x152   : > { %8667 = vmatprep.mubr.msk.bf16.mxu0 %vm1006_vm1, %v1719_v39  ;;  %8679 = vmatprep.mubr.msk.bf16.mxu1 %vm1006_vm1, %v1978_v60  ;;  %v1977_v29 = vmul.f32 %v9904_v41, %v9808_v9  ;;  %v2237_v23 = vmul.f32 %v9793_v61, %v9868_v40  ;;  %v2238_v0 = vmul.f32 %v9813_v13, %v9896_v12 }
 0x153   : > { %v1984_v60 = vpack.c.bf16 %v1975_v1, %v1974_v37  ;;  %v2239_v6 = vmul.f32 %v9893_v11, %v9879_v53  ;;  %v2247_v14 = vpack.c.bf16 %v2236_v22, %v2235_v15  ;;  %v2240_v19 = vmul.f32 %v1253_v43, %v9907_v62  ;;  %v8832_v62 = vld [vmem:[%s9523_s17] sm:$0xff]   ;;  %v8834_v43 = vld [vmem:[%s9523_s17 + $0x10] sm:$0xff]  }
 0x154   : > { %v1985_v44 = vpack.c.bf16 %v1977_v29, %v1976_v20  ;;  %v2241_v52 = vmul.f32 %v9876_v50, %v9868_v40  ;;  %v2248_v9 = vpack.c.bf16 %v2238_v0, %v2237_v23  ;;  %v2242_v51 = vmul.f32 %v9904_v41, %v9896_v12  ;;  %8719 = vmatprep.subr.bf16.mxu1 %v8832_v62 }
 0x155   : > { %v2249_v59 = vpack.c.bf16 %v2240_v19, %v2239_v6 }
 0x156   : > { %v9998_v56 = vpop.f32.mrb[20].mxu0  ;;  %v2250_v53 = vpack.c.bf16 %v2242_v51, %v2241_v52 }
 0x157   : > { %v10002_v61 = vpop.f32.mrb[21].mxu0 }
 0x158   : > { %v10004_v13 = vpop.f32.mrb[22].mxu0 }
 0x159   : > { %8668 = vmatmul.mubr.msk.bf16.gmra.mrb[44].mxu0 %vm1006_vm1, %v1720_v34  ;;  %v10007_v11 = vpop.f32.mrb[23].mxu0  ;;  %8680 = vmatmul.mubr.msk.bf16.vlgmr.msra.gmra.mrb[32].mxu1 %vm1006_vm1, %v1979_v31 }
 0x15a   : > { %8703 = vmatprep.mubr.msk.bf16.mxu0 %vm1006_vm1, %v2243_v45  ;;  %8683 = vmatprep.mubr.msk.bf16.mxu1 %vm1006_vm1, %v1980_v63 }
 0x15b   : > { %8720 = vmatpush3.bf16.msra.mxu1 %v8832_v62 }
 0x15c   : > { %8721 = vmatprep.subr.bf16.mxu1 %v8833_v24 }
 0x15e   : > { %v10015_v40 = vpop.f32.mrb[24].mxu0 }
 0x15f   : > { %v10017_v50 = vpop.f32.mrb[25].mxu0  ;;  %8722 = vmatpush3.bf16.msra.mxu1 %v8833_v24 }
 0x160   : > { %v8618_v5 = vpop.f32.mrb[26].mxu0  ;;  %8723 = vmatprep.subr.bf16.mxu1 %v8834_v43 }
 0x161   : > { %8704 = vmatmul.mubr.msk.bf16.vlgmr.msra.gmra.mrb[48].mxu0 %vm1006_vm1, %v2244_v21  ;;  %8684 = vmatmul.mubr.msk.bf16.gmra.mrb[36].mxu1 %vm1006_vm1, %v1981_v10  ;;  %v10034_v18 = vpop.f32.mrb[27].mxu0 }
 0x162   : > { %8707 = vmatprep.mubr.msk.bf16.mxu0 %vm1006_vm1, %v2245_v36  ;;  %8687 = vmatprep.mubr.msk.bf16.mxu1 %vm1006_vm1, %v1982_v49 }
 0x163   : > { %8724 = vmatpush3.bf16.msra.mxu1 %v8834_v43 }
 0x164   : > { %8725 = vmatprep.subr.bf16.mxu1 %v8835_v7 }
 0x166   : > { %v10036_v31 = vpop.f32.mrb[28].mxu0 }
 0x167   : > { %v10038_v4 = vpop.f32.mrb[29].mxu0  ;;  %8726 = vmatpush3.bf16.msra.mxu1 %v8835_v7 }
 0x168   : > { %v10040_v12 = vpop.f32.mrb[30].mxu0 }
 0x169   : > { %8708 = vmatmul.mubr.msk.bf16.gmra.mrb[52].mxu0 %vm1006_vm1, %v2246_v17  ;;  %8688 = vmatmul.mubr.msk.bf16.gmra.mrb[40].mxu1 %vm1006_vm1, %v1983_v28  ;;  %v10042_v41 = vpop.f32.mrb[31].mxu0  ;;  %v7341_v17 = vld [vmem:[%s12603_s30] ss:$0 sm:$0xff] }
 0x16a   : > { %8711 = vmatprep.mubr.msk.bf16.mxu0 %vm1006_vm1, %v2247_v14  ;;  %8691 = vmatprep.mubr.msk.bf16.mxu1 %vm1006_vm1, %v1984_v60  ;;  %v10108_v23 = vadd.f32 %v9944_v35, %v7341_v17  ;;  %v10111_v0 = vadd.f32 %v7341_v17, %v9950_v30  ;;  %v10114_v6 = vadd.f32 %v9958_v48, %v7341_v17 }
 0x16b   : > { %v10117_v14 = vadd.f32 %v7341_v17, %v9969_v25  ;;  %v10123_v19 = vadd.f32 %v7341_v17, %v10002_v61  ;;  %v10126_v52 = vadd.f32 %v10004_v13, %v7341_v17  ;;  %v10129_v35 = vadd.f32 %v7341_v17, %v10007_v11 }
 0x16c   : > { %12604 = vst [vmem:[#allocation12_spill] sm:$0xff] %v10108_v23  ;;  %12605 = vst [vmem:[#allocation13_spill] sm:$0xff] %v10114_v6  ;;  %v10134_v48 = vadd.f32 %v10015_v40, %v7341_v17  ;;  %v10137_v25 = vadd.f32 %v7341_v17, %v10017_v50  ;;  %v10148_v13 = vadd.f32 %v10036_v31, %v7341_v17 }
 0x16d   : > { %12606 = vst [vmem:[#allocation14_spill] sm:$0xff] %v10117_v14  ;;  %12608 = vst [vmem:[#allocation16_spill] sm:$0xff] %v10123_v19  ;;  %v10154_v50 = vadd.f32 %v7341_v17, %v10038_v4 }
 0x16e   : > { %12609 = vst [vmem:[#allocation17_spill] sm:$0xff] %v10126_v52  ;;  %12610 = vst [vmem:[#allocation18_spill] sm:$0xff] %v10129_v35 }
 0x16f   : > { %12611 = vst [vmem:[#allocation19_spill] sm:$0xff] %v10134_v48  ;;  %12612 = vst [vmem:[#allocation20_spill] sm:$0xff] %v10137_v25 }
 0x170   : > { %12615 = vst [vmem:[#allocation23_spill] sm:$0xff] %v10148_v13  ;;  %12616 = vst [vmem:[#allocation24_spill] sm:$0xff] %v10154_v50 }
 0x171   : > { %8712 = vmatmul.mubr.msk.bf16.gmra.mrb[56].mxu0 %vm1006_vm1, %v2248_v9  ;;  %8692 = vmatmul.mubr.msk.bf16.gmra.mrb[44].mxu1 %vm1006_vm1, %v1985_v44  ;;  %v10120_v44 = vadd.f32 %v9998_v56, %v7341_v17  ;;  %v10139_v9 = vadd.f32 %v8618_v5, %v7341_v17  ;;  %v10157_v5 = vadd.f32 %v10040_v12, %v7341_v17 }
 0x172   : > { %8715 = vmatprep.mubr.msk.bf16.mxu0 %vm1006_vm1, %v2249_v59  ;;  %v10145_v59 = vadd.f32 %v7341_v17, %v10034_v18 }
 0x173   : > { %12607 = vst [vmem:[#allocation15_spill] sm:$0xff] %v10120_v44  ;;  %12613 = vst [vmem:[#allocation21_spill] sm:$0xff] %v10139_v9 }
 0x174   : > { %12614 = vst [vmem:[#allocation22_spill] sm:$0xff] %v10145_v59  ;;  %12617 = vst [vmem:[#allocation25_spill] sm:$0xff] %v10157_v5 }
 0x179   : > { %8716 = vmatmul.mubr.msk.bf16.gmra.mrb[60].mxu0 %vm1006_vm1, %v2250_v53 }
 0x20c   : > { %v10048_v57 = vpop.f32.mrb[16].mxu1 }
 0x20d   : > { %v10050_v63 = vpop.f32.mrb[17].mxu1 }
 0x20e   : > { %v10052_v21 = vpop.f32.mrb[18].mxu1 }
 0x20f   : > { %v10054_v42 = vpop.f32.mrb[19].mxu1 }
 0x214   : > { %v10056_v32 = vpop.f32.mrb[32].mxu0  ;;  %v10058_v3 = vpop.f32.mrb[20].mxu1 }
 0x215   : > { %v10060_v16 = vpop.f32.mrb[33].mxu0  ;;  %v1579_v34 = vmax.f32 %v10048_v57, %v10058_v3  ;;  %v10064_v26 = vpop.f32.mrb[21].mxu1 }
 0x216   : > { %v10066_v33 = vpop.f32.mrb[34].mxu0  ;;  %v1577_v38 = vmax.f32 %v10050_v63, %v10064_v26  ;;  %v10070_v39 = vpop.f32.mrb[22].mxu1 }
 0x217   : > { %v10072_v8 = vpop.f32.mrb[35].mxu0  ;;  %v1580_v2 = vmax.f32 %v10052_v21, %v10070_v39  ;;  %v10076_v45 = vpop.f32.mrb[23].mxu1 }
 0x218   : > { %v1578_v10 = vmax.f32 %v10054_v42, %v10076_v45 }
 0x21c   : > { %v10080_v46 = vpop.f32.mrb[36].mxu0  ;;  %v8641_v47 = vpop.f32.mrb[24].mxu1 }
 0x21d   : > { %v1844_v49 = vmax.f32 %v10056_v32, %v10080_v46  ;;  %v10084_v55 = vpop.f32.mrb[37].mxu0  ;;  %v1583_v54 = vmax.f32 %v1579_v34, %v8641_v47  ;;  %v1546_v36 = vpop.f32.mrb[25].mxu1 }
 0x21e   : > { %v1842_v58 = vmax.f32 %v10060_v16, %v10084_v55  ;;  %v10088_v27 = vpop.f32.mrb[38].mxu0  ;;  %v1581_v28 = vmax.f32 %v1577_v38, %v1546_v36  ;;  %v10090_v37 = vpop.f32.mrb[26].mxu1 }
 0x21f   : > { %v1845_v1 = vmax.f32 %v10066_v33, %v10088_v27  ;;  %v10094_v15 = vpop.f32.mrb[39].mxu0  ;;  %v1584_v22 = vmax.f32 %v1580_v2, %v10090_v37  ;;  %v10102_v20 = vpop.f32.mrb[27].mxu1 }
 0x220   : > { %v1582_v60 = vmax.f32 %v1578_v10, %v10102_v20 }
 0x224   : > { %v10131_v30 = vpop.f32.mrb[40].mxu0  ;;  %v8645_v56 = vpop.f32.mrb[28].mxu1 }
 0x225   : > { %v1848_v51 = vmax.f32 %v1844_v49, %v10131_v30  ;;  %v10142_v61 = vpop.f32.mrb[41].mxu0  ;;  %v1587_v53 = vmax.f32 %v1583_v54, %v8645_v56  ;;  %v1562_v11 = vpop.f32.mrb[29].mxu1 }
 0x226   : > { %v1846_v40 = vmax.f32 %v1842_v58, %v10142_v61  ;;  %v10151_v62 = vpop.f32.mrb[42].mxu0  ;;  %v1585_v24 = vmax.f32 %v1581_v28, %v1562_v11  ;;  %v8646_v43 = vpop.f32.mrb[30].mxu1 }
 0x227   : > { %v1849_v18 = vmax.f32 %v1845_v1, %v10151_v62  ;;  %v10160_v7 = vpop.f32.mrb[43].mxu0  ;;  %v1591_v31 = vsub.f32 %v10048_v57, %v1587_v53  ;;  %v1603_v34 = vsub.f32 %v10058_v3, %v1587_v53  ;;  %v1615_v38 = vsub.f32 %v8641_v47, %v1587_v53  ;;  %v1565_v10 = vpop.f32.mrb[31].mxu1 }
 0x228   : > { %v1627_v2 = vsub.f32 %v8645_v56, %v1587_v53  ;;  %v1589_v49 = vsub.f32 %v10050_v63, %v1585_v24  ;;  %v1601_v4 = vsub.f32 %v10064_v26, %v1585_v24  ;;  %v1613_v54 = vsub.f32 %v1546_v36, %v1585_v24 }
 0x229   : > { %v1625_v12 = vsub.f32 %v1562_v11, %v1585_v24  ;;  %v1597_v58 = vmul.f32 1.442695, %v1591_v31  ;;  %v1609_v28 = vmul.f32 1.442695, %v1603_v34  ;;  %v1621_v29 = vmul.f32 1.442695, %v1615_v38 }
 0x22a   : > { %v1588_v9 = vmax.f32 %v1584_v22, %v8646_v43  ;;  %v10167_v1 = vadd.f32 %v7341_v17, %v10042_v41  ;;  %v1633_v48 = vmul.f32 1.442695, %v1627_v2  ;;  %v1593_v57 = vmul.f32 1.442695, %v1589_v49 }
 0x22b   : > { %v1586_v52 = vmax.f32 %v1582_v60, %v1565_v10  ;;  %9060 = vpow2.f32 %v1597_v58  ;;  %v1605_v3 = vmul.f32 1.442695, %v1601_v4  ;;  %v1617_v47 = vmul.f32 1.442695, %v1613_v54 }
 0x22c   : > { %12618 = vst [vmem:[#allocation26_spill] sm:$0xff] %v10167_v1  ;;  %v1592_v56 = vsub.f32 %v10052_v21, %v1588_v9  ;;  %v8669_v63 = vpop.f32.mrb[44].mxu0  ;;  %9062 = vpow2.f32 %v1609_v28  ;;  %v1604_v26 = vsub.f32 %v10070_v39, %v1588_v9  ;;  %v1616_v36 = vsub.f32 %v10090_v37, %v1588_v9  ;;  %v10172_v11 = vpop.f32.mrb[32].mxu1 }
 0x22d   : > { %v1628_v53 = vsub.f32 %v8646_v43, %v1588_v9  ;;  %v10174_v22 = vpop.f32.mrb[45].mxu0  ;;  %9064 = vpow2.f32 %v1621_v29  ;;  %v1629_v41 = vmul.f32 1.442695, %v1625_v12  ;;  %v1590_v17 = vsub.f32 %v10054_v42, %v1586_v52  ;;  %v10178_v24 = vpop.f32.mrb[33].mxu1 }
 0x22e   : > { %v1602_v60 = vsub.f32 %v10076_v45, %v1586_v52  ;;  %v10180_v21 = vpop.f32.mrb[46].mxu0  ;;  %9066 = vpow2.f32 %v1633_v48  ;;  %v1599_v31 = vmul.f32 1.442695, %v1592_v56  ;;  %v1611_v39 = vmul.f32 1.442695, %v1604_v26  ;;  %v10183_v38 = vpop.f32.mrb[34].mxu1 }
 0x22f   : > { %v1623_v34 = vmul.f32 1.442695, %v1616_v36  ;;  %9068 = vpow2.f32 %v1593_v57  ;;  %v1635_v37 = vmul.f32 1.442695, %v1628_v53  ;;  %v1595_v9 = vmul.f32 1.442695, %v1590_v17 }
 0x230   : > { %v1614_v43 = vsub.f32 %v10102_v20, %v1586_v52  ;;  %v10185_v29 = vpop.f32.mrb[47].mxu0  ;;  %9070 = vpow2.f32 %v1605_v3  ;;  %v1626_v42 = vsub.f32 %v1565_v10, %v1586_v52  ;;  %v12619_v45 = vmax.f32 %v10072_v8, %v10094_v15  ;;  %v10191_v49 = vpop.f32.mrb[35].mxu1 }
 0x231   : > { %v1852_v48 = vmax.f32 %v1848_v51, %v8669_v63  ;;  %9072 = vpow2.f32 %v1617_v47  ;;  %v1607_v4 = vmul.f32 1.442695, %v1602_v60  ;;  %v1850_v54 = vmax.f32 %v1846_v40, %v10174_v22 }
 0x232   : > { %v1847_v2 = vmax.f32 %v12619_v45, %v10160_v7  ;;  %v10195_v20 = vmax.f32 %v1849_v18, %v10180_v21  ;;  %9074 = vpow2.f32 %v1629_v41  ;;  %v1619_v12 = vmul.f32 1.442695, %v1614_v43 }
 0x233   : > { %v1856_v58 = vsub.f32 %v10056_v32, %v1852_v48  ;;  %v1868_v52 = vsub.f32 %v10080_v46, %v1852_v48  ;;  %9076 = vpow2.f32 %v1599_v31  ;;  %v1880_v10 = vsub.f32 %v10131_v30, %v1852_v48 }
 0x234   : > { %v1892_v28 = vsub.f32 %v8669_v63, %v1852_v48  ;;  %v1854_v51 = vsub.f32 %v10060_v16, %v1850_v54  ;;  %v10201_v57 = vpop.f32.mrb[48].mxu0  ;;  %9078 = vpow2.f32 %v1611_v39  ;;  %v1631_v3 = vmul.f32 1.442695, %v1626_v42  ;;  %v10204_v47 = vpop.f32.mrb[36].mxu1 }
 0x235   : > { %v1862_v40 = vmul.f32 1.442695, %v1856_v58  ;;  %v1866_v18 = vsub.f32 %v10084_v55, %v1850_v54  ;;  %v10206_v56 = vpop.f32.mrb[49].mxu0  ;;  %v10208_v32 = vpop.eup %9060  ;;  %9080 = vpow2.f32 %v1623_v34  ;;  %v1874_v46 = vmul.f32 1.442695, %v1868_v52 }
 0x236   : > { %v1886_v26 = vmul.f32 1.442695, %v1880_v10  ;;  %v1898_v30 = vmul.f32 1.442695, %v1892_v28  ;;  %v10210_v63 = vpop.eup %9062  ;;  %9082 = vpow2.f32 %v1635_v37  ;;  %v1858_v16 = vmul.f32 1.442695, %v1854_v51 }
 0x237   : > { %v1878_v36 = vsub.f32 %v10142_v61, %v1850_v54  ;;  %v1890_v53 = vsub.f32 %v10174_v22, %v1850_v54  ;;  %v10214_v41 = vpop.f32.mrb[37].mxu1  ;;  %v10216_v55 = vpop.f32.mrb[50].mxu0  ;;  %v1639_v60 = vadd.f32 %v10210_v63, %v10208_v32  ;;  %9084 = vpow2.f32 %v1595_v9 }
 0x238   : > { %v10218_v17 = vpop.eup %9064  ;;  %v1857_v31 = vsub.f32 %v10066_v33, %v10195_v20  ;;  %v1869_v39 = vsub.f32 %v10088_v27, %v10195_v20  ;;  %v10226_v34 = vpop.f32.mrb[38].mxu1  ;;  %9086 = vpow2.f32 %v1607_v4  ;;  %v1870_v37 = vmul.f32 1.442695, %v1866_v18 }
 0x239   : > { %12620 = vst [vmem:[#allocation27_spill] sm:$0xff] %v10218_v17  ;;  %v10228_v61 = vpop.f32.mrb[51].mxu0  ;;  %v10230_v22 = vpop.eup %9066  ;;  %v10232_v43 = vmul.f32 1.442695, %v1878_v36  ;;  %v1881_v42 = vsub.f32 %v10151_v62, %v10195_v20  ;;  %v1643_v33 = vadd.f32 %v10218_v17, %v1639_v60  ;;  %9088 = vpow2.f32 %v1619_v12 }
 0x23a   : > { %v10236_v9 = vpop.f32.mrb[39].mxu1  ;;  %v10238_v45 = vpop.eup %9068  ;;  %v1894_v27 = vmul.f32 1.442695, %v1890_v53  ;;  %v10241_v48 = vmul.f32 1.442695, %v1857_v31  ;;  %9090 = vpow2.f32 %v1631_v3  ;;  %v1893_v58 = vsub.f32 %v10180_v21, %v10195_v20 }
 0x23b   : > { %v10243_v54 = vpop.eup %9070  ;;  %v10245_v4 = vmul.f32 1.442695, %v1869_v39  ;;  %v10250_v62 = vmax.f32 %v1847_v2, %v10185_v29  ;;  %v1647_v10 = vadd.f32 %v10230_v22, %v1643_v33  ;;  %9092 = vpow2.f32 %v1862_v40 }
 0x23c   : > { %12621 = vst [vmem:[#allocation28_spill] sm:$0xff] %v10243_v54  ;;  %v10252_v52 = vpop.eup %9072  ;;  %v1637_v12 = vadd.f32 %v10243_v54, %v10238_v45  ;;  %v2109_v28 = vmax.f32 %v10172_v11, %v10204_v47  ;;  %v10259_v51 = vpop.f32.mrb[52].mxu0  ;;  %9094 = vpow2.f32 %v1874_v46  ;;  %v10263_v21 = vmul.f32 1.442695, %v1881_v42 }
 0x23d   : > { %12622 = vst [vmem:[#allocation29_spill] sm:$0xff] %v10252_v52  ;;  %v10261_v3 = vpop.eup %9074  ;;  %v1855_v2 = vsub.f32 %v10072_v8, %v10250_v62  ;;  %v1867_v20 = vsub.f32 %v10094_v15, %v10250_v62  ;;  %v10269_v18 = vpop.f32.mrb[40].mxu1  ;;  %9096 = vrcp.f32 %v1647_v10  ;;  %v1879_v46 = vsub.f32 %v10160_v7, %v10250_v62 }
 0x23e   : > { %12623 = vst [vmem:[#allocation30_spill] sm:$0xff] %v10261_v3  ;;  %v10271_v36 = vpop.f32.mrb[53].mxu0  ;;  %v10273_v40 = vpop.eup %9076  ;;  %v1641_v53 = vadd.f32 %v10252_v52, %v1637_v12  ;;  %v1891_v60 = vsub.f32 %v10185_v29, %v10250_v62  ;;  %9098 = vpow2.f32 %v1886_v26  ;;  %v10286_v39 = vmul.f32 1.442695, %v1893_v58 }
 0x23f   : > { %v10280_v31 = vpop.f32.mrb[41].mxu1  ;;  %v10282_v8 = vpop.f32.mrb[54].mxu0  ;;  %v10288_v42 = vmul.f32 1.442695, %v1855_v2  ;;  %v2107_v33 = vmax.f32 %v10178_v24, %v10214_v41  ;;  %9100 = vpow2.f32 %v1898_v30  ;;  %v10301_v26 = vmul.f32 1.442695, %v1867_v20 }
 0x240   : > { %v10284_v15 = vpop.eup %9078  ;;  %v10292_v10 = vpop.f32.mrb[42].mxu1  ;;  %v1645_v29 = vadd.f32 %v10261_v3, %v1641_v53  ;;  %9102 = vpow2.f32 %v1858_v16  ;;  %v10307_v17 = vmul.f32 1.442695, %v1879_v46  ;;  %v2110_v44 = vmax.f32 %v10183_v38, %v10226_v34 }
 0x241   : > { %v10294_v7 = vpop.f32.mrb[55].mxu0  ;;  %v10296_v12 = vpop.eup %9080  ;;  %v1640_v62 = vadd.f32 %v10284_v15, %v10273_v40  ;;  %v2108_v6 = vmax.f32 %v10191_v49, %v10236_v9  ;;  %v2113_v20 = vmax.f32 %v2109_v28, %v10269_v18  ;;  %v2374_v1 = vmax.f32 %v10201_v57, %v10259_v51 }
 0x242   : > { %12624 = vst [vmem:[#allocation31_spill] sm:$0xff] %v10296_v12  ;;  %v10303_v58 = vpop.f32.mrb[43].mxu1  ;;  %v10305_v2 = vpop.eup %9082  ;;  %9104 = vrcp.f32 %v1645_v29  ;;  %v2111_v16 = vmax.f32 %v2107_v33, %v10280_v31  ;;  %v2372_v46 = vmax.f32 %v10206_v56, %v10271_v36  ;;  %v10325_v50 = vmax.f32 %v2110_v44, %v10292_v10 }
 0x243   : > { %v10313_v53 = vpop.eup %9084  ;;  %v1644_v30 = vadd.f32 %v10296_v12, %v1640_v62  ;;  %9106 = vpow2.f32 %v1870_v37  ;;  %v2375_v37 = vmax.f32 %v10216_v55, %v10282_v8  ;;  %v10340_v44 = vmax.f32 %v2108_v6, %v10303_v58 }
 0x244   : > { %v10319_v23 = vpop.eup %9086  ;;  %9108 = vpow2.f32 %v10232_v43  ;;  %v10335_v62 = vpop.f32.mrb[56].mxu0 }
 0x245   : > { %12625 = vst [vmem:[#allocation32_spill] sm:$0xff] %v10319_v23  ;;  %v10327_v59 = vpop.eup %9088  ;;  %v1648_v29 = vadd.f32 %v10305_v2, %v1644_v30  ;;  %v1638_v28 = vadd.f32 %v10319_v23, %v10313_v53  ;;  %9110 = vpow2.f32 %v1894_v27  ;;  %v8693_v30 = vpop.f32.mrb[44].mxu1  ;;  %v10345_v3 = vmax.f32 %v2374_v1, %v10335_v62 }
 0x246   : > { %12626 = vst [vmem:[#allocation33_spill] sm:$0xff] %v10327_v59  ;;  %v10337_v33 = vpop.eup %9090  ;;  %v10347_v25 = vpop.f32.mrb[57].mxu0  ;;  %v2117_v19 = vmax.f32 %v2113_v20, %v8693_v30  ;;  %v1896_v1 = vmul.f32 1.442695, %v1891_v60 }
 0x247   : > { %12627 = vst [vmem:[#allocation34_spill] sm:$0xff] %v10337_v33  ;;  %v10349_v43 = vpop.eup %9092  ;;  %9112 = vrcp.f32 %v1648_v29  ;;  %v1642_v35 = vadd.f32 %v10327_v59, %v1638_v28  ;;  %v10352_v52 = vpop.f32.mrb[45].mxu1  ;;  %v10355_v6 = vmax.f32 %v2372_v46, %v10347_v25 }
 0x248   : > { %12628 = vst [vmem:[#allocation35_spill] sm:$0xff] %v10349_v43  ;;  %v10357_v27 = vpop.f32.mrb[58].mxu0  ;;  %v10359_v12 = vpop.eup %9094  ;;  %9114 = vpow2.f32 %v10241_v48  ;;  %v2115_v23 = vmax.f32 %v2111_v16, %v10352_v52  ;;  %v2121_v48 = vsub.f32 %v10172_v11, %v2117_v19 }
 0x249   : > { %12629 = vst [vmem:[#allocation36_spill] sm:$0xff] %v10359_v12  ;;  %v10363_v54 = vpop.f32.mrb[46].mxu1  ;;  %v10366_v29 = vmax.f32 %v2375_v37, %v10357_v27  ;;  %v10368_v20 = vpop.f32.mrb[59].mxu0  ;;  %v1646_v46 = vadd.f32 %v10337_v33, %v1642_v35  ;;  %v1904_v59 = vadd.f32 %v10359_v12, %v10349_v43  ;;  %9116 = vpow2.f32 %v10245_v4 }
 0x24a   : > { %v10370_v28 = vpop.eup %9096  ;;  %v10377_v60 = vpop.f32.mrb[47].mxu1  ;;  %9118 = vpow2.f32 %v10263_v21  ;;  %v2127_v12 = vmul.f32 1.442695, %v2121_v48  ;;  %v2133_v43 = vsub.f32 %v10204_v47, %v2117_v19 }
 0x24b   : > { %12630 = vst [vmem:[#allocation37_spill] sm:$0xff] %v10370_v28  ;;  %v10379_v16 = vpop.eup %9098  ;;  %v10383_v37 = vmul.f32 %v10370_v28, %v10208_v32  ;;  %v10387_v14 = vmul.f32 %v10370_v28, %v10210_v63  ;;  %v1687_v35 = vmul.f32 %v10370_v28, %v10230_v22  ;;  %9120 = vrcp.f32 %v1646_v46 }
 0x24c   : > { %12631 = vst [vmem:[#allocation38_spill] sm:$0xff] %v10379_v16  ;;  %v10392_v4 = vpop.eup %9100  ;;  %v1908_v11 = vadd.f32 %v10379_v16, %v1904_v59  ;;  %9122 = vpow2.f32 %v10286_v39  ;;  %v2145_v63 = vsub.f32 %v10269_v18, %v2117_v19  ;;  %v2157_v22 = vsub.f32 %v8693_v30, %v2117_v19  ;;  %v10408_v47 = vpop.f32.mrb[60].mxu0 }
 0x24d   : > { %12632 = vst [vmem:[#allocation39_spill] sm:$0xff] %v10392_v4  ;;  %v10396_v33 = vpop.eup %9102  ;;  %v10399_v32 = vmul.f32 %v1687_v35, %v10148_v13  ;;  %9124 = vpow2.f32 %v10288_v42  ;;  %v2139_v59 = vmul.f32 1.442695, %v2133_v43  ;;  %v2119_v46 = vsub.f32 %v10178_v24, %v2115_v23  ;;  %v10414_v19 = vpop.f32.mrb[61].mxu0 }
 0x24e   : > { %v10403_v28 = vpop.eup %9104  ;;  %v1912_v21 = vadd.f32 %v10392_v4, %v1908_v11  ;;  %9126 = vpow2.f32 %v10301_v26  ;;  %v2151_v35 = vmul.f32 1.442695, %v2145_v63  ;;  %v2163_v39 = vmul.f32 1.442695, %v2157_v22  ;;  %v10421_v11 = vpop.f32.mrb[62].mxu0 }
 0x24f   : > { %v10410_v48 = vpop.eup %9106  ;;  %v2131_v18 = vsub.f32 %v10214_v41, %v2115_v23  ;;  %v2123_v43 = vmul.f32 1.442695, %v2119_v46  ;;  %v2143_v24 = vsub.f32 %v10280_v31, %v2115_v23  ;;  %v2155_v41 = vsub.f32 %v10352_v52, %v2115_v23  ;;  %v10429_v22 = vpop.f32.mrb[63].mxu0 }
 0x250   : > { %v10416_v30 = vpop.eup %9108  ;;  %9128 = vrcp.f32 %v1912_v21  ;;  %v1902_v42 = vadd.f32 %v10410_v48, %v10396_v33  ;;  %v2118_v63 = vmax.f32 %v10325_v50, %v10363_v54  ;;  %v2116_v4 = vmax.f32 %v10340_v44, %v10377_v60 }
 0x251   : > { %v10423_v13 = vpop.eup %9110  ;;  %9130 = vpow2.f32 %v10307_v17  ;;  %v2135_v26 = vmul.f32 1.442695, %v2131_v18  ;;  %v2147_v31 = vmul.f32 1.442695, %v2143_v24  ;;  %v2159_v44 = vmul.f32 1.442695, %v2155_v41 }
 0x252   : > { %v10431_v21 = vpop.eup %9112  ;;  %v1906_v46 = vadd.f32 %v10416_v30, %v1902_v42  ;;  %9132 = vpow2.f32 %v1896_v1  ;;  %v2122_v18 = vsub.f32 %v10183_v38, %v2118_v63  ;;  %v2158_v41 = vsub.f32 %v10363_v54, %v2118_v63 }
 0x253   : > { %v10436_v16 = vpop.eup %9114  ;;  %v10440_v17 = vmul.f32 %v10431_v21, %v10273_v40  ;;  %v10444_v23 = vmul.f32 %v10431_v21, %v10284_v15  ;;  %v1688_v50 = vmul.f32 %v10431_v21, %v10305_v2  ;;  %9134 = vpow2.f32 %v2127_v12 }
 0x254   : > { %v10448_v52 = vpop.eup %9116  ;;  %v1910_v1 = vadd.f32 %v10423_v13, %v1906_v46  ;;  %9136 = vpow2.f32 %v2139_v59  ;;  %v2134_v2 = vsub.f32 %v10226_v34, %v2118_v63  ;;  %v2129_v24 = vmul.f32 1.442695, %v2122_v18 }
 0x255   : > { %12633 = vst [vmem:[#allocation40_spill] sm:$0xff] %v10448_v52  ;;  %v10452_v42 = vpop.eup %9118  ;;  %v10455_v40 = vmul.f32 %v1688_v50, %v10157_v5  ;;  %v1905_v15 = vadd.f32 %v10448_v52, %v10436_v16  ;;  %9138 = vpow2.f32 %v2151_v35  ;;  %v2146_v59 = vsub.f32 %v10292_v10, %v2118_v63 }
 0x256   : > { %v10460_v12 = vpop.eup %9120  ;;  %9140 = vrcp.f32 %v1910_v1  ;;  %v2141_v50 = vmul.f32 1.442695, %v2134_v2  ;;  %v2120_v5 = vsub.f32 %v10191_v49, %v2116_v4  ;;  %v2165_v35 = vmul.f32 1.442695, %v2158_v41 }
 0x257   : > { %v10464_v38 = vpop.eup %9122  ;;  %v1909_v46 = vadd.f32 %v10452_v42, %v1905_v15  ;;  %9142 = vpow2.f32 %v2163_v39  ;;  %v2153_v34 = vmul.f32 1.442695, %v2146_v59  ;;  %v2132_v1 = vsub.f32 %v10236_v9, %v2116_v4 }
 0x258   : > { %12634 = vst [vmem:[#allocation41_spill] sm:$0xff] %v10464_v38  ;;  %v10468_v52 = vpop.eup %9124  ;;  %9144 = vpow2.f32 %v2123_v43  ;;  %v2125_v54 = vmul.f32 1.442695, %v2120_v5  ;;  %v2144_v63 = vsub.f32 %v10303_v58, %v2116_v4  ;;  %v2156_v43 = vsub.f32 %v10377_v60, %v2116_v4 }
 0x259   : > { %v10471_v18 = vpop.eup %9126  ;;  %v1913_v10 = vadd.f32 %v10464_v38, %v1909_v46  ;;  %9146 = vpow2.f32 %v2135_v26  ;;  %v2137_v39 = vmul.f32 1.442695, %v2132_v1  ;;  %v12635_v26 = vmax.f32 %v10228_v61, %v10294_v7 }
 0x25a   : > { %v10475_v15 = vpop.eup %9128  ;;  %v1903_v49 = vadd.f32 %v10471_v18, %v10468_v52  ;;  %9148 = vpow2.f32 %v2147_v31  ;;  %v2149_v9 = vmul.f32 1.442695, %v2144_v63  ;;  %v2382_v58 = vmax.f32 %v10345_v3, %v10408_v47 }
 0x25b   : > { %v10480_v2 = vpop.eup %9130  ;;  %9150 = vrcp.f32 %v1913_v10  ;;  %v2377_v5 = vmax.f32 %v12635_v26, %v10368_v20  ;;  %v2161_v31 = vmul.f32 1.442695, %v2156_v43  ;;  %v2380_v60 = vmax.f32 %v10355_v6, %v10414_v19 }
 0x25c   : > { %v10488_v59 = vpop.eup %9132  ;;  %v1907_v41 = vadd.f32 %v10480_v2, %v1903_v49  ;;  %9152 = vpow2.f32 %v2159_v44  ;;  %v2386_v46 = vsub.f32 %v10201_v57, %v2382_v58  ;;  %v2398_v1 = vsub.f32 %v10259_v51, %v2382_v58 }
 0x25d   : > { %v10493_v4 = vpop.eup %9134  ;;  %9154 = vpow2.f32 %v2129_v24  ;;  %v2410_v10 = vsub.f32 %v10335_v62, %v2382_v58  ;;  %v2422_v44 = vsub.f32 %v10408_v47, %v2382_v58  ;;  %v2384_v49 = vsub.f32 %v10206_v56, %v2380_v60 }
 0x25e   : > { %12636 = vst [vmem:[#allocation42_spill] sm:$0xff] %v10493_v4  ;;  %v10498_v63 = vpop.eup %9136  ;;  %v1911_v3 = vadd.f32 %v10488_v59, %v1907_v41  ;;  %9156 = vpow2.f32 %v2141_v50  ;;  %v2392_v57 = vmul.f32 1.442695, %v2386_v46  ;;  %v2404_v24 = vmul.f32 1.442695, %v2398_v1 }
 0x25f   : > { %12637 = vst [vmem:[#allocation43_spill] sm:$0xff] %v10498_v63  ;;  %v10503_v43 = vpop.eup %9138  ;;  %v2169_v6 = vadd.f32 %v10498_v63, %v10493_v4  ;;  %9158 = vpow2.f32 %v2153_v34  ;;  %v2416_v62 = vmul.f32 1.442695, %v2410_v10  ;;  %v2428_v26 = vmul.f32 1.442695, %v2422_v44 }
 0x260   : > { %12638 = vst [vmem:[#allocation44_spill] sm:$0xff] %v10503_v43  ;;  %v10507_v51 = vpop.eup %9140  ;;  %9160 = vrcp.f32 %v1911_v3  ;;  %v2388_v38 = vmul.f32 1.442695, %v2384_v49  ;;  %v2396_v56 = vsub.f32 %v10271_v36, %v2380_v60  ;;  %v2408_v50 = vsub.f32 %v10347_v25, %v2380_v60 }
 0x261   : > { %v10509_v41 = vpop.eup %9142  ;;  %v2173_v47 = vadd.f32 %v10503_v43, %v2169_v6  ;;  %9162 = vpow2.f32 %v2165_v35  ;;  %v2420_v34 = vsub.f32 %v10414_v19, %v2380_v60  ;;  %v2383_v46 = vmax.f32 %v10366_v29, %v10421_v11  ;;  %v12654_v43 = vld [vmem:[#allocation30_spill] sm:$0xff] }
 0x262   : > { %12639 = vst [vmem:[#allocation45_spill] sm:$0xff] %v10509_v41  ;;  %v10514_v58 = vpop.eup %9144  ;;  %9164 = vpow2.f32 %v2125_v54  ;;  %v2381_v1 = vmax.f32 %v2377_v5, %v10429_v22  ;;  %v2400_v35 = vmul.f32 1.442695, %v2396_v56  ;;  %v2412_v44 = vmul.f32 1.442695, %v2408_v50 }
 0x263   : > { %v10520_v10 = vpop.eup %9146  ;;  %v2177_v3 = vadd.f32 %v10509_v41, %v2173_v47  ;;  %9166 = vpow2.f32 %v2137_v39  ;;  %v2424_v54 = vmul.f32 1.442695, %v2420_v34  ;;  %v2387_v19 = vsub.f32 %v10216_v55, %v2383_v46 }
 0x264   : > { %v10523_v36 = vpop.eup %9148  ;;  %v2167_v25 = vadd.f32 %v10520_v10, %v10514_v58  ;;  %9168 = vpow2.f32 %v2149_v9  ;;  %v2399_v29 = vsub.f32 %v10282_v8, %v2383_v46  ;;  %v2411_v5 = vsub.f32 %v10357_v27, %v2383_v46 }
 0x265   : > { %v10528_v60 = vpop.eup %9150  ;;  %9170 = vrcp.f32 %v2177_v3  ;;  %v2423_v39 = vsub.f32 %v10421_v11, %v2383_v46  ;;  %v2394_v47 = vmul.f32 1.442695, %v2387_v19  ;;  %v2385_v9 = vsub.f32 %v10228_v61, %v2381_v1 }
 0x266   : > { %v10533_v49 = vpop.eup %9152  ;;  %v2171_v6 = vadd.f32 %v10523_v36, %v2167_v25  ;;  %9172 = vpow2.f32 %v2161_v31  ;;  %v2406_v55 = vmul.f32 1.442695, %v2399_v29  ;;  %v2418_v50 = vmul.f32 1.442695, %v2411_v5 }
 0x267   : > { %12640 = vst [vmem:[#allocation46_spill] sm:$0xff] %v10533_v49  ;;  %v10537_v56 = vpop.eup %9154  ;;  %9174 = vpow2.f32 %v2392_v57  ;;  %v10539_v34 = vmul.f32 1.442695, %v2423_v39  ;;  %v10544_v11 = vmul.f32 1.442695, %v2385_v9  ;;  %v2397_v46 = vsub.f32 %v10294_v7, %v2381_v1  ;;  %v12645_v39 = vld [vmem:[#allocation14_spill] sm:$0xff] }
 0x268   : > { %12641 = vst [vmem:[#allocation47_spill] sm:$0xff] %v10537_v56  ;;  %v10541_v8 = vpop.eup %9156  ;;  %v2175_v27 = vadd.f32 %v10533_v49, %v2171_v6  ;;  %9176 = vpow2.f32 %v2404_v24  ;;  %v2409_v57 = vsub.f32 %v10368_v20, %v2381_v1  ;;  %v2421_v3 = vsub.f32 %v10429_v22, %v2381_v1 }
 0x269   : > { %12642 = vst [vmem:[#allocation48_spill] sm:$0xff] %v10541_v8  ;;  %v10547_v31 = vpop.eup %9158  ;;  %v2170_v61 = vadd.f32 %v10541_v8, %v10537_v56  ;;  %9178 = vpow2.f32 %v2416_v62  ;;  %v10555_v19 = vmul.f32 1.442695, %v2397_v46  ;;  %v1653_v24 = vmul.f32 %v10403_v28, %v10238_v45  ;;  %v12646_v45 = vld [vmem:[#allocation28_spill] sm:$0xff] }
 0x26a   : > { %12643 = vst [vmem:[#allocation49_spill] sm:$0xff] %v10547_v31  ;;  %v10553_v25 = vpop.eup %9160  ;;  %9180 = vrcp.f32 %v2175_v27  ;;  %v1654_v7 = vmul.f32 %v10460_v12, %v10313_v53  ;;  %v10564_v62 = vmul.f32 1.442695, %v2409_v57  ;;  %v10566_v20 = vmul.f32 1.442695, %v2421_v3 }
 0x26b   : > { %v10561_v29 = vpop.eup %9162  ;;  %v2174_v5 = vadd.f32 %v10547_v31, %v2170_v61  ;;  %9182 = vpow2.f32 %v2428_v26  ;;  %v1657_v1 = vmul.f32 %v1653_v24, %v10111_v0  ;;  %v1661_v9 = vmul.f32 %v10403_v28, %v12646_v45  ;;  %v12647_v26 = vld [vmem:[#allocation32_spill] sm:$0xff]  ;;  %v12648_v61 = vld [vmem:[#allocation29_spill] sm:$0xff] }
 0x26c   : > { %12644 = vst [vmem:[#allocation50_spill] sm:$0xff] %v10561_v29  ;;  %v10568_v22 = vpop.eup %9164  ;;  %9184 = vpow2.f32 %v2388_v38  ;;  %v1658_v6 = vmul.f32 %v1654_v7, %v12645_v39  ;;  %v1662_v46 = vmul.f32 %v10460_v12, %v12647_v26  ;;  %v1673_v57 = vmul.f32 %v10403_v28, %v12648_v61  ;;  %v12649_v24 = vld [vmem:[#allocation16_spill] sm:$0xff]  ;;  %v12650_v45 = vld [vmem:[#allocation33_spill] sm:$0xff] }
 0x26d   : > { %v10574_v53 = vpop.eup %9166  ;;  %v2178_v27 = vadd.f32 %v10561_v29, %v2174_v5  ;;  %9186 = vpow2.f32 %v2400_v35  ;;  %v1665_v7 = vmul.f32 %v1661_v9, %v12649_v24  ;;  %v1674_v41 = vmul.f32 %v10460_v12, %v12650_v45  ;;  %v12652_v35 = vld [vmem:[#allocation18_spill] sm:$0xff]  ;;  %v12653_v26 = vld [vmem:[#allocation20_spill] sm:$0xff] }
 0x26e   : > { %v10581_v3 = vpop.eup %9168  ;;  %v2168_v38 = vadd.f32 %v10574_v53, %v10568_v22  ;;  %9188 = vpow2.f32 %v2412_v44  ;;  %v1666_v5 = vmul.f32 %v1662_v46, %v12652_v35  ;;  %v1677_v29 = vmul.f32 %v1673_v57, %v12653_v26  ;;  %v12655_v9 = vld [vmem:[#allocation22_spill] sm:$0xff] }
 0x26f   : > { %v10588_v31 = vpop.eup %9170  ;;  %9190 = vrcp.f32 %v2178_v27  ;;  %v1685_v61 = vmul.f32 %v10403_v28, %v12654_v43  ;;  %v1669_v44 = vadd.f32 %v1665_v7, %v1657_v1  ;;  %v1678_v56 = vmul.f32 %v1674_v41, %v12655_v9  ;;  %v12656_v27 = vld [vmem:[#allocation34_spill] sm:$0xff] }
 0x270   : > { %12651 = vst [vmem:[#allocation14_spill] sm:$0xff] %v10588_v31  ;;  %v10594_v8 = vpop.eup %9172  ;;  %v2172_v63 = vadd.f32 %v10581_v3, %v2168_v38  ;;  %9192 = vpow2.f32 %v2424_v54  ;;  %v1670_v45 = vadd.f32 %v1666_v5, %v1658_v6  ;;  %v1686_v46 = vmul.f32 %v10460_v12, %v12656_v27  ;;  %v12657_v31 = vld [vmem:[#allocation24_spill] sm:$0xff]  ;;  %v12660_v6 = vld [vmem:[#allocation26_spill] sm:$0xff] }
 0x271   : > { %v10598_v4 = vpop.eup %9174  ;;  %9194 = vpow2.f32 %v2394_v47  ;;  %v1689_v57 = vmul.f32 %v1685_v61, %v12657_v31  ;;  %v1681_v43 = vadd.f32 %v1677_v29, %v1669_v44  ;;  %v12659_v38 = vld [vmem:[#allocation12_spill] sm:$0xff]  ;;  %v12661_v61 = vld [vmem:[#allocation13_spill] sm:$0xff] }
 0x272   : > { %v10603_v49 = vpop.eup %9176  ;;  %v2176_v28 = vadd.f32 %v10594_v8, %v2172_v63  ;;  %9196 = vpow2.f32 %v2406_v55  ;;  %v1659_v54 = vmul.f32 %v10383_v37, %v12659_v38  ;;  %v1682_v47 = vadd.f32 %v1678_v56, %v1670_v45  ;;  %v12662_v55 = vld [vmem:[#allocation15_spill] sm:$0xff]  ;;  %v12663_v56 = vld [vmem:[#allocation17_spill] sm:$0xff] }
 0x273   : > { %12658 = vst [vmem:[#allocation28_spill] sm:$0xff] %v10603_v49  ;;  %v10608_v1 = vpop.eup %9178  ;;  %v2434_v41 = vadd.f32 %v10603_v49, %v10598_v4  ;;  %9198 = vpow2.f32 %v2418_v50  ;;  %v1690_v12 = vmul.f32 %v1686_v46, %v12660_v6  ;;  %v1693_v5 = vadd.f32 %v1689_v57, %v1681_v43  ;;  %v12664_v57 = vld [vmem:[#allocation27_spill] sm:$0xff] }
 0x274   : > { %v10613_v7 = vpop.eup %9180  ;;  %9200 = vrcp.f32 %v2176_v28  ;;  %v1660_v63 = vmul.f32 %v10440_v17, %v12661_v61  ;;  %v1667_v29 = vmul.f32 %v10387_v14, %v12662_v55  ;;  %v1668_v45 = vmul.f32 %v10444_v23, %v12663_v56  ;;  %v12665_v17 = vld [vmem:[#allocation37_spill] sm:$0xff]  ;;  %v12666_v43 = vld [vmem:[#allocation31_spill] sm:$0xff] }
 0x275   : > { %v10619_v37 = vpop.eup %9182  ;;  %v2438_v44 = vadd.f32 %v10608_v1, %v2434_v41  ;;  %9202 = vpow2.f32 %v10539_v34  ;;  %v1694_v50 = vadd.f32 %v1690_v12, %v1682_v47  ;;  %v1675_v28 = vmul.f32 %v12665_v17, %v12664_v57 }
 0x276   : > { %v10625_v27 = vpop.eup %9184  ;;  %9204 = vpow2.f32 %v10544_v11  ;;  %v1671_v46 = vadd.f32 %v1667_v29, %v1659_v54  ;;  %v1676_v14 = vmul.f32 %v10431_v21, %v12666_v43  ;;  %v1672_v47 = vadd.f32 %v1668_v45, %v1660_v63  ;;  %v12667_v54 = vld [vmem:[#allocation19_spill] sm:$0xff]  ;;  %v12668_v29 = vld [vmem:[#allocation21_spill] sm:$0xff] }
 0x277   : > { %v10632_v49 = vpop.eup %9186  ;;  %v2442_v41 = vadd.f32 %v10619_v37, %v2438_v44  ;;  %9206 = vpow2.f32 %v10555_v19  ;;  %v2492_v34 = vpack.c.bf16 %v1694_v50, %v1693_v5  ;;  %v1679_v12 = vmul.f32 %v1675_v28, %v12667_v54 }
 0x278   : > { %v10636_v23 = vpop.eup %9188  ;;  %v2432_v11 = vadd.f32 %v10632_v49, %v10625_v27  ;;  %9208 = vpow2.f32 %v10564_v62  ;;  %v1680_v57 = vmul.f32 %v1676_v14, %v12668_v29  ;;  %v1918_v19 = vmul.f32 %v10507_v51, %v10396_v33 }
 0x279   : > { %v10643_v21 = vpop.eup %9190  ;;  %9210 = vrcp.f32 %v2442_v41  ;;  %8727 = vmatprep.mubr.msk.bf16.mxu1 %vm1006_vm1, %v2492_v34  ;;  %v1919_v5 = vmul.f32 %v10553_v25, %v10468_v52  ;;  %v1926_v63 = vmul.f32 %v10507_v51, %v10410_v48  ;;  %v1683_v50 = vadd.f32 %v1679_v12, %v1671_v46 }
 0x27a   : > { %v10652_v44 = vpop.eup %9192  ;;  %v2436_v62 = vadd.f32 %v10636_v23, %v2432_v11  ;;  %9212 = vpow2.f32 %v10566_v20  ;;  %v1684_v45 = vadd.f32 %v1680_v57, %v1672_v47  ;;  %v1922_v28 = vmul.f32 %v1918_v19, %v10111_v0 }
 0x27b   : > { %v10656_v17 = vpop.eup %9194  ;;  %v1923_v33 = vmul.f32 %v1919_v5, %v12645_v39  ;;  %v1927_v52 = vmul.f32 %v10553_v25, %v10471_v18  ;;  %v1930_v43 = vmul.f32 %v1926_v63, %v12649_v24  ;;  %v1695_v41 = vadd.f32 %v10399_v32, %v1683_v50 }
 0x27c   : > { %v10663_v48 = vpop.eup %9196  ;;  %v2440_v14 = vadd.f32 %v10652_v44, %v2436_v62  ;;  %v1696_v20 = vadd.f32 %v10455_v40, %v1684_v45  ;;  %v1938_v46 = vmul.f32 %v10507_v51, %v10416_v30  ;;  %v1939_v12 = vmul.f32 %v10553_v25, %v10480_v2 }
 0x27d   : > { %v10670_v34 = vpop.eup %9198  ;;  %v2435_v47 = vadd.f32 %v10663_v48, %v10656_v17  ;;  %v1931_v18 = vmul.f32 %v1927_v52, %v12652_v35  ;;  %v1934_v11 = vadd.f32 %v1930_v43, %v1922_v28  ;;  %v1950_v30 = vmul.f32 %v10507_v51, %v10423_v13  ;;  %v12670_v52 = vld [vmem:[#allocation35_spill] sm:$0xff] }
 0x27e   : > { %v10677_v57 = vpop.eup %9200  ;;  %9214 = vrcp.f32 %v2440_v14  ;;  %v2493_v32 = vpack.c.bf16 %v1696_v20, %v1695_v41  ;;  %v1942_v40 = vmul.f32 %v1938_v46, %v12653_v26  ;;  %v1943_v62 = vmul.f32 %v1939_v12, %v12655_v9 }
 0x27f   : > { %v10682_v19 = vpop.eup %9202  ;;  %v2439_v5 = vadd.f32 %v10670_v34, %v2435_v47  ;;  %v1935_v63 = vadd.f32 %v1931_v18, %v1923_v33  ;;  %v1951_v50 = vmul.f32 %v10553_v25, %v10488_v59  ;;  %v1954_v28 = vmul.f32 %v1950_v30, %v12657_v31  ;;  %v12671_v25 = vld [vmem:[#allocation36_spill] sm:$0xff] }
 0x280   : > { %12669 = vst [vmem:[#allocation32_spill] sm:$0xff] %v10682_v19  ;;  %v10688_v2 = vpop.eup %9204  ;;  %8728 = vmatmul.mubr.msk.bf16.vlgmr.msra.gmra.mrb[48].mxu1 %vm1006_vm1, %v2493_v32  ;;  %v1946_v45 = vadd.f32 %v1942_v40, %v1934_v11  ;;  %v1920_v13 = vmul.f32 %v10475_v15, %v12670_v52  ;;  %v1921_v51 = vmul.f32 %v10528_v60, %v10436_v16  ;;  %v12672_v32 = vld [vmem:[#allocation40_spill] sm:$0xff] }
 0x281   : > { %v10696_v43 = vpop.eup %9206  ;;  %v2443_v33 = vadd.f32 %v10682_v19, %v2439_v5  ;;  %v1947_v14 = vadd.f32 %v1943_v62, %v1935_v63  ;;  %v1955_v59 = vmul.f32 %v1951_v50, %v12660_v6  ;;  %v1928_v41 = vmul.f32 %v10475_v15, %v12671_v25  ;;  %v12673_v62 = vld [vmem:[#allocation38_spill] sm:$0xff]  ;;  %v12677_v19 = vld [vmem:[#allocation25_spill] sm:$0xff] }
 0x282   : > { %v10702_v20 = vpop.eup %9208  ;;  %v2433_v46 = vadd.f32 %v10696_v43, %v10688_v2  ;;  %v1958_v47 = vadd.f32 %v1954_v28, %v1946_v45  ;;  %v1924_v18 = vmul.f32 %v1920_v13, %v12659_v38  ;;  %v1925_v16 = vmul.f32 %v1921_v51, %v12661_v61  ;;  %v12674_v28 = vld [vmem:[#allocation39_spill] sm:$0xff] }
 0x283   : > { %v10708_v11 = vpop.eup %9210  ;;  %9216 = vrcp.f32 %v2443_v33  ;;  %v1959_v12 = vadd.f32 %v1955_v59, %v1947_v14  ;;  %v1929_v40 = vmul.f32 %v10528_v60, %v12672_v32  ;;  %v1932_v30 = vmul.f32 %v1928_v41, %v12662_v55  ;;  %v12675_v14 = vld [vmem:[#allocation41_spill] sm:$0xff]  ;;  %v12676_v32 = vld [vmem:[#allocation23_spill] sm:$0xff] }
 0x284   : > { %v10713_v5 = vpop.eup %9212  ;;  %v2437_v63 = vadd.f32 %v10702_v20, %v2433_v46  ;;  %v1940_v50 = vmul.f32 %v10475_v15, %v12673_v62  ;;  %v1941_v45 = vmul.f32 %v10528_v60, %v10452_v42  ;;  %v1952_v52 = vmul.f32 %v10475_v15, %v12674_v28 }
 0x285   : > { %v2494_v13 = vpack.c.bf16 %v1959_v12, %v1958_v47  ;;  %v1933_v51 = vmul.f32 %v1929_v40, %v12663_v56  ;;  %v1936_v33 = vadd.f32 %v1932_v30, %v1924_v18  ;;  %v1953_v59 = vmul.f32 %v10528_v60, %v12675_v14 }
 0x286   : > { %v2441_v25 = vadd.f32 %v10713_v5, %v2437_v63  ;;  %v1944_v41 = vmul.f32 %v1940_v50, %v12667_v54  ;;  %v1945_v46 = vmul.f32 %v1941_v45, %v12668_v29  ;;  %v1956_v62 = vmul.f32 %v1952_v52, %v12676_v32 }
 0x287   : > { %8731 = vmatprep.mubr.msk.bf16.mxu1 %vm1006_vm1, %v2494_v13  ;;  %v1937_v42 = vadd.f32 %v1933_v51, %v1925_v16  ;;  %v1957_v15 = vmul.f32 %v1953_v59, %v12677_v19  ;;  %v2183_v47 = vmul.f32 %v10613_v7, %v10514_v58  ;;  %v2184_v18 = vmul.f32 %v10677_v57, %v10568_v22 }
 0x288   : > { %v10735_v60 = vpop.eup %9214  ;;  %9218 = vrcp.f32 %v2441_v25  ;;  %v1948_v12 = vadd.f32 %v1944_v41, %v1936_v33  ;;  %v2191_v40 = vmul.f32 %v10613_v7, %v10520_v10  ;;  %v2192_v30 = vmul.f32 %v10677_v57, %v10574_v53  ;;  %v12678_v53 = vld [vmem:[#allocation46_spill] sm:$0xff] }
 0x289   : > { %v1949_v63 = vadd.f32 %v1945_v46, %v1937_v42  ;;  %v2187_v16 = vmul.f32 %v2183_v47, %v10111_v0  ;;  %v2188_v50 = vmul.f32 %v2184_v18, %v12645_v39  ;;  %v2203_v58 = vmul.f32 %v10613_v7, %v10523_v36  ;;  %v12679_v25 = vld [vmem:[#allocation42_spill] sm:$0xff]  ;;  %v12681_v47 = vld [vmem:[#allocation47_spill] sm:$0xff] }
 0x28a   : > { %v1960_v45 = vadd.f32 %v1956_v62, %v1948_v12  ;;  %v2195_v22 = vmul.f32 %v2191_v40, %v12649_v24  ;;  %v2196_v28 = vmul.f32 %v2192_v30, %v12652_v35  ;;  %v2204_v52 = vmul.f32 %v10677_v57, %v10581_v3  ;;  %v12680_v41 = vld [vmem:[#allocation14_spill] sm:$0xff] }
 0x28b   : > { %v1961_v10 = vadd.f32 %v1957_v15, %v1949_v63  ;;  %v2207_v13 = vmul.f32 %v2203_v58, %v12653_v26  ;;  %v2215_v51 = vmul.f32 %v10613_v7, %v12678_v53  ;;  %v2216_v33 = vmul.f32 %v10677_v57, %v10594_v8  ;;  %v12682_v57 = vld [vmem:[#allocation43_spill] sm:$0xff]  ;;  %v12683_v63 = vld [vmem:[#allocation48_spill] sm:$0xff] }
 0x28c   : > { %v2199_v14 = vadd.f32 %v2195_v22, %v2187_v16  ;;  %v2200_v59 = vadd.f32 %v2196_v28, %v2188_v50  ;;  %v2208_v36 = vmul.f32 %v2204_v52, %v12655_v9  ;;  %v2185_v46 = vmul.f32 %v12680_v41, %v12679_v25  ;;  %v12684_v50 = vld [vmem:[#allocation44_spill] sm:$0xff] }
 0x28d   : > { %v10757_v62 = vpop.eup %9216  ;;  %v2495_v42 = vpack.c.bf16 %v1961_v10, %v1960_v45  ;;  %v2219_v3 = vmul.f32 %v2215_v51, %v12657_v31  ;;  %v2220_v15 = vmul.f32 %v2216_v33, %v12660_v6  ;;  %v2186_v7 = vmul.f32 %v10643_v21, %v12681_v47  ;;  %v12685_v45 = vld [vmem:[#allocation49_spill] sm:$0xff] }
 0x28e   : > { %v2211_v18 = vadd.f32 %v2207_v13, %v2199_v14  ;;  %v2212_v12 = vadd.f32 %v2208_v36, %v2200_v59  ;;  %v2189_v8 = vmul.f32 %v2185_v46, %v12659_v38  ;;  %v2193_v40 = vmul.f32 %v12680_v41, %v12682_v57  ;;  %v12686_v13 = vld [vmem:[#allocation45_spill] sm:$0xff]  ;;  %v12687_v59 = vld [vmem:[#allocation50_spill] sm:$0xff] }
 0x28f   : > { %8732 = vmatmul.mubr.msk.bf16.gmra.mrb[52].mxu1 %vm1006_vm1, %v2495_v42  ;;  %v2190_v30 = vmul.f32 %v2186_v7, %v12661_v61  ;;  %v2194_v16 = vmul.f32 %v10643_v21, %v12683_v63  ;;  %v2205_v58 = vmul.f32 %v12680_v41, %v12684_v50  ;;  %v2206_v22 = vmul.f32 %v10643_v21, %v12685_v45 }
 0x290   : > { %v2223_v28 = vadd.f32 %v2219_v3, %v2211_v18  ;;  %v2224_v52 = vadd.f32 %v2220_v15, %v2212_v12  ;;  %v2197_v10 = vmul.f32 %v2193_v40, %v12662_v55  ;;  %v2217_v53 = vmul.f32 %v12680_v41, %v12686_v13 }
 0x291   : > { %v2198_v51 = vmul.f32 %v2194_v16, %v12663_v56  ;;  %v2209_v33 = vmul.f32 %v2205_v58, %v12667_v54  ;;  %v2210_v14 = vmul.f32 %v2206_v22, %v12668_v29  ;;  %v2218_v36 = vmul.f32 %v10643_v21, %v12687_v59 }
 0x292   : > { %v9219_v25 = vpop.eup %9218  ;;  %v2496_v46 = vpack.c.bf16 %v2224_v52, %v2223_v28  ;;  %v2201_v42 = vadd.f32 %v2197_v10, %v2189_v8  ;;  %v2221_v3 = vmul.f32 %v2217_v53, %v12676_v32  ;;  %v2448_v15 = vmul.f32 %v10735_v60, %v10625_v27 }
 0x293   : > { %v2202_v47 = vadd.f32 %v2198_v51, %v2190_v30  ;;  %v2222_v41 = vmul.f32 %v2218_v36, %v12677_v19  ;;  %v2449_v7 = vmul.f32 %v9219_v25, %v10688_v2  ;;  %v2456_v18 = vmul.f32 %v10735_v60, %v10632_v49 }
 0x294   : > { %8735 = vmatprep.mubr.msk.bf16.mxu1 %vm1006_vm1, %v2496_v46  ;;  %v2213_v12 = vadd.f32 %v2209_v33, %v2201_v42  ;;  %v2452_v21 = vmul.f32 %v2448_v15, %v10111_v0  ;;  %v2457_v8 = vmul.f32 %v9219_v25, %v10696_v43  ;;  %v2468_v57 = vmul.f32 %v10735_v60, %v10636_v23 }
 0x295   : > { %v2214_v40 = vadd.f32 %v2210_v14, %v2202_v47  ;;  %v2453_v27 = vmul.f32 %v2449_v7, %v12645_v39  ;;  %v2460_v30 = vmul.f32 %v2456_v18, %v12649_v24  ;;  %v2469_v2 = vmul.f32 %v9219_v25, %v10702_v20 }
 0x296   : > { %v2225_v63 = vadd.f32 %v2221_v3, %v2213_v12  ;;  %v2461_v49 = vmul.f32 %v2457_v8, %v12652_v35  ;;  %v2472_v16 = vmul.f32 %v2468_v57, %v12653_v26  ;;  %v2480_v0 = vmul.f32 %v10735_v60, %v10652_v44  ;;  %v12688_v44 = vld [vmem:[#allocation28_spill] sm:$0xff]  ;;  %v9285_v3 = vld [vmem:[#allocation2 + $0x10] sm:$0xff]  ;;  %v9287_v12 = vld [vmem:[#allocation2 + $0x18] sm:$0xff] }
 0x297   : > { %v2226_v50 = vadd.f32 %v2222_v41, %v2214_v40  ;;  %v2464_v43 = vadd.f32 %v2460_v30, %v2452_v21  ;;  %v2473_v58 = vmul.f32 %v2469_v2, %v12655_v9  ;;  %v2481_v23 = vmul.f32 %v9219_v25, %v10713_v5  ;;  %v9286_v41 = vld [vmem:[#allocation2] sm:$0xff]  ;;  %v9288_v57 = vld [vmem:[#allocation2 + $0x8] sm:$0xff] }
 0x298   : > { %v2465_v45 = vadd.f32 %v2461_v49, %v2453_v27  ;;  %v2484_v39 = vmul.f32 %v2480_v0, %v12657_v31  ;;  %v2450_v24 = vmul.f32 %v10708_v11, %v10598_v4  ;;  %v2451_v35 = vmul.f32 %v10757_v62, %v10656_v17 }
 0x299   : > { %v2497_v20 = vpack.c.bf16 %v2226_v50, %v2225_v63  ;;  %v2476_v26 = vadd.f32 %v2472_v16, %v2464_v43  ;;  %v2485_v22 = vmul.f32 %v2481_v23, %v12660_v6  ;;  %v2458_v60 = vmul.f32 %v10708_v11, %v12688_v44  ;;  %v9289_v23 = vld [vmem:[#allocation2 + $0x20] sm:$0xff]  ;;  %v9292_v44 = vld [vmem:[#allocation2 + $0x38] sm:$0xff] }
 0x29a   : > { %v2477_v28 = vadd.f32 %v2473_v58, %v2465_v45  ;;  %v2454_v9 = vmul.f32 %v2450_v24, %v12659_v38  ;;  %v2455_v5 = vmul.f32 %v2451_v35, %v12661_v61  ;;  %v2459_v31 = vmul.f32 %v10757_v62, %v10663_v48  ;;  %v12689_v61 = vld [vmem:[#allocation32_spill] sm:$0xff]  ;;  %v9290_v24 = vld [vmem:[#allocation2 + $0x28] sm:$0xff] }
 0x29b   : > { %8736 = vmatmul.mubr.msk.bf16.gmra.mrb[56].mxu1 %vm1006_vm1, %v2497_v20  ;;  %v2488_v4 = vadd.f32 %v2484_v39, %v2476_v26  ;;  %v2462_v17 = vmul.f32 %v2458_v60, %v12662_v55  ;;  %v2470_v52 = vmul.f32 %v10708_v11, %v10608_v1  ;;  %v2471_v6 = vmul.f32 %v10757_v62, %v10670_v34  ;;  %v9291_v20 = vld [vmem:[#allocation2 + $0x30] sm:$0xff] }
 0x29c   : > { %v2489_v10 = vadd.f32 %v2485_v22, %v2477_v28  ;;  %v2463_v13 = vmul.f32 %v2459_v31, %v12663_v56  ;;  %v2482_v38 = vmul.f32 %v10708_v11, %v10619_v37  ;;  %v2483_v48 = vmul.f32 %v10757_v62, %v12689_v61 }
 0x29d   : > { %v2466_v53 = vadd.f32 %v2462_v17, %v2454_v9  ;;  %v2474_v51 = vmul.f32 %v2470_v52, %v12667_v54  ;;  %v2475_v55 = vmul.f32 %v2471_v6, %v12668_v29  ;;  %v10837_v54 = vld [vmem:[%s12690_s16] ss:$0 sm:$0xff] }
 0x29e   : > { %v2498_v33 = vpack.c.bf16 %v2489_v10, %v2488_v4  ;;  %v2467_v1 = vadd.f32 %v2463_v13, %v2455_v5  ;;  %v2486_v14 = vmul.f32 %v2482_v38, %v12676_v32  ;;  %v2487_v34 = vmul.f32 %v2483_v48, %v12677_v19  ;;  %v9293_v38 = vld [vmem:[#allocation2 + $0x40] sm:$0xff] }
 0x29f   : > { %v2478_v59 = vadd.f32 %v2474_v51, %v2466_v53  ;;  %v9294_v53 = vld [vmem:[#allocation2 + $0x48] sm:$0xff] }
 0x2a0   : > { %8739 = vmatprep.mubr.msk.bf16.mxu1 %vm1006_vm1, %v2498_v33  ;;  %v2479_v56 = vadd.f32 %v2475_v55, %v2467_v1  ;;  %v9295_v55 = vld [vmem:[#allocation2 + $0x50] sm:$0xff] }
 0x2a1   : > { %v2490_v37 = vadd.f32 %v2486_v14, %v2478_v59  ;;  %v9296_v14 = vld [vmem:[#allocation2 + $0x58] sm:$0xff] }
 0x2a2   : > { %v2491_v11 = vadd.f32 %v2487_v34, %v2479_v56 }
 0x2a4   : > { %v2499_v36 = vpack.c.bf16 %v2491_v11, %v2490_v37 }
 0x2a6   : > { %8740 = vmatmul.mubr.msk.bf16.gmra.mrb[60].mxu1 %vm1006_vm1, %v2499_v36 }
 0x353   : > { %v8729_v29 = vpop.f32.mrb[48].mxu1 }
 0x354   : > { %v2606_v32 = vadd.f32 %v8729_v29, %v10837_v54  ;;  %v2597_v62 = vpop.f32.mrb[49].mxu1 }
 0x355   : > { %v2598_v19 = vadd.f32 %v10837_v54, %v2597_v62  ;;  %v8730_v25 = vpop.f32.mrb[50].mxu1 }
 0x356   : > { %v2609_v46 = vadd.f32 %v8730_v25, %v10837_v54  ;;  %v2600_v42 = vpop.f32.mrb[51].mxu1  ;;  %v10842_v15 = vadd.f32 %v9285_v3, %v2606_v32 }
 0x357   : > { %v2601_v47 = vadd.f32 %v10837_v54, %v2600_v42  ;;  %v10845_v7 = vadd.f32 %v9286_v41, %v2598_v19 }
 0x358   : > { %v2684_v18 = vsel %vm1006_vm1, %v10842_v15, 0.0  ;;  %v10849_v21 = vadd.f32 %v9287_v12, %v2609_v46  ;;  %v9297_v46 = vld [vmem:[#allocation2 + $0x60] sm:$0xff] }
 0x359   : > { %2685 = vadd.xlane.f32.xlu1 %v2684_v18  ;;  %v2678_v8 = vsel %vm1006_vm1, %v10845_v7, 0.0  ;;  %v10853_v40 = vadd.f32 %v9288_v57, %v2601_v47  ;;  %v9298_v47 = vld [vmem:[#allocation2 + $0x68] sm:$0xff]  ;;  %v9299_v18 = vld [vmem:[#allocation2 + $0x70] sm:$0xff] }
 0x35a   : > { %2679 = vadd.xlane.f32.xlu0 %v2678_v8  ;;  %v2687_v27 = vsel %vm1006_vm1, %v10849_v21, 0.0  ;;  %v9300_v8 = vld [vmem:[#allocation2 + $0x78] sm:$0xff] }
 0x35b   : > { %v2681_v30 = vsel %vm1006_vm1, %v10853_v40, 0.0 }
 0x35d   : > { %2688 = vadd.xlane.f32.xlu1 %v2687_v27 }
 0x35e   : > { %2682 = vadd.xlane.f32.xlu0 %v2681_v30 }
 0x362   : > { %v8733_v2 = vpop.f32.mrb[52].mxu1 }
 0x363   : > { %v2613_v63 = vpop.f32.mrb[53].mxu1  ;;  %v2622_v49 = vadd.f32 %v8733_v2, %v10837_v54  ;;  %v8836_v2 = vld [vmem:[%s9542_s23] ss:$16 sps:$4 sm:$0xff]  }
 0x364   : > { %v2614_v16 = vadd.f32 %v10837_v54, %v2613_v63  ;;  %v8734_v0 = vpop.f32.mrb[54].mxu1  ;;  %v8838_v63 = vld [vmem:[%s9542_s23 + $0x4] ss:$16 sps:$4 sm:$0xff]  }
 0x365   : > { %v2616_v50 = vpop.f32.mrb[55].mxu1  ;;  %v2625_v43 = vadd.f32 %v8734_v0, %v10837_v54  ;;  %v10869_v26 = vadd.f32 %v9291_v20, %v2622_v49  ;;  %v8839_v49 = vld [vmem:[%s9542_s23 + $0x8] ss:$16 sps:$4 sm:$0xff]   ;;  %3081 = vmatprep.subr.bf16.mxu0 %v8838_v63 }
 0x366   : > { %v2617_v58 = vadd.f32 %v10837_v54, %v2616_v50  ;;  %v10863_v45 = vadd.f32 %v9289_v23, %v2614_v16  ;;  %v8841_v16 = vld [vmem:[%s9542_s23 + $0xc] ss:$16 sps:$4 sm:$0xff]   ;;  %3082 = vmatpush1.bf16.msra.mxu0 %v8836_v2 }
 0x367   : > { %v10873_v60 = vadd.f32 %v9292_v44, %v2625_v43  ;;  %v2696_v28 = vsel %vm1006_vm1, %v10869_v26, 0.0  ;;  %3194 = vmatprep.subr.bf16.mxu1 %v8841_v16 }
 0x368   : > { %v2690_v39 = vsel %vm1006_vm1, %v10863_v45, 0.0  ;;  %v10867_v35 = vadd.f32 %v9290_v24, %v2617_v58  ;;  %3195 = vmatpush1.bf16.msra.mxu1 %v8839_v49 }
 0x369   : > { %2691 = vadd.xlane.f32.xlu0 %v2690_v39  ;;  %v2699_v9 = vsel %vm1006_vm1, %v10873_v60, 0.0 }
 0x36a   : > { %v2693_v22 = vsel %vm1006_vm1, %v10867_v35, 0.0 }
 0x36b   : > { %2694 = vadd.xlane.f32.xlu1 %v2693_v22 }
 0x36d   : > { %2697 = vadd.xlane.f32.xlu0 %v2696_v28 }
 0x36e   : > { %v8737_v5 = vpop.f32.mrb[56].mxu1 }
 0x36f   : > { %2700 = vadd.xlane.f32.xlu1 %v2699_v9  ;;  %v2629_v31 = vpop.f32.mrb[57].mxu1  ;;  %v2638_v4 = vadd.f32 %v8737_v5, %v10837_v54 }
 0x370   : > { %v2630_v17 = vadd.f32 %v10837_v54, %v2629_v31  ;;  %v8738_v52 = vpop.f32.mrb[58].mxu1 }
 0x371   : > { %v2632_v6 = vpop.f32.mrb[59].mxu1  ;;  %v2641_v10 = vadd.f32 %v8738_v52, %v10837_v54  ;;  %v10889_v33 = vadd.f32 %v9295_v55, %v2638_v4 }
 0x372   : > { %v2633_v13 = vadd.f32 %v10837_v54, %v2632_v6  ;;  %v10883_v61 = vadd.f32 %v9293_v38, %v2630_v17 }
 0x373   : > { %v10893_v34 = vadd.f32 %v9296_v14, %v2641_v10  ;;  %v2708_v59 = vsel %vm1006_vm1, %v10889_v33, 0.0 }
 0x374   : > { %v2702_v48 = vsel %vm1006_vm1, %v10883_v61, 0.0  ;;  %v10887_v51 = vadd.f32 %v9294_v53, %v2633_v13 }
 0x375   : > { %2703 = vadd.xlane.f32.xlu0 %v2702_v48  ;;  %v2711_v11 = vsel %vm1006_vm1, %v10893_v34, 0.0 }
 0x376   : > { %v2705_v1 = vsel %vm1006_vm1, %v10887_v51, 0.0 }
 0x377   : > { %2706 = vadd.xlane.f32.xlu1 %v2705_v1 }
 0x379   : > { %v8741_v56 = vpop.f32.mrb[60].mxu1  ;;  %2709 = vadd.xlane.f32.xlu0 %v2708_v59 }
 0x37a   : > { %v2645_v37 = vpop.f32.mrb[61].mxu1  ;;  %v2654_v36 = vadd.f32 %v8741_v56, %v10837_v54 }
 0x37b   : > { %v2646_v29 = vadd.f32 %v10837_v54, %v2645_v37  ;;  %v8742_v32 = vpop.f32.mrb[62].mxu1  ;;  %2712 = vadd.xlane.f32.xlu1 %v2711_v11 }
 0x37c   : > { %v2648_v62 = vpop.f32.mrb[63].mxu1  ;;  %v2657_v19 = vadd.f32 %v8742_v32, %v10837_v54  ;;  %v10909_v12 = vadd.f32 %v9299_v18, %v2654_v36 }
 0x37d   : > { %v2649_v25 = vadd.f32 %v10837_v54, %v2648_v62  ;;  %v10903_v42 = vadd.f32 %v9297_v46, %v2646_v29 }
 0x37e   : > { %v10913_v57 = vadd.f32 %v9300_v8, %v2657_v19  ;;  %v2720_v27 = vsel %vm1006_vm1, %v10909_v12, 0.0 }
 0x37f   : > { %v2714_v3 = vsel %vm1006_vm1, %v10903_v42, 0.0  ;;  %v10907_v41 = vadd.f32 %v9298_v47, %v2649_v25 }
 0x380   : > { %2715 = vadd.xlane.f32.xlu0 %v2714_v3  ;;  %v2723_v30 = vsel %vm1006_vm1, %v10913_v57, 0.0 }
 0x381   : > { %v2717_v54 = vsel %vm1006_vm1, %v10907_v41, 0.0 }
 0x382   : > { %2718 = vadd.xlane.f32.xlu1 %v2717_v54 }
 0x384   : > { %2721 = vadd.xlane.f32.xlu0 %v2720_v27 }
 0x386   : > { %2724 = vadd.xlane.f32.xlu1 %v2723_v30 }
 0x3e6   : > { %v2686_v0 = vpop.xlane.xlu1 %2685 }
 0x3e7   : > { %v2729_v50 = vmul.f32 0.015625, %v2686_v0  ;;  %v2680_v43 = vpop.xlane.xlu0 %2679 }
 0x3e8   : > { %v2727_v58 = vmul.f32 0.015625, %v2680_v43 }
 0x3e9   : > { %v10924_v23 = vsub.f32 %v10842_v15, %v2729_v50 }
 0x3ea   : > { %v10927_v39 = vsub.f32 %v10845_v7, %v2727_v58  ;;  %v2689_v24 = vpop.xlane.xlu1 %2688 }
 0x3eb   : > { %v2730_v20 = vmul.f32 0.015625, %v2689_v24  ;;  %v2683_v22 = vpop.xlane.xlu0 %2682  ;;  %v2761_v15 = vmul.f32 %v10924_v23, %v10924_v23 }
 0x3ec   : > { %v2728_v44 = vmul.f32 0.015625, %v2683_v22  ;;  %v2759_v28 = vmul.f32 %v10927_v39, %v10927_v39  ;;  %v8844_v22 = vld [vmem:[%s9542_s23 + $0x24] ss:$16 sps:$4 sm:$0xff]  }
 0x3ed   : > { %v10932_v9 = vsub.f32 %v10849_v21, %v2730_v20  ;;  %v2781_v4 = vsel %vm1006_vm1, %v2761_v15, 0.0  ;;  %v8842_v20 = vld [vmem:[%s9542_s23 + $0x20] ss:$16 sps:$4 sm:$0xff]   ;;  %3083 = vmatprep.subr.bf16.mxu0 %v8844_v22 }
 0x3ee   : > { %v10935_v5 = vsub.f32 %v10853_v40, %v2728_v44  ;;  %v2775_v31 = vsel %vm1006_vm1, %v2759_v28, 0.0  ;;  %v8845_v28 = vld [vmem:[%s9542_s23 + $0x28] ss:$16 sps:$4 sm:$0xff]   ;;  %3084 = vmatpush1.bf16.msra.mxu0 %v8842_v20 }
 0x3ef   : > { %2776 = vadd.xlane.f32.xlu0 %v2775_v31  ;;  %v2762_v21 = vmul.f32 %v10932_v9, %v10932_v9  ;;  %v8847_v31 = vld [vmem:[%s9542_s23 + $0x2c] ss:$16 sps:$4 sm:$0xff]  }
 0x3f0   : > { %v2760_v7 = vmul.f32 %v10935_v5, %v10935_v5  ;;  %3196 = vmatprep.subr.bf16.mxu1 %v8847_v31 }
 0x3f1   : > { %v2784_v52 = vsel %vm1006_vm1, %v2762_v21, 0.0  ;;  %3197 = vmatpush1.bf16.msra.mxu1 %v8845_v28 }
 0x3f2   : > { %v2778_v17 = vsel %vm1006_vm1, %v2760_v7, 0.0 }
 0x3f3   : > { %2782 = vadd.xlane.f32.xlu0 %v2781_v4  ;;  %2779 = vadd.xlane.f32.xlu1 %v2778_v17 }
 0x3f6   : > { %v2692_v40 = vpop.xlane.xlu0 %2691 }
 0x3f7   : > { %v2731_v6 = vmul.f32 0.015625, %v2692_v40  ;;  %2785 = vadd.xlane.f32.xlu1 %v2784_v52 }
 0x3f8   : > { %v2695_v10 = vpop.xlane.xlu1 %2694 }
 0x3f9   : > { %v10948_v13 = vsub.f32 %v10863_v45, %v2731_v6  ;;  %v2732_v38 = vmul.f32 0.015625, %v2695_v10 }
 0x3fa   : > { %v2698_v48 = vpop.xlane.xlu0 %2697 }
 0x3fb   : > { %v10951_v53 = vsub.f32 %v10867_v35, %v2732_v38  ;;  %v2733_v55 = vmul.f32 0.015625, %v2698_v48  ;;  %v2763_v1 = vmul.f32 %v10948_v13, %v10948_v13 }
 0x3fc   : > { %v2701_v14 = vpop.xlane.xlu1 %2700 }
 0x3fd   : > { %v10956_v59 = vsub.f32 %v10869_v26, %v2733_v55  ;;  %v2734_v56 = vmul.f32 0.015625, %v2701_v14  ;;  %v2787_v37 = vsel %vm1006_vm1, %v2763_v1, 0.0  ;;  %v2764_v45 = vmul.f32 %v10951_v53, %v10951_v53  ;;  %v8853_v55 = vld [vmem:[%s9542_s23 + $0x4c] ss:$16 sps:$4 sm:$0xff]   ;;  %v8848_v1 = vld [vmem:[%s9542_s23 + $0x40] ss:$16 sps:$4 sm:$0xff]  }
 0x3fe   : > { %2788 = vadd.xlane.f32.xlu0 %v2787_v37  ;;  %v8851_v14 = vld [vmem:[%s9542_s23 + $0x48] ss:$16 sps:$4 sm:$0xff]   ;;  %3198 = vmatprep.subr.bf16.mxu1 %v8853_v55  ;;  %v8859_v37 = vld [vmem:[%s9542_s23 + $0x6c] ss:$16 sps:$4 sm:$0xff]  }
 0x3ff   : > { %v10962_v11 = vsub.f32 %v10873_v60, %v2734_v56  ;;  %v2790_v35 = vsel %vm1006_vm1, %v2764_v45, 0.0  ;;  %v2765_v36 = vmul.f32 %v10956_v59, %v10956_v59  ;;  %3199 = vmatpush1.bf16.msra.mxu1 %v8851_v14  ;;  %v8856_v56 = vld [vmem:[%s9542_s23 + $0x64] ss:$16 sps:$4 sm:$0xff]   ;;  %v8854_v45 = vld [vmem:[%s9542_s23 + $0x60] ss:$16 sps:$4 sm:$0xff]  }
 0x400   : > { %2791 = vadd.xlane.f32.xlu1 %v2790_v35  ;;  %v8857_v35 = vld [vmem:[%s9542_s23 + $0x68] ss:$16 sps:$4 sm:$0xff]   ;;  %3200 = vmatprep.subr.bf16.mxu1 %v8859_v37  ;;  %v8871_v37 = vld [vmem:[%s9542_s23 + $0xac] ss:$16 sps:$4 sm:$0xff]  }
 0x401   : > { %v2793_v29 = vsel %vm1006_vm1, %v2765_v36, 0.0  ;;  %v2766_v26 = vmul.f32 %v10962_v11, %v10962_v11  ;;  %v12519_v36 = vmov 0  }
 0x402   : > { %2794 = vadd.xlane.f32.xlu0 %v2793_v29  ;;  %v2704_v32 = vpop.xlane.xlu0 %2703  ;;  %3113 = vmatprep.mubr.bf16.mxu0 %v12519_v36  ;;  %v8862_v29 = vld [vmem:[%s9542_s23 + $0x84] ss:$16 sps:$4 sm:$0xff]  }
 0x403   : > { %v2796_v62 = vsel %vm1006_vm1, %v2766_v26, 0.0  ;;  %v2735_v19 = vmul.f32 0.015625, %v2704_v32  ;;  %3201 = vmatpush1.bf16.msra.mxu1 %v8857_v35  ;;  %3226 = vmatprep.mubr.bf16.mxu1 %v12519_v36  ;;  %v8865_v26 = vld [vmem:[%s9542_s23 + $0x8c] ss:$16 sps:$4 sm:$0xff]   ;;  %v8866_v35 = vld [vmem:[%s9542_s23 + $0xa0] ss:$16 sps:$4 sm:$0xff]  }
 0x404   : > { %2797 = vadd.xlane.f32.xlu1 %v2796_v62  ;;  %v2707_v25 = vpop.xlane.xlu1 %2706  ;;  %3700 = vmatprep.subr.bf16.mxu1 %v8865_v26 }
 0x405   : > { %v10972_v60 = vsub.f32 %v10883_v61, %v2735_v19  ;;  %v2736_v46 = vmul.f32 0.015625, %v2707_v25 }
 0x406   : > { %v2710_v3 = vpop.xlane.xlu0 %2709 }
 0x407   : > { %v10975_v47 = vsub.f32 %v10887_v51, %v2736_v46  ;;  %v2737_v18 = vmul.f32 0.015625, %v2710_v3  ;;  %v2767_v54 = vmul.f32 %v10972_v60, %v10972_v60 }
 0x408   : > { %v2713_v8 = vpop.xlane.xlu1 %2712 }
 0x409   : > { %v10980_v27 = vsub.f32 %v10889_v33, %v2737_v18  ;;  %v2738_v30 = vmul.f32 0.015625, %v2713_v8  ;;  %v2799_v2 = vsel %vm1006_vm1, %v2767_v54, 0.0  ;;  %v2768_v61 = vmul.f32 %v10975_v47, %v10975_v47 }
 0x40a   : > { %2800 = vadd.xlane.f32.xlu0 %v2799_v2 }
 0x40b   : > { %v10986_v51 = vsub.f32 %v10893_v34, %v2738_v30  ;;  %v2802_v63 = vsel %vm1006_vm1, %v2768_v61, 0.0  ;;  %v2769_v49 = vmul.f32 %v10980_v27, %v10980_v27 }
 0x40c   : > { %2803 = vadd.xlane.f32.xlu1 %v2802_v63 }
 0x40d   : > { %v2716_v33 = vpop.xlane.xlu0 %2715  ;;  %v2805_v16 = vsel %vm1006_vm1, %v2769_v49, 0.0  ;;  %v2770_v0 = vmul.f32 %v10986_v51, %v10986_v51 }
 0x40e   : > { %v2739_v50 = vmul.f32 0.015625, %v2716_v33  ;;  %2806 = vadd.xlane.f32.xlu0 %v2805_v16  ;;  %v11040_v33 = vld [vmem:[%s12691_s24] ss:$0 sm:$0xff] }
 0x40f   : > { %v2719_v43 = vpop.xlane.xlu1 %2718  ;;  %v2808_v34 = vsel %vm1006_vm1, %v2770_v0, 0.0 }
 0x410   : > { %v10996_v58 = vsub.f32 %v10903_v42, %v2739_v50  ;;  %v2740_v24 = vmul.f32 0.015625, %v2719_v43  ;;  %2809 = vadd.xlane.f32.xlu1 %v2808_v34 }
 0x411   : > { %v2722_v44 = vpop.xlane.xlu0 %2721 }
 0x412   : > { %v11003_v15 = vsub.f32 %v10907_v41, %v2740_v24  ;;  %v2741_v7 = vmul.f32 0.015625, %v2722_v44  ;;  %v2771_v4 = vmul.f32 %v10996_v58, %v10996_v58  ;;  %v11049_v44 = vld [vmem:[%s12692_s4] ss:$0 sm:$0xff] }
 0x413   : > { %v2725_v17 = vpop.xlane.xlu1 %2724 }
 0x414   : > { %v11008_v42 = vsub.f32 %v10909_v12, %v2741_v7  ;;  %v2742_v21 = vmul.f32 0.015625, %v2725_v17  ;;  %v2811_v40 = vsel %vm1006_vm1, %v2771_v4, 0.0  ;;  %v2772_v41 = vmul.f32 %v11003_v15, %v11003_v15 }
 0x415   : > { %2812 = vadd.xlane.f32.xlu0 %v2811_v40 }
 0x416   : > { %v11014_v52 = vsub.f32 %v10913_v57, %v2742_v21  ;;  %v2814_v6 = vsel %vm1006_vm1, %v2772_v41, 0.0  ;;  %v2773_v12 = vmul.f32 %v11008_v42, %v11008_v42  ;;  %v8850_v57 = vld [vmem:[%s9542_s23 + $0x44] ss:$16 sps:$4 sm:$0xff]  }
 0x417   : > { %2815 = vadd.xlane.f32.xlu1 %v2814_v6  ;;  %3085 = vmatprep.subr.bf16.mxu0 %v8850_v57  ;;  %v8863_v57 = vld [vmem:[%s9542_s23 + $0x88] ss:$16 sps:$4 sm:$0xff]  }
 0x418   : > { %v2817_v10 = vsel %vm1006_vm1, %v2773_v12, 0.0  ;;  %v2774_v38 = vmul.f32 %v11014_v52, %v11014_v52  ;;  %3086 = vmatpush1.bf16.msra.mxu0 %v8848_v1 }
 0x419   : > { %2818 = vadd.xlane.f32.xlu0 %v2817_v10  ;;  %3087 = vmatprep.subr.bf16.mxu0 %v8856_v56  ;;  %v8868_v56 = vld [vmem:[%s9542_s23 + $0xa4] ss:$16 sps:$4 sm:$0xff]  }
 0x41a   : > { %v2820_v48 = vsel %vm1006_vm1, %v2774_v38, 0.0 }
 0x41b   : > { %2821 = vadd.xlane.f32.xlu1 %v2820_v48  ;;  %v8860_v48 = vld [vmem:[%s9542_s23 + $0x80] ss:$16 sps:$4 sm:$0xff]  }
 0x41c   : > { %3088 = vmatpush1.bf16.msra.mxu0 %v8854_v45 }
 0x41d   : > { %3587 = vmatprep.subr.bf16.mxu0 %v8862_v29  ;;  %v8869_v29 = vld [vmem:[%s9542_s23 + $0xa8] ss:$16 sps:$4 sm:$0xff]  }
 0x47c   : > { %v2777_v32 = vpop.xlane.xlu0 %2776 }
 0x47d   : > { %v2823_v62 = vmul.f32 0.015625, %v2777_v32 }
 0x47f   : > { %v2839_v19 = vadd.f32 1e-05, %v2823_v62 }
 0x480   : > { %v2780_v25 = vpop.xlane.xlu1 %2779  ;;  %v2783_v46 = vpop.xlane.xlu0 %2782 }
 0x481   : > { %9220 = vrsqrt.f32 %v2839_v19  ;;  %v2824_v3 = vmul.f32 0.015625, %v2780_v25  ;;  %v2825_v18 = vmul.f32 0.015625, %v2783_v46  ;;  %v8874_v19 = vld [vmem:[%s9542_s23 + $0xc4] ss:$16 sps:$4 sm:$0xff]   ;;  %v8877_v25 = vld [vmem:[%s9542_s23 + $0xcc] ss:$16 sps:$4 sm:$0xff]  }
 0x483   : > { %v2840_v54 = vadd.f32 1e-05, %v2824_v3  ;;  %v2841_v8 = vadd.f32 1e-05, %v2825_v18 }
 0x484   : > { %v2786_v30 = vpop.xlane.xlu1 %2785 }
 0x485   : > { %9222 = vrsqrt.f32 %v2840_v54  ;;  %v2826_v2 = vmul.f32 0.015625, %v2786_v30 }
 0x486   : > { %9224 = vrsqrt.f32 %v2841_v8 }
 0x487   : > { %v2842_v61 = vadd.f32 1e-05, %v2826_v2 }
 0x489   : > { %9226 = vrsqrt.f32 %v2842_v61 }
 0x48b   : > { %v9221_v63 = vpop.eup %9220  ;;  %v2789_v49 = vpop.xlane.xlu0 %2788 }
 0x48c   : > { %v2871_v16 = vmul.f32 %v9221_v63, %v10927_v39  ;;  %v2827_v0 = vmul.f32 0.015625, %v2789_v49 }
 0x48d   : > { %v2792_v50 = vpop.xlane.xlu1 %2791 }
 0x48e   : > { %v2843_v43 = vadd.f32 1e-05, %v2827_v0  ;;  %v2828_v34 = vmul.f32 0.015625, %v2792_v50  ;;  %v2893_v20 = vmul.f32 %v11040_v33, %v2871_v16  ;;  %v8872_v16 = vld [vmem:[%s9542_s23 + $0xc0] ss:$16 sps:$4 sm:$0xff]  }
 0x48f   : > { %v9223_v24 = vpop.eup %9222  ;;  %v2795_v22 = vpop.xlane.xlu0 %2794  ;;  %v8875_v0 = vld [vmem:[%s9542_s23 + $0xc8] ss:$16 sps:$4 sm:$0xff]  }
 0x490   : > { %v2872_v28 = vmul.f32 %v9223_v24, %v10935_v5  ;;  %9228 = vrsqrt.f32 %v2843_v43  ;;  %v2844_v39 = vadd.f32 1e-05, %v2828_v34  ;;  %v9225_v31 = vpop.eup %9224  ;;  %v2829_v7 = vmul.f32 0.015625, %v2795_v22  ;;  %v8883_v43 = vld [vmem:[%s9542_s23 + $0xec] ss:$16 sps:$4 sm:$0xff]  }
 0x491   : > { %v2798_v4 = vpop.xlane.xlu1 %2797  ;;  %v11054_v41 = vadd.f32 %v11049_v44, %v2893_v20  ;;  %v2873_v12 = vmul.f32 %v9225_v31, %v10924_v23  ;;  %v8878_v31 = vld [vmem:[%s9542_s23 + $0xe0] ss:$16 sps:$4 sm:$0xff]  }
 0x492   : > { %v2894_v17 = vmul.f32 %v11040_v33, %v2872_v28  ;;  %9230 = vrsqrt.f32 %v2844_v39  ;;  %v2830_v21 = vmul.f32 0.015625, %v2798_v4  ;;  %v2845_v6 = vadd.f32 1e-05, %v2829_v7  ;;  %v8881_v7 = vld [vmem:[%s9542_s23 + $0xe8] ss:$16 sps:$4 sm:$0xff]  }
 0x493   : > { %v9227_v40 = vpop.eup %9226  ;;  %12693 = vst [vmem:[#allocation29_spill] sm:$0xff] %v11054_v41  ;;  %v2895_v23 = vmul.f32 %v11040_v33, %v2873_v12 }
 0x494   : > { %v11057_v5 = vadd.f32 %v11049_v44, %v2894_v17  ;;  %v2874_v10 = vmul.f32 %v9227_v40, %v10932_v9  ;;  %v2846_v38 = vadd.f32 1e-05, %v2830_v21 }
 0x495   : > { %v11085_v18 = vadd.f32 %v11049_v44, %v2895_v23 }
 0x496   : > { %12694 = vst [vmem:[#allocation16_spill] sm:$0xff] %v11057_v5  ;;  %v11065_v55 = vpack.c.bf16 %v11057_v5, %v11054_v41  ;;  %v2896_v1 = vmul.f32 %v11040_v33, %v2874_v10  ;;  %9232 = vrsqrt.f32 %v2846_v38  ;;  %v7453_v41 = vld [vmem:[%s12717_s7 + $0x4] sm:$0xf] }
 0x497   : > { %9234 = vrsqrt.f32 %v2845_v6  ;;  %v2801_v14 = vpop.xlane.xlu0 %2800  ;;  %12697 = vst [vmem:[#allocation20_spill] sm:$0xff] %v11085_v18 }
 0x498   : > { %12695 = vst [vmem:[#allocation33_spill] sm:$0xff] %v11065_v55  ;;  %7421 = vmatmul.mubr.msk.bf16.vlgmr.msra.gmra.mrb[64].mxu0 %vm1006_vm1, %v11065_v55  ;;  %7429 = vmatmul.mubr.msk.bf16.vlgmr.msra.gmra.mrb[64].mxu1 %vm1006_vm1, %v11065_v55  ;;  %v2831_v9 = vmul.f32 0.015625, %v2801_v14  ;;  %v11078_v32 = vadd.f32 %v11049_v44, %v2896_v1 }
 0x499   : > { %3588 = vmatpush1.bf16.msra.mxu0 %v8860_v48  ;;  %3701 = vmatpush1.bf16.msra.mxu1 %v8863_v57  ;;  %v2804_v45 = vpop.xlane.xlu1 %2803 }
 0x49a   : > { %v9229_v26 = vpop.eup %9228  ;;  %12696 = vst [vmem:[#allocation18_spill] sm:$0xff] %v11078_v32  ;;  %v2832_v62 = vmul.f32 0.015625, %v2804_v45  ;;  %3123 = vmatprep.mubr.bf16.mxu0 %v12519_v36  ;;  %3236 = vmatprep.mubr.bf16.mxu1 %v12519_v36  ;;  %v2847_v46 = vadd.f32 1e-05, %v2831_v9  ;;  %v11091_v63 = vpack.c.bf16 %v11078_v32, %v11085_v18 }
 0x49b   : > { %3589 = vmatprep.subr.bf16.mxu0 %v8868_v56  ;;  %3702 = vmatprep.subr.bf16.mxu1 %v8871_v37  ;;  %v2875_v54 = vmul.f32 %v9229_v26, %v10948_v13  ;;  %v2807_v30 = vpop.xlane.xlu0 %2806 }
 0x49c   : > { %v9231_v3 = vpop.eup %9230  ;;  %v2848_v8 = vadd.f32 1e-05, %v2832_v62  ;;  %12698 = vst [vmem:[#allocation30_spill] sm:$0xff] %v11091_v63  ;;  %v2833_v50 = vmul.f32 0.015625, %v2807_v30 }
 0x49d   : > { %v2876_v2 = vmul.f32 %v9231_v3, %v10951_v53  ;;  %v2810_v61 = vpop.xlane.xlu1 %2809  ;;  %3590 = vmatpush1.bf16.msra.mxu0 %v8866_v35  ;;  %3703 = vmatpush1.bf16.msra.mxu1 %v8869_v29  ;;  %v8880_v53 = vld [vmem:[%s9542_s23 + $0xe4] ss:$16 sps:$4 sm:$0xff]   ;;  %v2897_v24 = vmul.f32 %v11040_v33, %v2875_v54 }
 0x49e   : > { %9236 = vrsqrt.f32 %v2848_v8  ;;  %v2834_v49 = vmul.f32 0.015625, %v2810_v61  ;;  %3591 = vmatprep.subr.bf16.mxu0 %v8874_v19  ;;  %3704 = vmatprep.subr.bf16.mxu1 %v8877_v25  ;;  %v2849_v4 = vadd.f32 1e-05, %v2833_v50 }
 0x49f   : > { %v2898_v13 = vmul.f32 %v11040_v33, %v2876_v2  ;;  %9238 = vrsqrt.f32 %v2847_v46  ;;  %v11112_v17 = vadd.f32 %v11049_v44, %v2897_v24 }
 0x4a0   : > { %v9233_v34 = vpop.eup %9232  ;;  %7422 = vmatmul.mubr.msk.bf16.gmra.mrb[68].mxu0 %vm1006_vm1, %v11091_v63  ;;  %7430 = vmatmul.mubr.msk.bf16.gmra.mrb[68].mxu1 %vm1006_vm1, %v11091_v63  ;;  %v2850_v22 = vadd.f32 1e-05, %v2834_v49 }
 0x4a1   : > { %v9235_v20 = vpop.eup %9234  ;;  %3133 = vmatprep.mubr.bf16.mxu0 %v12519_v36  ;;  %3246 = vmatprep.mubr.bf16.mxu1 %v12519_v36  ;;  %v11106_v28 = vadd.f32 %v11049_v44, %v2898_v13  ;;  %v2878_v39 = vmul.f32 %v9233_v34, %v10962_v11  ;;  %12700 = vst [vmem:[#allocation34_spill] sm:$0xff] %v11112_v17 }
 0x4a2   : > { %3592 = vmatpush1.bf16.msra.mxu0 %v8872_v16  ;;  %3705 = vmatpush1.bf16.msra.mxu1 %v8875_v0  ;;  %v2877_v21 = vmul.f32 %v9235_v20, %v10956_v59  ;;  %v2813_v40 = vpop.xlane.xlu0 %2812  ;;  %9240 = vrsqrt.f32 %v2850_v22 }
 0x4a3   : > { %12699 = vst [vmem:[#allocation22_spill] sm:$0xff] %v11106_v28  ;;  %3593 = vmatprep.subr.bf16.mxu0 %v8880_v53  ;;  %3706 = vmatprep.subr.bf16.mxu1 %v8883_v43  ;;  %v11117_v10 = vpack.c.bf16 %v11106_v28, %v11112_v17  ;;  %v2900_v11 = vmul.f32 %v11040_v33, %v2878_v39  ;;  %9242 = vrsqrt.f32 %v2849_v4  ;;  %v2835_v38 = vmul.f32 0.015625, %v2813_v40 }
 0x4a4   : > { %v2816_v6 = vpop.xlane.xlu1 %2815  ;;  %v2899_v57 = vmul.f32 %v11040_v33, %v2877_v21 }
 0x4a5   : > { %v2836_v12 = vmul.f32 0.015625, %v2816_v6  ;;  %12701 = vst [vmem:[#allocation24_spill] sm:$0xff] %v11117_v10  ;;  %v11128_v14 = vadd.f32 %v11049_v44, %v2900_v11  ;;  %v2851_v23 = vadd.f32 1e-05, %v2835_v38  ;;  %v8886_v6 = vld [vmem:[%s9557_s3 + $0x100] sm:$0xff]   ;;  %v8888_v11 = vld [vmem:[%s9557_s3 + $0x148] sm:$0xff]  }
 0x4a6   : > { %3594 = vmatpush1.bf16.msra.mxu0 %v8878_v31  ;;  %3707 = vmatpush1.bf16.msra.mxu1 %v8881_v7  ;;  %v11132_v9 = vadd.f32 %v11049_v44, %v2899_v57  ;;  %v2819_v35 = vpop.xlane.xlu0 %2818  ;;  %v8889_v38 = vld [vmem:[%s9557_s3 + $0x1c8] sm:$0xff]  }
 0x4a7   : > { %v2852_v1 = vadd.f32 1e-05, %v2836_v12  ;;  %12702 = vst [vmem:[#allocation12_spill] sm:$0xff] %v11128_v14  ;;  %v2837_v25 = vmul.f32 0.015625, %v2819_v35  ;;  %v8887_v12 = vld [vmem:[%s9557_s3 + $0x180] sm:$0xff]   ;;  %v8891_v57 = vld [vmem:[%s9557_s3 + $0x188] sm:$0xff]  }
 0x4a8   : > { %v9237_v48 = vpop.eup %9236  ;;  %7423 = vmatmul.mubr.msk.bf16.gmra.mrb[72].mxu0 %vm1006_vm1, %v11117_v10  ;;  %7431 = vmatmul.mubr.msk.bf16.gmra.mrb[72].mxu1 %vm1006_vm1, %v11117_v10  ;;  %v2822_v37 = vpop.xlane.xlu1 %2821  ;;  %12703 = vst [vmem:[#allocation26_spill] sm:$0xff] %v11132_v9  ;;  %v11137_v26 = vpack.c.bf16 %v11128_v14, %v11132_v9  ;;  %v8898_v35 = vld [vmem:[%s9557_s3 + $0x118] sm:$0xff]  }
 0x4a9   : > { %v9239_v59 = vpop.eup %9238  ;;  %3143 = vmatprep.mubr.bf16.mxu0 %v12519_v36  ;;  %3256 = vmatprep.mubr.bf16.mxu1 %v12519_v36  ;;  %v2880_v56 = vmul.f32 %v9237_v48, %v10975_v47  ;;  %9244 = vrsqrt.f32 %v2852_v1  ;;  %v2838_v29 = vmul.f32 0.015625, %v2822_v37  ;;  %v2853_v8 = vadd.f32 1e-05, %v2837_v25  ;;  %v8890_v48 = vld [vmem:[%s9557_s3 + $0x108] sm:$0xff]   ;;  %v8893_v1 = vld [vmem:[%s9557_s3 + $0x1d0] sm:$0xff]   ;;  %v8902_v25 = vld [vmem:[%s9557_s3 + $0x120] sm:$0xff]  }
 0x4aa   : > { %v2879_v45 = vmul.f32 %v9239_v59, %v10972_v60  ;;  %12704 = vst [vmem:[#allocation13_spill] sm:$0xff] %v11137_v26  ;;  %9246 = vrsqrt.f32 %v2851_v23  ;;  %v8892_v59 = vld [vmem:[%s9557_s3 + $0x150] sm:$0xff]   ;;  %v8896_v23 = vld [vmem:[%s9557_s3 + $0x158] sm:$0xff]  }
 0x4ab   : > { %v2902_v62 = vmul.f32 %v11040_v33, %v2880_v56  ;;  %v2854_v46 = vadd.f32 1e-05, %v2838_v29  ;;  %v8894_v56 = vld [vmem:[%s9557_s3 + $0x110] sm:$0xff]   ;;  %v8899_v29 = vld [vmem:[%s9557_s3 + $0x198] sm:$0xff]  }
 0x4ac   : > { %v9241_v19 = vpop.eup %9240  ;;  %v2901_v47 = vmul.f32 %v11040_v33, %v2879_v45  ;;  %v8895_v37 = vld [vmem:[%s9557_s3 + $0x190] sm:$0xff]   ;;  %v8897_v45 = vld [vmem:[%s9557_s3 + $0x1d8] sm:$0xff]  }
 0x4ad   : > { %v9243_v60 = vpop.eup %9242  ;;  %v11148_v3 = vadd.f32 %v11049_v44, %v2902_v62  ;;  %v2882_v54 = vmul.f32 %v9241_v19, %v10986_v51  ;;  %9248 = vrsqrt.f32 %v2854_v46  ;;  %v8900_v62 = vld [vmem:[%s9557_s3 + $0x160] sm:$0xff]   ;;  %v8905_v46 = vld [vmem:[%s9557_s3 + $0x1e8] sm:$0xff]  }
 0x4ae   : > { %v11152_v30 = vadd.f32 %v11049_v44, %v2901_v47  ;;  %v2881_v2 = vmul.f32 %v9243_v60, %v10980_v27  ;;  %9250 = vrsqrt.f32 %v2853_v8  ;;  %v8901_v19 = vld [vmem:[%s9557_s3 + $0x1e0] sm:$0xff]   ;;  %v8904_v60 = vld [vmem:[%s9557_s3 + $0x168] sm:$0xff]  }
 0x4af   : > { %12705 = vst [vmem:[#allocation15_spill] sm:$0xff] %v11148_v3  ;;  %v2904_v49 = vmul.f32 %v11040_v33, %v2882_v54  ;;  %v8903_v47 = vld [vmem:[%s9557_s3 + $0x1a0] sm:$0xff]   ;;  %v8906_v54 = vld [vmem:[%s9557_s3 + $0x128] sm:$0xff]  }
 0x4b0   : > { %7424 = vmatmul.mubr.msk.bf16.gmra.mrb[76].mxu0 %vm1006_vm1, %v11137_v26  ;;  %7432 = vmatmul.mubr.msk.bf16.gmra.mrb[76].mxu1 %vm1006_vm1, %v11137_v26  ;;  %12706 = vst [vmem:[#allocation17_spill] sm:$0xff] %v11152_v30  ;;  %v11157_v61 = vpack.c.bf16 %v11148_v3, %v11152_v30  ;;  %v2903_v0 = vmul.f32 %v11040_v33, %v2881_v2  ;;  %v8907_v8 = vld [vmem:[%s9557_s3 + $0x1a8] sm:$0xff]   ;;  %v8908_v2 = vld [vmem:[%s9557_s3 + $0x170] sm:$0xff]  }
 0x4b1   : > { %3153 = vmatprep.mubr.bf16.mxu0 %v12519_v36  ;;  %3266 = vmatprep.mubr.bf16.mxu1 %v12519_v36  ;;  %v11168_v27 = vadd.f32 %v11049_v44, %v2904_v49  ;;  %v8909_v49 = vld [vmem:[%s9557_s3 + $0x1f0] sm:$0xff]  }
 0x4b2   : > { %12707 = vst [vmem:[#allocation27_spill] sm:$0xff] %v11157_v61  ;;  %v11172_v50 = vadd.f32 %v11049_v44, %v2903_v0  ;;  %v8911_v0 = vld [vmem:[%s9557_s3 + $0x1b0] sm:$0xff]  }
 0x4b3   : > { %v9245_v16 = vpop.eup %9244  ;;  %12708 = vst [vmem:[#allocation37_spill] sm:$0xff] %v11168_v27 }
 0x4b4   : > { %v9247_v51 = vpop.eup %9246  ;;  %v2884_v13 = vmul.f32 %v9245_v16, %v11003_v15  ;;  %12709 = vst [vmem:[#allocation31_spill] sm:$0xff] %v11172_v50  ;;  %v11177_v43 = vpack.c.bf16 %v11168_v27, %v11172_v50  ;;  %v8910_v16 = vld [vmem:[%s9557_s3 + $0x130] sm:$0xff]  }
 0x4b5   : > { %v2883_v53 = vmul.f32 %v9247_v51, %v10996_v58  ;;  %v8912_v51 = vld [vmem:[%s9557_s3 + $0x178] sm:$0xff]  }
 0x4b6   : > { %12710 = vst [vmem:[#allocation19_spill] sm:$0xff] %v11177_v43  ;;  %v2906_v34 = vmul.f32 %v11040_v33, %v2884_v13  ;;  %v8913_v13 = vld [vmem:[%s9557_s3 + $0x1f8] sm:$0xff]  }
 0x4b7   : > { %v9249_v24 = vpop.eup %9248  ;;  %v2905_v20 = vmul.f32 %v11040_v33, %v2883_v53  ;;  %v8914_v53 = vld [vmem:[%s9557_s3 + $0x138] sm:$0xff]  }
 0x4b8   : > { %7425 = vmatmul.mubr.msk.bf16.gmra.mrb[80].mxu0 %vm1006_vm1, %v11157_v61  ;;  %7433 = vmatmul.mubr.msk.bf16.gmra.mrb[80].mxu1 %vm1006_vm1, %v11157_v61  ;;  %v9251_v15 = vpop.eup %9250  ;;  %v11188_v58 = vadd.f32 %v11049_v44, %v2906_v34  ;;  %v2886_v22 = vmul.f32 %v9249_v24, %v11014_v52  ;;  %v8915_v34 = vld [vmem:[%s9557_s3 + $0x1b8] sm:$0xff]   ;;  %v8916_v24 = vld [vmem:[%s9557_s3 + $0x40] sm:$0xff]  }
 0x4b9   : > { %3163 = vmatprep.mubr.bf16.mxu0 %v12519_v36  ;;  %3276 = vmatprep.mubr.bf16.mxu1 %v12519_v36  ;;  %v11192_v39 = vadd.f32 %v11049_v44, %v2905_v20  ;;  %v2885_v31 = vmul.f32 %v9251_v15, %v11008_v42  ;;  %v8917_v20 = vld [vmem:[%s9557_s3 + $0xc0] sm:$0xff]   ;;  %v2957_v15 = vlaneseq }
 0x4ba   : > { %12711 = vst [vmem:[#allocation21_spill] sm:$0xff] %v11188_v58  ;;  %v2908_v4 = vmul.f32 %v11040_v33, %v2886_v22 }
 0x4bb   : > { %12712 = vst [vmem:[#allocation35_spill] sm:$0xff] %v11192_v39  ;;  %v11197_v7 = vpack.c.bf16 %v11188_v58, %v11192_v39  ;;  %v2907_v21 = vmul.f32 %v11040_v33, %v2885_v31  ;;  %v8884_v33 = vld [vmem:[%s9557_s3 + $0x140] sm:$0xff]   ;;  %v2958_v22 = vshrl.u32 %v2957_v15, 7 }
 0x4bc   : > { %v11208_v42 = vadd.f32 %v11049_v44, %v2908_v4  ;;  %8027 = vmatprep.subr.bf16.mxu0 %v8884_v33 }
 0x4bd   : > { %12713 = vst [vmem:[#allocation36_spill] sm:$0xff] %v11197_v7  ;;  %v11211_v52 = vadd.f32 %v11049_v44, %v2907_v21  ;;  %v8885_v44 = vld [vmem:[%s9557_s3 + $0x1c0] sm:$0xff]   ;;  %v11303_v31 = vsub.s32 0, %v2958_v22  ;;  %v11305_v4 = vsub.s32 2, %v2958_v22  ;;  %v11308_v33 = vsub.s32 1, %v2958_v22 }
 0x4be   : > { %12714 = vst [vmem:[#allocation40_spill] sm:$0xff] %v11208_v42  ;;  %8091 = vmatprep.subr.bf16.mxu1 %v8885_v44  ;;  %v2955_v21 = vld [vmem:[%s12717_s7] sm:$0xf]  ;;  %v11310_v44 = vsub.s32 3, %v2958_v22 }
 0x4bf   : > { %12715 = vst [vmem:[#allocation38_spill] sm:$0xff] %v11211_v52  ;;  %v11215_v40 = vpack.c.bf16 %v11208_v42, %v11211_v52  ;;  %12718 = vst [vmem:[#allocation41_spill] sm:$0xff] %v11303_v31 }
 0x4c0   : > { %7426 = vmatmul.mubr.msk.bf16.gmra.mrb[84].mxu0 %vm1006_vm1, %v11177_v43  ;;  %7434 = vmatmul.mubr.msk.bf16.gmra.mrb[84].mxu1 %vm1006_vm1, %v11177_v43  ;;  %12719 = vst [vmem:[#allocation23_spill] sm:$0xff] %v11305_v4  ;;  %12720 = vst [vmem:[#allocation25_spill] sm:$0xff] %v11308_v33 }
 0x4c1   : > { %3173 = vmatprep.mubr.bf16.mxu0 %v12519_v36  ;;  %3286 = vmatprep.mubr.bf16.mxu1 %v12519_v36  ;;  %12716 = vst [vmem:[#allocation39_spill] sm:$0xff] %v11215_v40  ;;  %12721 = vst [vmem:[#allocation46_spill] sm:$0xff] %v11310_v44 }
 0x4c8   : > { %7427 = vmatmul.mubr.msk.bf16.gmra.mrb[88].mxu0 %vm1006_vm1, %v11197_v7  ;;  %7435 = vmatmul.mubr.msk.bf16.gmra.mrb[88].mxu1 %vm1006_vm1, %v11197_v7 }
 0x4c9   : > { %3183 = vmatprep.mubr.bf16.mxu0 %v12519_v36  ;;  %3296 = vmatprep.mubr.bf16.mxu1 %v12519_v36 }
 0x4d0   : > { %7428 = vmatmul.mubr.msk.bf16.gmra.mrb[92].mxu0 %vm1006_vm1, %v11215_v40  ;;  %7436 = vmatmul.mubr.msk.bf16.gmra.mrb[92].mxu1 %vm1006_vm1, %v11215_v40 }
 0x4d1   : > { %3619 = vmatprep.mubr.bf16.mxu0 %v12519_v36  ;;  %3732 = vmatprep.mubr.bf16.mxu1 %v12519_v36 }
 0x4d8   : > { %7470 = vmatmul.mubr.msk.bf16.vlgmr.msra.gmra.mrb[96].mxu0 %vm1006_vm1, %v11065_v55  ;;  %7478 = vmatmul.mubr.msk.bf16.vlgmr.msra.gmra.mrb[96].mxu1 %vm1006_vm1, %v11065_v55 }
 0x4d9   : > { %3629 = vmatprep.mubr.bf16.mxu0 %v12519_v36  ;;  %3742 = vmatprep.mubr.bf16.mxu1 %v12519_v36 }
 0x4da   : > { %8028 = vmatpush3.bf16.msra.mxu0 %v8886_v6  ;;  %8092 = vmatpush3.bf16.msra.mxu1 %v8887_v12  ;;  %v11313_v6 = vrot.slane %v2955_v21, %v11303_v31  ;;  %v11316_v12 = vrot.slane %v2955_v21, %v11305_v4 }
 0x4db   : > { %8029 = vmatprep.subr.bf16.mxu0 %v8888_v11  ;;  %8093 = vmatprep.subr.bf16.mxu1 %v8889_v38  ;;  %v11319_v11 = vrot.slane %v2955_v21, %v11308_v33  ;;  %v11322_v38 = vrot.slane %v2955_v21, %v11310_v44 }
 0x4de   : > { %8030 = vmatpush3.bf16.msra.mxu0 %v8890_v48  ;;  %8094 = vmatpush3.bf16.msra.mxu1 %v8891_v57 }
 0x4df   : > { %8031 = vmatprep.subr.bf16.mxu0 %v8892_v59  ;;  %8095 = vmatprep.subr.bf16.mxu1 %v8893_v1 }
 0x4e0   : > { %7471 = vmatmul.mubr.msk.bf16.gmra.mrb[100].mxu0 %vm1006_vm1, %v11091_v63  ;;  %7479 = vmatmul.mubr.msk.bf16.gmra.mrb[100].mxu1 %vm1006_vm1, %v11091_v63 }
 0x4e1   : > { %3639 = vmatprep.mubr.bf16.mxu0 %v12519_v36  ;;  %3752 = vmatprep.mubr.bf16.mxu1 %v12519_v36 }
 0x4e2   : > { %8032 = vmatpush3.bf16.msra.mxu0 %v8894_v56  ;;  %8096 = vmatpush3.bf16.msra.mxu1 %v8895_v37 }
 0x4e3   : > { %8033 = vmatprep.subr.bf16.mxu0 %v8896_v23  ;;  %8097 = vmatprep.subr.bf16.mxu1 %v8897_v45 }
 0x4e6   : > { %8034 = vmatpush3.bf16.msra.mxu0 %v8898_v35  ;;  %8098 = vmatpush3.bf16.msra.mxu1 %v8899_v29 }
 0x4e7   : > { %8035 = vmatprep.subr.bf16.mxu0 %v8900_v62  ;;  %8099 = vmatprep.subr.bf16.mxu1 %v8901_v19 }
 0x4e8   : > { %7472 = vmatmul.mubr.msk.bf16.gmra.mrb[104].mxu0 %vm1006_vm1, %v11117_v10  ;;  %7480 = vmatmul.mubr.msk.bf16.gmra.mrb[104].mxu1 %vm1006_vm1, %v11117_v10 }
 0x4e9   : > { %3649 = vmatprep.mubr.bf16.mxu0 %v12519_v36  ;;  %3762 = vmatprep.mubr.bf16.mxu1 %v12519_v36 }
 0x4ea   : > { %8036 = vmatpush3.bf16.msra.mxu0 %v8902_v25  ;;  %8100 = vmatpush3.bf16.msra.mxu1 %v8903_v47 }
 0x4eb   : > { %8037 = vmatprep.subr.bf16.mxu0 %v8904_v60  ;;  %8101 = vmatprep.subr.bf16.mxu1 %v8905_v46 }
 0x4ee   : > { %8038 = vmatpush3.bf16.msra.mxu0 %v8906_v54  ;;  %8102 = vmatpush3.bf16.msra.mxu1 %v8907_v8 }
 0x4ef   : > { %8039 = vmatprep.subr.bf16.mxu0 %v8908_v2  ;;  %8103 = vmatprep.subr.bf16.mxu1 %v8909_v49 }
 0x4f0   : > { %7473 = vmatmul.mubr.msk.bf16.gmra.mrb[108].mxu0 %vm1006_vm1, %v11137_v26  ;;  %7481 = vmatmul.mubr.msk.bf16.gmra.mrb[108].mxu1 %vm1006_vm1, %v11137_v26  ;;  %v8919_v26 = vld [vmem:[%s9557_s3 + $0x80] sm:$0xff]  }
 0x4f1   : > { %3659 = vmatprep.mubr.bf16.mxu0 %v12519_v36  ;;  %3772 = vmatprep.mubr.bf16.mxu1 %v12519_v36 }
 0x4f2   : > { %8040 = vmatpush3.bf16.msra.mxu0 %v8910_v16  ;;  %8104 = vmatpush3.bf16.msra.mxu1 %v8911_v0 }
 0x4f3   : > { %8041 = vmatprep.subr.bf16.mxu0 %v8912_v51  ;;  %8105 = vmatprep.subr.bf16.mxu1 %v8913_v13 }
 0x4f6   : > { %8042 = vmatpush3.bf16.msra.mxu0 %v8914_v53  ;;  %8106 = vmatpush3.bf16.msra.mxu1 %v8915_v34 }
 0x4f7   : > { %8155 = vmatprep.subr.bf16.mxu0 %v8916_v24  ;;  %8219 = vmatprep.subr.bf16.mxu1 %v8917_v20 }
 0x4f8   : > { %7474 = vmatmul.mubr.msk.bf16.gmra.mrb[112].mxu0 %vm1006_vm1, %v11157_v61  ;;  %7482 = vmatmul.mubr.msk.bf16.gmra.mrb[112].mxu1 %vm1006_vm1, %v11157_v61  ;;  %v8918_v61 = vld [vmem:[%s9557_s3] sm:$0xff]  }
 0x4f9   : > { %3669 = vmatprep.mubr.bf16.mxu0 %v12519_v36  ;;  %3782 = vmatprep.mubr.bf16.mxu1 %v12519_v36 }
 0x500   : > { %7475 = vmatmul.mubr.msk.bf16.gmra.mrb[116].mxu0 %vm1006_vm1, %v11177_v43  ;;  %7483 = vmatmul.mubr.msk.bf16.gmra.mrb[116].mxu1 %vm1006_vm1, %v11177_v43 }
 0x501   : > { %3679 = vmatprep.mubr.bf16.mxu0 %v12519_v36  ;;  %3792 = vmatprep.mubr.bf16.mxu1 %v12519_v36 }
 0x508   : > { %7476 = vmatmul.mubr.msk.bf16.gmra.mrb[120].mxu0 %vm1006_vm1, %v11197_v7  ;;  %7484 = vmatmul.mubr.msk.bf16.gmra.mrb[120].mxu1 %vm1006_vm1, %v11197_v7 }
 0x509   : > { %3689 = vmatprep.mubr.bf16.mxu0 %v12519_v36  ;;  %3802 = vmatprep.mubr.bf16.mxu1 %v12519_v36 }
 0x510   : > { %7477 = vmatmul.mubr.msk.bf16.gmra.mrb[124].mxu0 %vm1006_vm1, %v11215_v40  ;;  %7485 = vmatmul.mubr.msk.bf16.gmra.mrb[124].mxu1 %vm1006_vm1, %v11215_v40 }
 0x56b   : > { %v3115_v48 = vpop.f32.mrb[64].mxu0  ;;  %v3228_v57 = vpop.f32.mrb[64].mxu1 }
 0x56c   : > { %v3116_v59 = vadd.f32 %v3115_v48, %v11313_v6  ;;  %v3229_v1 = vadd.f32 %v3228_v57, %v11316_v12  ;;  %v3117_v56 = vpop.f32.mrb[65].mxu0  ;;  %v3230_v37 = vpop.f32.mrb[65].mxu1 }
 0x56d   : > { %v3118_v23 = vadd.f32 %v3117_v56, %v11319_v11  ;;  %v3231_v45 = vadd.f32 %v3230_v37, %v11322_v38  ;;  %v3119_v35 = vpop.f32.mrb[66].mxu0  ;;  %v3232_v29 = vpop.f32.mrb[66].mxu1 }
 0x56e   : > { %v3120_v62 = vadd.f32 %v3119_v35, %v11313_v6  ;;  %v3233_v19 = vadd.f32 %v3232_v29, %v11316_v12  ;;  %v3121_v25 = vpop.f32.mrb[67].mxu0  ;;  %v3234_v47 = vpop.f32.mrb[67].mxu1  ;;  %v3307_v54 = vmax.f32 %v3116_v59, 0.0  ;;  %v3309_v8 = vmax.f32 %v3229_v1, 0.0 }
 0x56f   : > { %v3122_v60 = vadd.f32 %v3121_v25, %v11319_v11  ;;  %v3235_v46 = vadd.f32 %v3234_v47, %v11322_v38  ;;  %v3308_v16 = vmax.f32 %v3118_v23, 0.0  ;;  %v3310_v0 = vmax.f32 %v3231_v45, 0.0 }
 0x570   : > { %v3311_v2 = vmax.f32 %v3120_v62, 0.0  ;;  %v3313_v49 = vmax.f32 %v3233_v19, 0.0 }
 0x571   : > { %v3312_v51 = vmax.f32 %v3122_v60, 0.0  ;;  %v3314_v13 = vmax.f32 %v3235_v46, 0.0 }
 0x572   : > { %v11332_v53 = vpack.c.bf16 %v3311_v2, %v3307_v54  ;;  %v11334_v34 = vpack.c.bf16 %v3313_v49, %v3309_v8 }
 0x573   : > { %v11336_v24 = vpack.c.bf16 %v3312_v51, %v3308_v16  ;;  %v11338_v20 = vpack.c.bf16 %v3314_v13, %v3310_v0  ;;  %v3125_v15 = vpop.f32.mrb[68].mxu0  ;;  %v3238_v22 = vpop.f32.mrb[68].mxu1 }
 0x574   : > { %v3126_v21 = vadd.f32 %v3125_v15, %v11313_v6  ;;  %v3239_v48 = vadd.f32 %v3238_v22, %v11316_v12  ;;  %v3127_v57 = vpop.f32.mrb[69].mxu0  ;;  %v3240_v59 = vpop.f32.mrb[69].mxu1 }
 0x575   : > { %v3128_v1 = vadd.f32 %v3127_v57, %v11319_v11  ;;  %v3241_v56 = vadd.f32 %v3240_v59, %v11322_v38  ;;  %v3129_v37 = vpop.f32.mrb[70].mxu0  ;;  %v3242_v23 = vpop.f32.mrb[70].mxu1 }
 0x576   : > { %v3130_v45 = vadd.f32 %v3129_v37, %v11313_v6  ;;  %v3243_v35 = vadd.f32 %v3242_v23, %v11316_v12  ;;  %v3131_v29 = vpop.f32.mrb[71].mxu0  ;;  %v3244_v62 = vpop.f32.mrb[71].mxu1  ;;  %v3315_v47 = vmax.f32 %v3126_v21, 0.0  ;;  %v3317_v60 = vmax.f32 %v3239_v48, 0.0 }
 0x577   : > { %v3132_v19 = vadd.f32 %v3131_v29, %v11319_v11  ;;  %v3245_v25 = vadd.f32 %v3244_v62, %v11322_v38  ;;  %v3316_v8 = vmax.f32 %v3128_v1, 0.0  ;;  %v3318_v2 = vmax.f32 %v3241_v56, 0.0 }
 0x578   : > { %v3319_v46 = vmax.f32 %v3130_v45, 0.0  ;;  %v3321_v54 = vmax.f32 %v3243_v35, 0.0 }
 0x579   : > { %v3320_v49 = vmax.f32 %v3132_v19, 0.0  ;;  %v3322_v16 = vmax.f32 %v3245_v25, 0.0 }
 0x57a   : > { %v11348_v0 = vpack.c.bf16 %v3319_v46, %v3315_v47  ;;  %v11350_v51 = vpack.c.bf16 %v3321_v54, %v3317_v60 }
 0x57b   : > { %v11352_v13 = vpack.c.bf16 %v3320_v49, %v3316_v8  ;;  %v11354_v15 = vpack.c.bf16 %v3322_v16, %v3318_v2  ;;  %v3135_v22 = vpop.f32.mrb[72].mxu0  ;;  %v3248_v57 = vpop.f32.mrb[72].mxu1 }
 0x57c   : > { %v3136_v59 = vadd.f32 %v3135_v22, %v11313_v6  ;;  %v3249_v21 = vadd.f32 %v3248_v57, %v11316_v12  ;;  %v3137_v48 = vpop.f32.mrb[73].mxu0  ;;  %v3250_v37 = vpop.f32.mrb[73].mxu1 }
 0x57d   : > { %v3138_v1 = vadd.f32 %v3137_v48, %v11319_v11  ;;  %v3251_v56 = vadd.f32 %v3250_v37, %v11322_v38  ;;  %v3139_v23 = vpop.f32.mrb[74].mxu0  ;;  %v3252_v45 = vpop.f32.mrb[74].mxu1 }
 0x57e   : > { %v3140_v35 = vadd.f32 %v3139_v23, %v11313_v6  ;;  %v3253_v29 = vadd.f32 %v3252_v45, %v11316_v12  ;;  %v3141_v62 = vpop.f32.mrb[75].mxu0  ;;  %v3254_v19 = vpop.f32.mrb[75].mxu1  ;;  %v3323_v60 = vmax.f32 %v3136_v59, 0.0  ;;  %v3325_v46 = vmax.f32 %v3249_v21, 0.0 }
 0x57f   : > { %v3142_v25 = vadd.f32 %v3141_v62, %v11319_v11  ;;  %v3255_v47 = vadd.f32 %v3254_v19, %v11322_v38  ;;  %v3324_v2 = vmax.f32 %v3138_v1, 0.0  ;;  %v3326_v49 = vmax.f32 %v3251_v56, 0.0 }
 0x580   : > { %v3327_v54 = vmax.f32 %v3140_v35, 0.0  ;;  %v3329_v8 = vmax.f32 %v3253_v29, 0.0 }
 0x581   : > { %v3328_v16 = vmax.f32 %v3142_v25, 0.0  ;;  %v3330_v22 = vmax.f32 %v3255_v47, 0.0 }
 0x582   : > { %v11364_v57 = vpack.c.bf16 %v3327_v54, %v3323_v60  ;;  %v11366_v48 = vpack.c.bf16 %v3329_v8, %v3325_v46 }
 0x583   : > { %v11368_v37 = vpack.c.bf16 %v3328_v16, %v3324_v2  ;;  %v11370_v23 = vpack.c.bf16 %v3330_v22, %v3326_v49  ;;  %v3145_v45 = vpop.f32.mrb[76].mxu0  ;;  %v3258_v62 = vpop.f32.mrb[76].mxu1 }
 0x584   : > { %v3146_v19 = vadd.f32 %v3145_v45, %v11313_v6  ;;  %v3259_v59 = vadd.f32 %v3258_v62, %v11316_v12  ;;  %v3147_v21 = vpop.f32.mrb[77].mxu0  ;;  %v3260_v35 = vpop.f32.mrb[77].mxu1 }
 0x585   : > { %v3148_v1 = vadd.f32 %v3147_v21, %v11319_v11  ;;  %v3261_v56 = vadd.f32 %v3260_v35, %v11322_v38  ;;  %v3149_v29 = vpop.f32.mrb[78].mxu0  ;;  %v3262_v25 = vpop.f32.mrb[78].mxu1 }
 0x586   : > { %v3150_v47 = vadd.f32 %v3149_v29, %v11313_v6  ;;  %v3263_v60 = vadd.f32 %v3262_v25, %v11316_v12  ;;  %v3151_v46 = vpop.f32.mrb[79].mxu0  ;;  %v3264_v54 = vpop.f32.mrb[79].mxu1  ;;  %v3331_v49 = vmax.f32 %v3146_v19, 0.0  ;;  %v3333_v16 = vmax.f32 %v3259_v59, 0.0 }
 0x587   : > { %v3152_v8 = vadd.f32 %v3151_v46, %v11319_v11  ;;  %v3265_v2 = vadd.f32 %v3264_v54, %v11322_v38  ;;  %v3332_v62 = vmax.f32 %v3148_v1, 0.0  ;;  %v3334_v21 = vmax.f32 %v3261_v56, 0.0 }
 0x588   : > { %v3335_v22 = vmax.f32 %v3150_v47, 0.0  ;;  %v3337_v45 = vmax.f32 %v3263_v60, 0.0 }
 0x589   : > { %v3336_v36 = vmax.f32 %v3152_v8, 0.0  ;;  %v3338_v35 = vmax.f32 %v3265_v2, 0.0 }
 0x58a   : > { %v11380_v42 = vpack.c.bf16 %v3335_v22, %v3331_v49  ;;  %v11382_v52 = vpack.c.bf16 %v3337_v45, %v3333_v16 }
 0x58b   : > { %v11384_v29 = vpack.c.bf16 %v3336_v36, %v3332_v62  ;;  %v11386_v25 = vpack.c.bf16 %v3338_v35, %v3334_v21  ;;  %v3155_v58 = vpop.f32.mrb[80].mxu0  ;;  %v3268_v46 = vpop.f32.mrb[80].mxu1 }
 0x58c   : > { %v3156_v54 = vadd.f32 %v3155_v58, %v11313_v6  ;;  %v3269_v19 = vadd.f32 %v3268_v46, %v11316_v12  ;;  %v3157_v59 = vpop.f32.mrb[81].mxu0  ;;  %v3270_v47 = vpop.f32.mrb[81].mxu1 }
 0x58d   : > { %v3158_v1 = vadd.f32 %v3157_v59, %v11319_v11  ;;  %v3271_v56 = vadd.f32 %v3270_v47, %v11322_v38  ;;  %v3159_v60 = vpop.f32.mrb[82].mxu0  ;;  %v3272_v8 = vpop.f32.mrb[82].mxu1 }
 0x58e   : > { %v3160_v2 = vadd.f32 %v3159_v60, %v11313_v6  ;;  %v3273_v36 = vadd.f32 %v3272_v8, %v11316_v12  ;;  %v3161_v49 = vpop.f32.mrb[83].mxu0  ;;  %v3274_v16 = vpop.f32.mrb[83].mxu1  ;;  %v3339_v45 = vmax.f32 %v3156_v54, 0.0  ;;  %v3341_v62 = vmax.f32 %v3269_v19, 0.0 }
 0x58f   : > { %v3162_v22 = vadd.f32 %v3161_v49, %v11319_v11  ;;  %v3275_v58 = vadd.f32 %v3274_v16, %v11322_v38  ;;  %v3340_v46 = vmax.f32 %v3158_v1, 0.0  ;;  %v3342_v59 = vmax.f32 %v3271_v56, 0.0 }
 0x590   : > { %v3343_v21 = vmax.f32 %v3160_v2, 0.0  ;;  %v3345_v35 = vmax.f32 %v3273_v36, 0.0 }
 0x591   : > { %v3344_v39 = vmax.f32 %v3162_v22, 0.0  ;;  %v3346_v47 = vmax.f32 %v3275_v58, 0.0 }
 0x592   : > { %v11396_v27 = vpack.c.bf16 %v3343_v21, %v3339_v45  ;;  %v11398_v50 = vpack.c.bf16 %v3345_v35, %v3341_v62 }
 0x593   : > { %v11400_v60 = vpack.c.bf16 %v3344_v39, %v3340_v46  ;;  %v11402_v8 = vpack.c.bf16 %v3346_v47, %v3342_v59  ;;  %v3165_v3 = vpop.f32.mrb[84].mxu0  ;;  %v3278_v49 = vpop.f32.mrb[84].mxu1 }
 0x594   : > { %v3166_v16 = vadd.f32 %v3165_v3, %v11313_v6  ;;  %v3279_v54 = vadd.f32 %v3278_v49, %v11316_v12  ;;  %v3167_v19 = vpop.f32.mrb[85].mxu0  ;;  %v3280_v2 = vpop.f32.mrb[85].mxu1 }
 0x595   : > { %v3168_v1 = vadd.f32 %v3167_v19, %v11319_v11  ;;  %v3281_v56 = vadd.f32 %v3280_v2, %v11322_v38  ;;  %v3169_v36 = vpop.f32.mrb[86].mxu0  ;;  %v3282_v22 = vpop.f32.mrb[86].mxu1 }
 0x596   : > { %v3170_v58 = vadd.f32 %v3169_v36, %v11313_v6  ;;  %v3283_v39 = vadd.f32 %v3282_v22, %v11316_v12  ;;  %v3171_v45 = vpop.f32.mrb[87].mxu0  ;;  %v3284_v62 = vpop.f32.mrb[87].mxu1  ;;  %v3347_v35 = vmax.f32 %v3166_v16, 0.0  ;;  %v3349_v46 = vmax.f32 %v3279_v54, 0.0 }
 0x597   : > { %v3172_v21 = vadd.f32 %v3171_v45, %v11319_v11  ;;  %v3285_v3 = vadd.f32 %v3284_v62, %v11322_v38  ;;  %v3348_v49 = vmax.f32 %v3168_v1, 0.0  ;;  %v3350_v19 = vmax.f32 %v3281_v56, 0.0 }
 0x598   : > { %v3351_v59 = vmax.f32 %v3170_v58, 0.0  ;;  %v3353_v47 = vmax.f32 %v3283_v39, 0.0 }
 0x599   : > { %v3352_v30 = vmax.f32 %v3172_v21, 0.0  ;;  %v3354_v2 = vmax.f32 %v3285_v3, 0.0 }
 0x59a   : > { %v11412_v14 = vpack.c.bf16 %v3351_v59, %v3347_v35  ;;  %v11414_v9 = vpack.c.bf16 %v3353_v47, %v3349_v46 }
 0x59b   : > { %v11416_v36 = vpack.c.bf16 %v3352_v30, %v3348_v49  ;;  %v11418_v22 = vpack.c.bf16 %v3354_v2, %v3350_v19  ;;  %v3175_v28 = vpop.f32.mrb[88].mxu0  ;;  %v3288_v45 = vpop.f32.mrb[88].mxu1 }
 0x59c   : > { %v3176_v62 = vadd.f32 %v3175_v28, %v11313_v6  ;;  %v3289_v16 = vadd.f32 %v3288_v45, %v11316_v12  ;;  %v3177_v54 = vpop.f32.mrb[89].mxu0  ;;  %v3290_v58 = vpop.f32.mrb[89].mxu1 }
 0x59d   : > { %v3178_v1 = vadd.f32 %v3177_v54, %v11319_v11  ;;  %v3291_v56 = vadd.f32 %v3290_v58, %v11322_v38  ;;  %v3179_v39 = vpop.f32.mrb[90].mxu0  ;;  %v3292_v21 = vpop.f32.mrb[90].mxu1 }
 0x59e   : > { %v3180_v3 = vadd.f32 %v3179_v39, %v11313_v6  ;;  %v3293_v30 = vadd.f32 %v3292_v21, %v11316_v12  ;;  %v3181_v35 = vpop.f32.mrb[91].mxu0  ;;  %v3294_v46 = vpop.f32.mrb[91].mxu1  ;;  %v3355_v47 = vmax.f32 %v3176_v62, 0.0  ;;  %v3357_v49 = vmax.f32 %v3289_v16, 0.0 }
 0x59f   : > { %v3182_v59 = vadd.f32 %v3181_v35, %v11319_v11  ;;  %v3295_v28 = vadd.f32 %v3294_v46, %v11322_v38  ;;  %v3356_v45 = vmax.f32 %v3178_v1, 0.0  ;;  %v3358_v54 = vmax.f32 %v3291_v56, 0.0 }
 0x5a0   : > { %v3359_v19 = vmax.f32 %v3180_v3, 0.0  ;;  %v3361_v2 = vmax.f32 %v3293_v30, 0.0 }
 0x5a1   : > { %v3360_v58 = vmax.f32 %v3182_v59, 0.0  ;;  %v3362_v17 = vmax.f32 %v3295_v28, 0.0 }
 0x5a2   : > { %v11428_v32 = vpack.c.bf16 %v3359_v19, %v3355_v47  ;;  %v11430_v39 = vpack.c.bf16 %v3361_v2, %v3357_v49  ;;  %v11444_v19 = vrot.slane %v7453_v41, %v11303_v31  ;;  %v11447_v2 = vrot.slane %v7453_v41, %v11305_v4 }
 0x5a3   : > { %v11432_v21 = vpack.c.bf16 %v3360_v58, %v3356_v45  ;;  %v11434_v18 = vpack.c.bf16 %v3362_v17, %v3358_v54  ;;  %v3185_v35 = vpop.f32.mrb[92].mxu0  ;;  %v3298_v5 = vpop.f32.mrb[92].mxu1  ;;  %v11452_v54 = vrot.slane %v7453_v41, %v11308_v33  ;;  %v11455_v58 = vrot.slane %v7453_v41, %v11310_v44 }
 0x5a4   : > { %v3186_v62 = vadd.f32 %v3185_v35, %v11313_v6  ;;  %v3299_v16 = vadd.f32 %v3298_v5, %v11316_v12  ;;  %v3187_v3 = vpop.f32.mrb[93].mxu0  ;;  %v3300_v1 = vpop.f32.mrb[93].mxu1 }
 0x5a5   : > { %v3188_v56 = vadd.f32 %v3187_v3, %v11319_v11  ;;  %v3301_v30 = vadd.f32 %v3300_v1, %v11322_v38  ;;  %v3189_v46 = vpop.f32.mrb[94].mxu0  ;;  %v3302_v59 = vpop.f32.mrb[94].mxu1 }
 0x5a6   : > { %v3190_v28 = vadd.f32 %v3189_v46, %v11313_v6  ;;  %v3303_v17 = vadd.f32 %v3302_v59, %v11316_v12  ;;  %v3191_v47 = vpop.f32.mrb[95].mxu0  ;;  %v3304_v49 = vpop.f32.mrb[95].mxu1  ;;  %v3363_v6 = vmax.f32 %v3186_v62, 0.0  ;;  %v3365_v12 = vmax.f32 %v3299_v16, 0.0 }
 0x5a7   : > { %v3192_v5 = vadd.f32 %v3191_v47, %v11319_v11  ;;  %v3305_v45 = vadd.f32 %v3304_v49, %v11322_v38  ;;  %v3364_v1 = vmax.f32 %v3188_v56, 0.0  ;;  %v3366_v46 = vmax.f32 %v3301_v30, 0.0 }
 0x5a8   : > { %v3367_v35 = vmax.f32 %v3190_v28, 0.0  ;;  %v3369_v3 = vmax.f32 %v3303_v17, 0.0 }
 0x5a9   : > { %v3368_v59 = vmax.f32 %v3192_v5, 0.0  ;;  %v3370_v31 = vmax.f32 %v3305_v45, 0.0 }
 0x5aa   : > { %v11457_v4 = vpack.c.bf16 %v3367_v35, %v3363_v6  ;;  %v11459_v40 = vpack.c.bf16 %v3369_v3, %v3365_v12 }
 0x5ab   : > { %v11461_v11 = vpack.c.bf16 %v3368_v59, %v3364_v1  ;;  %v11463_v38 = vpack.c.bf16 %v3370_v31, %v3366_v46  ;;  %v3621_v47 = vpop.f32.mrb[96].mxu0  ;;  %v3734_v49 = vpop.f32.mrb[96].mxu1 }
 0x5ac   : > { %v3622_v41 = vadd.f32 %v3621_v47, %v11444_v19  ;;  %v3735_v62 = vadd.f32 %v3734_v49, %v11447_v2  ;;  %v3623_v16 = vpop.f32.mrb[97].mxu0  ;;  %v3736_v28 = vpop.f32.mrb[97].mxu1 }
 0x5ad   : > { %v3624_v56 = vadd.f32 %v3623_v16, %v11452_v54  ;;  %v3737_v30 = vadd.f32 %v3736_v28, %v11455_v58  ;;  %v3625_v17 = vpop.f32.mrb[98].mxu0  ;;  %v3738_v5 = vpop.f32.mrb[98].mxu1 }
 0x5ae   : > { %v3626_v45 = vadd.f32 %v3625_v17, %v11444_v19  ;;  %v3739_v6 = vadd.f32 %v3738_v5, %v11447_v2  ;;  %v3627_v31 = vpop.f32.mrb[99].mxu0  ;;  %v3740_v12 = vpop.f32.mrb[99].mxu1  ;;  %v3813_v1 = vmax.f32 %v3622_v41, 0.0  ;;  %v3815_v46 = vmax.f32 %v3735_v62, 0.0 }
 0x5af   : > { %v3628_v35 = vadd.f32 %v3627_v31, %v11452_v54  ;;  %v3741_v3 = vadd.f32 %v3740_v12, %v11455_v58  ;;  %v3814_v49 = vmax.f32 %v3624_v56, 0.0  ;;  %v3816_v16 = vmax.f32 %v3737_v30, 0.0  ;;  %v8920_v56 = vld [vmem:[%s9557_s3 + $0x48] sm:$0xff]  }
 0x5b0   : > { %v3817_v59 = vmax.f32 %v3626_v45, 0.0  ;;  %v3819_v47 = vmax.f32 %v3739_v6, 0.0  ;;  %v8921_v6 = vld [vmem:[%s9557_s3 + $0xc8] sm:$0xff]  }
 0x5b1   : > { %v3818_v28 = vmax.f32 %v3628_v35, 0.0  ;;  %v3820_v17 = vmax.f32 %v3741_v3, 0.0 }
 0x5b2   : > { %v3877_v44 = vpack.c.bf16 %v3817_v59, %v3813_v1  ;;  %v3879_v5 = vpack.c.bf16 %v3819_v47, %v3815_v46 }
 0x5b3   : > { %v3878_v33 = vpack.c.bf16 %v3818_v28, %v3814_v49  ;;  %v3880_v7 = vpack.c.bf16 %v3820_v17, %v3816_v16  ;;  %v3631_v43 = vpop.f32.mrb[100].mxu0  ;;  %v3744_v31 = vpop.f32.mrb[100].mxu1  ;;  %v8922_v28 = vld [vmem:[%s9557_s3 + $0x8] sm:$0xff]  }
 0x5b4   : > { %v3632_v12 = vadd.f32 %v3631_v43, %v11444_v19  ;;  %v3745_v41 = vadd.f32 %v3744_v31, %v11447_v2  ;;  %v3633_v62 = vpop.f32.mrb[101].mxu0  ;;  %v3746_v45 = vpop.f32.mrb[101].mxu1  ;;  %v8923_v17 = vld [vmem:[%s9557_s3 + $0x88] sm:$0xff]  }
 0x5b5   : > { %v3634_v30 = vadd.f32 %v3633_v62, %v11452_v54  ;;  %v3747_v35 = vadd.f32 %v3746_v45, %v11455_v58  ;;  %v3635_v3 = vpop.f32.mrb[102].mxu0  ;;  %v3748_v1 = vpop.f32.mrb[102].mxu1  ;;  %4198 = vmatprep.mubr.bf16.mxu0 %v3878_v33  ;;  %4295 = vmatprep.mubr.bf16.mxu1 %v3880_v7  ;;  %v8924_v45 = vld [vmem:[%s9557_s3 + $0x50] sm:$0xff]  }
 0x5b6   : > { %v3636_v46 = vadd.f32 %v3635_v3, %v11444_v19  ;;  %v3749_v43 = vadd.f32 %v3748_v1, %v11447_v2  ;;  %v3637_v59 = vpop.f32.mrb[103].mxu0  ;;  %v3750_v47 = vpop.f32.mrb[103].mxu1  ;;  %4199 = vmatmul.mubr.bf16.vlgmr.msra.gmra.mrb[128].mxu0 %v3877_v44  ;;  %4296 = vmatmul.mubr.bf16.vlgmr.msra.gmra.mrb[128].mxu1 %v3879_v5  ;;  %v3821_v33 = vmax.f32 %v3632_v12, 0.0  ;;  %v3823_v7 = vmax.f32 %v3745_v41, 0.0  ;;  %v8925_v3 = vld [vmem:[%s9557_s3 + $0xd0] sm:$0xff]  }
 0x5b7   : > { %v3638_v49 = vadd.f32 %v3637_v59, %v11452_v54  ;;  %v3751_v16 = vadd.f32 %v3750_v47, %v11455_v58  ;;  %8156 = vmatpush3.bf16.msra.mxu0 %v8918_v61  ;;  %8220 = vmatpush3.bf16.msra.mxu1 %v8919_v26  ;;  %v3822_v44 = vmax.f32 %v3634_v30, 0.0  ;;  %v3824_v5 = vmax.f32 %v3747_v35, 0.0 }
 0x5b8   : > { %v3825_v31 = vmax.f32 %v3636_v46, 0.0  ;;  %v3827_v62 = vmax.f32 %v3749_v43, 0.0  ;;  %8157 = vmatprep.subr.bf16.mxu0 %v8920_v56  ;;  %8221 = vmatprep.subr.bf16.mxu1 %v8921_v6  ;;  %v8926_v56 = vld [vmem:[%s9557_s3 + $0x10] sm:$0xff]  }
 0x5b9   : > { %v3826_v1 = vmax.f32 %v3638_v49, 0.0  ;;  %v3828_v59 = vmax.f32 %v3751_v16, 0.0  ;;  %v8927_v46 = vld [vmem:[%s9557_s3 + $0x90] sm:$0xff]   ;;  %v8928_v49 = vld [vmem:[%s9557_s3 + $0x58] sm:$0xff]  }
 0x5ba   : > { %v3881_v10 = vpack.c.bf16 %v3825_v31, %v3821_v33  ;;  %v3883_v61 = vpack.c.bf16 %v3827_v62, %v3823_v7  ;;  %v8929_v16 = vld [vmem:[%s9557_s3 + $0xd8] sm:$0xff]  }
 0x5bb   : > { %v3882_v26 = vpack.c.bf16 %v3826_v1, %v3822_v44  ;;  %v3884_v47 = vpack.c.bf16 %v3828_v59, %v3824_v5  ;;  %v3641_v12 = vpop.f32.mrb[104].mxu0  ;;  %v3754_v41 = vpop.f32.mrb[104].mxu1  ;;  %8158 = vmatpush3.bf16.msra.mxu0 %v8922_v28  ;;  %8222 = vmatpush3.bf16.msra.mxu1 %v8923_v17  ;;  %v8930_v1 = vld [vmem:[%s9557_s3 + $0x18] sm:$0xff]  }
 0x5bc   : > { %v3642_v6 = vadd.f32 %v3641_v12, %v11444_v19  ;;  %v3755_v43 = vadd.f32 %v3754_v41, %v11447_v2  ;;  %v3643_v30 = vpop.f32.mrb[105].mxu0  ;;  %v3756_v35 = vpop.f32.mrb[105].mxu1  ;;  %8159 = vmatprep.subr.bf16.mxu0 %v8924_v45  ;;  %8223 = vmatprep.subr.bf16.mxu1 %v8925_v3  ;;  %v8931_v59 = vld [vmem:[%s9557_s3 + $0x98] sm:$0xff]  }
 0x5bd   : > { %v3644_v33 = vadd.f32 %v3643_v30, %v11452_v54  ;;  %v3757_v7 = vadd.f32 %v3756_v35, %v11455_v58  ;;  %v3645_v28 = vpop.f32.mrb[106].mxu0  ;;  %v3758_v17 = vpop.f32.mrb[106].mxu1  ;;  %4206 = vmatprep.mubr.bf16.mxu0 %v3882_v26  ;;  %4303 = vmatprep.mubr.bf16.mxu1 %v3884_v47  ;;  %v8932_v30 = vld [vmem:[%s9557_s3 + $0x60] sm:$0xff]  }
 0x5be   : > { %v3646_v31 = vadd.f32 %v3645_v28, %v11444_v19  ;;  %v3759_v62 = vadd.f32 %v3758_v17, %v11447_v2  ;;  %v3647_v44 = vpop.f32.mrb[107].mxu0  ;;  %v3760_v45 = vpop.f32.mrb[107].mxu1  ;;  %4207 = vmatmul.mubr.bf16.gmra.mrb[132].mxu0 %v3881_v10  ;;  %4304 = vmatmul.mubr.bf16.gmra.mrb[132].mxu1 %v3883_v61  ;;  %v3829_v26 = vmax.f32 %v3642_v6, 0.0  ;;  %v3831_v47 = vmax.f32 %v3755_v43, 0.0  ;;  %v8933_v35 = vld [vmem:[%s9557_s3 + $0xe0] sm:$0xff]  }
 0x5bf   : > { %v3648_v3 = vadd.f32 %v3647_v44, %v11452_v54  ;;  %v3761_v5 = vadd.f32 %v3760_v45, %v11455_v58  ;;  %8160 = vmatpush3.bf16.msra.mxu0 %v8926_v56  ;;  %8224 = vmatpush3.bf16.msra.mxu1 %v8927_v46  ;;  %v3830_v10 = vmax.f32 %v3644_v33, 0.0  ;;  %v3832_v61 = vmax.f32 %v3757_v7, 0.0 }
 0x5c0   : > { %v3833_v12 = vmax.f32 %v3646_v31, 0.0  ;;  %v3835_v41 = vmax.f32 %v3759_v62, 0.0  ;;  %8161 = vmatprep.subr.bf16.mxu0 %v8928_v49  ;;  %8225 = vmatprep.subr.bf16.mxu1 %v8929_v16  ;;  %v8934_v49 = vld [vmem:[%s9557_s3 + $0x20] sm:$0xff]  }
 0x5c1   : > { %v3834_v28 = vmax.f32 %v3648_v3, 0.0  ;;  %v3836_v17 = vmax.f32 %v3761_v5, 0.0  ;;  %v8935_v31 = vld [vmem:[%s9557_s3 + $0xa0] sm:$0xff]   ;;  %v8936_v3 = vld [vmem:[%s9557_s3 + $0x68] sm:$0xff]  }
 0x5c2   : > { %v3885_v44 = vpack.c.bf16 %v3833_v12, %v3829_v26  ;;  %v3887_v56 = vpack.c.bf16 %v3835_v41, %v3831_v47  ;;  %v8937_v5 = vld [vmem:[%s9557_s3 + $0xe8] sm:$0xff]  }
 0x5c3   : > { %v3886_v46 = vpack.c.bf16 %v3834_v28, %v3830_v10  ;;  %v3888_v45 = vpack.c.bf16 %v3836_v17, %v3832_v61  ;;  %v3651_v6 = vpop.f32.mrb[108].mxu0  ;;  %v3764_v43 = vpop.f32.mrb[108].mxu1  ;;  %8162 = vmatpush3.bf16.msra.mxu0 %v8930_v1  ;;  %8226 = vmatpush3.bf16.msra.mxu1 %v8931_v59  ;;  %v8938_v28 = vld [vmem:[%s9557_s3 + $0x28] sm:$0xff]  }
 0x5c4   : > { %v3652_v16 = vadd.f32 %v3651_v6, %v11444_v19  ;;  %v3765_v62 = vadd.f32 %v3764_v43, %v11447_v2  ;;  %v3653_v33 = vpop.f32.mrb[109].mxu0  ;;  %v3766_v7 = vpop.f32.mrb[109].mxu1  ;;  %8163 = vmatprep.subr.bf16.mxu0 %v8932_v30  ;;  %8227 = vmatprep.subr.bf16.mxu1 %v8933_v35  ;;  %v8939_v17 = vld [vmem:[%s9557_s3 + $0xa8] sm:$0xff]  }
 0x5c5   : > { %v3654_v26 = vadd.f32 %v3653_v33, %v11452_v54  ;;  %v3767_v47 = vadd.f32 %v3766_v7, %v11455_v58  ;;  %v3655_v1 = vpop.f32.mrb[110].mxu0  ;;  %v3768_v59 = vpop.f32.mrb[110].mxu1  ;;  %4214 = vmatprep.mubr.bf16.mxu0 %v3886_v46  ;;  %4311 = vmatprep.mubr.bf16.mxu1 %v3888_v45  ;;  %v8940_v33 = vld [vmem:[%s9557_s3 + $0x70] sm:$0xff]  }
 0x5c6   : > { %v3656_v12 = vadd.f32 %v3655_v1, %v11444_v19  ;;  %v3769_v41 = vadd.f32 %v3768_v59, %v11447_v2  ;;  %v3657_v10 = vpop.f32.mrb[111].mxu0  ;;  %v3770_v30 = vpop.f32.mrb[111].mxu1  ;;  %4215 = vmatmul.mubr.bf16.gmra.mrb[136].mxu0 %v3885_v44  ;;  %4312 = vmatmul.mubr.bf16.gmra.mrb[136].mxu1 %v3887_v56  ;;  %v3837_v46 = vmax.f32 %v3652_v16, 0.0  ;;  %v3839_v45 = vmax.f32 %v3765_v62, 0.0  ;;  %v8941_v7 = vld [vmem:[%s9557_s3 + $0xf0] sm:$0xff]  }
 0x5c7   : > { %v3658_v35 = vadd.f32 %v3657_v10, %v11452_v54  ;;  %v3771_v61 = vadd.f32 %v3770_v30, %v11455_v58  ;;  %8164 = vmatpush3.bf16.msra.mxu0 %v8934_v49  ;;  %8228 = vmatpush3.bf16.msra.mxu1 %v8935_v31  ;;  %v3838_v44 = vmax.f32 %v3654_v26, 0.0  ;;  %v3840_v56 = vmax.f32 %v3767_v47, 0.0 }
 0x5c8   : > { %v3841_v6 = vmax.f32 %v3656_v12, 0.0  ;;  %v3843_v43 = vmax.f32 %v3769_v41, 0.0  ;;  %8165 = vmatprep.subr.bf16.mxu0 %v8936_v3  ;;  %8229 = vmatprep.subr.bf16.mxu1 %v8937_v5  ;;  %v8942_v3 = vld [vmem:[%s9557_s3 + $0x30] sm:$0xff]  }
 0x5c9   : > { %v3842_v1 = vmax.f32 %v3658_v35, 0.0  ;;  %v3844_v59 = vmax.f32 %v3771_v61, 0.0  ;;  %v8943_v12 = vld [vmem:[%s9557_s3 + $0xb0] sm:$0xff]   ;;  %v8944_v35 = vld [vmem:[%s9557_s3 + $0x78] sm:$0xff]  }
 0x5ca   : > { %v3889_v10 = vpack.c.bf16 %v3841_v6, %v3837_v46  ;;  %v3891_v49 = vpack.c.bf16 %v3843_v43, %v3839_v45  ;;  %v8945_v61 = vld [vmem:[%s9557_s3 + $0xf8] sm:$0xff]  }
 0x5cb   : > { %v3890_v31 = vpack.c.bf16 %v3842_v1, %v3838_v44  ;;  %v3892_v30 = vpack.c.bf16 %v3844_v59, %v3840_v56  ;;  %v3661_v16 = vpop.f32.mrb[112].mxu0  ;;  %v3774_v62 = vpop.f32.mrb[112].mxu1  ;;  %8166 = vmatpush3.bf16.msra.mxu0 %v8938_v28  ;;  %8230 = vmatpush3.bf16.msra.mxu1 %v8939_v17  ;;  %v8946_v1 = vld [vmem:[%s9557_s3 + $0x38] sm:$0xff]  }
 0x5cc   : > { %v3662_v5 = vadd.f32 %v3661_v16, %v11444_v19  ;;  %v3775_v41 = vadd.f32 %v3774_v62, %v11447_v2  ;;  %v3663_v26 = vpop.f32.mrb[113].mxu0  ;;  %v3776_v47 = vpop.f32.mrb[113].mxu1  ;;  %8167 = vmatprep.subr.bf16.mxu0 %v8940_v33  ;;  %8231 = vmatprep.subr.bf16.mxu1 %v8941_v7  ;;  %v8947_v59 = vld [vmem:[%s9557_s3 + $0xb8] sm:$0xff]   ;;  %v8950_v16 = vld [vmem:[%s9542_s23 + $0x104] ss:$16 sps:$4 sm:$0xff]  }
 0x5cd   : > { %v3664_v46 = vadd.f32 %v3663_v26, %v11452_v54  ;;  %v3777_v45 = vadd.f32 %v3776_v47, %v11455_v58  ;;  %v3665_v28 = vpop.f32.mrb[114].mxu0  ;;  %v3778_v17 = vpop.f32.mrb[114].mxu1  ;;  %4222 = vmatprep.mubr.bf16.mxu0 %v3890_v31  ;;  %4319 = vmatprep.mubr.bf16.mxu1 %v3892_v30  ;;  %v8953_v47 = vld [vmem:[%s9542_s23 + $0x10c] ss:$16 sps:$4 sm:$0xff]  }
 0x5ce   : > { %v3666_v6 = vadd.f32 %v3665_v28, %v11444_v19  ;;  %v3779_v43 = vadd.f32 %v3778_v17, %v11447_v2  ;;  %v3667_v44 = vpop.f32.mrb[115].mxu0  ;;  %v3780_v33 = vpop.f32.mrb[115].mxu1  ;;  %4223 = vmatmul.mubr.bf16.gmra.mrb[140].mxu0 %v3889_v10  ;;  %4320 = vmatmul.mubr.bf16.gmra.mrb[140].mxu1 %v3891_v49  ;;  %v3845_v31 = vmax.f32 %v3662_v5, 0.0  ;;  %v3847_v30 = vmax.f32 %v3775_v41, 0.0 }
 0x5cf   : > { %v3668_v7 = vadd.f32 %v3667_v44, %v11452_v54  ;;  %v3781_v56 = vadd.f32 %v3780_v33, %v11455_v58  ;;  %8168 = vmatpush3.bf16.msra.mxu0 %v8942_v3  ;;  %8232 = vmatpush3.bf16.msra.mxu1 %v8943_v12  ;;  %v3846_v28 = vmax.f32 %v3664_v46, 0.0  ;;  %v3848_v17 = vmax.f32 %v3777_v45, 0.0 }
 0x5d0   : > { %v3849_v62 = vmax.f32 %v3666_v6, 0.0  ;;  %v3851_v26 = vmax.f32 %v3779_v43, 0.0  ;;  %8169 = vmatprep.subr.bf16.mxu0 %v8944_v35  ;;  %8233 = vmatprep.subr.bf16.mxu1 %v8945_v61 }
 0x5d1   : > { %v3850_v10 = vmax.f32 %v3668_v7, 0.0  ;;  %v3852_v49 = vmax.f32 %v3781_v56, 0.0 }
 0x5d2   : > { %v3893_v63 = vpack.c.bf16 %v3849_v62, %v3845_v31  ;;  %v3895_v44 = vpack.c.bf16 %v3851_v26, %v3847_v30 }
 0x5d3   : > { %v3894_v55 = vpack.c.bf16 %v3850_v10, %v3846_v28  ;;  %v3896_v33 = vpack.c.bf16 %v3852_v49, %v3848_v17  ;;  %v3671_v3 = vpop.f32.mrb[116].mxu0  ;;  %v3784_v12 = vpop.f32.mrb[116].mxu1  ;;  %8170 = vmatpush3.bf16.msra.mxu0 %v8946_v1  ;;  %8234 = vmatpush3.bf16.msra.mxu1 %v8947_v59 }
 0x5d4   : > { %v3672_v5 = vadd.f32 %v3671_v3, %v11444_v19  ;;  %v3785_v41 = vadd.f32 %v3784_v12, %v11447_v2  ;;  %v3673_v6 = vpop.f32.mrb[117].mxu0  ;;  %v3786_v35 = vpop.f32.mrb[117].mxu1  ;;  %4866 = vmatprep.subr.bf16.mxu0 %v8950_v16  ;;  %4979 = vmatprep.subr.bf16.mxu1 %v8953_v47 }
 0x5d5   : > { %v3674_v61 = vadd.f32 %v3673_v6, %v11452_v54  ;;  %v3787_v46 = vadd.f32 %v3786_v35, %v11455_v58  ;;  %v3675_v45 = vpop.f32.mrb[118].mxu0  ;;  %v3788_v43 = vpop.f32.mrb[118].mxu1  ;;  %4230 = vmatprep.mubr.bf16.mxu0 %v3894_v55  ;;  %4327 = vmatprep.mubr.bf16.mxu1 %v3896_v33 }
 0x5d6   : > { %v3676_v7 = vadd.f32 %v3675_v45, %v11444_v19  ;;  %v3789_v56 = vadd.f32 %v3788_v43, %v11447_v2  ;;  %v3677_v1 = vpop.f32.mrb[119].mxu0  ;;  %v3790_v59 = vpop.f32.mrb[119].mxu1  ;;  %4231 = vmatmul.mubr.bf16.gmra.mrb[144].mxu0 %v3893_v63  ;;  %4328 = vmatmul.mubr.bf16.gmra.mrb[144].mxu1 %v3895_v44  ;;  %v3853_v30 = vmax.f32 %v3672_v5, 0.0  ;;  %v3855_v62 = vmax.f32 %v3785_v41, 0.0 }
 0x5d7   : > { %v3678_v31 = vadd.f32 %v3677_v1, %v11452_v54  ;;  %v3791_v16 = vadd.f32 %v3790_v59, %v11455_v58  ;;  %v3854_v28 = vmax.f32 %v3674_v61, 0.0  ;;  %v3856_v17 = vmax.f32 %v3787_v46, 0.0 }
 0x5d8   : > { %v3857_v26 = vmax.f32 %v3676_v7, 0.0  ;;  %v3859_v47 = vmax.f32 %v3789_v56, 0.0 }
 0x5d9   : > { %v3858_v55 = vmax.f32 %v3678_v31, 0.0  ;;  %v3860_v10 = vmax.f32 %v3791_v16, 0.0 }
 0x5da   : > { %v3897_v49 = vpack.c.bf16 %v3857_v26, %v3853_v30  ;;  %v3899_v33 = vpack.c.bf16 %v3859_v47, %v3855_v62 }
 0x5db   : > { %v3898_v3 = vpack.c.bf16 %v3858_v55, %v3854_v28  ;;  %v3900_v12 = vpack.c.bf16 %v3860_v10, %v3856_v17  ;;  %v3681_v6 = vpop.f32.mrb[120].mxu0  ;;  %v3794_v35 = vpop.f32.mrb[120].mxu1 }
 0x5dc   : > { %v3682_v63 = vadd.f32 %v3681_v6, %v11444_v19  ;;  %v3795_v44 = vadd.f32 %v3794_v35, %v11447_v2  ;;  %v3683_v45 = vpop.f32.mrb[121].mxu0  ;;  %v3796_v43 = vpop.f32.mrb[121].mxu1 }
 0x5dd   : > { %v3684_v5 = vadd.f32 %v3683_v45, %v11452_v54  ;;  %v3797_v41 = vadd.f32 %v3796_v43, %v11455_v58  ;;  %v3685_v61 = vpop.f32.mrb[122].mxu0  ;;  %v3798_v46 = vpop.f32.mrb[122].mxu1  ;;  %4238 = vmatprep.mubr.bf16.mxu0 %v3898_v3  ;;  %4335 = vmatprep.mubr.bf16.mxu1 %v3900_v12 }
 0x5de   : > { %v3686_v7 = vadd.f32 %v3685_v61, %v11444_v19  ;;  %v3799_v56 = vadd.f32 %v3798_v46, %v11447_v2  ;;  %v3687_v1 = vpop.f32.mrb[123].mxu0  ;;  %v3800_v59 = vpop.f32.mrb[123].mxu1  ;;  %4239 = vmatmul.mubr.bf16.gmra.mrb[148].mxu0 %v3897_v49  ;;  %4336 = vmatmul.mubr.bf16.gmra.mrb[148].mxu1 %v3899_v33  ;;  %v3861_v30 = vmax.f32 %v3682_v63, 0.0  ;;  %v3863_v62 = vmax.f32 %v3795_v44, 0.0 }
 0x5df   : > { %v3688_v31 = vadd.f32 %v3687_v1, %v11452_v54  ;;  %v3801_v16 = vadd.f32 %v3800_v59, %v11455_v58  ;;  %v3862_v28 = vmax.f32 %v3684_v5, 0.0  ;;  %v3864_v17 = vmax.f32 %v3797_v41, 0.0 }
 0x5e0   : > { %v3865_v26 = vmax.f32 %v3686_v7, 0.0  ;;  %v3867_v47 = vmax.f32 %v3799_v56, 0.0 }
 0x5e1   : > { %v3866_v55 = vmax.f32 %v3688_v31, 0.0  ;;  %v3868_v10 = vmax.f32 %v3801_v16, 0.0 }
 0x5e2   : > { %v3901_v3 = vpack.c.bf16 %v3865_v26, %v3861_v30  ;;  %v3903_v12 = vpack.c.bf16 %v3867_v47, %v3863_v62 }
 0x5e3   : > { %v3902_v6 = vpack.c.bf16 %v3866_v55, %v3862_v28  ;;  %v3904_v35 = vpack.c.bf16 %v3868_v10, %v3864_v17  ;;  %v3691_v45 = vpop.f32.mrb[124].mxu0  ;;  %v3804_v43 = vpop.f32.mrb[124].mxu1 }
 0x5e4   : > { %v3692_v49 = vadd.f32 %v3691_v45, %v11444_v19  ;;  %v3805_v33 = vadd.f32 %v3804_v43, %v11447_v2  ;;  %v3693_v61 = vpop.f32.mrb[125].mxu0  ;;  %v3806_v46 = vpop.f32.mrb[125].mxu1  ;;  %v8954_v45 = vld [vmem:[%s9542_s23 + $0x120] ss:$16 sps:$4 sm:$0xff]   ;;  %v8957_v43 = vld [vmem:[%s9542_s23 + $0x128] ss:$16 sps:$4 sm:$0xff]  }
 0x5e5   : > { %v3694_v63 = vadd.f32 %v3693_v61, %v11452_v54  ;;  %v3807_v44 = vadd.f32 %v3806_v46, %v11455_v58  ;;  %v3695_v5 = vpop.f32.mrb[126].mxu0  ;;  %v3808_v41 = vpop.f32.mrb[126].mxu1  ;;  %4246 = vmatprep.mubr.bf16.mxu0 %v3902_v6  ;;  %4343 = vmatprep.mubr.bf16.mxu1 %v3904_v35  ;;  %v8956_v6 = vld [vmem:[%s9542_s23 + $0x124] ss:$16 sps:$4 sm:$0xff]   ;;  %v8959_v35 = vld [vmem:[%s9542_s23 + $0x12c] ss:$16 sps:$4 sm:$0xff]  }
 0x5e6   : > { %v3696_v7 = vadd.f32 %v3695_v5, %v11444_v19  ;;  %v3809_v56 = vadd.f32 %v3808_v41, %v11447_v2  ;;  %v3697_v1 = vpop.f32.mrb[127].mxu0  ;;  %v3810_v59 = vpop.f32.mrb[127].mxu1  ;;  %4247 = vmatmul.mubr.bf16.gmra.mrb[152].mxu0 %v3901_v3  ;;  %4344 = vmatmul.mubr.bf16.gmra.mrb[152].mxu1 %v3903_v12  ;;  %v3869_v30 = vmax.f32 %v3692_v49, 0.0  ;;  %v3871_v62 = vmax.f32 %v3805_v33, 0.0  ;;  %v8968_v49 = vld [vmem:[%s9542_s23 + $0x164] ss:$16 sps:$4 sm:$0xff]  }
 0x5e7   : > { %v3698_v31 = vadd.f32 %v3697_v1, %v11452_v54  ;;  %v3811_v16 = vadd.f32 %v3810_v59, %v11455_v58  ;;  %v3870_v28 = vmax.f32 %v3694_v63, 0.0  ;;  %v3872_v17 = vmax.f32 %v3807_v44, 0.0  ;;  %v8948_v54 = vld [vmem:[%s9542_s23 + $0x100] ss:$16 sps:$4 sm:$0xff]   ;;  %v8951_v58 = vld [vmem:[%s9542_s23 + $0x108] ss:$16 sps:$4 sm:$0xff]  }
 0x5e8   : > { %v3873_v26 = vmax.f32 %v3696_v7, 0.0  ;;  %v3875_v47 = vmax.f32 %v3809_v56, 0.0  ;;  %v8971_v33 = vld [vmem:[%s9542_s23 + $0x16c] ss:$16 sps:$4 sm:$0xff]   ;;  %v8989_v61 = vld [vmem:[%s9557_s3 + $0x2e0] sm:$0xff]   ;;  %v8996_v56 = vld [vmem:[%s9557_s3 + $0x270] sm:$0xff]  }
 0x5e9   : > { %v3874_v19 = vmax.f32 %v3698_v31, 0.0  ;;  %v3876_v2 = vmax.f32 %v3811_v16, 0.0  ;;  %v8990_v46 = vld [vmem:[%s9557_s3 + $0x220] sm:$0xff]   ;;  %v8992_v44 = vld [vmem:[%s9557_s3 + $0x268] sm:$0xff]   ;;  %v8997_v1 = vld [vmem:[%s9557_s3 + $0x2f0] sm:$0xff]  }
 0x5ea   : > { %v3905_v55 = vpack.c.bf16 %v3873_v26, %v3869_v30  ;;  %v3907_v10 = vpack.c.bf16 %v3875_v47, %v3871_v62  ;;  %v8991_v63 = vld [vmem:[%s9557_s3 + $0x2a0] sm:$0xff]   ;;  %v8993_v5 = vld [vmem:[%s9557_s3 + $0x2e8] sm:$0xff]   ;;  %v8998_v16 = vld [vmem:[%s9557_s3 + $0x230] sm:$0xff]  }
 0x5eb   : > { %v3906_v3 = vpack.c.bf16 %v3874_v19, %v3870_v28  ;;  %v3908_v12 = vpack.c.bf16 %v3876_v2, %v3872_v17  ;;  %v8994_v41 = vld [vmem:[%s9557_s3 + $0x228] sm:$0xff]   ;;  %v8999_v30 = vld [vmem:[%s9557_s3 + $0x2b0] sm:$0xff]  }
 0x5ec   : > { %v8995_v7 = vld [vmem:[%s9557_s3 + $0x2a8] sm:$0xff]  }
 0x5ed   : > { %4254 = vmatprep.mubr.bf16.mxu0 %v3906_v3  ;;  %4351 = vmatprep.mubr.bf16.mxu1 %v3908_v12 }
 0x5ee   : > { %4255 = vmatmul.mubr.bf16.gmra.mrb[156].mxu0 %v3905_v55  ;;  %4352 = vmatmul.mubr.bf16.gmra.mrb[156].mxu1 %v3907_v10 }
 0x5ef   : > { %4584 = vmatprep.mubr.bf16.mxu0 %v11336_v24  ;;  %4681 = vmatprep.mubr.bf16.mxu1 %v11338_v20  ;;  %v8962_v24 = vld [vmem:[%s9542_s23 + $0x144] ss:$16 sps:$4 sm:$0xff]   ;;  %v8965_v20 = vld [vmem:[%s9542_s23 + $0x14c] ss:$16 sps:$4 sm:$0xff]  }
 0x5f6   : > { %4585 = vmatmul.mubr.bf16.vlgmr.msra.gmra.mrb[160].mxu0 %v11332_v53  ;;  %4682 = vmatmul.mubr.bf16.vlgmr.msra.gmra.mrb[160].mxu1 %v11334_v34  ;;  %v8960_v53 = vld [vmem:[%s9542_s23 + $0x140] ss:$16 sps:$4 sm:$0xff]   ;;  %v8963_v34 = vld [vmem:[%s9542_s23 + $0x148] ss:$16 sps:$4 sm:$0xff]  }
 0x5f7   : > { %4867 = vmatpush1.bf16.msra.mxu0 %v8948_v54  ;;  %4980 = vmatpush1.bf16.msra.mxu1 %v8951_v58  ;;  %v9000_v58 = vld [vmem:[%s9557_s3 + $0x278] sm:$0xff]  }
 0x5f8   : > { %4592 = vmatprep.mubr.bf16.mxu0 %v11352_v13  ;;  %4689 = vmatprep.mubr.bf16.mxu1 %v11354_v15  ;;  %v8966_v13 = vld [vmem:[%s9542_s23 + $0x160] ss:$16 sps:$4 sm:$0xff]   ;;  %v8969_v15 = vld [vmem:[%s9542_s23 + $0x168] ss:$16 sps:$4 sm:$0xff]  }
 0x5f9   : > { %4868 = vmatprep.subr.bf16.mxu0 %v8956_v6  ;;  %4981 = vmatprep.subr.bf16.mxu1 %v8959_v35  ;;  %v9001_v6 = vld [vmem:[%s9557_s3 + $0x2f8] sm:$0xff]  }
 0x5fb   : > { %4869 = vmatpush1.bf16.msra.mxu0 %v8954_v45  ;;  %4982 = vmatpush1.bf16.msra.mxu1 %v8957_v43  ;;  %v9002_v43 = vld [vmem:[%s9557_s3 + $0x238] sm:$0xff]  }
 0x5fc   : > { %4870 = vmatprep.subr.bf16.mxu0 %v8962_v24  ;;  %4983 = vmatprep.subr.bf16.mxu1 %v8965_v20  ;;  %v9003_v24 = vld [vmem:[%s9557_s3 + $0x2b8] sm:$0xff]  }
 0x5fe   : > { %4593 = vmatmul.mubr.bf16.gmra.mrb[164].mxu0 %v11348_v0  ;;  %4690 = vmatmul.mubr.bf16.gmra.mrb[164].mxu1 %v11350_v51  ;;  %v12728_v0 = vld [vmem:[#allocation19_spill] sm:$0xff]  ;;  %v8976_v51 = vld [vmem:[%s9557_s3 + $0x248] sm:$0xff]  }
 0x5ff   : > { %4600 = vmatprep.mubr.bf16.mxu0 %v11368_v37  ;;  %4697 = vmatprep.mubr.bf16.mxu1 %v11370_v23  ;;  %v8979_v37 = vld [vmem:[%s9557_s3 + $0x288] sm:$0xff]   ;;  %v12729_v23 = vld [vmem:[#allocation36_spill] sm:$0xff] }
 0x600   : > { %4871 = vmatpush1.bf16.msra.mxu0 %v8960_v53  ;;  %4984 = vmatpush1.bf16.msra.mxu1 %v8963_v34 }
 0x601   : > { %4872 = vmatprep.subr.bf16.mxu0 %v8968_v49  ;;  %4985 = vmatprep.subr.bf16.mxu1 %v8971_v33 }
 0x604   : > { %4873 = vmatpush1.bf16.msra.mxu0 %v8966_v13  ;;  %4986 = vmatpush1.bf16.msra.mxu1 %v8969_v15 }
 0x606   : > { %4601 = vmatmul.mubr.bf16.gmra.mrb[168].mxu0 %v11364_v57  ;;  %4698 = vmatmul.mubr.bf16.gmra.mrb[168].mxu1 %v11366_v48  ;;  %v8977_v57 = vld [vmem:[%s9557_s3 + $0x2c8] sm:$0xff]  }
 0x607   : > { %4608 = vmatprep.mubr.bf16.mxu0 %v11384_v29  ;;  %4705 = vmatprep.mubr.bf16.mxu1 %v11386_v25  ;;  %v8978_v48 = vld [vmem:[%s9557_s3 + $0x208] sm:$0xff]   ;;  %v8980_v29 = vld [vmem:[%s9557_s3 + $0x250] sm:$0xff]  }
 0x608   : > { %v8981_v25 = vld [vmem:[%s9557_s3 + $0x2d0] sm:$0xff]  }
 0x60e   : > { %4609 = vmatmul.mubr.bf16.gmra.mrb[172].mxu0 %v11380_v42  ;;  %4706 = vmatmul.mubr.bf16.gmra.mrb[172].mxu1 %v11382_v52  ;;  %v8972_v42 = vld [vmem:[%s9557_s3 + $0x240] sm:$0xff]  }
 0x60f   : > { %4616 = vmatprep.mubr.bf16.mxu0 %v11400_v60  ;;  %4713 = vmatprep.mubr.bf16.mxu1 %v11402_v8  ;;  %v8973_v52 = vld [vmem:[%s9557_s3 + $0x2c0] sm:$0xff]   ;;  %v8982_v60 = vld [vmem:[%s9557_s3 + $0x210] sm:$0xff]  }
 0x610   : > { %8283 = vmatprep.subr.bf16.mxu0 %v8972_v42  ;;  %8347 = vmatprep.subr.bf16.mxu1 %v8973_v52  ;;  %v8983_v8 = vld [vmem:[%s9557_s3 + $0x290] sm:$0xff]  }
 0x616   : > { %4617 = vmatmul.mubr.bf16.gmra.mrb[176].mxu0 %v11396_v27  ;;  %4714 = vmatmul.mubr.bf16.gmra.mrb[176].mxu1 %v11398_v50  ;;  %v12722_v27 = vmov 0   ;;  %v12727_v50 = vld [vmem:[#allocation27_spill] sm:$0xff] }
 0x617   : > { %4624 = vmatprep.mubr.bf16.mxu0 %v11416_v36  ;;  %4721 = vmatprep.mubr.bf16.mxu1 %v11418_v22  ;;  %v12730_v36 = vld [vmem:[#allocation39_spill] sm:$0xff]  ;;  %v8984_v22 = vld [vmem:[%s9557_s3 + $0x258] sm:$0xff]  }
 0x61e   : > { %4625 = vmatmul.mubr.bf16.gmra.mrb[180].mxu0 %v11412_v14  ;;  %4722 = vmatmul.mubr.bf16.gmra.mrb[180].mxu1 %v11414_v9  ;;  %v12723_v14 = vld [vmem:[#allocation33_spill] sm:$0xff] }
 0x61f   : > { %4632 = vmatprep.mubr.bf16.mxu0 %v11432_v21  ;;  %4729 = vmatprep.mubr.bf16.mxu1 %v11434_v18  ;;  %v12725_v18 = vld [vmem:[#allocation24_spill] sm:$0xff]  ;;  %v12726_v9 = vld [vmem:[#allocation13_spill] sm:$0xff] }
 0x620   : > { %v8986_v21 = vld [vmem:[%s9557_s3 + $0x218] sm:$0xff]  }
 0x626   : > { %4633 = vmatmul.mubr.bf16.gmra.mrb[184].mxu0 %v11428_v32  ;;  %4730 = vmatmul.mubr.bf16.gmra.mrb[184].mxu1 %v11430_v39  ;;  %v12724_v32 = vld [vmem:[#allocation30_spill] sm:$0xff]  ;;  %v8985_v39 = vld [vmem:[%s9557_s3 + $0x2d8] sm:$0xff]  }
 0x627   : > { %4640 = vmatprep.mubr.bf16.mxu0 %v11461_v11  ;;  %4737 = vmatprep.mubr.bf16.mxu1 %v11463_v38  ;;  %v8987_v11 = vld [vmem:[%s9557_s3 + $0x298] sm:$0xff]   ;;  %v8988_v38 = vld [vmem:[%s9557_s3 + $0x260] sm:$0xff]  }
 0x62e   : > { %4641 = vmatmul.mubr.bf16.gmra.mrb[188].mxu0 %v11457_v4  ;;  %4738 = vmatmul.mubr.bf16.gmra.mrb[188].mxu1 %v11459_v40  ;;  %v8974_v40 = vld [vmem:[%s9557_s3 + $0x200] sm:$0xff]  }
 0x62f   : > { %4898 = vmatprep.mubr.bf16.mxu0 %v12722_v27  ;;  %5011 = vmatprep.mubr.bf16.mxu1 %v12722_v27  ;;  %v8975_v4 = vld [vmem:[%s9557_s3 + $0x280] sm:$0xff]  }
 0x636   : > { %7647 = vmatmul.mubr.msk.bf16.vlgmr.msra.gmra.mrb[192].mxu0 %vm1006_vm1, %v12723_v14  ;;  %7655 = vmatmul.mubr.msk.bf16.vlgmr.msra.gmra.mrb[192].mxu1 %vm1006_vm1, %v12723_v14 }
 0x637   : > { %4908 = vmatprep.mubr.bf16.mxu0 %v12722_v27  ;;  %5021 = vmatprep.mubr.bf16.mxu1 %v12722_v27 }
 0x638   : > { %8284 = vmatpush3.bf16.msra.mxu0 %v8974_v40  ;;  %8348 = vmatpush3.bf16.msra.mxu1 %v8975_v4 }
 0x639   : > { %8285 = vmatprep.subr.bf16.mxu0 %v8976_v51  ;;  %8349 = vmatprep.subr.bf16.mxu1 %v8977_v57  ;;  %v9006_v57 = vld [vmem:[%s9542_s23 + $0x184] ss:$16 sps:$4 sm:$0xff]  }
 0x63c   : > { %8286 = vmatpush3.bf16.msra.mxu0 %v8978_v48  ;;  %8350 = vmatpush3.bf16.msra.mxu1 %v8979_v37 }
 0x63d   : > { %8287 = vmatprep.subr.bf16.mxu0 %v8980_v29  ;;  %8351 = vmatprep.subr.bf16.mxu1 %v8981_v25  ;;  %v9009_v29 = vld [vmem:[%s9542_s23 + $0x18c] ss:$16 sps:$4 sm:$0xff]  }
 0x63e   : > { %7648 = vmatmul.mubr.msk.bf16.gmra.mrb[196].mxu0 %vm1006_vm1, %v12724_v32  ;;  %7656 = vmatmul.mubr.msk.bf16.gmra.mrb[196].mxu1 %vm1006_vm1, %v12724_v32 }
 0x63f   : > { %4918 = vmatprep.mubr.bf16.mxu0 %v12722_v27  ;;  %5031 = vmatprep.mubr.bf16.mxu1 %v12722_v27 }
 0x640   : > { %8288 = vmatpush3.bf16.msra.mxu0 %v8982_v60  ;;  %8352 = vmatpush3.bf16.msra.mxu1 %v8983_v8 }
 0x641   : > { %8289 = vmatprep.subr.bf16.mxu0 %v8984_v22  ;;  %8353 = vmatprep.subr.bf16.mxu1 %v8985_v39 }
 0x644   : > { %8290 = vmatpush3.bf16.msra.mxu0 %v8986_v21  ;;  %8354 = vmatpush3.bf16.msra.mxu1 %v8987_v11 }
 0x645   : > { %8291 = vmatprep.subr.bf16.mxu0 %v8988_v38  ;;  %8355 = vmatprep.subr.bf16.mxu1 %v8989_v61 }
 0x646   : > { %7649 = vmatmul.mubr.msk.bf16.gmra.mrb[200].mxu0 %vm1006_vm1, %v12725_v18  ;;  %7657 = vmatmul.mubr.msk.bf16.gmra.mrb[200].mxu1 %vm1006_vm1, %v12725_v18 }
 0x647   : > { %4928 = vmatprep.mubr.bf16.mxu0 %v12722_v27  ;;  %5041 = vmatprep.mubr.bf16.mxu1 %v12722_v27 }
 0x648   : > { %8292 = vmatpush3.bf16.msra.mxu0 %v8990_v46  ;;  %8356 = vmatpush3.bf16.msra.mxu1 %v8991_v63 }
 0x649   : > { %8293 = vmatprep.subr.bf16.mxu0 %v8992_v44  ;;  %8357 = vmatprep.subr.bf16.mxu1 %v8993_v5 }
 0x64c   : > { %8294 = vmatpush3.bf16.msra.mxu0 %v8994_v41  ;;  %8358 = vmatpush3.bf16.msra.mxu1 %v8995_v7 }
 0x64d   : > { %8295 = vmatprep.subr.bf16.mxu0 %v8996_v56  ;;  %8359 = vmatprep.subr.bf16.mxu1 %v8997_v1 }
 0x64e   : > { %7650 = vmatmul.mubr.msk.bf16.gmra.mrb[204].mxu0 %vm1006_vm1, %v12726_v9  ;;  %7658 = vmatmul.mubr.msk.bf16.gmra.mrb[204].mxu1 %vm1006_vm1, %v12726_v9 }
 0x64f   : > { %4938 = vmatprep.mubr.bf16.mxu0 %v12722_v27  ;;  %5051 = vmatprep.mubr.bf16.mxu1 %v12722_v27 }
 0x650   : > { %8296 = vmatpush3.bf16.msra.mxu0 %v8998_v16  ;;  %8360 = vmatpush3.bf16.msra.mxu1 %v8999_v30 }
 0x651   : > { %8297 = vmatprep.subr.bf16.mxu0 %v9000_v58  ;;  %8361 = vmatprep.subr.bf16.mxu1 %v9001_v6 }
 0x654   : > { %8298 = vmatpush3.bf16.msra.mxu0 %v9002_v43  ;;  %8362 = vmatpush3.bf16.msra.mxu1 %v9003_v24 }
 0x655   : > { %5775 = vmatprep.subr.bf16.mxu0 %v9006_v57  ;;  %5888 = vmatprep.subr.bf16.mxu1 %v9009_v29 }
 0x656   : > { %7651 = vmatmul.mubr.msk.bf16.gmra.mrb[208].mxu0 %vm1006_vm1, %v12727_v50  ;;  %7659 = vmatmul.mubr.msk.bf16.gmra.mrb[208].mxu1 %vm1006_vm1, %v12727_v50 }
 0x657   : > { %4948 = vmatprep.mubr.bf16.mxu0 %v12722_v27  ;;  %5061 = vmatprep.mubr.bf16.mxu1 %v12722_v27 }
 0x65e   : > { %7652 = vmatmul.mubr.msk.bf16.gmra.mrb[212].mxu0 %vm1006_vm1, %v12728_v0  ;;  %7660 = vmatmul.mubr.msk.bf16.gmra.mrb[212].mxu1 %vm1006_vm1, %v12728_v0 }
 0x65f   : > { %4958 = vmatprep.mubr.bf16.mxu0 %v12722_v27  ;;  %5071 = vmatprep.mubr.bf16.mxu1 %v12722_v27 }
 0x666   : > { %7653 = vmatmul.mubr.msk.bf16.gmra.mrb[216].mxu0 %vm1006_vm1, %v12729_v23  ;;  %7661 = vmatmul.mubr.msk.bf16.gmra.mrb[216].mxu1 %vm1006_vm1, %v12729_v23 }
 0x667   : > { %4968 = vmatprep.mubr.bf16.mxu0 %v12722_v27  ;;  %5081 = vmatprep.mubr.bf16.mxu1 %v12722_v27 }
 0x66e   : > { %7654 = vmatmul.mubr.msk.bf16.gmra.mrb[220].mxu0 %vm1006_vm1, %v12730_v36  ;;  %7662 = vmatmul.mubr.msk.bf16.gmra.mrb[220].mxu1 %vm1006_vm1, %v12730_v36 }
 0x689   : > { %v8043_v59 = vpop.f32.mrb[128].mxu0  ;;  %v8107_v31 = vpop.f32.mrb[128].mxu1 }
 0x68a   : > { %v8044_v62 = vpop.f32.mrb[129].mxu0  ;;  %v8108_v26 = vpop.f32.mrb[129].mxu1 }
 0x68b   : > { %v8045_v47 = vadd.f32 %v8044_v62, %v8043_v59  ;;  %v8109_v28 = vadd.f32 %v8108_v26, %v8107_v31  ;;  %v8046_v17 = vpop.f32.mrb[130].mxu0  ;;  %v8110_v19 = vpop.f32.mrb[130].mxu1 }
 0x68c   : > { %v8047_v2 = vpop.f32.mrb[131].mxu0  ;;  %v8111_v55 = vpop.f32.mrb[131].mxu1 }
 0x68d   : > { %v11683_v10 = vadd.f32 %v8109_v28, %v8045_v47  ;;  %v8048_v3 = vadd.f32 %v8047_v2, %v8046_v17  ;;  %v8112_v12 = vadd.f32 %v8111_v55, %v8110_v19 }
 0x68f   : > { %v11685_v54 = vadd.f32 %v8112_v12, %v8048_v3 }
 0x691   : > { %v8049_v35 = vpop.f32.mrb[132].mxu0  ;;  %v8113_v45 = vpop.f32.mrb[132].mxu1 }
 0x692   : > { %v8050_v20 = vpop.f32.mrb[133].mxu0  ;;  %v8114_v53 = vpop.f32.mrb[133].mxu1 }
 0x693   : > { %v8051_v34 = vadd.f32 %v8050_v20, %v8049_v35  ;;  %v8115_v49 = vadd.f32 %v8114_v53, %v8113_v45  ;;  %v8052_v33 = vpop.f32.mrb[134].mxu0  ;;  %v8116_v13 = vpop.f32.mrb[134].mxu1 }
 0x694   : > { %v8053_v15 = vpop.f32.mrb[135].mxu0  ;;  %v8117_v42 = vpop.f32.mrb[135].mxu1 }
 0x695   : > { %v11691_v52 = vadd.f32 %v8115_v49, %v8051_v34  ;;  %v8054_v40 = vadd.f32 %v8053_v15, %v8052_v33  ;;  %v8118_v4 = vadd.f32 %v8117_v42, %v8116_v13 }
 0x697   : > { %v11693_v51 = vadd.f32 %v8118_v4, %v8054_v40 }
 0x699   : > { %v8055_v48 = vpop.f32.mrb[136].mxu0  ;;  %v8119_v37 = vpop.f32.mrb[136].mxu1 }
 0x69a   : > { %v8056_v25 = vpop.f32.mrb[137].mxu0  ;;  %v8120_v60 = vpop.f32.mrb[137].mxu1 }
 0x69b   : > { %v8057_v8 = vadd.f32 %v8056_v25, %v8055_v48  ;;  %v8121_v22 = vadd.f32 %v8120_v60, %v8119_v37  ;;  %v8058_v39 = vpop.f32.mrb[138].mxu0  ;;  %v8122_v21 = vpop.f32.mrb[138].mxu1 }
 0x69c   : > { %v8059_v11 = vpop.f32.mrb[139].mxu0  ;;  %v8123_v38 = vpop.f32.mrb[139].mxu1 }
 0x69d   : > { %v11697_v61 = vadd.f32 %v8121_v22, %v8057_v8  ;;  %v8060_v46 = vadd.f32 %v8059_v11, %v8058_v39  ;;  %v8124_v63 = vadd.f32 %v8123_v38, %v8122_v21 }
 0x69f   : > { %v11699_v44 = vadd.f32 %v8124_v63, %v8060_v46 }
 0x6a1   : > { %v8061_v5 = vpop.f32.mrb[140].mxu0  ;;  %v8125_v41 = vpop.f32.mrb[140].mxu1 }
 0x6a2   : > { %v8062_v7 = vpop.f32.mrb[141].mxu0  ;;  %v8126_v56 = vpop.f32.mrb[141].mxu1 }
 0x6a3   : > { %v8063_v1 = vadd.f32 %v8062_v7, %v8061_v5  ;;  %v8127_v59 = vadd.f32 %v8126_v56, %v8125_v41  ;;  %v8064_v31 = vpop.f32.mrb[142].mxu0  ;;  %v8128_v16 = vpop.f32.mrb[142].mxu1 }
 0x6a4   : > { %v8065_v30 = vpop.f32.mrb[143].mxu0  ;;  %v8129_v62 = vpop.f32.mrb[143].mxu1 }
 0x6a5   : > { %v11701_v26 = vadd.f32 %v8127_v59, %v8063_v1  ;;  %v8066_v47 = vadd.f32 %v8065_v30, %v8064_v31  ;;  %v8130_v28 = vadd.f32 %v8129_v62, %v8128_v16 }
 0x6a7   : > { %v11703_v17 = vadd.f32 %v8130_v28, %v8066_v47 }
 0x6a9   : > { %v8067_v19 = vpop.f32.mrb[144].mxu0  ;;  %v8131_v2 = vpop.f32.mrb[144].mxu1 }
 0x6aa   : > { %v8068_v55 = vpop.f32.mrb[145].mxu0  ;;  %v8132_v3 = vpop.f32.mrb[145].mxu1 }
 0x6ab   : > { %v8069_v12 = vadd.f32 %v8068_v55, %v8067_v19  ;;  %v8133_v58 = vadd.f32 %v8132_v3, %v8131_v2  ;;  %v8070_v6 = vpop.f32.mrb[146].mxu0  ;;  %v8134_v35 = vpop.f32.mrb[146].mxu1 }
 0x6ac   : > { %v8071_v45 = vpop.f32.mrb[147].mxu0  ;;  %v8135_v43 = vpop.f32.mrb[147].mxu1 }
 0x6ad   : > { %v11705_v24 = vadd.f32 %v8133_v58, %v8069_v12  ;;  %v8072_v20 = vadd.f32 %v8071_v45, %v8070_v6  ;;  %v8136_v53 = vadd.f32 %v8135_v43, %v8134_v35 }
 0x6af   : > { %v11707_v34 = vadd.f32 %v8136_v53, %v8072_v20 }
 0x6b1   : > { %v8073_v49 = vpop.f32.mrb[148].mxu0  ;;  %v8137_v33 = vpop.f32.mrb[148].mxu1 }
 0x6b2   : > { %v8074_v13 = vpop.f32.mrb[149].mxu0  ;;  %v8138_v15 = vpop.f32.mrb[149].mxu1 }
 0x6b3   : > { %v8075_v42 = vadd.f32 %v8074_v13, %v8073_v49  ;;  %v8139_v40 = vadd.f32 %v8138_v15, %v8137_v33  ;;  %v8076_v4 = vpop.f32.mrb[150].mxu0  ;;  %v8140_v57 = vpop.f32.mrb[150].mxu1 }
 0x6b4   : > { %v8077_v48 = vpop.f32.mrb[151].mxu0  ;;  %v8141_v37 = vpop.f32.mrb[151].mxu1 }
 0x6b5   : > { %v11709_v29 = vadd.f32 %v8139_v40, %v8075_v42  ;;  %v8078_v25 = vadd.f32 %v8077_v48, %v8076_v4  ;;  %v8142_v60 = vadd.f32 %v8141_v37, %v8140_v57 }
 0x6b7   : > { %v11711_v8 = vadd.f32 %v8142_v60, %v8078_v25 }
 0x6b9   : > { %v8079_v22 = vpop.f32.mrb[152].mxu0  ;;  %v8143_v39 = vpop.f32.mrb[152].mxu1 }
 0x6ba   : > { %v8080_v21 = vpop.f32.mrb[153].mxu0  ;;  %v8144_v11 = vpop.f32.mrb[153].mxu1 }
 0x6bb   : > { %v8081_v38 = vadd.f32 %v8080_v21, %v8079_v22  ;;  %v8145_v46 = vadd.f32 %v8144_v11, %v8143_v39  ;;  %v8082_v63 = vpop.f32.mrb[154].mxu0  ;;  %v8146_v5 = vpop.f32.mrb[154].mxu1 }
 0x6bc   : > { %v8083_v41 = vpop.f32.mrb[155].mxu0  ;;  %v8147_v7 = vpop.f32.mrb[155].mxu1 }
 0x6bd   : > { %v11713_v56 = vadd.f32 %v8145_v46, %v8081_v38  ;;  %v8084_v1 = vadd.f32 %v8083_v41, %v8082_v63  ;;  %v8148_v59 = vadd.f32 %v8147_v7, %v8146_v5 }
 0x6bf   : > { %v11715_v31 = vadd.f32 %v8148_v59, %v8084_v1 }
 0x6c1   : > { %v8085_v16 = vpop.f32.mrb[156].mxu0  ;;  %v8149_v30 = vpop.f32.mrb[156].mxu1 }
 0x6c2   : > { %v8086_v62 = vpop.f32.mrb[157].mxu0  ;;  %v8150_v47 = vpop.f32.mrb[157].mxu1 }
 0x6c3   : > { %v8087_v28 = vadd.f32 %v8086_v62, %v8085_v16  ;;  %v8151_v19 = vadd.f32 %v8150_v47, %v8149_v30  ;;  %v8088_v2 = vpop.f32.mrb[158].mxu0  ;;  %v8152_v55 = vpop.f32.mrb[158].mxu1 }
 0x6c4   : > { %v8089_v3 = vpop.f32.mrb[159].mxu0  ;;  %v8153_v12 = vpop.f32.mrb[159].mxu1 }
 0x6c5   : > { %v11717_v58 = vadd.f32 %v8151_v19, %v8087_v28  ;;  %v8090_v6 = vadd.f32 %v8089_v3, %v8088_v2  ;;  %v8154_v35 = vadd.f32 %v8153_v12, %v8152_v55 }
 0x6c7   : > { %v11719_v45 = vadd.f32 %v8154_v35, %v8090_v6 }
 0x6c9   : > { %v8171_v43 = vpop.f32.mrb[160].mxu0  ;;  %v8235_v20 = vpop.f32.mrb[160].mxu1 }
 0x6ca   : > { %v8172_v53 = vpop.f32.mrb[161].mxu0  ;;  %v8236_v49 = vpop.f32.mrb[161].mxu1 }
 0x6cb   : > { %v8173_v33 = vadd.f32 %v8172_v53, %v8171_v43  ;;  %v8237_v13 = vadd.f32 %v8236_v49, %v8235_v20  ;;  %v8174_v15 = vpop.f32.mrb[162].mxu0  ;;  %v8238_v42 = vpop.f32.mrb[162].mxu1 }
 0x6cc   : > { %v8175_v40 = vpop.f32.mrb[163].mxu0  ;;  %v8239_v4 = vpop.f32.mrb[163].mxu1 }
 0x6cd   : > { %v4587_v57 = vadd.f32 %v8173_v33, %v11683_v10  ;;  %v8176_v48 = vadd.f32 %v8175_v40, %v8174_v15  ;;  %v8240_v37 = vadd.f32 %v8239_v4, %v8238_v42 }
 0x6cf   : > { %v11722_v25 = vadd.f32 %v8237_v13, %v4587_v57  ;;  %v4590_v60 = vadd.f32 %v8176_v48, %v11685_v54 }
 0x6d1   : > { %v11725_v22 = vadd.f32 %v8240_v37, %v4590_v60  ;;  %v8177_v39 = vpop.f32.mrb[164].mxu0  ;;  %v8241_v21 = vpop.f32.mrb[164].mxu1 }
 0x6d2   : > { %v8178_v11 = vpop.f32.mrb[165].mxu0  ;;  %v8242_v38 = vpop.f32.mrb[165].mxu1 }
 0x6d3   : > { %v8179_v46 = vadd.f32 %v8178_v11, %v8177_v39  ;;  %v8243_v63 = vadd.f32 %v8242_v38, %v8241_v21  ;;  %v8180_v5 = vpop.f32.mrb[166].mxu0  ;;  %v8244_v41 = vpop.f32.mrb[166].mxu1 }
 0x6d4   : > { %v8181_v7 = vpop.f32.mrb[167].mxu0  ;;  %v8245_v1 = vpop.f32.mrb[167].mxu1 }
 0x6d5   : > { %v4595_v10 = vadd.f32 %v8179_v46, %v11691_v52  ;;  %v8182_v59 = vadd.f32 %v8181_v7, %v8180_v5  ;;  %v8246_v16 = vadd.f32 %v8245_v1, %v8244_v41 }
 0x6d7   : > { %v11728_v30 = vadd.f32 %v8243_v63, %v4595_v10  ;;  %v4598_v54 = vadd.f32 %v8182_v59, %v11693_v51 }
 0x6d9   : > { %v11731_v62 = vadd.f32 %v8246_v16, %v4598_v54  ;;  %v8183_v47 = vpop.f32.mrb[168].mxu0  ;;  %v8247_v28 = vpop.f32.mrb[168].mxu1 }
 0x6da   : > { %v8184_v19 = vpop.f32.mrb[169].mxu0  ;;  %v8248_v2 = vpop.f32.mrb[169].mxu1 }
 0x6db   : > { %v8185_v55 = vadd.f32 %v8184_v19, %v8183_v47  ;;  %v8249_v3 = vadd.f32 %v8248_v2, %v8247_v28  ;;  %v8186_v12 = vpop.f32.mrb[170].mxu0  ;;  %v8250_v6 = vpop.f32.mrb[170].mxu1 }
 0x6dc   : > { %v8187_v35 = vpop.f32.mrb[171].mxu0  ;;  %v8251_v43 = vpop.f32.mrb[171].mxu1 }
 0x6dd   : > { %v4603_v52 = vadd.f32 %v8185_v55, %v11697_v61  ;;  %v8188_v20 = vadd.f32 %v8187_v35, %v8186_v12  ;;  %v8252_v53 = vadd.f32 %v8251_v43, %v8250_v6 }
 0x6df   : > { %v11734_v49 = vadd.f32 %v8249_v3, %v4603_v52  ;;  %v4606_v51 = vadd.f32 %v8188_v20, %v11699_v44 }
 0x6e1   : > { %v11737_v33 = vadd.f32 %v8252_v53, %v4606_v51  ;;  %v8189_v13 = vpop.f32.mrb[172].mxu0  ;;  %v8253_v15 = vpop.f32.mrb[172].mxu1 }
 0x6e2   : > { %v8190_v42 = vpop.f32.mrb[173].mxu0  ;;  %v8254_v40 = vpop.f32.mrb[173].mxu1 }
 0x6e3   : > { %v8191_v4 = vadd.f32 %v8190_v42, %v8189_v13  ;;  %v8255_v57 = vadd.f32 %v8254_v40, %v8253_v15  ;;  %v8192_v48 = vpop.f32.mrb[174].mxu0  ;;  %v8256_v37 = vpop.f32.mrb[174].mxu1 }
 0x6e4   : > { %v8193_v60 = vpop.f32.mrb[175].mxu0  ;;  %v8257_v39 = vpop.f32.mrb[175].mxu1 }
 0x6e5   : > { %v4611_v61 = vadd.f32 %v8191_v4, %v11701_v26  ;;  %v8194_v21 = vadd.f32 %v8193_v60, %v8192_v48  ;;  %v8258_v11 = vadd.f32 %v8257_v39, %v8256_v37 }
 0x6e7   : > { %v11740_v38 = vadd.f32 %v8255_v57, %v4611_v61  ;;  %v4614_v44 = vadd.f32 %v8194_v21, %v11703_v17 }
 0x6e9   : > { %v11743_v46 = vadd.f32 %v8258_v11, %v4614_v44  ;;  %v8195_v63 = vpop.f32.mrb[176].mxu0  ;;  %v8259_v5 = vpop.f32.mrb[176].mxu1 }
 0x6ea   : > { %v8196_v41 = vpop.f32.mrb[177].mxu0  ;;  %v8260_v7 = vpop.f32.mrb[177].mxu1 }
 0x6eb   : > { %v8197_v1 = vadd.f32 %v8196_v41, %v8195_v63  ;;  %v8261_v10 = vadd.f32 %v8260_v7, %v8259_v5  ;;  %v8198_v59 = vpop.f32.mrb[178].mxu0  ;;  %v8262_v16 = vpop.f32.mrb[178].mxu1 }
 0x6ec   : > { %v8199_v54 = vpop.f32.mrb[179].mxu0  ;;  %v8263_v47 = vpop.f32.mrb[179].mxu1 }
 0x6ed   : > { %v4619_v26 = vadd.f32 %v8197_v1, %v11705_v24  ;;  %v8200_v28 = vadd.f32 %v8199_v54, %v8198_v59  ;;  %v8264_v19 = vadd.f32 %v8263_v47, %v8262_v16 }
 0x6ef   : > { %v11746_v2 = vadd.f32 %v8261_v10, %v4619_v26  ;;  %v4622_v17 = vadd.f32 %v8200_v28, %v11707_v34 }
 0x6f1   : > { %v11749_v55 = vadd.f32 %v8264_v19, %v4622_v17  ;;  %v8201_v3 = vpop.f32.mrb[180].mxu0  ;;  %v8265_v12 = vpop.f32.mrb[180].mxu1  ;;  %v7630_v17 = vld [vmem:[%s12717_s7 + $0x8] sm:$0xf] }
 0x6f2   : > { %v8202_v6 = vpop.f32.mrb[181].mxu0  ;;  %v8266_v35 = vpop.f32.mrb[181].mxu1 }
 0x6f3   : > { %v8203_v43 = vadd.f32 %v8202_v6, %v8201_v3  ;;  %v8267_v52 = vadd.f32 %v8266_v35, %v8265_v12  ;;  %v8204_v20 = vpop.f32.mrb[182].mxu0  ;;  %v8268_v53 = vpop.f32.mrb[182].mxu1 }
 0x6f4   : > { %v8205_v51 = vpop.f32.mrb[183].mxu0  ;;  %v8269_v13 = vpop.f32.mrb[183].mxu1 }
 0x6f5   : > { %v4627_v24 = vadd.f32 %v8203_v43, %v11709_v29  ;;  %v8206_v15 = vadd.f32 %v8205_v51, %v8204_v20  ;;  %v8270_v42 = vadd.f32 %v8269_v13, %v8268_v53  ;;  %v12731_v43 = vld [vmem:[#allocation41_spill] sm:$0xff] }
 0x6f6   : > { %v12733_v13 = vld [vmem:[#allocation25_spill] sm:$0xff] }
 0x6f7   : > { %v11752_v40 = vadd.f32 %v8267_v52, %v4627_v24  ;;  %v4630_v34 = vadd.f32 %v8206_v15, %v11711_v8  ;;  %v11766_v52 = vrot.slane %v7630_v17, %v12731_v43  ;;  %v11775_v24 = vrot.slane %v7630_v17, %v12733_v13  ;;  %v12734_v15 = vld [vmem:[#allocation46_spill] sm:$0xff] }
 0x6f9   : > { %v11755_v4 = vadd.f32 %v8270_v42, %v4630_v34  ;;  %v8207_v57 = vpop.f32.mrb[184].mxu0  ;;  %v8271_v48 = vpop.f32.mrb[184].mxu1  ;;  %v11778_v42 = vrot.slane %v7630_v17, %v12734_v15 }
 0x6fa   : > { %v8208_v37 = vpop.f32.mrb[185].mxu0  ;;  %v8272_v60 = vpop.f32.mrb[185].mxu1 }
 0x6fb   : > { %v8209_v39 = vadd.f32 %v8208_v37, %v8207_v57  ;;  %v8273_v61 = vadd.f32 %v8272_v60, %v8271_v48  ;;  %v8210_v21 = vpop.f32.mrb[186].mxu0  ;;  %v8274_v11 = vpop.f32.mrb[186].mxu1 }
 0x6fc   : > { %v8211_v44 = vpop.f32.mrb[187].mxu0  ;;  %v8275_v63 = vpop.f32.mrb[187].mxu1 }
 0x6fd   : > { %v4635_v29 = vadd.f32 %v8209_v39, %v11713_v56  ;;  %v8212_v5 = vadd.f32 %v8211_v44, %v8210_v21  ;;  %v8276_v41 = vadd.f32 %v8275_v63, %v8274_v11 }
 0x6ff   : > { %v11758_v7 = vadd.f32 %v8273_v61, %v4635_v29  ;;  %v4638_v8 = vadd.f32 %v8212_v5, %v11715_v31  ;;  %v12732_v31 = vld [vmem:[#allocation23_spill] sm:$0xff] }
 0x700   : > { %v11769_v20 = vrot.slane %v7630_v17, %v12732_v31 }
 0x701   : > { %v11761_v1 = vadd.f32 %v8276_v41, %v4638_v8  ;;  %v8213_v10 = vpop.f32.mrb[188].mxu0  ;;  %v8277_v59 = vpop.f32.mrb[188].mxu1 }
 0x702   : > { %v8214_v16 = vpop.f32.mrb[189].mxu0  ;;  %v8278_v54 = vpop.f32.mrb[189].mxu1 }
 0x703   : > { %v8215_v47 = vadd.f32 %v8214_v16, %v8213_v10  ;;  %v8279_v26 = vadd.f32 %v8278_v54, %v8277_v59  ;;  %v8216_v28 = vpop.f32.mrb[190].mxu0  ;;  %v8280_v19 = vpop.f32.mrb[190].mxu1 }
 0x704   : > { %v8217_v3 = vpop.f32.mrb[191].mxu0  ;;  %v8281_v12 = vpop.f32.mrb[191].mxu1 }
 0x705   : > { %v4643_v56 = vadd.f32 %v8215_v47, %v11717_v58  ;;  %v8218_v6 = vadd.f32 %v8217_v3, %v8216_v28  ;;  %v8282_v35 = vadd.f32 %v8281_v12, %v8280_v19 }
 0x707   : > { %v11771_v53 = vadd.f32 %v8279_v26, %v4643_v56  ;;  %v4646_v51 = vadd.f32 %v8218_v6, %v11719_v45 }
 0x709   : > { %v11780_v34 = vadd.f32 %v8282_v35, %v4646_v51  ;;  %v4900_v58 = vpop.f32.mrb[192].mxu0  ;;  %v5013_v57 = vpop.f32.mrb[192].mxu1  ;;  %v9004_v51 = vld [vmem:[%s9542_s23 + $0x180] ss:$16 sps:$4 sm:$0xff]  }
 0x70a   : > { %v4901_v48 = vadd.f32 %v4900_v58, %v11766_v52  ;;  %v5014_v37 = vadd.f32 %v5013_v57, %v11769_v20  ;;  %v4902_v60 = vpop.f32.mrb[193].mxu0  ;;  %v5015_v39 = vpop.f32.mrb[193].mxu1  ;;  %v9007_v58 = vld [vmem:[%s9542_s23 + $0x188] ss:$16 sps:$4 sm:$0xff]  }
 0x70b   : > { %v4903_v61 = vadd.f32 %v4902_v60, %v11775_v24  ;;  %v5016_v45 = vadd.f32 %v5015_v39, %v11778_v42  ;;  %v4904_v21 = vpop.f32.mrb[194].mxu0  ;;  %v5017_v11 = vpop.f32.mrb[194].mxu1  ;;  %v9012_v39 = vld [vmem:[%s9542_s23 + $0x1a4] ss:$16 sps:$4 sm:$0xff]  }
 0x70c   : > { %v4905_v44 = vadd.f32 %v4904_v21, %v11766_v52  ;;  %v5018_v63 = vadd.f32 %v5017_v11, %v11769_v20  ;;  %v4906_v29 = vpop.f32.mrb[195].mxu0  ;;  %v5019_v5 = vpop.f32.mrb[195].mxu1  ;;  %v5092_v10 = vmax.f32 %v4901_v48, 0.0  ;;  %v5094_v59 = vmax.f32 %v5014_v37, 0.0 }
 0x70d   : > { %v4907_v41 = vadd.f32 %v4906_v29, %v11775_v24  ;;  %v5020_v8 = vadd.f32 %v5019_v5, %v11778_v42  ;;  %v5093_v47 = vmax.f32 %v4903_v61, 0.0  ;;  %v5095_v26 = vmax.f32 %v5016_v45, 0.0  ;;  %v9015_v61 = vld [vmem:[%s9542_s23 + $0x1ac] ss:$16 sps:$4 sm:$0xff]  }
 0x70e   : > { %v5096_v16 = vmax.f32 %v4905_v44, 0.0  ;;  %v5098_v54 = vmax.f32 %v5018_v63, 0.0 }
 0x70f   : > { %v5097_v28 = vmax.f32 %v4907_v41, 0.0  ;;  %v5099_v19 = vmax.f32 %v5020_v8, 0.0 }
 0x710   : > { %v5156_v17 = vpack.c.bf16 %v5096_v16, %v5092_v10  ;;  %v5158_v3 = vpack.c.bf16 %v5098_v54, %v5094_v59  ;;  %v9010_v59 = vld [vmem:[%s9542_s23 + $0x1a0] ss:$16 sps:$4 sm:$0xff]   ;;  %v9013_v16 = vld [vmem:[%s9542_s23 + $0x1a8] ss:$16 sps:$4 sm:$0xff]   ;;  %v9018_v54 = vld [vmem:[%s9542_s23 + $0x1c4] ss:$16 sps:$4 sm:$0xff]  }
 0x711   : > { %v5157_v12 = vpack.c.bf16 %v5097_v28, %v5093_v47  ;;  %v5159_v56 = vpack.c.bf16 %v5099_v19, %v5095_v26  ;;  %v4910_v6 = vpop.f32.mrb[196].mxu0  ;;  %v5023_v35 = vpop.f32.mrb[196].mxu1 }
 0x712   : > { %v4911_v57 = vadd.f32 %v4910_v6, %v11766_v52  ;;  %v5024_v48 = vadd.f32 %v5023_v35, %v11769_v20  ;;  %v4912_v37 = vpop.f32.mrb[197].mxu0  ;;  %v5025_v60 = vpop.f32.mrb[197].mxu1 }
 0x713   : > { %v4913_v45 = vadd.f32 %v4912_v37, %v11775_v24  ;;  %v5026_v21 = vadd.f32 %v5025_v60, %v11778_v42  ;;  %v4914_v11 = vpop.f32.mrb[198].mxu0  ;;  %v5027_v44 = vpop.f32.mrb[198].mxu1  ;;  %5477 = vmatprep.mubr.bf16.mxu0 %v5157_v12  ;;  %5574 = vmatprep.mubr.bf16.mxu1 %v5159_v56  ;;  %v9021_v12 = vld [vmem:[%s9542_s23 + $0x1cc] ss:$16 sps:$4 sm:$0xff]  }
 0x714   : > { %v4915_v63 = vadd.f32 %v4914_v11, %v11766_v52  ;;  %v5028_v29 = vadd.f32 %v5027_v44, %v11769_v20  ;;  %v4916_v5 = vpop.f32.mrb[199].mxu0  ;;  %v5029_v41 = vpop.f32.mrb[199].mxu1  ;;  %5478 = vmatmul.mubr.bf16.vlgmr.msra.gmra.mrb[224].mxu0 %v5156_v17  ;;  %5575 = vmatmul.mubr.bf16.vlgmr.msra.gmra.mrb[224].mxu1 %v5158_v3  ;;  %v5100_v47 = vmax.f32 %v4911_v57, 0.0  ;;  %v5102_v26 = vmax.f32 %v5024_v48, 0.0  ;;  %v9016_v48 = vld [vmem:[%s9542_s23 + $0x1c0] ss:$16 sps:$4 sm:$0xff]  }
 0x715   : > { %v4917_v8 = vadd.f32 %v4916_v5, %v11775_v24  ;;  %v5030_v10 = vadd.f32 %v5029_v41, %v11778_v42  ;;  %5776 = vmatpush1.bf16.msra.mxu0 %v9004_v51  ;;  %5889 = vmatpush1.bf16.msra.mxu1 %v9007_v58  ;;  %v5101_v17 = vmax.f32 %v4913_v45, 0.0  ;;  %v5103_v3 = vmax.f32 %v5026_v21, 0.0  ;;  %v9019_v11 = vld [vmem:[%s9542_s23 + $0x1c8] ss:$16 sps:$4 sm:$0xff]   ;;  %v9024_v44 = vld [vmem:[%s9542_s23 + $0x1e4] ss:$16 sps:$4 sm:$0xff]  }
 0x716   : > { %v5104_v28 = vmax.f32 %v4915_v63, 0.0  ;;  %v5106_v19 = vmax.f32 %v5028_v29, 0.0  ;;  %5777 = vmatprep.subr.bf16.mxu0 %v9012_v39  ;;  %5890 = vmatprep.subr.bf16.mxu1 %v9015_v61  ;;  %v9027_v63 = vld [vmem:[%s9542_s23 + $0x1ec] ss:$16 sps:$4 sm:$0xff]  }
 0x717   : > { %v5105_v56 = vmax.f32 %v4917_v8, 0.0  ;;  %v5107_v6 = vmax.f32 %v5030_v10, 0.0 }
 0x718   : > { %v5160_v35 = vpack.c.bf16 %v5104_v28, %v5100_v47  ;;  %v5162_v51 = vpack.c.bf16 %v5106_v19, %v5102_v26  ;;  %v9022_v28 = vld [vmem:[%s9542_s23 + $0x1e0] ss:$16 sps:$4 sm:$0xff]   ;;  %v9025_v19 = vld [vmem:[%s9542_s23 + $0x1e8] ss:$16 sps:$4 sm:$0xff]  }
 0x719   : > { %v5161_v58 = vpack.c.bf16 %v5105_v56, %v5101_v17  ;;  %v5163_v37 = vpack.c.bf16 %v5107_v6, %v5103_v3  ;;  %v4920_v60 = vpop.f32.mrb[200].mxu0  ;;  %v5033_v57 = vpop.f32.mrb[200].mxu1  ;;  %5778 = vmatpush1.bf16.msra.mxu0 %v9010_v59  ;;  %5891 = vmatpush1.bf16.msra.mxu1 %v9013_v16 }
 0x71a   : > { %v4921_v39 = vadd.f32 %v4920_v60, %v11766_v52  ;;  %v5034_v61 = vadd.f32 %v5033_v57, %v11769_v20  ;;  %v4922_v45 = vpop.f32.mrb[201].mxu0  ;;  %v5035_v21 = vpop.f32.mrb[201].mxu1  ;;  %5779 = vmatprep.subr.bf16.mxu0 %v9018_v54  ;;  %5892 = vmatprep.subr.bf16.mxu1 %v9021_v12 }
 0x71b   : > { %v4923_v29 = vadd.f32 %v4922_v45, %v11775_v24  ;;  %v5036_v5 = vadd.f32 %v5035_v21, %v11778_v42  ;;  %v4924_v41 = vpop.f32.mrb[202].mxu0  ;;  %v5037_v8 = vpop.f32.mrb[202].mxu1  ;;  %5485 = vmatprep.mubr.bf16.mxu0 %v5161_v58  ;;  %5582 = vmatprep.mubr.bf16.mxu1 %v5163_v37 }
 0x71c   : > { %v4925_v10 = vadd.f32 %v4924_v41, %v11766_v52  ;;  %v5038_v59 = vadd.f32 %v5037_v8, %v11769_v20  ;;  %v4926_v16 = vpop.f32.mrb[203].mxu0  ;;  %v5039_v47 = vpop.f32.mrb[203].mxu1  ;;  %5486 = vmatmul.mubr.bf16.gmra.mrb[228].mxu0 %v5160_v35  ;;  %5583 = vmatmul.mubr.bf16.gmra.mrb[228].mxu1 %v5162_v51  ;;  %v5108_v12 = vmax.f32 %v4921_v39, 0.0  ;;  %v5110_v17 = vmax.f32 %v5034_v61, 0.0 }
 0x71d   : > { %v4927_v54 = vadd.f32 %v4926_v16, %v11775_v24  ;;  %v5040_v26 = vadd.f32 %v5039_v47, %v11778_v42  ;;  %5780 = vmatpush1.bf16.msra.mxu0 %v9016_v48  ;;  %5893 = vmatpush1.bf16.msra.mxu1 %v9019_v11  ;;  %v5109_v6 = vmax.f32 %v4923_v29, 0.0  ;;  %v5111_v58 = vmax.f32 %v5036_v5, 0.0 }
 0x71e   : > { %v5112_v3 = vmax.f32 %v4925_v10, 0.0  ;;  %v5114_v56 = vmax.f32 %v5038_v59, 0.0  ;;  %5781 = vmatprep.subr.bf16.mxu0 %v9024_v44  ;;  %5894 = vmatprep.subr.bf16.mxu1 %v9027_v63 }
 0x71f   : > { %v5113_v37 = vmax.f32 %v4927_v54, 0.0  ;;  %v5115_v60 = vmax.f32 %v5040_v26, 0.0 }
 0x720   : > { %v5164_v35 = vpack.c.bf16 %v5112_v3, %v5108_v12  ;;  %v5166_v51 = vpack.c.bf16 %v5114_v56, %v5110_v17 }
 0x721   : > { %v5165_v57 = vpack.c.bf16 %v5113_v37, %v5109_v6  ;;  %v5167_v45 = vpack.c.bf16 %v5115_v60, %v5111_v58  ;;  %v4930_v21 = vpop.f32.mrb[204].mxu0  ;;  %v5043_v41 = vpop.f32.mrb[204].mxu1  ;;  %5782 = vmatpush1.bf16.msra.mxu0 %v9022_v28  ;;  %5895 = vmatpush1.bf16.msra.mxu1 %v9025_v19 }
 0x722   : > { %v4931_v48 = vadd.f32 %v4930_v21, %v11766_v52  ;;  %v5044_v11 = vadd.f32 %v5043_v41, %v11769_v20  ;;  %v4932_v39 = vpop.f32.mrb[205].mxu0  ;;  %v5045_v61 = vpop.f32.mrb[205].mxu1 }
 0x723   : > { %v4933_v44 = vadd.f32 %v4932_v39, %v11775_v24  ;;  %v5046_v63 = vadd.f32 %v5045_v61, %v11778_v42  ;;  %v4934_v29 = vpop.f32.mrb[206].mxu0  ;;  %v5047_v5 = vpop.f32.mrb[206].mxu1  ;;  %5493 = vmatprep.mubr.bf16.mxu0 %v5165_v57  ;;  %5590 = vmatprep.mubr.bf16.mxu1 %v5167_v45 }
 0x724   : > { %v4935_v8 = vadd.f32 %v4934_v29, %v11766_v52  ;;  %v5048_v10 = vadd.f32 %v5047_v5, %v11769_v20  ;;  %v4936_v59 = vpop.f32.mrb[207].mxu0  ;;  %v5049_v16 = vpop.f32.mrb[207].mxu1  ;;  %5494 = vmatmul.mubr.bf16.gmra.mrb[232].mxu0 %v5164_v35  ;;  %5591 = vmatmul.mubr.bf16.gmra.mrb[232].mxu1 %v5166_v51  ;;  %v5116_v26 = vmax.f32 %v4931_v48, 0.0  ;;  %v5118_v28 = vmax.f32 %v5044_v11, 0.0 }
 0x725   : > { %v4937_v47 = vadd.f32 %v4936_v59, %v11775_v24  ;;  %v5050_v54 = vadd.f32 %v5049_v16, %v11778_v42  ;;  %v5117_v17 = vmax.f32 %v4933_v44, 0.0  ;;  %v5119_v3 = vmax.f32 %v5046_v63, 0.0 }
 0x726   : > { %v5120_v19 = vmax.f32 %v4935_v8, 0.0  ;;  %v5122_v12 = vmax.f32 %v5048_v10, 0.0 }
 0x727   : > { %v5121_v56 = vmax.f32 %v4937_v47, 0.0  ;;  %v5123_v6 = vmax.f32 %v5050_v54, 0.0 }
 0x728   : > { %v5168_v58 = vpack.c.bf16 %v5120_v19, %v5116_v26  ;;  %v5170_v37 = vpack.c.bf16 %v5122_v12, %v5118_v28 }
 0x729   : > { %v5169_v60 = vpack.c.bf16 %v5121_v56, %v5117_v17  ;;  %v5171_v57 = vpack.c.bf16 %v5123_v6, %v5119_v3  ;;  %v4940_v45 = vpop.f32.mrb[208].mxu0  ;;  %v5053_v21 = vpop.f32.mrb[208].mxu1 }
 0x72a   : > { %v4941_v35 = vadd.f32 %v4940_v45, %v11766_v52  ;;  %v5054_v51 = vadd.f32 %v5053_v21, %v11769_v20  ;;  %v4942_v41 = vpop.f32.mrb[209].mxu0  ;;  %v5055_v39 = vpop.f32.mrb[209].mxu1 }
 0x72b   : > { %v4943_v48 = vadd.f32 %v4942_v41, %v11775_v24  ;;  %v5056_v11 = vadd.f32 %v5055_v39, %v11778_v42  ;;  %v4944_v61 = vpop.f32.mrb[210].mxu0  ;;  %v5057_v44 = vpop.f32.mrb[210].mxu1  ;;  %5501 = vmatprep.mubr.bf16.mxu0 %v5169_v60  ;;  %5598 = vmatprep.mubr.bf16.mxu1 %v5171_v57 }
 0x72c   : > { %v4945_v63 = vadd.f32 %v4944_v61, %v11766_v52  ;;  %v5058_v29 = vadd.f32 %v5057_v44, %v11769_v20  ;;  %v4946_v5 = vpop.f32.mrb[211].mxu0  ;;  %v5059_v8 = vpop.f32.mrb[211].mxu1  ;;  %5502 = vmatmul.mubr.bf16.gmra.mrb[236].mxu0 %v5168_v58  ;;  %5599 = vmatmul.mubr.bf16.gmra.mrb[236].mxu1 %v5170_v37  ;;  %v5124_v16 = vmax.f32 %v4941_v35, 0.0  ;;  %v5126_v47 = vmax.f32 %v5054_v51, 0.0 }
 0x72d   : > { %v4947_v10 = vadd.f32 %v4946_v5, %v11775_v24  ;;  %v5060_v59 = vadd.f32 %v5059_v8, %v11778_v42  ;;  %v5125_v28 = vmax.f32 %v4943_v48, 0.0  ;;  %v5127_v19 = vmax.f32 %v5056_v11, 0.0 }
 0x72e   : > { %v5128_v54 = vmax.f32 %v4945_v63, 0.0  ;;  %v5130_v26 = vmax.f32 %v5058_v29, 0.0 }
 0x72f   : > { %v5129_v12 = vmax.f32 %v4947_v10, 0.0  ;;  %v5131_v17 = vmax.f32 %v5060_v59, 0.0 }
 0x730   : > { %v5172_v3 = vpack.c.bf16 %v5128_v54, %v5124_v16  ;;  %v5174_v56 = vpack.c.bf16 %v5130_v26, %v5126_v47 }
 0x731   : > { %v5173_v6 = vpack.c.bf16 %v5129_v12, %v5125_v28  ;;  %v5175_v60 = vpack.c.bf16 %v5131_v17, %v5127_v19  ;;  %v4950_v57 = vpop.f32.mrb[212].mxu0  ;;  %v5063_v45 = vpop.f32.mrb[212].mxu1 }
 0x732   : > { %v4951_v58 = vadd.f32 %v4950_v57, %v11766_v52  ;;  %v5064_v37 = vadd.f32 %v5063_v45, %v11769_v20  ;;  %v4952_v21 = vpop.f32.mrb[213].mxu0  ;;  %v5065_v41 = vpop.f32.mrb[213].mxu1 }
 0x733   : > { %v4953_v35 = vadd.f32 %v4952_v21, %v11775_v24  ;;  %v5066_v51 = vadd.f32 %v5065_v41, %v11778_v42  ;;  %v4954_v39 = vpop.f32.mrb[214].mxu0  ;;  %v5067_v48 = vpop.f32.mrb[214].mxu1  ;;  %5509 = vmatprep.mubr.bf16.mxu0 %v5173_v6  ;;  %5606 = vmatprep.mubr.bf16.mxu1 %v5175_v60 }
 0x734   : > { %v4955_v11 = vadd.f32 %v4954_v39, %v11766_v52  ;;  %v5068_v61 = vadd.f32 %v5067_v48, %v11769_v20  ;;  %v4956_v44 = vpop.f32.mrb[215].mxu0  ;;  %v5069_v63 = vpop.f32.mrb[215].mxu1  ;;  %5510 = vmatmul.mubr.bf16.gmra.mrb[240].mxu0 %v5172_v3  ;;  %5607 = vmatmul.mubr.bf16.gmra.mrb[240].mxu1 %v5174_v56  ;;  %v5132_v8 = vmax.f32 %v4951_v58, 0.0  ;;  %v5134_v10 = vmax.f32 %v5064_v37, 0.0 }
 0x735   : > { %v4957_v29 = vadd.f32 %v4956_v44, %v11775_v24  ;;  %v5070_v5 = vadd.f32 %v5069_v63, %v11778_v42  ;;  %v5133_v47 = vmax.f32 %v4953_v35, 0.0  ;;  %v5135_v54 = vmax.f32 %v5066_v51, 0.0 }
 0x736   : > { %v5136_v59 = vmax.f32 %v4955_v11, 0.0  ;;  %v5138_v16 = vmax.f32 %v5068_v61, 0.0 }
 0x737   : > { %v5137_v26 = vmax.f32 %v4957_v29, 0.0  ;;  %v5139_v28 = vmax.f32 %v5070_v5, 0.0 }
 0x738   : > { %v5176_v19 = vpack.c.bf16 %v5136_v59, %v5132_v8  ;;  %v5178_v12 = vpack.c.bf16 %v5138_v16, %v5134_v10 }
 0x739   : > { %v5177_v17 = vpack.c.bf16 %v5137_v26, %v5133_v47  ;;  %v5179_v6 = vpack.c.bf16 %v5139_v28, %v5135_v54  ;;  %v4960_v60 = vpop.f32.mrb[216].mxu0  ;;  %v5073_v57 = vpop.f32.mrb[216].mxu1 }
 0x73a   : > { %v4961_v3 = vadd.f32 %v4960_v60, %v11766_v52  ;;  %v5074_v56 = vadd.f32 %v5073_v57, %v11769_v20  ;;  %v4962_v45 = vpop.f32.mrb[217].mxu0  ;;  %v5075_v21 = vpop.f32.mrb[217].mxu1 }
 0x73b   : > { %v4963_v58 = vadd.f32 %v4962_v45, %v11775_v24  ;;  %v5076_v37 = vadd.f32 %v5075_v21, %v11778_v42  ;;  %v4964_v41 = vpop.f32.mrb[218].mxu0  ;;  %v5077_v35 = vpop.f32.mrb[218].mxu1  ;;  %5517 = vmatprep.mubr.bf16.mxu0 %v5177_v17  ;;  %5614 = vmatprep.mubr.bf16.mxu1 %v5179_v6 }
 0x73c   : > { %v4965_v51 = vadd.f32 %v4964_v41, %v11766_v52  ;;  %v5078_v39 = vadd.f32 %v5077_v35, %v11769_v20  ;;  %v4966_v48 = vpop.f32.mrb[219].mxu0  ;;  %v5079_v11 = vpop.f32.mrb[219].mxu1  ;;  %5518 = vmatmul.mubr.bf16.gmra.mrb[244].mxu0 %v5176_v19  ;;  %5615 = vmatmul.mubr.bf16.gmra.mrb[244].mxu1 %v5178_v12  ;;  %v5140_v63 = vmax.f32 %v4961_v3, 0.0  ;;  %v5142_v29 = vmax.f32 %v5074_v56, 0.0 }
 0x73d   : > { %v4967_v61 = vadd.f32 %v4966_v48, %v11775_v24  ;;  %v5080_v44 = vadd.f32 %v5079_v11, %v11778_v42  ;;  %v5141_v10 = vmax.f32 %v4963_v58, 0.0  ;;  %v5143_v59 = vmax.f32 %v5076_v37, 0.0 }
 0x73e   : > { %v5144_v5 = vmax.f32 %v4965_v51, 0.0  ;;  %v5146_v8 = vmax.f32 %v5078_v39, 0.0 }
 0x73f   : > { %v5145_v16 = vmax.f32 %v4967_v61, 0.0  ;;  %v5147_v47 = vmax.f32 %v5080_v44, 0.0 }
 0x740   : > { %v5180_v54 = vpack.c.bf16 %v5144_v5, %v5140_v63  ;;  %v5182_v26 = vpack.c.bf16 %v5146_v8, %v5142_v29 }
 0x741   : > { %v5181_v28 = vpack.c.bf16 %v5145_v16, %v5141_v10  ;;  %v5183_v17 = vpack.c.bf16 %v5147_v47, %v5143_v59  ;;  %v4970_v6 = vpop.f32.mrb[220].mxu0  ;;  %v5083_v60 = vpop.f32.mrb[220].mxu1  ;;  %v9035_v47 = vld [vmem:[%s9557_s3 + $0x388] sm:$0xff]  }
 0x742   : > { %v4971_v19 = vadd.f32 %v4970_v6, %v11766_v52  ;;  %v5084_v12 = vadd.f32 %v5083_v60, %v11769_v20  ;;  %v4972_v57 = vpop.f32.mrb[221].mxu0  ;;  %v5085_v45 = vpop.f32.mrb[221].mxu1  ;;  %v9043_v6 = vld [vmem:[%s9557_s3 + $0x398] sm:$0xff]   ;;  %v9044_v60 = vld [vmem:[%s9557_s3 + $0x360] sm:$0xff]  }
 0x743   : > { %v4973_v3 = vadd.f32 %v4972_v57, %v11775_v24  ;;  %v5086_v56 = vadd.f32 %v5085_v45, %v11778_v42  ;;  %v4974_v21 = vpop.f32.mrb[222].mxu0  ;;  %v5087_v58 = vpop.f32.mrb[222].mxu1  ;;  %5525 = vmatprep.mubr.bf16.mxu0 %v5181_v28  ;;  %5622 = vmatprep.mubr.bf16.mxu1 %v5183_v17  ;;  %v9039_v28 = vld [vmem:[%s9557_s3 + $0x390] sm:$0xff]   ;;  %v9042_v17 = vld [vmem:[%s9557_s3 + $0x318] sm:$0xff]   ;;  %v9048_v57 = vld [vmem:[%s9557_s3 + $0x368] sm:$0xff]  }
 0x744   : > { %v4975_v37 = vadd.f32 %v4974_v21, %v11766_v52  ;;  %v5088_v41 = vadd.f32 %v5087_v58, %v11769_v20  ;;  %v4976_v35 = vpop.f32.mrb[223].mxu0  ;;  %v5089_v51 = vpop.f32.mrb[223].mxu1  ;;  %5526 = vmatmul.mubr.bf16.gmra.mrb[248].mxu0 %v5180_v54  ;;  %5623 = vmatmul.mubr.bf16.gmra.mrb[248].mxu1 %v5182_v26  ;;  %v5148_v11 = vmax.f32 %v4971_v19, 0.0  ;;  %v5150_v61 = vmax.f32 %v5084_v12, 0.0  ;;  %v9037_v54 = vld [vmem:[%s9557_s3 + $0x3d0] sm:$0xff]   ;;  %v9045_v19 = vld [vmem:[%s9557_s3 + $0x3e0] sm:$0xff]  }
 0x745   : > { %v4977_v39 = vadd.f32 %v4976_v35, %v11775_v24  ;;  %v5090_v48 = vadd.f32 %v5089_v51, %v11778_v42  ;;  %v5149_v29 = vmax.f32 %v4973_v3, 0.0  ;;  %v5151_v5 = vmax.f32 %v5086_v56, 0.0  ;;  %v9033_v24 = vld [vmem:[%s9557_s3 + $0x3c8] sm:$0xff]   ;;  %v9038_v26 = vld [vmem:[%s9557_s3 + $0x310] sm:$0xff]   ;;  %v9046_v12 = vld [vmem:[%s9557_s3 + $0x320] sm:$0xff]  }
 0x746   : > { %v5152_v44 = vmax.f32 %v4975_v37, 0.0  ;;  %v5154_v63 = vmax.f32 %v5088_v41, 0.0  ;;  %v9034_v42 = vld [vmem:[%s9557_s3 + $0x308] sm:$0xff]   ;;  %v9052_v21 = vld [vmem:[%s9557_s3 + $0x370] sm:$0xff]   ;;  %v9056_v35 = vld [vmem:[%s9557_s3 + $0x378] sm:$0xff]  }
 0x747   : > { %v5153_v8 = vmax.f32 %v4977_v39, 0.0  ;;  %v5155_v10 = vmax.f32 %v5090_v48, 0.0  ;;  %v9049_v45 = vld [vmem:[%s9557_s3 + $0x3e8] sm:$0xff]   ;;  %v9053_v58 = vld [vmem:[%s9557_s3 + $0x3f0] sm:$0xff]   ;;  %v9057_v51 = vld [vmem:[%s9557_s3 + $0x3f8] sm:$0xff]  }
 0x748   : > { %v5184_v59 = vpack.c.bf16 %v5152_v44, %v5148_v11  ;;  %v5186_v52 = vpack.c.bf16 %v5154_v63, %v5150_v61  ;;  %v9050_v3 = vld [vmem:[%s9557_s3 + $0x328] sm:$0xff]   ;;  %v9054_v37 = vld [vmem:[%s9557_s3 + $0x330] sm:$0xff]   ;;  %v9058_v39 = vld [vmem:[%s9557_s3 + $0x338] sm:$0xff]  }
 0x749   : > { %v5185_v16 = vpack.c.bf16 %v5153_v8, %v5149_v29  ;;  %v5187_v20 = vpack.c.bf16 %v5155_v10, %v5151_v5  ;;  %v9051_v56 = vld [vmem:[%s9557_s3 + $0x3a8] sm:$0xff]   ;;  %v9055_v41 = vld [vmem:[%s9557_s3 + $0x3b0] sm:$0xff]   ;;  %v9059_v48 = vld [vmem:[%s9557_s3 + $0x3b8] sm:$0xff]  }
 0x74b   : > { %5533 = vmatprep.mubr.bf16.mxu0 %v5185_v16  ;;  %5630 = vmatprep.mubr.bf16.mxu1 %v5187_v20 }
 0x74c   : > { %5534 = vmatmul.mubr.bf16.gmra.mrb[252].mxu0 %v5184_v59  ;;  %5631 = vmatmul.mubr.bf16.gmra.mrb[252].mxu1 %v5186_v52 }
 0x74d   : > { %5807 = vmatprep.mubr.bf16.mxu0 %v12722_v27  ;;  %5920 = vmatprep.mubr.bf16.mxu1 %v12722_v27 }
 0x754   : > { %7792 = vmatmul.mubr.msk.bf16.vlgmr.msra.gmra.mrb[0].mxu0 %vm1006_vm1, %v12723_v14  ;;  %7800 = vmatmul.mubr.msk.bf16.vlgmr.msra.gmra.mrb[0].mxu1 %vm1006_vm1, %v12723_v14  ;;  %v9028_v14 = vld [vmem:[%s9557_s3 + $0x340] sm:$0xff]  }
 0x755   : > { %5817 = vmatprep.mubr.bf16.mxu0 %v12722_v27  ;;  %5930 = vmatprep.mubr.bf16.mxu1 %v12722_v27 }
 0x756   : > { %8411 = vmatprep.subr.bf16.mxu0 %v9028_v14 }
 0x75c   : > { %7793 = vmatmul.mubr.msk.bf16.gmra.mrb[4].mxu0 %vm1006_vm1, %v12724_v32  ;;  %7801 = vmatmul.mubr.msk.bf16.gmra.mrb[4].mxu1 %vm1006_vm1, %v12724_v32  ;;  %v9029_v32 = vld [vmem:[%s9557_s3 + $0x3c0] sm:$0xff]  }
 0x75d   : > { %5827 = vmatprep.mubr.bf16.mxu0 %v12722_v27  ;;  %5940 = vmatprep.mubr.bf16.mxu1 %v12722_v27 }
 0x75e   : > { %8475 = vmatprep.subr.bf16.mxu1 %v9029_v32 }
 0x764   : > { %7794 = vmatmul.mubr.msk.bf16.gmra.mrb[8].mxu0 %vm1006_vm1, %v12725_v18  ;;  %7802 = vmatmul.mubr.msk.bf16.gmra.mrb[8].mxu1 %vm1006_vm1, %v12725_v18  ;;  %v9030_v18 = vld [vmem:[%s9557_s3 + $0x300] sm:$0xff]  }
 0x765   : > { %5837 = vmatprep.mubr.bf16.mxu0 %v12722_v27  ;;  %5950 = vmatprep.mubr.bf16.mxu1 %v12722_v27 }
 0x766   : > { %8412 = vmatpush3.bf16.msra.mxu0 %v9030_v18 }
 0x76c   : > { %7795 = vmatmul.mubr.msk.bf16.gmra.mrb[12].mxu0 %vm1006_vm1, %v12726_v9  ;;  %7803 = vmatmul.mubr.msk.bf16.gmra.mrb[12].mxu1 %vm1006_vm1, %v12726_v9  ;;  %v9031_v9 = vld [vmem:[%s9557_s3 + $0x380] sm:$0xff]  }
 0x76d   : > { %5847 = vmatprep.mubr.bf16.mxu0 %v12722_v27  ;;  %5960 = vmatprep.mubr.bf16.mxu1 %v12722_v27 }
 0x76e   : > { %8476 = vmatpush3.bf16.msra.mxu1 %v9031_v9 }
 0x76f   : > { %8477 = vmatprep.subr.bf16.mxu1 %v9033_v24 }
 0x772   : > { %8478 = vmatpush3.bf16.msra.mxu1 %v9035_v47 }
 0x773   : > { %8479 = vmatprep.subr.bf16.mxu1 %v9037_v54 }
 0x774   : > { %7796 = vmatmul.mubr.msk.bf16.gmra.mrb[16].mxu0 %vm1006_vm1, %v12727_v50  ;;  %7804 = vmatmul.mubr.msk.bf16.gmra.mrb[16].mxu1 %vm1006_vm1, %v12727_v50  ;;  %v9032_v50 = vld [vmem:[%s9557_s3 + $0x348] sm:$0xff]  }
 0x775   : > { %5857 = vmatprep.mubr.bf16.mxu0 %v12722_v27  ;;  %5970 = vmatprep.mubr.bf16.mxu1 %v12722_v27 }
 0x776   : > { %8413 = vmatprep.subr.bf16.mxu0 %v9032_v50  ;;  %8480 = vmatpush3.bf16.msra.mxu1 %v9039_v28 }
 0x777   : > { %8414 = vmatpush3.bf16.msra.mxu0 %v9034_v42 }
 0x77c   : > { %7797 = vmatmul.mubr.msk.bf16.gmra.mrb[20].mxu0 %vm1006_vm1, %v12728_v0  ;;  %7805 = vmatmul.mubr.msk.bf16.gmra.mrb[20].mxu1 %vm1006_vm1, %v12728_v0  ;;  %v9036_v0 = vld [vmem:[%s9557_s3 + $0x350] sm:$0xff]  }
 0x77d   : > { %5867 = vmatprep.mubr.bf16.mxu0 %v12722_v27  ;;  %5980 = vmatprep.mubr.bf16.mxu1 %v12722_v27 }
 0x77e   : > { %8415 = vmatprep.subr.bf16.mxu0 %v9036_v0 }
 0x77f   : > { %8416 = vmatpush3.bf16.msra.mxu0 %v9038_v26 }
 0x784   : > { %7798 = vmatmul.mubr.msk.bf16.gmra.mrb[24].mxu0 %vm1006_vm1, %v12729_v23  ;;  %7806 = vmatmul.mubr.msk.bf16.gmra.mrb[24].mxu1 %vm1006_vm1, %v12729_v23  ;;  %v9041_v23 = vld [vmem:[%s9557_s3 + $0x3d8] sm:$0xff]  }
 0x785   : > { %5877 = vmatprep.mubr.bf16.mxu0 %v12722_v27  ;;  %5990 = vmatprep.mubr.bf16.mxu1 %v12722_v27  ;;  %v9040_v27 = vld [vmem:[%s9557_s3 + $0x358] sm:$0xff]  }
 0x786   : > { %8417 = vmatprep.subr.bf16.mxu0 %v9040_v27  ;;  %8481 = vmatprep.subr.bf16.mxu1 %v9041_v23 }
 0x787   : > { %8418 = vmatpush3.bf16.msra.mxu0 %v9042_v17  ;;  %8482 = vmatpush3.bf16.msra.mxu1 %v9043_v6 }
 0x788   : > { %8419 = vmatprep.subr.bf16.mxu0 %v9044_v60  ;;  %8483 = vmatprep.subr.bf16.mxu1 %v9045_v19 }
 0x78b   : > { %8420 = vmatpush3.bf16.msra.mxu0 %v9046_v12 }
 0x78c   : > { %7799 = vmatmul.mubr.msk.bf16.gmra.mrb[28].mxu0 %vm1006_vm1, %v12730_v36  ;;  %7807 = vmatmul.mubr.msk.bf16.gmra.mrb[28].mxu1 %vm1006_vm1, %v12730_v36  ;;  %v9047_v36 = vld [vmem:[%s9557_s3 + $0x3a0] sm:$0xff]  }
 0x78d   : > { %8484 = vmatpush3.bf16.msra.mxu1 %v9047_v36  ;;  %8421 = vmatprep.subr.bf16.mxu0 %v9048_v57 }
 0x78e   : > { %8485 = vmatprep.subr.bf16.mxu1 %v9049_v45 }
 0x78f   : > { %8422 = vmatpush3.bf16.msra.mxu0 %v9050_v3 }
 0x790   : > { %8423 = vmatprep.subr.bf16.mxu0 %v9052_v21 }
 0x791   : > { %8486 = vmatpush3.bf16.msra.mxu1 %v9051_v56 }
 0x792   : > { %8487 = vmatprep.subr.bf16.mxu1 %v9053_v58 }
 0x793   : > { %8424 = vmatpush3.bf16.msra.mxu0 %v9054_v37 }
 0x794   : > { %8425 = vmatprep.subr.bf16.mxu0 %v9056_v35 }
 0x795   : > { %8488 = vmatpush3.bf16.msra.mxu1 %v9055_v41 }
 0x796   : > { %8489 = vmatprep.subr.bf16.mxu1 %v9057_v51 }
 0x797   : > { %8426 = vmatpush3.bf16.msra.mxu0 %v9058_v39 }
 0x799   : > { %8490 = vmatpush3.bf16.msra.mxu1 %v9059_v48 }
 0x7e7   : > { %v8299_v11 = vpop.f32.mrb[224].mxu0  ;;  %v8363_v61 = vpop.f32.mrb[224].mxu1 }
 0x7e8   : > { %v8300_v44 = vpop.f32.mrb[225].mxu0  ;;  %v8364_v63 = vpop.f32.mrb[225].mxu1 }
 0x7e9   : > { %v8301_v29 = vadd.f32 %v8300_v44, %v8299_v11  ;;  %v8365_v5 = vadd.f32 %v8364_v63, %v8363_v61  ;;  %v8302_v8 = vpop.f32.mrb[226].mxu0  ;;  %v8366_v10 = vpop.f32.mrb[226].mxu1 }
 0x7ea   : > { %v8303_v59 = vpop.f32.mrb[227].mxu0  ;;  %v8367_v52 = vpop.f32.mrb[227].mxu1 }
 0x7eb   : > { %v5577_v16 = vadd.f32 %v8365_v5, %v8301_v29  ;;  %v8304_v20 = vadd.f32 %v8303_v59, %v8302_v8  ;;  %v8368_v14 = vadd.f32 %v8367_v52, %v8366_v10 }
 0x7ed   : > { %v11941_v32 = vadd.f32 %v5577_v16, %v11722_v25  ;;  %v5580_v18 = vadd.f32 %v8368_v14, %v8304_v20 }
 0x7ef   : > { %v11944_v9 = vadd.f32 %v5580_v18, %v11725_v22  ;;  %v8305_v50 = vpop.f32.mrb[228].mxu0  ;;  %v8369_v24 = vpop.f32.mrb[228].mxu1 }
 0x7f0   : > { %v8306_v42 = vpop.f32.mrb[229].mxu0  ;;  %v8370_v47 = vpop.f32.mrb[229].mxu1 }
 0x7f1   : > { %v8307_v0 = vadd.f32 %v8306_v42, %v8305_v50  ;;  %v8371_v54 = vadd.f32 %v8370_v47, %v8369_v24  ;;  %v8308_v26 = vpop.f32.mrb[230].mxu0  ;;  %v8372_v28 = vpop.f32.mrb[230].mxu1 }
 0x7f2   : > { %v8309_v27 = vpop.f32.mrb[231].mxu0  ;;  %v8373_v23 = vpop.f32.mrb[231].mxu1 }
 0x7f3   : > { %v5585_v17 = vadd.f32 %v8371_v54, %v8307_v0  ;;  %v8310_v6 = vadd.f32 %v8309_v27, %v8308_v26  ;;  %v8374_v60 = vadd.f32 %v8373_v23, %v8372_v28 }
 0x7f5   : > { %v11947_v25 = vadd.f32 %v5585_v17, %v11728_v30  ;;  %v5588_v19 = vadd.f32 %v8374_v60, %v8310_v6 }
 0x7f7   : > { %v11950_v22 = vadd.f32 %v5588_v19, %v11731_v62  ;;  %v8311_v12 = vpop.f32.mrb[232].mxu0  ;;  %v8375_v36 = vpop.f32.mrb[232].mxu1 }
 0x7f8   : > { %v8312_v57 = vpop.f32.mrb[233].mxu0  ;;  %v8376_v45 = vpop.f32.mrb[233].mxu1 }
 0x7f9   : > { %v8313_v3 = vadd.f32 %v8312_v57, %v8311_v12  ;;  %v8377_v56 = vadd.f32 %v8376_v45, %v8375_v36  ;;  %v8314_v21 = vpop.f32.mrb[234].mxu0  ;;  %v8378_v58 = vpop.f32.mrb[234].mxu1 }
 0x7fa   : > { %v8315_v37 = vpop.f32.mrb[235].mxu0  ;;  %v8379_v41 = vpop.f32.mrb[235].mxu1 }
 0x7fb   : > { %v5593_v35 = vadd.f32 %v8377_v56, %v8313_v3  ;;  %v8316_v51 = vadd.f32 %v8315_v37, %v8314_v21  ;;  %v8380_v39 = vadd.f32 %v8379_v41, %v8378_v58 }
 0x7fd   : > { %v11953_v30 = vadd.f32 %v5593_v35, %v11734_v49  ;;  %v5596_v48 = vadd.f32 %v8380_v39, %v8316_v51 }
 0x7ff   : > { %v11956_v62 = vadd.f32 %v5596_v48, %v11737_v33  ;;  %v8317_v11 = vpop.f32.mrb[236].mxu0  ;;  %v8381_v61 = vpop.f32.mrb[236].mxu1 }
 0x800   : > { %v8318_v44 = vpop.f32.mrb[237].mxu0  ;;  %v8382_v63 = vpop.f32.mrb[237].mxu1 }
 0x801   : > { %v8319_v29 = vadd.f32 %v8318_v44, %v8317_v11  ;;  %v8383_v5 = vadd.f32 %v8382_v63, %v8381_v61  ;;  %v8320_v8 = vpop.f32.mrb[238].mxu0  ;;  %v8384_v10 = vpop.f32.mrb[238].mxu1 }
 0x802   : > { %v8321_v59 = vpop.f32.mrb[239].mxu0  ;;  %v8385_v52 = vpop.f32.mrb[239].mxu1 }
 0x803   : > { %v5601_v16 = vadd.f32 %v8383_v5, %v8319_v29  ;;  %v8322_v20 = vadd.f32 %v8321_v59, %v8320_v8  ;;  %v8386_v14 = vadd.f32 %v8385_v52, %v8384_v10 }
 0x805   : > { %v11959_v49 = vadd.f32 %v5601_v16, %v11740_v38  ;;  %v5604_v18 = vadd.f32 %v8386_v14, %v8322_v20 }
 0x807   : > { %v11962_v33 = vadd.f32 %v5604_v18, %v11743_v46  ;;  %v8323_v50 = vpop.f32.mrb[240].mxu0  ;;  %v8387_v24 = vpop.f32.mrb[240].mxu1 }
 0x808   : > { %v8324_v42 = vpop.f32.mrb[241].mxu0  ;;  %v8388_v47 = vpop.f32.mrb[241].mxu1 }
 0x809   : > { %v8325_v0 = vadd.f32 %v8324_v42, %v8323_v50  ;;  %v8389_v54 = vadd.f32 %v8388_v47, %v8387_v24  ;;  %v8326_v26 = vpop.f32.mrb[242].mxu0  ;;  %v8390_v28 = vpop.f32.mrb[242].mxu1 }
 0x80a   : > { %v8327_v27 = vpop.f32.mrb[243].mxu0  ;;  %v8391_v23 = vpop.f32.mrb[243].mxu1 }
 0x80b   : > { %v5609_v17 = vadd.f32 %v8389_v54, %v8325_v0  ;;  %v8328_v6 = vadd.f32 %v8327_v27, %v8326_v26  ;;  %v8392_v60 = vadd.f32 %v8391_v23, %v8390_v28  ;;  %v7775_v27 = vld [vmem:[%s12717_s7 + $0xc] sm:$0xf] }
 0x80d   : > { %v11965_v38 = vadd.f32 %v5609_v17, %v11746_v2  ;;  %v5612_v19 = vadd.f32 %v8392_v60, %v8328_v6 }
 0x80f   : > { %v11968_v46 = vadd.f32 %v5612_v19, %v11749_v55  ;;  %v8329_v12 = vpop.f32.mrb[244].mxu0  ;;  %v8393_v36 = vpop.f32.mrb[244].mxu1 }
 0x810   : > { %v8330_v57 = vpop.f32.mrb[245].mxu0  ;;  %v8394_v45 = vpop.f32.mrb[245].mxu1 }
 0x811   : > { %v8331_v3 = vadd.f32 %v8330_v57, %v8329_v12  ;;  %v8395_v56 = vadd.f32 %v8394_v45, %v8393_v36  ;;  %v8332_v21 = vpop.f32.mrb[246].mxu0  ;;  %v8396_v58 = vpop.f32.mrb[246].mxu1  ;;  %v11993_v57 = vrot.slane %v7775_v27, %v12733_v13  ;;  %v11996_v45 = vrot.slane %v7775_v27, %v12734_v15 }
 0x812   : > { %v8333_v37 = vpop.f32.mrb[247].mxu0  ;;  %v8397_v41 = vpop.f32.mrb[247].mxu1 }
 0x813   : > { %v5617_v35 = vadd.f32 %v8395_v56, %v8331_v3  ;;  %v8334_v51 = vadd.f32 %v8333_v37, %v8332_v21  ;;  %v8398_v39 = vadd.f32 %v8397_v41, %v8396_v58 }
 0x815   : > { %v11971_v2 = vadd.f32 %v5617_v35, %v11752_v40  ;;  %v5620_v48 = vadd.f32 %v8398_v39, %v8334_v51 }
 0x817   : > { %v11974_v55 = vadd.f32 %v5620_v48, %v11755_v4  ;;  %v8335_v11 = vpop.f32.mrb[248].mxu0  ;;  %v8399_v61 = vpop.f32.mrb[248].mxu1 }
 0x818   : > { %v8336_v44 = vpop.f32.mrb[249].mxu0  ;;  %v8400_v63 = vpop.f32.mrb[249].mxu1 }
 0x819   : > { %v8337_v29 = vadd.f32 %v8336_v44, %v8335_v11  ;;  %v8401_v5 = vadd.f32 %v8400_v63, %v8399_v61  ;;  %v8338_v8 = vpop.f32.mrb[250].mxu0  ;;  %v8402_v10 = vpop.f32.mrb[250].mxu1 }
 0x81a   : > { %v8339_v59 = vpop.f32.mrb[251].mxu0  ;;  %v8403_v52 = vpop.f32.mrb[251].mxu1 }
 0x81b   : > { %v5625_v16 = vadd.f32 %v8401_v5, %v8337_v29  ;;  %v8340_v20 = vadd.f32 %v8339_v59, %v8338_v8  ;;  %v8404_v14 = vadd.f32 %v8403_v52, %v8402_v10 }
 0x81d   : > { %v11977_v40 = vadd.f32 %v5625_v16, %v11758_v7  ;;  %v5628_v18 = vadd.f32 %v8404_v14, %v8340_v20  ;;  %v11984_v7 = vrot.slane %v7775_v27, %v12731_v43 }
 0x81f   : > { %v11980_v4 = vadd.f32 %v5628_v18, %v11761_v1  ;;  %v8341_v50 = vpop.f32.mrb[252].mxu0  ;;  %v8405_v24 = vpop.f32.mrb[252].mxu1  ;;  %v11987_v1 = vrot.slane %v7775_v27, %v12732_v31 }
 0x820   : > { %v8342_v42 = vpop.f32.mrb[253].mxu0  ;;  %v8406_v47 = vpop.f32.mrb[253].mxu1 }
 0x821   : > { %v8343_v0 = vadd.f32 %v8342_v42, %v8341_v50  ;;  %v8407_v54 = vadd.f32 %v8406_v47, %v8405_v24  ;;  %v8344_v26 = vpop.f32.mrb[254].mxu0  ;;  %v8408_v28 = vpop.f32.mrb[254].mxu1 }
 0x822   : > { %v8345_v23 = vpop.f32.mrb[255].mxu0  ;;  %v8409_v17 = vpop.f32.mrb[255].mxu1 }
 0x823   : > { %v5633_v6 = vadd.f32 %v8407_v54, %v8343_v0  ;;  %v8346_v60 = vadd.f32 %v8345_v23, %v8344_v26  ;;  %v8410_v19 = vadd.f32 %v8409_v17, %v8408_v28 }
 0x825   : > { %v11990_v12 = vadd.f32 %v5633_v6, %v11771_v53  ;;  %v5636_v36 = vadd.f32 %v8410_v19, %v8346_v60 }
 0x827   : > { %v11999_v3 = vadd.f32 %v5636_v36, %v11780_v34  ;;  %v5809_v56 = vpop.f32.mrb[0].mxu0  ;;  %v5922_v21 = vpop.f32.mrb[0].mxu1 }
 0x828   : > { %v5810_v43 = vadd.f32 %v5809_v56, %v11984_v7  ;;  %v5923_v31 = vadd.f32 %v5922_v21, %v11987_v1  ;;  %v5811_v58 = vpop.f32.mrb[1].mxu0  ;;  %v5924_v37 = vpop.f32.mrb[1].mxu1 }
 0x829   : > { %v5812_v53 = vadd.f32 %v5811_v58, %v11993_v57  ;;  %v5925_v41 = vadd.f32 %v5924_v37, %v11996_v45  ;;  %v5813_v13 = vpop.f32.mrb[2].mxu0  ;;  %v5926_v35 = vpop.f32.mrb[2].mxu1 }
 0x82a   : > { %v5814_v15 = vadd.f32 %v5813_v13, %v11984_v7  ;;  %v5927_v51 = vadd.f32 %v5926_v35, %v11987_v1  ;;  %v5815_v34 = vpop.f32.mrb[3].mxu0  ;;  %v5928_v39 = vpop.f32.mrb[3].mxu1  ;;  %v6001_v61 = vmax.f32 %v5810_v43, 0.0  ;;  %v6003_v44 = vmax.f32 %v5923_v31, 0.0 }
 0x82b   : > { %v5816_v48 = vadd.f32 %v5815_v34, %v11993_v57  ;;  %v5929_v11 = vadd.f32 %v5928_v39, %v11996_v45  ;;  %v6002_v5 = vmax.f32 %v5812_v53, 0.0  ;;  %v6004_v8 = vmax.f32 %v5925_v41, 0.0 }
 0x82c   : > { %v6005_v63 = vmax.f32 %v5814_v15, 0.0  ;;  %v6007_v29 = vmax.f32 %v5927_v51, 0.0 }
 0x82d   : > { %v6006_v10 = vmax.f32 %v5816_v48, 0.0  ;;  %v6008_v59 = vmax.f32 %v5929_v11, 0.0 }
 0x82e   : > { %v6065_v52 = vpack.c.bf16 %v6005_v63, %v6001_v61  ;;  %v6067_v16 = vpack.c.bf16 %v6007_v29, %v6003_v44 }
 0x82f   : > { %v6066_v20 = vpack.c.bf16 %v6006_v10, %v6002_v5  ;;  %v6068_v14 = vpack.c.bf16 %v6008_v59, %v6004_v8  ;;  %v5819_v18 = vpop.f32.mrb[4].mxu0  ;;  %v5932_v50 = vpop.f32.mrb[4].mxu1 }
 0x830   : > { %v5820_v24 = vadd.f32 %v5819_v18, %v11984_v7  ;;  %v5933_v42 = vadd.f32 %v5932_v50, %v11987_v1  ;;  %v5821_v47 = vpop.f32.mrb[5].mxu0  ;;  %v5934_v0 = vpop.f32.mrb[5].mxu1 }
 0x831   : > { %v5822_v54 = vadd.f32 %v5821_v47, %v11993_v57  ;;  %v5935_v26 = vadd.f32 %v5934_v0, %v11996_v45  ;;  %v5823_v28 = vpop.f32.mrb[6].mxu0  ;;  %v5936_v27 = vpop.f32.mrb[6].mxu1  ;;  %6386 = vmatprep.mubr.bf16.mxu0 %v6066_v20  ;;  %6483 = vmatprep.mubr.bf16.mxu1 %v6068_v14 }
 0x832   : > { %v5824_v23 = vadd.f32 %v5823_v28, %v11984_v7  ;;  %v5937_v17 = vadd.f32 %v5936_v27, %v11987_v1  ;;  %v5825_v6 = vpop.f32.mrb[7].mxu0  ;;  %v5938_v60 = vpop.f32.mrb[7].mxu1  ;;  %6387 = vmatmul.mubr.bf16.vlgmr.msra.gmra.mrb[32].mxu0 %v6065_v52  ;;  %6484 = vmatmul.mubr.bf16.vlgmr.msra.gmra.mrb[32].mxu1 %v6067_v16  ;;  %v6009_v56 = vmax.f32 %v5820_v24, 0.0  ;;  %v6011_v21 = vmax.f32 %v5933_v42, 0.0 }
 0x833   : > { %v5826_v19 = vadd.f32 %v5825_v6, %v11993_v57  ;;  %v5939_v36 = vadd.f32 %v5938_v60, %v11996_v45  ;;  %v6010_v58 = vmax.f32 %v5822_v54, 0.0  ;;  %v6012_v37 = vmax.f32 %v5935_v26, 0.0 }
 0x834   : > { %v6013_v43 = vmax.f32 %v5824_v23, 0.0  ;;  %v6015_v31 = vmax.f32 %v5937_v17, 0.0 }
 0x835   : > { %v6014_v53 = vmax.f32 %v5826_v19, 0.0  ;;  %v6016_v41 = vmax.f32 %v5939_v36, 0.0 }
 0x836   : > { %v6069_v13 = vpack.c.bf16 %v6013_v43, %v6009_v56  ;;  %v6071_v35 = vpack.c.bf16 %v6015_v31, %v6011_v21 }
 0x837   : > { %v6070_v15 = vpack.c.bf16 %v6014_v53, %v6010_v58  ;;  %v6072_v51 = vpack.c.bf16 %v6016_v41, %v6012_v37  ;;  %v5829_v34 = vpop.f32.mrb[8].mxu0  ;;  %v5942_v39 = vpop.f32.mrb[8].mxu1 }
 0x838   : > { %v5830_v48 = vadd.f32 %v5829_v34, %v11984_v7  ;;  %v5943_v11 = vadd.f32 %v5942_v39, %v11987_v1  ;;  %v5831_v61 = vpop.f32.mrb[9].mxu0  ;;  %v5944_v44 = vpop.f32.mrb[9].mxu1 }
 0x839   : > { %v5832_v63 = vadd.f32 %v5831_v61, %v11993_v57  ;;  %v5945_v29 = vadd.f32 %v5944_v44, %v11996_v45  ;;  %v5833_v5 = vpop.f32.mrb[10].mxu0  ;;  %v5946_v8 = vpop.f32.mrb[10].mxu1  ;;  %6394 = vmatprep.mubr.bf16.mxu0 %v6070_v15  ;;  %6491 = vmatprep.mubr.bf16.mxu1 %v6072_v51 }
 0x83a   : > { %v5834_v10 = vadd.f32 %v5833_v5, %v11984_v7  ;;  %v5947_v59 = vadd.f32 %v5946_v8, %v11987_v1  ;;  %v5835_v52 = vpop.f32.mrb[11].mxu0  ;;  %v5948_v16 = vpop.f32.mrb[11].mxu1  ;;  %6395 = vmatmul.mubr.bf16.gmra.mrb[36].mxu0 %v6069_v13  ;;  %6492 = vmatmul.mubr.bf16.gmra.mrb[36].mxu1 %v6071_v35  ;;  %v6017_v18 = vmax.f32 %v5830_v48, 0.0  ;;  %v6019_v50 = vmax.f32 %v5943_v11, 0.0 }
 0x83b   : > { %v5836_v20 = vadd.f32 %v5835_v52, %v11993_v57  ;;  %v5949_v14 = vadd.f32 %v5948_v16, %v11996_v45  ;;  %v6018_v47 = vmax.f32 %v5832_v63, 0.0  ;;  %v6020_v0 = vmax.f32 %v5945_v29, 0.0 }
 0x83c   : > { %v6021_v24 = vmax.f32 %v5834_v10, 0.0  ;;  %v6023_v42 = vmax.f32 %v5947_v59, 0.0 }
 0x83d   : > { %v6022_v54 = vmax.f32 %v5836_v20, 0.0  ;;  %v6024_v26 = vmax.f32 %v5949_v14, 0.0 }
 0x83e   : > { %v6073_v28 = vpack.c.bf16 %v6021_v24, %v6017_v18  ;;  %v6075_v27 = vpack.c.bf16 %v6023_v42, %v6019_v50 }
 0x83f   : > { %v6074_v23 = vpack.c.bf16 %v6022_v54, %v6018_v47  ;;  %v6076_v17 = vpack.c.bf16 %v6024_v26, %v6020_v0  ;;  %v5839_v6 = vpop.f32.mrb[12].mxu0  ;;  %v5952_v60 = vpop.f32.mrb[12].mxu1 }
 0x840   : > { %v5840_v19 = vadd.f32 %v5839_v6, %v11984_v7  ;;  %v5953_v36 = vadd.f32 %v5952_v60, %v11987_v1  ;;  %v5841_v56 = vpop.f32.mrb[13].mxu0  ;;  %v5954_v21 = vpop.f32.mrb[13].mxu1 }
 0x841   : > { %v5842_v43 = vadd.f32 %v5841_v56, %v11993_v57  ;;  %v5955_v31 = vadd.f32 %v5954_v21, %v11996_v45  ;;  %v5843_v58 = vpop.f32.mrb[14].mxu0  ;;  %v5956_v37 = vpop.f32.mrb[14].mxu1  ;;  %6402 = vmatprep.mubr.bf16.mxu0 %v6074_v23  ;;  %6499 = vmatprep.mubr.bf16.mxu1 %v6076_v17 }
 0x842   : > { %v5844_v53 = vadd.f32 %v5843_v58, %v11984_v7  ;;  %v5957_v41 = vadd.f32 %v5956_v37, %v11987_v1  ;;  %v5845_v13 = vpop.f32.mrb[15].mxu0  ;;  %v5958_v35 = vpop.f32.mrb[15].mxu1  ;;  %6403 = vmatmul.mubr.bf16.gmra.mrb[40].mxu0 %v6073_v28  ;;  %6500 = vmatmul.mubr.bf16.gmra.mrb[40].mxu1 %v6075_v27  ;;  %v6025_v34 = vmax.f32 %v5840_v19, 0.0  ;;  %v6027_v39 = vmax.f32 %v5953_v36, 0.0 }
 0x843   : > { %v5846_v15 = vadd.f32 %v5845_v13, %v11993_v57  ;;  %v5959_v51 = vadd.f32 %v5958_v35, %v11996_v45  ;;  %v6026_v61 = vmax.f32 %v5842_v43, 0.0  ;;  %v6028_v44 = vmax.f32 %v5955_v31, 0.0 }
 0x844   : > { %v6029_v48 = vmax.f32 %v5844_v53, 0.0  ;;  %v6031_v11 = vmax.f32 %v5957_v41, 0.0 }
 0x845   : > { %v6030_v63 = vmax.f32 %v5846_v15, 0.0  ;;  %v6032_v29 = vmax.f32 %v5959_v51, 0.0 }
 0x846   : > { %v6077_v5 = vpack.c.bf16 %v6029_v48, %v6025_v34  ;;  %v6079_v8 = vpack.c.bf16 %v6031_v11, %v6027_v39 }
 0x847   : > { %v6078_v10 = vpack.c.bf16 %v6030_v63, %v6026_v61  ;;  %v6080_v59 = vpack.c.bf16 %v6032_v29, %v6028_v44  ;;  %v5849_v52 = vpop.f32.mrb[16].mxu0  ;;  %v5962_v16 = vpop.f32.mrb[16].mxu1 }
 0x848   : > { %v5850_v20 = vadd.f32 %v5849_v52, %v11984_v7  ;;  %v5963_v14 = vadd.f32 %v5962_v16, %v11987_v1  ;;  %v5851_v18 = vpop.f32.mrb[17].mxu0  ;;  %v5964_v50 = vpop.f32.mrb[17].mxu1 }
 0x849   : > { %v5852_v24 = vadd.f32 %v5851_v18, %v11993_v57  ;;  %v5965_v42 = vadd.f32 %v5964_v50, %v11996_v45  ;;  %v5853_v47 = vpop.f32.mrb[18].mxu0  ;;  %v5966_v0 = vpop.f32.mrb[18].mxu1  ;;  %6410 = vmatprep.mubr.bf16.mxu0 %v6078_v10  ;;  %6507 = vmatprep.mubr.bf16.mxu1 %v6080_v59 }
 0x84a   : > { %v5854_v54 = vadd.f32 %v5853_v47, %v11984_v7  ;;  %v5967_v26 = vadd.f32 %v5966_v0, %v11987_v1  ;;  %v5855_v28 = vpop.f32.mrb[19].mxu0  ;;  %v5968_v27 = vpop.f32.mrb[19].mxu1  ;;  %6411 = vmatmul.mubr.bf16.gmra.mrb[44].mxu0 %v6077_v5  ;;  %6508 = vmatmul.mubr.bf16.gmra.mrb[44].mxu1 %v6079_v8  ;;  %v6033_v6 = vmax.f32 %v5850_v20, 0.0  ;;  %v6035_v60 = vmax.f32 %v5963_v14, 0.0 }
 0x84b   : > { %v5856_v23 = vadd.f32 %v5855_v28, %v11993_v57  ;;  %v5969_v17 = vadd.f32 %v5968_v27, %v11996_v45  ;;  %v6034_v56 = vmax.f32 %v5852_v24, 0.0  ;;  %v6036_v21 = vmax.f32 %v5965_v42, 0.0 }
 0x84c   : > { %v6037_v19 = vmax.f32 %v5854_v54, 0.0  ;;  %v6039_v36 = vmax.f32 %v5967_v26, 0.0 }
 0x84d   : > { %v6038_v43 = vmax.f32 %v5856_v23, 0.0  ;;  %v6040_v31 = vmax.f32 %v5969_v17, 0.0 }
 0x84e   : > { %v6081_v58 = vpack.c.bf16 %v6037_v19, %v6033_v6  ;;  %v6083_v37 = vpack.c.bf16 %v6039_v36, %v6035_v60 }
 0x84f   : > { %v6082_v53 = vpack.c.bf16 %v6038_v43, %v6034_v56  ;;  %v6084_v41 = vpack.c.bf16 %v6040_v31, %v6036_v21  ;;  %v5859_v13 = vpop.f32.mrb[20].mxu0  ;;  %v5972_v35 = vpop.f32.mrb[20].mxu1 }
 0x850   : > { %v5860_v15 = vadd.f32 %v5859_v13, %v11984_v7  ;;  %v5973_v51 = vadd.f32 %v5972_v35, %v11987_v1  ;;  %v5861_v34 = vpop.f32.mrb[21].mxu0  ;;  %v5974_v39 = vpop.f32.mrb[21].mxu1 }
 0x851   : > { %v5862_v48 = vadd.f32 %v5861_v34, %v11993_v57  ;;  %v5975_v11 = vadd.f32 %v5974_v39, %v11996_v45  ;;  %v5863_v61 = vpop.f32.mrb[22].mxu0  ;;  %v5976_v44 = vpop.f32.mrb[22].mxu1  ;;  %6418 = vmatprep.mubr.bf16.mxu0 %v6082_v53  ;;  %6515 = vmatprep.mubr.bf16.mxu1 %v6084_v41 }
 0x852   : > { %v5864_v63 = vadd.f32 %v5863_v61, %v11984_v7  ;;  %v5977_v29 = vadd.f32 %v5976_v44, %v11987_v1  ;;  %v5865_v5 = vpop.f32.mrb[23].mxu0  ;;  %v5978_v8 = vpop.f32.mrb[23].mxu1  ;;  %6419 = vmatmul.mubr.bf16.gmra.mrb[48].mxu0 %v6081_v58  ;;  %6516 = vmatmul.mubr.bf16.gmra.mrb[48].mxu1 %v6083_v37  ;;  %v6041_v52 = vmax.f32 %v5860_v15, 0.0  ;;  %v6043_v16 = vmax.f32 %v5973_v51, 0.0 }
 0x853   : > { %v5866_v10 = vadd.f32 %v5865_v5, %v11993_v57  ;;  %v5979_v59 = vadd.f32 %v5978_v8, %v11996_v45  ;;  %v6042_v18 = vmax.f32 %v5862_v48, 0.0  ;;  %v6044_v50 = vmax.f32 %v5975_v11, 0.0 }
 0x854   : > { %v6045_v20 = vmax.f32 %v5864_v63, 0.0  ;;  %v6047_v14 = vmax.f32 %v5977_v29, 0.0 }
 0x855   : > { %v6046_v24 = vmax.f32 %v5866_v10, 0.0  ;;  %v6048_v42 = vmax.f32 %v5979_v59, 0.0 }
 0x856   : > { %v6085_v47 = vpack.c.bf16 %v6045_v20, %v6041_v52  ;;  %v6087_v0 = vpack.c.bf16 %v6047_v14, %v6043_v16 }
 0x857   : > { %v6086_v54 = vpack.c.bf16 %v6046_v24, %v6042_v18  ;;  %v6088_v26 = vpack.c.bf16 %v6048_v42, %v6044_v50  ;;  %v5869_v28 = vpop.f32.mrb[24].mxu0  ;;  %v5982_v27 = vpop.f32.mrb[24].mxu1 }
 0x858   : > { %v5870_v23 = vadd.f32 %v5869_v28, %v11984_v7  ;;  %v5983_v17 = vadd.f32 %v5982_v27, %v11987_v1  ;;  %v5871_v6 = vpop.f32.mrb[25].mxu0  ;;  %v5984_v60 = vpop.f32.mrb[25].mxu1 }
 0x859   : > { %v5872_v19 = vadd.f32 %v5871_v6, %v11993_v57  ;;  %v5985_v36 = vadd.f32 %v5984_v60, %v11996_v45  ;;  %v5873_v56 = vpop.f32.mrb[26].mxu0  ;;  %v5986_v21 = vpop.f32.mrb[26].mxu1  ;;  %6426 = vmatprep.mubr.bf16.mxu0 %v6086_v54  ;;  %6523 = vmatprep.mubr.bf16.mxu1 %v6088_v26 }
 0x85a   : > { %v5874_v43 = vadd.f32 %v5873_v56, %v11984_v7  ;;  %v5987_v31 = vadd.f32 %v5986_v21, %v11987_v1  ;;  %v5875_v58 = vpop.f32.mrb[27].mxu0  ;;  %v5988_v37 = vpop.f32.mrb[27].mxu1  ;;  %6427 = vmatmul.mubr.bf16.gmra.mrb[52].mxu0 %v6085_v47  ;;  %6524 = vmatmul.mubr.bf16.gmra.mrb[52].mxu1 %v6087_v0  ;;  %v6049_v13 = vmax.f32 %v5870_v23, 0.0  ;;  %v6051_v35 = vmax.f32 %v5983_v17, 0.0 }
 0x85b   : > { %v5876_v53 = vadd.f32 %v5875_v58, %v11993_v57  ;;  %v5989_v41 = vadd.f32 %v5988_v37, %v11996_v45  ;;  %v6050_v34 = vmax.f32 %v5872_v19, 0.0  ;;  %v6052_v39 = vmax.f32 %v5985_v36, 0.0 }
 0x85c   : > { %v6053_v15 = vmax.f32 %v5874_v43, 0.0  ;;  %v6055_v51 = vmax.f32 %v5987_v31, 0.0 }
 0x85d   : > { %v6054_v48 = vmax.f32 %v5876_v53, 0.0  ;;  %v6056_v11 = vmax.f32 %v5989_v41, 0.0 }
 0x85e   : > { %v6089_v61 = vpack.c.bf16 %v6053_v15, %v6049_v13  ;;  %v6091_v44 = vpack.c.bf16 %v6055_v51, %v6051_v35 }
 0x85f   : > { %v6090_v63 = vpack.c.bf16 %v6054_v48, %v6050_v34  ;;  %v6092_v29 = vpack.c.bf16 %v6056_v11, %v6052_v39  ;;  %v5879_v5 = vpop.f32.mrb[28].mxu0  ;;  %v5992_v8 = vpop.f32.mrb[28].mxu1  ;;  %v12070_v39 = vld [vmem:[%s893_s29] ss:$0 sm:$0xff] }
 0x860   : > { %v5880_v10 = vadd.f32 %v5879_v5, %v11984_v7  ;;  %v5993_v59 = vadd.f32 %v5992_v8, %v11987_v1  ;;  %v5881_v52 = vpop.f32.mrb[29].mxu0  ;;  %v5994_v16 = vpop.f32.mrb[29].mxu1 }
 0x861   : > { %v5882_v20 = vadd.f32 %v5881_v52, %v11993_v57  ;;  %v5995_v14 = vadd.f32 %v5994_v16, %v11996_v45  ;;  %v5883_v18 = vpop.f32.mrb[30].mxu0  ;;  %v5996_v50 = vpop.f32.mrb[30].mxu1  ;;  %6434 = vmatprep.mubr.bf16.mxu0 %v6090_v63  ;;  %6531 = vmatprep.mubr.bf16.mxu1 %v6092_v29 }
 0x862   : > { %v5884_v24 = vadd.f32 %v5883_v18, %v11984_v7  ;;  %v5997_v42 = vadd.f32 %v5996_v50, %v11987_v1  ;;  %v5885_v47 = vpop.f32.mrb[31].mxu0  ;;  %v5998_v0 = vpop.f32.mrb[31].mxu1  ;;  %6435 = vmatmul.mubr.bf16.gmra.mrb[56].mxu0 %v6089_v61  ;;  %6532 = vmatmul.mubr.bf16.gmra.mrb[56].mxu1 %v6091_v44  ;;  %v6057_v28 = vmax.f32 %v5880_v10, 0.0  ;;  %v6059_v27 = vmax.f32 %v5993_v59, 0.0 }
 0x863   : > { %v5886_v54 = vadd.f32 %v5885_v47, %v11993_v57  ;;  %v5999_v26 = vadd.f32 %v5998_v0, %v11996_v45  ;;  %v6058_v6 = vmax.f32 %v5882_v20, 0.0  ;;  %v6060_v60 = vmax.f32 %v5995_v14, 0.0  ;;  %v12735_v20 = vld [vmem:[#allocation29_spill] sm:$0xff]  ;;  %v12736_v0 = vld [vmem:[#allocation16_spill] sm:$0xff] }
 0x864   : > { %v6061_v23 = vmax.f32 %v5884_v24, 0.0  ;;  %v6063_v17 = vmax.f32 %v5997_v42, 0.0 }
 0x865   : > { %v6062_v19 = vmax.f32 %v5886_v54, 0.0  ;;  %v6064_v36 = vmax.f32 %v5999_v26, 0.0 }
 0x866   : > { %v6093_v56 = vpack.c.bf16 %v6061_v23, %v6057_v28  ;;  %v6095_v7 = vpack.c.bf16 %v6063_v17, %v6059_v27 }
 0x867   : > { %v6094_v21 = vpack.c.bf16 %v6062_v19, %v6058_v6  ;;  %v6096_v1 = vpack.c.bf16 %v6064_v36, %v6060_v60 }
 0x869   : > { %6442 = vmatprep.mubr.bf16.mxu0 %v6094_v21  ;;  %6539 = vmatprep.mubr.bf16.mxu1 %v6096_v1 }
 0x86a   : > { %6443 = vmatmul.mubr.bf16.gmra.mrb[60].mxu0 %v6093_v56  ;;  %6540 = vmatmul.mubr.bf16.gmra.mrb[60].mxu1 %v6095_v7 }
 0x905   : > { %v8427_v57 = vpop.f32.mrb[32].mxu0  ;;  %v8491_v43 = vpop.f32.mrb[32].mxu1 }
 0x906   : > { %v8428_v45 = vpop.f32.mrb[33].mxu0  ;;  %v8492_v31 = vpop.f32.mrb[33].mxu1 }
 0x907   : > { %v8429_v58 = vadd.f32 %v8428_v45, %v8427_v57  ;;  %v8493_v37 = vadd.f32 %v8492_v31, %v8491_v43  ;;  %v8430_v53 = vpop.f32.mrb[34].mxu0  ;;  %v8494_v41 = vpop.f32.mrb[34].mxu1  ;;  %v12737_v57 = vld [vmem:[#allocation20_spill] sm:$0xff] }
 0x908   : > { %v8431_v13 = vpop.f32.mrb[35].mxu0  ;;  %v8495_v35 = vpop.f32.mrb[35].mxu1 }
 0x909   : > { %v6486_v15 = vadd.f32 %v8493_v37, %v8429_v58  ;;  %v8432_v51 = vadd.f32 %v8431_v13, %v8430_v53  ;;  %v8496_v34 = vadd.f32 %v8495_v35, %v8494_v41  ;;  %v12738_v41 = vld [vmem:[#allocation18_spill] sm:$0xff] }
 0x90b   : > { %v6548_v48 = vadd.f32 %v6486_v15, %v11941_v32  ;;  %v6489_v11 = vadd.f32 %v8496_v34, %v8432_v51 }
 0x90d   : > { %v6549_v61 = vadd.f32 %v6489_v11, %v11944_v9  ;;  %v8433_v44 = vpop.f32.mrb[36].mxu0  ;;  %v8497_v63 = vpop.f32.mrb[36].mxu1  ;;  %v6571_v29 = vadd.f32 %v12070_v39, %v6548_v48 }
 0x90e   : > { %v8434_v5 = vpop.f32.mrb[37].mxu0  ;;  %v8498_v8 = vpop.f32.mrb[37].mxu1 }
 0x90f   : > { %v8435_v10 = vadd.f32 %v8434_v5, %v8433_v44  ;;  %v8499_v59 = vadd.f32 %v8498_v8, %v8497_v63  ;;  %v8436_v52 = vpop.f32.mrb[38].mxu0  ;;  %v8500_v16 = vpop.f32.mrb[38].mxu1  ;;  %v12076_v14 = vadd.f32 %v6571_v29, %v12735_v20  ;;  %v6572_v18 = vadd.f32 %v12070_v39, %v6549_v61 }
 0x910   : > { %v8437_v50 = vpop.f32.mrb[39].mxu0  ;;  %v8501_v32 = vpop.f32.mrb[39].mxu1 }
 0x911   : > { %v6494_v24 = vadd.f32 %v8499_v59, %v8435_v10  ;;  %v8438_v42 = vadd.f32 %v8437_v50, %v8436_v52  ;;  %v8502_v9 = vadd.f32 %v8501_v32, %v8500_v16  ;;  %v6605_v47 = vsel %vm1006_vm1, %v12076_v14, 0.0  ;;  %v12739_v59 = vld [vmem:[#allocation34_spill] sm:$0xff] }
 0x912   : > { %6606 = vadd.xlane.f32.xlu0 %v6605_v47  ;;  %v12082_v54 = vadd.f32 %v6572_v18, %v12736_v0 }
 0x913   : > { %v6550_v26 = vadd.f32 %v6494_v24, %v11947_v25  ;;  %v6497_v28 = vadd.f32 %v8502_v9, %v8438_v42  ;;  %v12740_v24 = vld [vmem:[#allocation22_spill] sm:$0xff] }
 0x914   : > { %v6608_v27 = vsel %vm1006_vm1, %v12082_v54, 0.0 }
 0x915   : > { %v6551_v23 = vadd.f32 %v6497_v28, %v11950_v22  ;;  %6609 = vadd.xlane.f32.xlu1 %v6608_v27  ;;  %v8439_v17 = vpop.f32.mrb[40].mxu0  ;;  %v8503_v6 = vpop.f32.mrb[40].mxu1  ;;  %v6573_v60 = vadd.f32 %v12070_v39, %v6550_v26 }
 0x916   : > { %v8440_v19 = vpop.f32.mrb[41].mxu0  ;;  %v8504_v36 = vpop.f32.mrb[41].mxu1 }
 0x917   : > { %v8441_v56 = vadd.f32 %v8440_v19, %v8439_v17  ;;  %v8505_v7 = vadd.f32 %v8504_v36, %v8503_v6  ;;  %v8442_v21 = vpop.f32.mrb[42].mxu0  ;;  %v8506_v1 = vpop.f32.mrb[42].mxu1  ;;  %v12090_v43 = vadd.f32 %v6573_v60, %v12737_v57  ;;  %v6574_v25 = vadd.f32 %v12070_v39, %v6551_v23 }
 0x918   : > { %v8443_v45 = vpop.f32.mrb[43].mxu0  ;;  %v8507_v31 = vpop.f32.mrb[43].mxu1 }
 0x919   : > { %v6502_v58 = vadd.f32 %v8505_v7, %v8441_v56  ;;  %v8444_v22 = vadd.f32 %v8443_v45, %v8442_v21  ;;  %v8508_v37 = vadd.f32 %v8507_v31, %v8506_v1  ;;  %v6611_v53 = vsel %vm1006_vm1, %v12090_v43, 0.0  ;;  %v12741_v7 = vld [vmem:[#allocation26_spill] sm:$0xff] }
 0x91a   : > { %6612 = vadd.xlane.f32.xlu0 %v6611_v53  ;;  %v12096_v13 = vadd.f32 %v6574_v25, %v12738_v41 }
 0x91b   : > { %v6552_v35 = vadd.f32 %v6502_v58, %v11953_v30  ;;  %v6505_v15 = vadd.f32 %v8508_v37, %v8444_v22  ;;  %v12742_v58 = vld [vmem:[#allocation12_spill] sm:$0xff] }
 0x91c   : > { %v6614_v51 = vsel %vm1006_vm1, %v12096_v13, 0.0 }
 0x91d   : > { %v6553_v34 = vadd.f32 %v6505_v15, %v11956_v62  ;;  %6615 = vadd.xlane.f32.xlu1 %v6614_v51  ;;  %v8445_v48 = vpop.f32.mrb[44].mxu0  ;;  %v8509_v11 = vpop.f32.mrb[44].mxu1  ;;  %v6575_v61 = vadd.f32 %v12070_v39, %v6552_v35 }
 0x91e   : > { %v8446_v44 = vpop.f32.mrb[45].mxu0  ;;  %v8510_v63 = vpop.f32.mrb[45].mxu1 }
 0x91f   : > { %v8447_v29 = vadd.f32 %v8446_v44, %v8445_v48  ;;  %v8511_v5 = vadd.f32 %v8510_v63, %v8509_v11  ;;  %v8448_v8 = vpop.f32.mrb[46].mxu0  ;;  %v8512_v10 = vpop.f32.mrb[46].mxu1  ;;  %v12104_v52 = vadd.f32 %v6575_v61, %v12739_v59  ;;  %v6576_v30 = vadd.f32 %v12070_v39, %v6553_v34 }
 0x920   : > { %v8449_v16 = vpop.f32.mrb[47].mxu0  ;;  %v8513_v20 = vpop.f32.mrb[47].mxu1 }
 0x921   : > { %v6510_v18 = vadd.f32 %v8511_v5, %v8447_v29  ;;  %v8450_v62 = vadd.f32 %v8449_v16, %v8448_v8  ;;  %v8514_v50 = vadd.f32 %v8513_v20, %v8512_v10  ;;  %v6617_v32 = vsel %vm1006_vm1, %v12104_v52, 0.0  ;;  %v12743_v5 = vld [vmem:[#allocation17_spill] sm:$0xff] }
 0x922   : > { %6618 = vadd.xlane.f32.xlu0 %v6617_v32  ;;  %v12110_v42 = vadd.f32 %v6576_v30, %v12740_v24 }
 0x923   : > { %v6554_v9 = vadd.f32 %v6510_v18, %v11959_v49  ;;  %v6513_v47 = vadd.f32 %v8514_v50, %v8450_v62  ;;  %v12744_v18 = vld [vmem:[#allocation15_spill] sm:$0xff] }
 0x924   : > { %v6620_v0 = vsel %vm1006_vm1, %v12110_v42, 0.0 }
 0x925   : > { %v6555_v26 = vadd.f32 %v6513_v47, %v11962_v33  ;;  %6621 = vadd.xlane.f32.xlu1 %v6620_v0  ;;  %v8451_v28 = vpop.f32.mrb[48].mxu0  ;;  %v8515_v27 = vpop.f32.mrb[48].mxu1  ;;  %v6577_v23 = vadd.f32 %v12070_v39, %v6554_v9 }
 0x926   : > { %v8452_v17 = vpop.f32.mrb[49].mxu0  ;;  %v8516_v6 = vpop.f32.mrb[49].mxu1 }
 0x927   : > { %v8453_v60 = vadd.f32 %v8452_v17, %v8451_v28  ;;  %v8517_v19 = vadd.f32 %v8516_v6, %v8515_v27  ;;  %v8454_v36 = vpop.f32.mrb[50].mxu0  ;;  %v8518_v56 = vpop.f32.mrb[50].mxu1  ;;  %v12118_v21 = vadd.f32 %v6577_v23, %v12741_v7  ;;  %v6578_v49 = vadd.f32 %v12070_v39, %v6555_v26 }
 0x928   : > { %v8455_v1 = vpop.f32.mrb[51].mxu0  ;;  %v8519_v57 = vpop.f32.mrb[51].mxu1 }
 0x929   : > { %v6518_v25 = vadd.f32 %v8517_v19, %v8453_v60  ;;  %v8456_v33 = vadd.f32 %v8455_v1, %v8454_v36  ;;  %v8520_v45 = vadd.f32 %v8519_v57, %v8518_v56  ;;  %v6623_v31 = vsel %vm1006_vm1, %v12118_v21, 0.0  ;;  %v12745_v19 = vld [vmem:[#allocation31_spill] sm:$0xff] }
 0x92a   : > { %6624 = vadd.xlane.f32.xlu0 %v6623_v31  ;;  %v12124_v22 = vadd.f32 %v6578_v49, %v12742_v58 }
 0x92b   : > { %v6556_v37 = vadd.f32 %v6518_v25, %v11965_v38  ;;  %v6521_v53 = vadd.f32 %v8520_v45, %v8456_v33  ;;  %v12746_v25 = vld [vmem:[#allocation37_spill] sm:$0xff] }
 0x92c   : > { %v6626_v41 = vsel %vm1006_vm1, %v12124_v22, 0.0 }
 0x92d   : > { %v6557_v35 = vadd.f32 %v6521_v53, %v11968_v46  ;;  %6627 = vadd.xlane.f32.xlu1 %v6626_v41  ;;  %v8457_v15 = vpop.f32.mrb[52].mxu0  ;;  %v8521_v51 = vpop.f32.mrb[52].mxu1  ;;  %v6579_v34 = vadd.f32 %v12070_v39, %v6556_v37 }
 0x92e   : > { %v8458_v48 = vpop.f32.mrb[53].mxu0  ;;  %v8522_v11 = vpop.f32.mrb[53].mxu1 }
 0x92f   : > { %v8459_v61 = vadd.f32 %v8458_v48, %v8457_v15  ;;  %v8523_v44 = vadd.f32 %v8522_v11, %v8521_v51  ;;  %v8460_v63 = vpop.f32.mrb[54].mxu0  ;;  %v8524_v29 = vpop.f32.mrb[54].mxu1  ;;  %v12132_v8 = vadd.f32 %v6579_v34, %v12743_v5  ;;  %v6580_v38 = vadd.f32 %v12070_v39, %v6557_v35 }
 0x930   : > { %v8461_v10 = vpop.f32.mrb[55].mxu0  ;;  %v8525_v59 = vpop.f32.mrb[55].mxu1 }
 0x931   : > { %v6526_v30 = vadd.f32 %v8523_v44, %v8459_v61  ;;  %v8462_v46 = vadd.f32 %v8461_v10, %v8460_v63  ;;  %v8526_v16 = vadd.f32 %v8525_v59, %v8524_v29  ;;  %v6629_v20 = vsel %vm1006_vm1, %v12132_v8, 0.0  ;;  %v12747_v44 = vld [vmem:[#allocation35_spill] sm:$0xff] }
 0x932   : > { %6630 = vadd.xlane.f32.xlu0 %v6629_v20  ;;  %v12138_v62 = vadd.f32 %v6580_v38, %v12744_v18 }
 0x933   : > { %v6558_v50 = vadd.f32 %v6526_v30, %v11971_v2  ;;  %v6529_v32 = vadd.f32 %v8526_v16, %v8462_v46  ;;  %v12748_v30 = vld [vmem:[#allocation21_spill] sm:$0xff] }
 0x934   : > { %v6632_v24 = vsel %vm1006_vm1, %v12138_v62, 0.0 }
 0x935   : > { %v6559_v9 = vadd.f32 %v6529_v32, %v11974_v55  ;;  %6633 = vadd.xlane.f32.xlu1 %v6632_v24  ;;  %v8463_v47 = vpop.f32.mrb[56].mxu0  ;;  %v8527_v0 = vpop.f32.mrb[56].mxu1  ;;  %v6581_v26 = vadd.f32 %v12070_v39, %v6558_v50  ;;  %v12749_v24 = vld [vmem:[#allocation38_spill] sm:$0xff] }
 0x936   : > { %v8464_v28 = vpop.f32.mrb[57].mxu0  ;;  %v8528_v27 = vpop.f32.mrb[57].mxu1 }
 0x937   : > { %v8465_v23 = vadd.f32 %v8464_v28, %v8463_v47  ;;  %v8529_v17 = vadd.f32 %v8528_v27, %v8527_v0  ;;  %v8466_v6 = vpop.f32.mrb[58].mxu0  ;;  %v8530_v60 = vpop.f32.mrb[58].mxu1  ;;  %v12146_v36 = vadd.f32 %v6581_v26, %v12745_v19  ;;  %v6582_v2 = vadd.f32 %v12070_v39, %v6559_v9  ;;  %v12750_v26 = vld [vmem:[#allocation40_spill] sm:$0xff] }
 0x938   : > { %v8467_v56 = vpop.f32.mrb[59].mxu0  ;;  %v8531_v7 = vpop.f32.mrb[59].mxu1 }
 0x939   : > { %v6534_v49 = vadd.f32 %v8529_v17, %v8465_v23  ;;  %v8468_v55 = vadd.f32 %v8467_v56, %v8466_v6  ;;  %v8532_v1 = vadd.f32 %v8531_v7, %v8530_v60  ;;  %v6635_v57 = vsel %vm1006_vm1, %v12146_v36, 0.0 }
 0x93a   : > { %6636 = vadd.xlane.f32.xlu0 %v6635_v57  ;;  %v12152_v33 = vadd.f32 %v6582_v2, %v12746_v25 }
 0x93b   : > { %v6560_v45 = vadd.f32 %v6534_v49, %v11977_v40  ;;  %v6537_v31 = vadd.f32 %v8532_v1, %v8468_v55 }
 0x93c   : > { %v6638_v58 = vsel %vm1006_vm1, %v12152_v33, 0.0 }
 0x93d   : > { %v6561_v37 = vadd.f32 %v6537_v31, %v11980_v4  ;;  %6639 = vadd.xlane.f32.xlu1 %v6638_v58  ;;  %v8469_v53 = vpop.f32.mrb[60].mxu0  ;;  %v8533_v41 = vpop.f32.mrb[60].mxu1  ;;  %v6583_v35 = vadd.f32 %v12070_v39, %v6560_v45 }
 0x93e   : > { %v8470_v15 = vpop.f32.mrb[61].mxu0  ;;  %v8534_v51 = vpop.f32.mrb[61].mxu1 }
 0x93f   : > { %v8471_v34 = vadd.f32 %v8470_v15, %v8469_v53  ;;  %v8535_v48 = vadd.f32 %v8534_v51, %v8533_v41  ;;  %v8472_v11 = vpop.f32.mrb[62].mxu0  ;;  %v8536_v61 = vpop.f32.mrb[62].mxu1  ;;  %v12160_v63 = vadd.f32 %v6583_v35, %v12747_v44  ;;  %v6584_v40 = vadd.f32 %v12070_v39, %v6561_v37 }
 0x940   : > { %v8473_v29 = vpop.f32.mrb[63].mxu0  ;;  %v8537_v5 = vpop.f32.mrb[63].mxu1 }
 0x941   : > { %v6542_v38 = vadd.f32 %v8535_v48, %v8471_v34  ;;  %v8474_v4 = vadd.f32 %v8473_v29, %v8472_v11  ;;  %v8538_v10 = vadd.f32 %v8537_v5, %v8536_v61  ;;  %v6641_v59 = vsel %vm1006_vm1, %v12160_v63, 0.0 }
 0x942   : > { %6642 = vadd.xlane.f32.xlu0 %v6641_v59  ;;  %v12166_v46 = vadd.f32 %v6584_v40, %v12748_v30 }
 0x943   : > { %v6562_v16 = vadd.f32 %v6542_v38, %v11990_v12  ;;  %v6545_v20 = vadd.f32 %v8538_v10, %v8474_v4 }
 0x944   : > { %v6644_v18 = vsel %vm1006_vm1, %v12166_v46, 0.0 }
 0x945   : > { %v6563_v50 = vadd.f32 %v6545_v20, %v11999_v3  ;;  %6645 = vadd.xlane.f32.xlu1 %v6644_v18  ;;  %v6585_v32 = vadd.f32 %v12070_v39, %v6562_v16 }
 0x947   : > { %v12174_v9 = vadd.f32 %v6585_v32, %v12749_v24  ;;  %v6586_v47 = vadd.f32 %v12070_v39, %v6563_v50 }
 0x949   : > { %v6647_v0 = vsel %vm1006_vm1, %v12174_v9, 0.0  ;;  %v12180_v28 = vadd.f32 %v6586_v47, %v12750_v26 }
 0x94a   : > { %6648 = vadd.xlane.f32.xlu0 %v6647_v0 }
 0x94b   : > { %v6650_v12 = vsel %vm1006_vm1, %v12180_v28, 0.0 }
 0x94c   : > { %6651 = vadd.xlane.f32.xlu1 %v6650_v12 }
 0x99f   : > { %v6607_v3 = vpop.xlane.xlu0 %6606 }
 0x9a0   : > { %v6653_v27 = vmul.f32 0.015625, %v6607_v3 }
 0x9a2   : > { %v12185_v23 = vsub.f32 %v12076_v14, %v6653_v27  ;;  %v6610_v17 = vpop.xlane.xlu1 %6609 }
 0x9a3   : > { %v6654_v6 = vmul.f32 0.015625, %v6610_v17 }
 0x9a4   : > { %v6685_v39 = vmul.f32 %v12185_v23, %v12185_v23 }
 0x9a5   : > { %v12190_v60 = vsub.f32 %v12082_v54, %v6654_v6 }
 0x9a6   : > { %v6701_v19 = vsel %vm1006_vm1, %v6685_v39, 0.0 }
 0x9a7   : > { %v6613_v2 = vpop.xlane.xlu0 %6612  ;;  %6702 = vadd.xlane.f32.xlu0 %v6701_v19  ;;  %v6686_v56 = vmul.f32 %v12190_v60, %v12190_v60 }
 0x9a8   : > { %v6655_v7 = vmul.f32 0.015625, %v6613_v2 }
 0x9a9   : > { %v6704_v49 = vsel %vm1006_vm1, %v6686_v56, 0.0 }
 0x9aa   : > { %v12197_v14 = vsub.f32 %v12090_v43, %v6655_v7  ;;  %v6616_v55 = vpop.xlane.xlu1 %6615  ;;  %6705 = vadd.xlane.f32.xlu1 %v6704_v49 }
 0x9ab   : > { %v6656_v1 = vmul.f32 0.015625, %v6616_v55 }
 0x9ac   : > { %v6687_v54 = vmul.f32 %v12197_v14, %v12197_v14 }
 0x9ad   : > { %v12202_v57 = vsub.f32 %v12096_v13, %v6656_v1 }
 0x9ae   : > { %v6707_v25 = vsel %vm1006_vm1, %v6687_v54, 0.0 }
 0x9af   : > { %v6619_v45 = vpop.xlane.xlu0 %6618  ;;  %6708 = vadd.xlane.f32.xlu0 %v6707_v25  ;;  %v6688_v31 = vmul.f32 %v12202_v57, %v12202_v57 }
 0x9b0   : > { %v6657_v58 = vmul.f32 0.015625, %v6619_v45 }
 0x9b1   : > { %v6710_v43 = vsel %vm1006_vm1, %v6688_v31, 0.0 }
 0x9b2   : > { %v12209_v37 = vsub.f32 %v12104_v52, %v6657_v58  ;;  %v6622_v53 = vpop.xlane.xlu1 %6621  ;;  %6711 = vadd.xlane.f32.xlu1 %v6710_v43 }
 0x9b3   : > { %v6658_v41 = vmul.f32 0.015625, %v6622_v53 }
 0x9b4   : > { %v6689_v13 = vmul.f32 %v12209_v37, %v12209_v37 }
 0x9b5   : > { %v12214_v35 = vsub.f32 %v12110_v42, %v6658_v41 }
 0x9b6   : > { %v6713_v15 = vsel %vm1006_vm1, %v6689_v13, 0.0 }
 0x9b7   : > { %v6625_v51 = vpop.xlane.xlu0 %6624  ;;  %6714 = vadd.xlane.f32.xlu0 %v6713_v15  ;;  %v6690_v34 = vmul.f32 %v12214_v35, %v12214_v35 }
 0x9b8   : > { %v6659_v48 = vmul.f32 0.015625, %v6625_v51 }
 0x9b9   : > { %v6716_v52 = vsel %vm1006_vm1, %v6690_v34, 0.0 }
 0x9ba   : > { %v12221_v11 = vsub.f32 %v12118_v21, %v6659_v48  ;;  %v6628_v61 = vpop.xlane.xlu1 %6627  ;;  %6717 = vadd.xlane.f32.xlu1 %v6716_v52 }
 0x9bb   : > { %v6660_v44 = vmul.f32 0.015625, %v6628_v61 }
 0x9bc   : > { %v6691_v42 = vmul.f32 %v12221_v11, %v12221_v11 }
 0x9bd   : > { %v12226_v40 = vsub.f32 %v12124_v22, %v6660_v44 }
 0x9be   : > { %v6719_v29 = vsel %vm1006_vm1, %v6691_v42, 0.0 }
 0x9bf   : > { %v6631_v5 = vpop.xlane.xlu0 %6630  ;;  %6720 = vadd.xlane.f32.xlu0 %v6719_v29  ;;  %v6692_v38 = vmul.f32 %v12226_v40, %v12226_v40  ;;  %v12285_v29 = vld [vmem:[%s896_s5] ss:$0 sm:$0xff] }
 0x9c0   : > { %v6661_v4 = vmul.f32 0.015625, %v6631_v5 }
 0x9c1   : > { %v6722_v21 = vsel %vm1006_vm1, %v6692_v38, 0.0 }
 0x9c2   : > { %v12233_v10 = vsub.f32 %v12132_v8, %v6661_v4  ;;  %v6634_v59 = vpop.xlane.xlu1 %6633  ;;  %6723 = vadd.xlane.f32.xlu1 %v6722_v21  ;;  %v12293_v4 = vld [vmem:[%s899_s0] ss:$0 sm:$0xff] }
 0x9c3   : > { %v6662_v30 = vmul.f32 0.015625, %v6634_v59 }
 0x9c4   : > { %v6693_v22 = vmul.f32 %v12233_v10, %v12233_v10 }
 0x9c5   : > { %v12238_v16 = vsub.f32 %v12138_v62, %v6662_v30 }
 0x9c6   : > { %v6725_v20 = vsel %vm1006_vm1, %v6693_v22, 0.0 }
 0x9c7   : > { %v6637_v18 = vpop.xlane.xlu0 %6636  ;;  %6726 = vadd.xlane.f32.xlu0 %v6725_v20  ;;  %v6694_v50 = vmul.f32 %v12238_v16, %v12238_v16 }
 0x9c8   : > { %v6663_v32 = vmul.f32 0.015625, %v6637_v18 }
 0x9c9   : > { %v6728_v8 = vsel %vm1006_vm1, %v6694_v50, 0.0 }
 0x9ca   : > { %v12245_v24 = vsub.f32 %v12146_v36, %v6663_v32  ;;  %v6640_v47 = vpop.xlane.xlu1 %6639  ;;  %6729 = vadd.xlane.f32.xlu1 %v6728_v8 }
 0x9cb   : > { %v6664_v0 = vmul.f32 0.015625, %v6640_v47 }
 0x9cc   : > { %v6695_v62 = vmul.f32 %v12245_v24, %v12245_v24 }
 0x9cd   : > { %v12250_v26 = vsub.f32 %v12152_v33, %v6664_v0 }
 0x9ce   : > { %v6731_v12 = vsel %vm1006_vm1, %v6695_v62, 0.0 }
 0x9cf   : > { %v6643_v3 = vpop.xlane.xlu0 %6642  ;;  %6732 = vadd.xlane.f32.xlu0 %v6731_v12  ;;  %v6696_v27 = vmul.f32 %v12250_v26, %v12250_v26 }
 0x9d0   : > { %v6665_v17 = vmul.f32 0.015625, %v6643_v3 }
 0x9d1   : > { %v6734_v36 = vsel %vm1006_vm1, %v6696_v27, 0.0 }
 0x9d2   : > { %v12257_v6 = vsub.f32 %v12160_v63, %v6665_v17  ;;  %v6646_v39 = vpop.xlane.xlu1 %6645  ;;  %6735 = vadd.xlane.f32.xlu1 %v6734_v36 }
 0x9d3   : > { %v6666_v19 = vmul.f32 0.015625, %v6646_v39 }
 0x9d4   : > { %v6697_v33 = vmul.f32 %v12257_v6, %v12257_v6 }
 0x9d5   : > { %v12262_v2 = vsub.f32 %v12166_v46, %v6666_v19 }
 0x9d6   : > { %v6737_v56 = vsel %vm1006_vm1, %v6697_v33, 0.0 }
 0x9d7   : > { %6738 = vadd.xlane.f32.xlu0 %v6737_v56  ;;  %v6649_v7 = vpop.xlane.xlu0 %6648  ;;  %v6698_v49 = vmul.f32 %v12262_v2, %v12262_v2 }
 0x9d8   : > { %v6667_v55 = vmul.f32 0.015625, %v6649_v7 }
 0x9d9   : > { %v6740_v63 = vsel %vm1006_vm1, %v6698_v49, 0.0  ;;  %v6652_v1 = vpop.xlane.xlu1 %6651 }
 0x9da   : > { %v12269_v54 = vsub.f32 %v12174_v9, %v6667_v55  ;;  %6741 = vadd.xlane.f32.xlu1 %v6740_v63  ;;  %v6668_v25 = vmul.f32 0.015625, %v6652_v1 }
 0x9dc   : > { %v12272_v45 = vsub.f32 %v12180_v28, %v6668_v25  ;;  %v6699_v46 = vmul.f32 %v12269_v54, %v12269_v54 }
 0x9de   : > { %v6743_v31 = vsel %vm1006_vm1, %v6699_v46, 0.0  ;;  %v6700_v58 = vmul.f32 %v12272_v45, %v12272_v45 }
 0x9df   : > { %6744 = vadd.xlane.f32.xlu0 %v6743_v31 }
 0x9e0   : > { %v6746_v43 = vsel %vm1006_vm1, %v6700_v58, 0.0 }
 0x9e1   : > { %6747 = vadd.xlane.f32.xlu1 %v6746_v43 }
 0xa34   : > { %v6703_v53 = vpop.xlane.xlu0 %6702 }
 0xa35   : > { %v6749_v9 = vmul.f32 0.015625, %v6703_v53 }
 0xa37   : > { %v6765_v41 = vadd.f32 1e-05, %v6749_v9  ;;  %v6706_v13 = vpop.xlane.xlu1 %6705 }
 0xa38   : > { %v6750_v15 = vmul.f32 0.015625, %v6706_v13 }
 0xa39   : > { %9252 = vrsqrt.f32 %v6765_v41 }
 0xa3a   : > { %v6766_v28 = vadd.f32 1e-05, %v6750_v15 }
 0xa3c   : > { %9254 = vrsqrt.f32 %v6766_v28  ;;  %v6709_v51 = vpop.xlane.xlu0 %6708 }
 0xa3d   : > { %v6751_v34 = vmul.f32 0.015625, %v6709_v51 }
 0xa3f   : > { %v6767_v48 = vadd.f32 1e-05, %v6751_v34  ;;  %v6712_v52 = vpop.xlane.xlu1 %6711 }
 0xa40   : > { %v6752_v61 = vmul.f32 0.015625, %v6712_v52 }
 0xa41   : > { %9256 = vrsqrt.f32 %v6767_v48 }
 0xa42   : > { %v6768_v44 = vadd.f32 1e-05, %v6752_v61 }
 0xa43   : > { %v9253_v42 = vpop.eup %9252 }
 0xa44   : > { %v6797_v5 = vmul.f32 %v9253_v42, %v12185_v23  ;;  %9258 = vrsqrt.f32 %v6768_v44  ;;  %v6715_v38 = vpop.xlane.xlu0 %6714 }
 0xa45   : > { %v6753_v21 = vmul.f32 0.015625, %v6715_v38 }
 0xa46   : > { %v9255_v59 = vpop.eup %9254  ;;  %v6819_v30 = vmul.f32 %v12285_v29, %v6797_v5 }
 0xa47   : > { %v6798_v22 = vmul.f32 %v9255_v59, %v12190_v60  ;;  %v6769_v20 = vadd.f32 1e-05, %v6753_v21  ;;  %v6718_v18 = vpop.xlane.xlu1 %6717 }
 0xa48   : > { %v12298_v50 = vadd.f32 %v12293_v4, %v6819_v30  ;;  %v6754_v23 = vmul.f32 0.015625, %v6718_v18 }
 0xa49   : > { %v6820_v32 = vmul.f32 %v12285_v29, %v6798_v22  ;;  %9260 = vrsqrt.f32 %v6769_v20 }
 0xa4a   : > { %6857 = vst.msk [vmem:[#allocation2] sm:$0xff] %vm1006_vm1, %v12298_v50  ;;  %v6770_v8 = vadd.f32 1e-05, %v6754_v23 }
 0xa4b   : > { %v9257_v47 = vpop.eup %9256  ;;  %v12304_v0 = vadd.f32 %v12293_v4, %v6820_v32 }
 0xa4c   : > { %v6799_v62 = vmul.f32 %v9257_v47, %v12197_v14  ;;  %9262 = vrsqrt.f32 %v6770_v8  ;;  %v6721_v60 = vpop.xlane.xlu0 %6720 }
 0xa4d   : > { %6858 = vst.msk [vmem:[#allocation2 + $0x8] sm:$0xff] %vm1006_vm1, %v12304_v0  ;;  %v6755_v12 = vmul.f32 0.015625, %v6721_v60 }
 0xa4e   : > { %v9259_v3 = vpop.eup %9258  ;;  %v6821_v27 = vmul.f32 %v12285_v29, %v6799_v62 }
 0xa4f   : > { %v6800_v17 = vmul.f32 %v9259_v3, %v12202_v57  ;;  %v6771_v36 = vadd.f32 1e-05, %v6755_v12  ;;  %v6724_v39 = vpop.xlane.xlu1 %6723 }
 0xa50   : > { %v12312_v19 = vadd.f32 %v12293_v4, %v6821_v27  ;;  %v6756_v33 = vmul.f32 0.015625, %v6724_v39 }
 0xa51   : > { %v6822_v56 = vmul.f32 %v12285_v29, %v6800_v17  ;;  %9264 = vrsqrt.f32 %v6771_v36 }
 0xa52   : > { %6859 = vst.msk [vmem:[#allocation2 + $0x10] sm:$0xff] %vm1006_vm1, %v12312_v19  ;;  %v6772_v14 = vadd.f32 1e-05, %v6756_v33 }
 0xa53   : > { %v9261_v7 = vpop.eup %9260  ;;  %v12318_v49 = vadd.f32 %v12293_v4, %v6822_v56 }
 0xa54   : > { %v6801_v55 = vmul.f32 %v9261_v7, %v12209_v37  ;;  %9266 = vrsqrt.f32 %v6772_v14  ;;  %v6727_v57 = vpop.xlane.xlu0 %6726 }
 0xa55   : > { %6860 = vst.msk [vmem:[#allocation2 + $0x18] sm:$0xff] %vm1006_vm1, %v12318_v49  ;;  %v6757_v63 = vmul.f32 0.015625, %v6727_v57 }
 0xa56   : > { %v9263_v1 = vpop.eup %9262  ;;  %v6823_v25 = vmul.f32 %v12285_v29, %v6801_v55 }
 0xa57   : > { %v6802_v46 = vmul.f32 %v9263_v1, %v12214_v35  ;;  %v6773_v31 = vadd.f32 1e-05, %v6757_v63  ;;  %v6730_v58 = vpop.xlane.xlu1 %6729 }
 0xa58   : > { %v12326_v43 = vadd.f32 %v12293_v4, %v6823_v25  ;;  %v6758_v53 = vmul.f32 0.015625, %v6730_v58 }
 0xa59   : > { %v6824_v9 = vmul.f32 %v12285_v29, %v6802_v46  ;;  %9268 = vrsqrt.f32 %v6773_v31 }
 0xa5a   : > { %6861 = vst.msk [vmem:[#allocation2 + $0x20] sm:$0xff] %vm1006_vm1, %v12326_v43  ;;  %v6774_v37 = vadd.f32 1e-05, %v6758_v53 }
 0xa5b   : > { %v9265_v41 = vpop.eup %9264  ;;  %v12332_v13 = vadd.f32 %v12293_v4, %v6824_v9 }
 0xa5c   : > { %v6803_v15 = vmul.f32 %v9265_v41, %v12221_v11  ;;  %9270 = vrsqrt.f32 %v6774_v37  ;;  %v6733_v35 = vpop.xlane.xlu0 %6732 }
 0xa5d   : > { %6862 = vst.msk [vmem:[#allocation2 + $0x28] sm:$0xff] %vm1006_vm1, %v12332_v13  ;;  %v6759_v28 = vmul.f32 0.015625, %v6733_v35 }
 0xa5e   : > { %v9267_v51 = vpop.eup %9266  ;;  %v6825_v34 = vmul.f32 %v12285_v29, %v6803_v15 }
 0xa5f   : > { %v6804_v48 = vmul.f32 %v9267_v51, %v12226_v40  ;;  %v6775_v52 = vadd.f32 1e-05, %v6759_v28  ;;  %v6736_v61 = vpop.xlane.xlu1 %6735 }
 0xa60   : > { %v12340_v44 = vadd.f32 %v12293_v4, %v6825_v34  ;;  %v6760_v42 = vmul.f32 0.015625, %v6736_v61 }
 0xa61   : > { %v6826_v5 = vmul.f32 %v12285_v29, %v6804_v48  ;;  %9272 = vrsqrt.f32 %v6775_v52  ;;  %v6879_v48 = vpack.c.bf16 (!%p7907_p8), %v12332_v13, %v12326_v43 }
 0xa62   : > { %6863 = vst.msk [vmem:[#allocation2 + $0x30] sm:$0xff] %vm1006_vm1, %v12340_v44  ;;  %v6776_v11 = vadd.f32 1e-05, %v6760_v42 }
 0xa63   : > { %v9269_v38 = vpop.eup %9268  ;;  %v12346_v21 = vadd.f32 %v12293_v4, %v6826_v5 }
 0xa64   : > { %v6805_v59 = vmul.f32 %v9269_v38, %v12233_v10  ;;  %9274 = vrsqrt.f32 %v6776_v11  ;;  %v6739_v40 = vpop.xlane.xlu0 %6738 }
 0xa65   : > { %6864 = vst.msk [vmem:[#allocation2 + $0x38] sm:$0xff] %vm1006_vm1, %v12346_v21  ;;  %v6761_v30 = vmul.f32 0.015625, %v6739_v40  ;;  %v6880_v61 = vpack.c.bf16 (!%p7907_p8), %v12346_v21, %v12340_v44 }
 0xa66   : > { %v9271_v22 = vpop.eup %9270  ;;  %v6827_v20 = vmul.f32 %v12285_v29, %v6805_v59 }
 0xa67   : > { %v6806_v18 = vmul.f32 %v9271_v22, %v12238_v16  ;;  %v6777_v23 = vadd.f32 1e-05, %v6761_v30  ;;  %v6742_v32 = vpop.xlane.xlu1 %6741 }
 0xa68   : > { %v6849_v8 = vadd.f32 %v12293_v4, %v6827_v20  ;;  %v6762_v47 = vmul.f32 0.015625, %v6742_v32 }
 0xa69   : > { %v6828_v62 = vmul.f32 %v12285_v29, %v6806_v18  ;;  %9276 = vrsqrt.f32 %v6777_v23 }
 0xa6a   : > { %6865 = vst.msk [vmem:[#allocation2 + $0x40] sm:$0xff] %vm1006_vm1, %v6849_v8  ;;  %v6778_v10 = vadd.f32 1e-05, %v6762_v47 }
 0xa6b   : > { %v9273_v60 = vpop.eup %9272  ;;  %v6850_v12 = vadd.f32 %v12293_v4, %v6828_v62 }
 0xa6c   : > { %v6807_v3 = vmul.f32 %v9273_v60, %v12245_v24  ;;  %9278 = vrsqrt.f32 %v6778_v10  ;;  %v6745_v27 = vpop.xlane.xlu0 %6744 }
 0xa6d   : > { %6866 = vst.msk [vmem:[#allocation2 + $0x48] sm:$0xff] %vm1006_vm1, %v6850_v12  ;;  %v6763_v16 = vmul.f32 0.015625, %v6745_v27  ;;  %v6881_v51 = vpack.c.bf16 (!%p7907_p8), %v6850_v12, %v6849_v8 }
 0xa6e   : > { %v9275_v17 = vpop.eup %9274  ;;  %v6829_v36 = vmul.f32 %v12285_v29, %v6807_v3  ;;  %v6748_v39 = vpop.xlane.xlu1 %6747 }
 0xa6f   : > { %v6808_v33 = vmul.f32 %v9275_v17, %v12250_v26  ;;  %v6779_v56 = vadd.f32 1e-05, %v6763_v16  ;;  %v6764_v14 = vmul.f32 0.015625, %v6748_v39  ;;  %8759 = vmatprep.mubr.msk.bf16.mxu1 (!%p7907_p8), %vm1006_vm1, %v6881_v51 }
 0xa70   : > { %v6851_v7 = vadd.f32 %v12293_v4, %v6829_v36 }
 0xa71   : > { %v6830_v55 = vmul.f32 %v12285_v29, %v6808_v33  ;;  %9280 = vrsqrt.f32 %v6779_v56  ;;  %v6780_v57 = vadd.f32 1e-05, %v6764_v14 }
 0xa72   : > { %6867 = vst.msk [vmem:[#allocation2 + $0x50] sm:$0xff] %vm1006_vm1, %v6851_v7 }
 0xa73   : > { %v9277_v24 = vpop.eup %9276  ;;  %v6852_v63 = vadd.f32 %v12293_v4, %v6830_v55  ;;  %9282 = vrsqrt.f32 %v6780_v57 }
 0xa74   : > { %v6809_v1 = vmul.f32 %v9277_v24, %v12257_v6 }
 0xa75   : > { %6868 = vst.msk [vmem:[#allocation2 + $0x58] sm:$0xff] %vm1006_vm1, %v6852_v63  ;;  %v6882_v34 = vpack.c.bf16 (!%p7907_p8), %v6852_v63, %v6851_v7 }
 0xa76   : > { %v9279_v25 = vpop.eup %9278  ;;  %v6831_v26 = vmul.f32 %v12285_v29, %v6809_v1 }
 0xa77   : > { %v6810_v46 = vmul.f32 %v9279_v25, %v12262_v2 }
 0xa78   : > { %v6853_v31 = vadd.f32 %v12293_v4, %v6831_v26 }
 0xa79   : > { %v6832_v58 = vmul.f32 %v12285_v29, %v6810_v46 }
 0xa7a   : > { %6869 = vst.msk [vmem:[#allocation2 + $0x60] sm:$0xff] %vm1006_vm1, %v6853_v31 }
 0xa7b   : > { %v9281_v53 = vpop.eup %9280  ;;  %v6854_v9 = vadd.f32 %v12293_v4, %v6832_v58 }
 0xa7c   : > { %v6811_v37 = vmul.f32 %v9281_v53, %v12269_v54  ;;  %v9301_v54 = vld [vmem:[%s12753_s27] sm:$0xff] (!%p7907_p8)  }
 0xa7d   : > { %v9283_v41 = vpop.eup %9282  ;;  %6870 = vst.msk [vmem:[#allocation2 + $0x68] sm:$0xff] %vm1006_vm1, %v6854_v9  ;;  %8743 = vmatprep.subr.bf16.mxu0 (!%p7907_p8), %v9301_v54  ;;  %8767 = vmatprep.subr.bf16.mxu1 (!%p7907_p8), %v9301_v54  ;;  %v6883_v52 = vpack.c.bf16 (!%p7907_p8), %v6854_v9, %v6853_v31 }
 0xa7e   : > { %v6833_v6 = vmul.f32 %v12285_v29, %v6811_v37  ;;  %v6812_v15 = vmul.f32 %v9283_v41, %v12272_v45  ;;  %6876 = sbr.rel (%p7907_p8) target bundleno = 2928 (0xb70), region = 108  ;;  %v9302_v45 = vld [vmem:[%s12753_s27 + $0x8] sm:$0xff] (!%p7907_p8)   ;;  %8744 = vmatpush3.bf16.msra.mxu0 (!%p7907_p8), %v9301_v54  ;;  %8771 = vmatpush3.bf16.msra.mxu1 (!%p7907_p8), %v9301_v54 }
 0xa7f   : > { %8745 = vmatprep.subr.bf16.mxu0 (!%p7907_p8), %v9302_v45  ;;  %8768 = vmatprep.subr.bf16.mxu1 (!%p7907_p8), %v9302_v45 }
 0xa80   : > { %v6855_v2 = vadd.f32 %v12293_v4, %v6833_v6  ;;  %v6834_v35 = vmul.f32 %v12285_v29, %v6812_v15  ;;  %v6877_v29 = vpack.c.bf16 (!%p7907_p8), %v12304_v0, %v12298_v50  ;;  %v9304_v50 = vld [vmem:[%s12753_s27 + $0x18] sm:$0xff] (!%p7907_p8)   ;;  %v6878_v0 = vpack.c.bf16 (!%p7907_p8), %v12318_v49, %v12312_v19  ;;  %v7908_v49 = vld [vmem:[%s12754_s28] ss:$0 sm:$0xff] (!%p7907_p8) }
 0xa82   : > { %6871 = vst.msk [vmem:[#allocation2 + $0x70] sm:$0xff] %vm1006_vm1, %v6855_v2  ;;  %v6856_v28 = vadd.f32 %v12293_v4, %v6834_v35  ;;  %v9303_v4 = vld [vmem:[%s12753_s27 + $0x10] sm:$0xff] (!%p7907_p8)   ;;  %8751 = vmatprep.mubr.msk.bf16.mxu0 (!%p7907_p8), %vm1006_vm1, %v6877_v29  ;;  %8746 = vmatpush3.bf16.msra.mxu0 (!%p7907_p8), %v9302_v45 }
 0xa83   : > { %8772 = vmatpush3.bf16.msra.mxu1 (!%p7907_p8), %v9302_v45  ;;  %8747 = vmatprep.subr.bf16.mxu0 (!%p7907_p8), %v9303_v4 }
 0xa84   : > { %6872 = vst.msk [vmem:[#allocation2 + $0x78] sm:$0xff] %vm1006_vm1, %v6856_v28  ;;  %8769 = vmatprep.subr.bf16.mxu1 (!%p7907_p8), %v9303_v4  ;;  %v6884_v19 = vpack.c.bf16 (!%p7907_p8), %v6856_v28, %v6855_v2 }
 0xa86   : > { %8748 = vmatpush3.bf16.msra.mxu0 %v9303_v4 }
 0xa87   : > { %8773 = vmatpush3.bf16.msra.mxu1 %v9303_v4  ;;  %8749 = vmatprep.subr.bf16.mxu0 %v9304_v50 }
 0xa88   : > { %8770 = vmatprep.subr.bf16.mxu1 %v9304_v50 }
 0xa8a   : > { %8750 = vmatpush3.bf16.msra.mxu0 %v9304_v50 }
 0xa8b   : > { %8774 = vmatpush3.bf16.msra.mxu1 %v9304_v50 }
 0xa8d   : > { %8752 = vmatmul.mubr.msk.bf16.vlgmr.msra.gmra.mrb[0].mxu0 %vm1006_vm1, %v6878_v0 }
 0xa8e   : > { %8760 = vmatmul.mubr.msk.bf16.vlgmr.msra.gmra.mrb[0].mxu1 %vm1006_vm1, %v6882_v34  ;;  %8755 = vmatprep.mubr.msk.bf16.mxu0 %vm1006_vm1, %v6879_v48 }
 0xa8f   : > { %8763 = vmatprep.mubr.msk.bf16.mxu1 %vm1006_vm1, %v6883_v52 }
 0xa95   : > { %8756 = vmatmul.mubr.msk.bf16.gmra.mrb[4].mxu0 %vm1006_vm1, %v6880_v61 }
 0xa96   : > { %8764 = vmatmul.mubr.msk.bf16.gmra.mrb[4].mxu1 %vm1006_vm1, %v6884_v19 }
 0xb60   : > { %v8753_v43 = vpop.f32.mrb[0].mxu0 }
 0xb61   : > { %v8761_v13 = vpop.f32.mrb[0].mxu1  ;;  %v6991_v42 = vadd.f32 %v8753_v43, %v7908_v49  ;;  %v6982_v11 = vpop.f32.mrb[1].mxu0 }
 0xb62   : > { %v7023_v5 = vadd.f32 %v8761_v13, %v7908_v49  ;;  %v7014_v38 = vpop.f32.mrb[1].mxu1  ;;  %v6983_v44 = vadd.f32 %v7908_v49, %v6982_v11  ;;  %v8754_v59 = vpop.f32.mrb[2].mxu0 }
 0xb63   : > { %v7015_v21 = vadd.f32 %v7908_v49, %v7014_v38  ;;  %v8762_v40 = vpop.f32.mrb[2].mxu1  ;;  %7047 = vst [vmem:[%s9570_s1 + $0x10] sm:$0xff] %v6991_v42  ;;  %v6994_v30 = vadd.f32 %v8754_v59, %v7908_v49  ;;  %v6985_v20 = vpop.f32.mrb[3].mxu0 }
 0xb64   : > { %7055 = vst [vmem:[%s9570_s1 + $0x50] sm:$0xff] %v7023_v5  ;;  %v7026_v22 = vadd.f32 %v8762_v40, %v7908_v49  ;;  %v7017_v18 = vpop.f32.mrb[3].mxu1  ;;  %7045 = vst [vmem:[%s9570_s1] sm:$0xff] %v6983_v44  ;;  %v6986_v23 = vadd.f32 %v7908_v49, %v6985_v20 }
 0xb65   : > { %7053 = vst [vmem:[%s9570_s1 + $0x40] sm:$0xff] %v7015_v21  ;;  %v7018_v32 = vadd.f32 %v7908_v49, %v7017_v18  ;;  %7048 = vst [vmem:[%s9570_s1 + $0x18] sm:$0xff] %v6994_v30 }
 0xb66   : > { %7056 = vst [vmem:[%s9570_s1 + $0x58] sm:$0xff] %v7026_v22  ;;  %7046 = vst [vmem:[%s9570_s1 + $0x8] sm:$0xff] %v6986_v23 }
 0xb67   : > { %7054 = vst [vmem:[%s9570_s1 + $0x48] sm:$0xff] %v7018_v32 }
 0xb68   : > { %v8757_v8 = vpop.f32.mrb[4].mxu0 }
 0xb69   : > { %v8765_v47 = vpop.f32.mrb[4].mxu1  ;;  %v7007_v62 = vadd.f32 %v8757_v8, %v7908_v49  ;;  %v6998_v60 = vpop.f32.mrb[5].mxu0 }
 0xb6a   : > { %v7039_v10 = vadd.f32 %v8765_v47, %v7908_v49  ;;  %v7030_v12 = vpop.f32.mrb[5].mxu1  ;;  %v6999_v3 = vadd.f32 %v7908_v49, %v6998_v60  ;;  %v8758_v16 = vpop.f32.mrb[6].mxu0 }
 0xb6b   : > { %v7031_v27 = vadd.f32 %v7908_v49, %v7030_v12  ;;  %v8766_v17 = vpop.f32.mrb[6].mxu1  ;;  %7051 = vst [vmem:[%s9570_s1 + $0x30] sm:$0xff] %v7007_v62  ;;  %v7010_v36 = vadd.f32 %v8758_v16, %v7908_v49  ;;  %v7001_v33 = vpop.f32.mrb[7].mxu0 }
 0xb6c   : > { %7059 = vst [vmem:[%s9570_s1 + $0x70] sm:$0xff] %v7039_v10  ;;  %v7042_v39 = vadd.f32 %v8766_v17, %v7908_v49  ;;  %v7033_v56 = vpop.f32.mrb[7].mxu1  ;;  %7049 = vst [vmem:[%s9570_s1 + $0x20] sm:$0xff] %v6999_v3  ;;  %v7002_v14 = vadd.f32 %v7908_v49, %v7001_v33 }
 0xb6d   : > { %7057 = vst [vmem:[%s9570_s1 + $0x60] sm:$0xff] %v7031_v27  ;;  %v7034_v7 = vadd.f32 %v7908_v49, %v7033_v56  ;;  %7052 = vst [vmem:[%s9570_s1 + $0x38] sm:$0xff] %v7010_v36 }
 0xb6e   : > { %7060 = vst [vmem:[%s9570_s1 + $0x78] sm:$0xff] %v7042_v39  ;;  %7050 = vst [vmem:[%s9570_s1 + $0x28] sm:$0xff] %v7002_v14 }
 0xb6f   : > { %7058 = vst [vmem:[%s9570_s1 + $0x68] sm:$0xff] %v7034_v7 }
 0xb70 PF: > { %s12755_s4 = sld [smem:[#allocation6_spill]]  ;;  %s12756_s1 = sld [smem:[#allocation4_spill]] }
 0xb71   : > { %s12757_s22 = sld [smem:[#allocation5_spill]]  ;;  %s12758_s23 = sld [smem:[#allocation7_spill]] }
 0xb72   : > { %s12759_s24 = sld [smem:[#allocation8_spill]] }
 0xb76   : > { %s30_s2 = sadd.s32 1, %s12755_s4  }
 0xb77   : > { %p27_p9 = scmp.ge.s32.totalorder %s30_s2, 6  }
 0xb79   :  { %29 = sbr.rel (!%p27_p9) target bundleno = 15 (0xf), region = 195 }

</bundles_post_ra>
